<compile_context>
chip_gen: v6e
topology: v6e:2x2x1
jax: 0.10.0
libtpu: 0.0.40
codegen_flags: <defaults>
</compile_context>

<pallas_src>
import functools

import jax
import jax.numpy as jnp
import numpy as np
from jax.experimental import pallas as pl
from jax.experimental.pallas import tpu as pltpu

# ---- module hyper-parameters (consistent with the nn.Module) ----
C_Z = 32       # pair-representation channels
N_HEAD = 2
C_HEAD = 16
HC = N_HEAD * C_HEAD
EPS = 1e-5     # nn.LayerNorm default eps


# ----------------------------------------------------------------------------
# small helpers
# ----------------------------------------------------------------------------
def _pick_tile(total, cap, align):
    """Largest tile <= cap that divides `total` and is a multiple of `align`
    (or `total` itself when it already fits / no aligned divisor exists)."""
    if total <= cap:
        return total
    t = (cap // align) * align
    while t >= align:
        if total % t == 0:
            return t
        t -= align
    return total


def _vmem_capacity_bytes():
    try:
        return int(pltpu.get_tpu_info().vmem_capacity_bytes)
    except Exception:
        return 64 << 20          # conservative (v7x per-TensorCore VMEM)


def _layer_norm(z2d, gamma, beta):
    """LayerNorm over the last axis; z2d is (M, C), gamma/beta are (1, C)."""
    mu = jnp.mean(z2d, axis=-1, keepdims=True)
    zc = z2d - mu
    var = jnp.mean(zc * zc, axis=-1, keepdims=True)
    return zc * jax.lax.rsqrt(var + EPS) * gamma + beta


def _attn_step_bytes(ti, n, c, n_head, c_head):
    """Rough per-grid-step VMEM footprint of the fused attention kernel (f32)."""
    hc = n_head * c_head
    f = 4 * hc
    fixed = (4 * (c * f + hc * c + 2 * c)        # resident weights
             + 2 * 4 * n_head * n * n)           # double-buffered bias block
    per_row = (2 * 4 * n * c                     # double-buffered z input block
               + 2 * 4 * n * c                   # double-buffered output block
               + 4 * n * f                       # q|k|v|g VMEM scratch
               + 2 * 4 * n * n                   # live logits + exp (one head)
               + 4 * n * (hc + c))               # per-head temporaries / epilogue
    return fixed + ti * per_row


def _attn_row_tile(n, c, n_head, c_head, batch, budget_bytes):
    """Largest multiple-of-8 divisor of `n` whose footprint fits the budget."""
    cands = [t for t in range(8, n + 1, 8) if n % t == 0]
    if not cands:
        # N is not a multiple of 8: only a full-row block keeps the (8, 128)
        # tiling rule satisfied (no remainder masking implemented).
        return n
    if batch == 1:
        # Keep >= 2 grid steps so both TensorCores of a v7x chip get work.
        halves = [t for t in cands if t <= n // 2]
        if halves:
            cands = halves
    fitting = [t for t in cands
               if _attn_step_bytes(t, n, c, n_head, c_head) <= budget_bytes]
    return max(fitting) if fitting else min(cands)


# ----------------------------------------------------------------------------
# shared per-head attention body (used by both the general and the small path)
# ----------------------------------------------------------------------------
def _head_attention(qkvg_scr, bias_h, wo_ref, h, n_head, c_head):
    """One head: QK^T + bias -> softmax (deferred norm) -> PV -> gate -> @wo_h.

    qkvg_scr : VMEM ref (ti, n, 4*hc) holding [q*scale | k | v | g] lanes.
    bias_h   : (n, n) value, bias[h, j, k].
    Returns the (ti*n, c_z) contribution of this head to the output.
    """
    ti, n, _ = qkvg_scr.shape
    hc = n_head * c_head
    d0 = h * c_head
    # Static lane slices straight off the scratch ref (bounded live ranges).
    qh = qkvg_scr[:, :, d0:d0 + c_head]                          # (ti, n, d), pre-scaled
    kh = qkvg_scr[:, :, hc + d0: hc + d0 + c_head]
    vh = qkvg_scr[:, :, 2 * hc + d0: 2 * hc + d0 + c_head]
    gh = jax.nn.sigmoid(qkvg_scr[:, :, 3 * hc + d0: 3 * hc + d0 + c_head])

    logits = jnp.einsum("ijd,ikd->ijk", qh, kh,
                        preferred_element_type=jnp.float32)      # (ti, n, n)
    logits = logits + bias_h[None, :, :]
    m = jnp.max(logits, axis=-1, keepdims=True)
    p = jnp.exp(logits - m)                                      # unnormalized probs
    s = jnp.sum(p, axis=-1, keepdims=True)                       # (ti, n, 1)
    oh = jnp.einsum("ijk,ikd->ijd", p, vh,
                    preferred_element_type=jnp.float32)          # (ti, n, d)
    # Deferred softmax normalization: ti*n reciprocals instead of ti*n*n divides.
    oh = oh * pl.reciprocal(s)
    goh = (gh * oh).reshape(ti * n, c_head)                      # leading-dim reshape only
    # Per-head epilogue accumulation -> no lane-dim concat across heads.
    return jnp.dot(goh, wo_ref[d0:d0 + c_head, :],
                   preferred_element_type=jnp.float32)


# ----------------------------------------------------------------------------
# Kernel A (general path): triangle bias projection only.
# Grid = (B, n_pair_tiles) over the flattened pair axis.
# ----------------------------------------------------------------------------
def _bias_kernel(z_ref, gamma_ref, beta_ref, wbt_ref, bias_ref):
    zn = _layer_norm(z_ref[...], gamma_ref[...], beta_ref[...])         # (tm, C)
    # (H, C) x (tm, C)^T -> (H, tm): lane-dense along the flattened pair axis.
    bias_ref[...] = jnp.einsum("hc,mc->hm", wbt_ref[...], zn,
                               preferred_element_type=jnp.float32)


def _compute_bias(z3, gamma2, beta2, wbt):
    B, NN, C = z3.shape
    H = wbt.shape[0]
    tm = _pick_tile(NN, 8192, 128)       # memory-bound: big tiles, few grid steps
    if tm == NN and NN * C * 4 * 2 > (48 << 20):
        # Guard against the silent "no aligned divisor -> whole axis" fallback
        # blowing VMEM for huge, oddly sized N*N (flagged by the perf review).
        raise ValueError("pair axis N*N has no 128-aligned divisor that fits "
                         "VMEM; pad N or add a masked remainder tile")
    grid = (B, NN // tm)
    return pl.pallas_call(
        _bias_kernel,
        grid=grid,
        in_specs=[
            pl.BlockSpec((None, tm, C), lambda b, t: (b, t, 0)),   # z (flattened pairs)
            pl.BlockSpec((1, C), lambda b, t: (0, 0)),             # gamma
            pl.BlockSpec((1, C), lambda b, t: (0, 0)),             # beta
            pl.BlockSpec((H, C), lambda b, t: (0, 0)),             # wb^T
        ],
        out_specs=pl.BlockSpec((None, H, tm), lambda b, t: (b, 0, t)),
        out_shape=jax.ShapeDtypeStruct((B, H, NN), jnp.float32),
        compiler_params=pltpu.CompilerParams(
            dimension_semantics=("parallel", "parallel")),
    )(z3, gamma2, beta2, wbt)


# ----------------------------------------------------------------------------
# Kernel B (general path): fused LayerNorm + q|k|v|g projection + triangle
# attention + sigmoid gate + linear_out for a tile of starting-node rows.
# Grid = (B, n_i_tiles).
# ----------------------------------------------------------------------------
def _attn_kernel(z_ref, gamma_ref, beta_ref, bias_ref, wcat_ref, wo_ref,
                 o_ref, qkvg_scr, *, n_head, c_head):
    ti, n, c = z_ref.shape
    hc = n_head * c_head
    c_out = o_ref.shape[-1]

    # Fused LayerNorm + concatenated projection; q columns are pre-scaled.
    zn = _layer_norm(z_ref[...].reshape(ti * n, c), gamma_ref[...], beta_ref[...])
    qkvg_scr[...] = jnp.dot(
        zn, wcat_ref[...], preferred_element_type=jnp.float32
    ).reshape(ti, n, 4 * hc)

    acc = jnp.zeros((ti * n, c_out), jnp.float32)
    for h in range(n_head):              # unrolled; n_head is tiny
        acc = acc + _head_attention(qkvg_scr, bias_ref[h], wo_ref,
                                    h, n_head, c_head)
    o_ref[...] = acc.reshape(ti, n, c_out)


def _attention_general(z, bias4, gamma2, beta2, wcat, wo, n_head, c_head):
    B, N, _, C = z.shape
    hc = n_head * c_head
    f = 4 * hc

    vmem_cap = _vmem_capacity_bytes()
    budget = int(vmem_cap * 0.45)        # per-step working-set target
    ti = _attn_row_tile(N, C, n_head, c_head, B, budget)
    est = _attn_step_bytes(ti, N, C, n_head, c_head)
    vmem_limit = int(min(0.9 * vmem_cap, max(est + (8 << 20), 32 << 20)))

    grid = (B, N // ti)
    return pl.pallas_call(
        functools.partial(_attn_kernel, n_head=n_head, c_head=c_head),
        grid=grid,
        in_specs=[
            pl.BlockSpec((None, ti, N, C), lambda b, it: (b, it, 0, 0)),     # z rows
            pl.BlockSpec((1, C), lambda b, it: (0, 0)),                      # gamma
            pl.BlockSpec((1, C), lambda b, it: (0, 0)),                      # beta
            pl.BlockSpec((None, n_head, N, N), lambda b, it: (b, 0, 0, 0)),  # bias[b]
            pl.BlockSpec((C, f), lambda b, it: (0, 0)),                      # [wq*s|wk|wv|wg]
            pl.BlockSpec((hc, C), lambda b, it: (0, 0)),                     # wo
        ],
        out_specs=pl.BlockSpec((None, ti, N, C), lambda b, it: (b, it, 0, 0)),
        out_shape=jax.ShapeDtypeStruct((B, N, N, C), jnp.float32),
        scratch_shapes=[pltpu.VMEM((ti, N, f), jnp.float32)],
        compiler_params=pltpu.CompilerParams(
            dimension_semantics=("parallel", "parallel"),
            vmem_limit_bytes=vmem_limit),
    )(z, gamma2, beta2, bias4, wcat, wo)


# ----------------------------------------------------------------------------
# Kernel C (small path): everything in a single pallas_call (whole batch
# element resident in VMEM, bias computed in-kernel).  Grid = (B,).
# ----------------------------------------------------------------------------
def _small_kernel(z_ref, gamma_ref, beta_ref, wcat_ref, wbt_ref, wo_ref,
                  o_ref, qkvg_scr, *, n_head, c_head):
    n = z_ref.shape[0]
    c = z_ref.shape[-1]
    hc = n_head * c_head
    c_out = o_ref.shape[-1]

    zn = _layer_norm(z_ref[...].reshape(n * n, c), gamma_ref[...], beta_ref[...])
    zn3 = zn.reshape(n, n, c)
    qkvg_scr[...] = jnp.dot(
        zn, wcat_ref[...], preferred_element_type=jnp.float32
    ).reshape(n, n, 4 * hc)

    acc = jnp.zeros((n * n, c_out), jnp.float32)
    for h in range(n_head):
        # In-kernel triangle bias for head h: bias[j, k] = sum_c zn[j,k,c]*wb[c,h]
        wb_h = wbt_ref[h:h + 1, :].reshape(1, 1, c)
        bias_h = jnp.sum(zn3 * wb_h, axis=-1)                   # (n, n)
        acc = acc + _head_attention(qkvg_scr, bias_h, wo_ref, h, n_head, c_head)
    o_ref[...] = acc.reshape(n, n, c_out)


def _attention_small(z, gamma2, beta2, wcat, wbt, wo, n_head, c_head):
    B, N, _, C = z.shape
    hc = n_head * c_head
    f = 4 * hc
    return pl.pallas_call(
        functools.partial(_small_kernel, n_head=n_head, c_head=c_head),
        grid=(B,),
        in_specs=[
            pl.BlockSpec((None, N, N, C), lambda b: (b, 0, 0, 0)),   # z[b]
            pl.BlockSpec((1, C), lambda b: (0, 0)),                  # gamma
            pl.BlockSpec((1, C), lambda b: (0, 0)),                  # beta
            pl.BlockSpec((C, f), lambda b: (0, 0)),                  # [wq*s|wk|wv|wg]
            pl.BlockSpec((n_head, C), lambda b: (0, 0)),             # wb^T
            pl.BlockSpec((hc, C), lambda b: (0, 0)),                 # wo
        ],
        out_specs=pl.BlockSpec((None, N, N, C), lambda b: (b, 0, 0, 0)),
        out_shape=jax.ShapeDtypeStruct((B, N, N, C), jnp.float32),
        scratch_shapes=[pltpu.VMEM((N, N, f), jnp.float32)],
        compiler_params=pltpu.CompilerParams(
            dimension_semantics=("parallel",),
            vmem_limit_bytes=32 << 20),
    )(z, gamma2, beta2, wcat, wbt, wo)


# ----------------------------------------------------------------------------
# Full forward (only free reshapes / weight concatenation in plain JAX).
# ----------------------------------------------------------------------------
def triangle_attention_starting_node(z, params, *, force_general=False):
    B, N, N2, C = z.shape
    assert N == N2 and C == C_Z
    scale = 1.0 / float(C_HEAD) ** 0.5   # exact for c_head=16 (power of two)

    # Concatenated projection weight [wq*scale | wk | wv | wg] : (C, 4*HC).
    wcat = jnp.concatenate(
        [params["wq"] * scale, params["wk"], params["wv"], params["wg"]], axis=1)
    wbt = params["wb"].T                                   # (H, C)
    gamma2 = params["gamma"].reshape(1, C)
    beta2 = params["beta"].reshape(1, C)

    # Small problems: one resident kernel (no bias round-trip, one launch).
    if (not force_general) and N <= 64:
        return _attention_small(z, gamma2, beta2, wcat, wbt, params["wo"],
                                N_HEAD, C_HEAD)

    # General path: (A) bias over all pairs, (B) fused LN/proj/attention/out.
    z3 = z.reshape(B, N * N, C)                            # free reshape
    bias = _compute_bias(z3, gamma2, beta2, wbt)           # (B, H, N*N)
    bias4 = bias.reshape(B, N_HEAD, N, N)                  # free reshape
    return _attention_general(z, bias4, gamma2, beta2, wcat, params["wo"],
                              N_HEAD, C_HEAD)


# ----------------------------------------------------------------------------
# Pure-JAX reference for correctness checking.
# ----------------------------------------------------------------------------
def reference(z, params):
    B, N, _, C = z.shape
    mu = jnp.mean(z, axis=-1, keepdims=True)
    var = jnp.mean((z - mu) ** 2, axis=-1, keepdims=True)
    zn = (z - mu) / jnp.sqrt(var + EPS) * params["gamma"] + params["beta"]

    def proj(w):
        return jnp.einsum("bijc,ck->bijk", zn, w)

    def heads(x):
        return x.reshape(B, N, N, N_HEAD, C_HEAD).transpose(0, 3, 1, 2, 4)

    q = heads(proj(params["wq"]))
    k = heads(proj(params["wk"]))
    v = heads(proj(params["wv"]))
    g = heads(jax.nn.sigmoid(proj(params["wg"])))
    bias = proj(params["wb"]).transpose(0, 3, 1, 2)              # (B,H,N,N)

    logits = jnp.einsum("bhijd,bhikd->bhijk", q, k) / (C_HEAD ** 0.5)
    logits = logits + bias[:, :, None, :, :]
    a = jax.nn.softmax(logits, axis=-1)
    o = jnp.einsum("bhijk,bhikd->bhijd", a, v)
    o = (g * o).transpose(0, 2, 3, 1, 4).reshape(B, N, N, HC)
    return jnp.einsum("bijk,kc->bijc", o, params["wo"])


if __name__ == "__main__":
    B, N = 2, 16
    key = jax.random.PRNGKey(0)
    ks = jax.random.split(key, 9)
    # deterministic synthetic parameters (weights stored as (in, out) = W.T of nn.Linear)
    params = {
        "gamma": 1.0 + 0.1 * jax.random.normal(ks[0], (C_Z,), jnp.float32),
        "beta": 0.1 * jax.random.normal(ks[1], (C_Z,), jnp.float32),
        "wq": 0.1 * jax.random.normal(ks[2], (C_Z, HC), jnp.float32),
        "wk": 0.1 * jax.random.normal(ks[3], (C_Z, HC), jnp.float32),
        "wv": 0.1 * jax.random.normal(ks[4], (C_Z, HC), jnp.float32),
        "wb": 0.1 * jax.random.normal(ks[5], (C_Z, N_HEAD), jnp.float32),
        "wg": 0.1 * jax.random.normal(ks[6], (C_Z, HC), jnp.float32),
        "wo": 0.1 * jax.random.normal(ks[7], (HC, C_Z), jnp.float32),
    }
    z = jax.random.normal(ks[8], (B, N, N, C_Z), jnp.float32)

    ref = jax.block_until_ready(reference(z, params))

    # Small fused single-call path (used automatically at this size).
    out_small = jax.block_until_ready(triangle_attention_starting_node(z, params))
    assert out_small.shape == (B, N, N, C_Z) and out_small.dtype == jnp.float32
    np.testing.assert_allclose(np.asarray(out_small), np.asarray(ref),
                               rtol=1e-4, atol=1e-4)

    # General two-kernel path (bias kernel + fused LN/proj/attention kernel).
    out_gen = jax.block_until_ready(
        triangle_attention_starting_node(z, params, force_general=True))
    assert out_gen.shape == (B, N, N, C_Z) and out_gen.dtype == jnp.float32
    np.testing.assert_allclose(np.asarray(out_gen), np.asarray(ref),
                               rtol=1e-4, atol=1e-4)

    print("KERNEL_OK")
</pallas_src>

<mosaic_0001>
module attributes {stable_mosaic.version = 11 : i64} {
  func.func @_small_kernel(%arg0: i32, %arg1: memref<1x16x16x32xf32, #tpu.memory_space<vmem>>, %arg2: memref<1x32xf32, #tpu.memory_space<vmem>>, %arg3: memref<1x32xf32, #tpu.memory_space<vmem>>, %arg4: memref<32x128xf32, #tpu.memory_space<vmem>>, %arg5: memref<2x32xf32, #tpu.memory_space<vmem>>, %arg6: memref<32x32xf32, #tpu.memory_space<vmem>>, %arg7: memref<1x16x16x32xf32, #tpu.memory_space<vmem>>, %arg8: memref<16x16x128xf32, #tpu.memory_space<vmem>>) attributes {dimension_semantics = [#tpu.dimension_semantics<parallel>], iteration_bounds = array<i64: 2>, scalar_prefetch = 0 : i64, scratch_operands = 1 : i64, tpu.core_type = #tpu.core_type<tc>, window_params = [{transform_indices = @transform_0, window_bounds = array<i64: 1, 16, 16, 32>}, {pipeline_mode = #tpu.pipeline_mode<synchronous>, transform_indices = @transform_1, window_bounds = array<i64: 1, 32>}, {pipeline_mode = #tpu.pipeline_mode<synchronous>, transform_indices = @transform_2, window_bounds = array<i64: 1, 32>}, {pipeline_mode = #tpu.pipeline_mode<synchronous>, transform_indices = @transform_3, window_bounds = array<i64: 32, 128>}, {pipeline_mode = #tpu.pipeline_mode<synchronous>, transform_indices = @transform_4, window_bounds = array<i64: 2, 32>}, {pipeline_mode = #tpu.pipeline_mode<synchronous>, transform_indices = @transform_5, window_bounds = array<i64: 32, 32>}, {transform_indices = @transform_6, window_bounds = array<i64: 1, 16, 16, 32>}]} {
    %c0 = arith.constant 0 : index
    %c0_0 = arith.constant 0 : index
    %c0_1 = arith.constant 0 : index
    %c0_2 = arith.constant 0 : index
    %0 = vector.load %arg1[%c0, %c0_0, %c0_1, %c0_2] : memref<1x16x16x32xf32, #tpu.memory_space<vmem>>, vector<1x16x16x32xf32>
    %1 = vector.shape_cast %0 : vector<1x16x16x32xf32> to vector<16x16x32xf32>
    %2 = vector.shape_cast %1 : vector<16x16x32xf32> to vector<256x32xf32>
    %c0_3 = arith.constant 0 : index
    %c0_4 = arith.constant 0 : index
    %3 = vector.load %arg2[%c0_3, %c0_4] : memref<1x32xf32, #tpu.memory_space<vmem>>, vector<1x32xf32>
    %c0_5 = arith.constant 0 : index
    %c0_6 = arith.constant 0 : index
    %4 = vector.load %arg3[%c0_5, %c0_6] : memref<1x32xf32, #tpu.memory_space<vmem>>, vector<1x32xf32>
    %cst = arith.constant dense<0.000000e+00> : vector<256xf32>
    %5 = vector.multi_reduction <add>, %2, %cst [1] : vector<256x32xf32> to vector<256xf32>
    %6 = vector.shape_cast %5 : vector<256xf32> to vector<256x1xf32>
    %cst_7 = arith.constant 3.200000e+01 : f32
    %7 = vector.broadcast %cst_7 : f32 to vector<256x1xf32>
    %8 = arith.divf %6, %7 : vector<256x1xf32>
    %9 = vector.broadcast %8 : vector<256x1xf32> to vector<256x32xf32>
    %10 = arith.subf %2, %9 : vector<256x32xf32>
    %11 = arith.mulf %10, %10 : vector<256x32xf32>
    %cst_8 = arith.constant dense<0.000000e+00> : vector<256xf32>
    %12 = vector.multi_reduction <add>, %11, %cst_8 [1] : vector<256x32xf32> to vector<256xf32>
    %13 = vector.shape_cast %12 : vector<256xf32> to vector<256x1xf32>
    %cst_9 = arith.constant 3.200000e+01 : f32
    %14 = vector.broadcast %cst_9 : f32 to vector<256x1xf32>
    %15 = arith.divf %13, %14 : vector<256x1xf32>
    %cst_10 = arith.constant 9.99999974E-6 : f32
    %16 = vector.broadcast %cst_10 : f32 to vector<256x1xf32>
    %17 = arith.addf %15, %16 : vector<256x1xf32>
    %18 = math.rsqrt %17 : vector<256x1xf32>
    %19 = vector.broadcast %18 : vector<256x1xf32> to vector<256x32xf32>
    %20 = arith.mulf %10, %19 : vector<256x32xf32>
    %21 = vector.broadcast %3 : vector<1x32xf32> to vector<256x32xf32>
    %22 = arith.mulf %20, %21 : vector<256x32xf32>
    %23 = vector.broadcast %4 : vector<1x32xf32> to vector<256x32xf32>
    %24 = arith.addf %22, %23 : vector<256x32xf32>
    %25 = vector.shape_cast %24 : vector<256x32xf32> to vector<16x16x32xf32>
    %c0_11 = arith.constant 0 : index
    %c0_12 = arith.constant 0 : index
    %26 = vector.load %arg4[%c0_11, %c0_12] : memref<32x128xf32, #tpu.memory_space<vmem>>, vector<32x128xf32>
    %cst_13 = arith.constant dense<0.000000e+00> : vector<256x128xf32>
    %27 = tpu.matmul %24, %26, %cst_13 {dimension_numbers = #tpu.dot_dimension_numbers<[1], [0], [0], [1], [0, 0, 1, 1], [], []>} : vector<256x32xf32>, vector<32x128xf32>, vector<256x128xf32> -> vector<256x128xf32>
    %28 = vector.shape_cast %27 : vector<256x128xf32> to vector<16x16x128xf32>
    %c0_14 = arith.constant 0 : index
    %c0_15 = arith.constant 0 : index
    %c0_16 = arith.constant 0 : index
    %29 = vector.load %arg8[%c0_14, %c0_15, %c0_16] : memref<16x16x128xf32, #tpu.memory_space<vmem>>, vector<16x16x128xf32>
    tpu.vector_store %arg8[%c0_14, %c0_15, %c0_16], %28 {strides = array<i32>} : memref<16x16x128xf32, #tpu.memory_space<vmem>>, vector<16x16x128xf32>,
    %cst_17 = arith.constant 0.000000e+00 : f32
    %30 = vector.broadcast %cst_17 : f32 to vector<256x32xf32>
    %c0_18 = arith.constant 0 : index
    %c0_19 = arith.constant 0 : index
    %31 = vector.load %arg5[%c0_18, %c0_19] : memref<2x32xf32, #tpu.memory_space<vmem>>, vector<1x32xf32>
    %32 = vector.shape_cast %31 : vector<1x32xf32> to vector<1x1x32xf32>
    %33 = vector.broadcast %32 : vector<1x1x32xf32> to vector<16x16x32xf32>
    %34 = arith.mulf %25, %33 : vector<16x16x32xf32>
    %cst_20 = arith.constant dense<0.000000e+00> : vector<16x16xf32>
    %35 = vector.multi_reduction <add>, %34, %cst_20 [2] : vector<16x16x32xf32> to vector<16x16xf32>
    %c0_21 = arith.constant 0 : index
    %c0_22 = arith.constant 0 : index
    %c0_23 = arith.constant 0 : index
    %36 = vector.load %arg8[%c0_21, %c0_22, %c0_23] : memref<16x16x128xf32, #tpu.memory_space<vmem>>, vector<16x16x16xf32>
    %c0_24 = arith.constant 0 : index
    %c0_25 = arith.constant 0 : index
    %c32 = arith.constant 32 : index
    %37 = vector.load %arg8[%c0_24, %c0_25, %c32] : memref<16x16x128xf32, #tpu.memory_space<vmem>>, vector<16x16x16xf32>
    %c0_26 = arith.constant 0 : index
    %c0_27 = arith.constant 0 : index
    %c64 = arith.constant 64 : index
    %38 = vector.load %arg8[%c0_26, %c0_27, %c64] : memref<16x16x128xf32, #tpu.memory_space<vmem>>, vector<16x16x16xf32>
    %c0_28 = arith.constant 0 : index
    %c0_29 = arith.constant 0 : index
    %c96 = arith.constant 96 : index
    %39 = vector.load %arg8[%c0_28, %c0_29, %c96] : memref<16x16x128xf32, #tpu.memory_space<vmem>>, vector<16x16x16xf32>
    %40 = arith.negf %39 : vector<16x16x16xf32>
    %41 = math.exp %40 : vector<16x16x16xf32>
    %cst_30 = arith.constant 1.000000e+00 : f32
    %42 = vector.broadcast %cst_30 : f32 to vector<16x16x16xf32>
    %43 = arith.addf %42, %41 : vector<16x16x16xf32>
    %44 = arith.divf %42, %43 : vector<16x16x16xf32>
    "tpu.trace_start"() <{level = 10 : i32, message = "ijd,ikd->ijk"}> : () -> ()
    %cst_31 = arith.constant dense<0.000000e+00> : vector<16x16x16xf32>
    %45 = tpu.matmul %36, %37, %cst_31 {dimension_numbers = #tpu.dot_dimension_numbers<[2], [2], [1], [1], [0, 0, 0, 1, 1, 1], [0], [0]>} : vector<16x16x16xf32>, vector<16x16x16xf32>, vector<16x16x16xf32> -> vector<16x16x16xf32>
    "tpu.trace_stop"() : () -> ()
    %46 = vector.shape_cast %35 : vector<16x16xf32> to vector<1x16x16xf32>
    %47 = vector.broadcast %46 : vector<1x16x16xf32> to vector<16x16x16xf32>
    %48 = arith.addf %45, %47 : vector<16x16x16xf32>
    %cst_32 = arith.constant dense<0xFF800000> : vector<16x16xf32>
    %49 = vector.multi_reduction <maximumf>, %48, %cst_32 [2] : vector<16x16x16xf32> to vector<16x16xf32>
    %50 = vector.shape_cast %49 : vector<16x16xf32> to vector<16x16x1xf32>
    %51 = vector.broadcast %50 : vector<16x16x1xf32> to vector<16x16x16xf32>
    %52 = arith.subf %48, %51 : vector<16x16x16xf32>
    %53 = math.exp %52 : vector<16x16x16xf32>
    %cst_33 = arith.constant dense<0.000000e+00> : vector<16x16xf32>
    %54 = vector.multi_reduction <add>, %53, %cst_33 [2] : vector<16x16x16xf32> to vector<16x16xf32>
    %55 = vector.shape_cast %54 : vector<16x16xf32> to vector<16x16x1xf32>
    "tpu.trace_start"() <{level = 10 : i32, message = "ijk,ikd->ijd"}> : () -> ()
    %cst_34 = arith.constant dense<0.000000e+00> : vector<16x16x16xf32>
    %56 = tpu.matmul %53, %38, %cst_34 {dimension_numbers = #tpu.dot_dimension_numbers<[2], [1], [1], [2], [0, 0, 0, 1, 1, 2], [0], [0]>} : vector<16x16x16xf32>, vector<16x16x16xf32>, vector<16x16x16xf32> -> vector<16x16x16xf32>
    "tpu.trace_stop"() : () -> ()
    %57 = tpu.reciprocal %55 : vector<16x16x1xf32> -> vector<16x16x1xf32>
    %58 = vector.broadcast %57 : vector<16x16x1xf32> to vector<16x16x16xf32>
    %59 = arith.mulf %56, %58 : vector<16x16x16xf32>
    %60 = arith.mulf %44, %59 : vector<16x16x16xf32>
    %61 = vector.shape_cast %60 : vector<16x16x16xf32> to vector<256x16xf32>
    %c0_35 = arith.constant 0 : index
    %c0_36 = arith.constant 0 : index
    %62 = vector.load %arg6[%c0_35, %c0_36] : memref<32x32xf32, #tpu.memory_space<vmem>>, vector<16x32xf32>
    %cst_37 = arith.constant dense<0.000000e+00> : vector<256x32xf32>
    %63 = tpu.matmul %61, %62, %cst_37 {dimension_numbers = #tpu.dot_dimension_numbers<[1], [0], [0], [1], [0, 0, 1, 1], [], []>} : vector<256x16xf32>, vector<16x32xf32>, vector<256x32xf32> -> vector<256x32xf32>
    %64 = arith.addf %30, %63 : vector<256x32xf32>
    %c1 = arith.constant 1 : index
    %c0_38 = arith.constant 0 : index
    %65 = vector.load %arg5[%c1, %c0_38] : memref<2x32xf32, #tpu.memory_space<vmem>>, vector<1x32xf32>
    %66 = vector.shape_cast %65 : vector<1x32xf32> to vector<1x1x32xf32>
    %67 = vector.broadcast %66 : vector<1x1x32xf32> to vector<16x16x32xf32>
    %68 = arith.mulf %25, %67 : vector<16x16x32xf32>
    %cst_39 = arith.constant dense<0.000000e+00> : vector<16x16xf32>
    %69 = vector.multi_reduction <add>, %68, %cst_39 [2] : vector<16x16x32xf32> to vector<16x16xf32>
    %c0_40 = arith.constant 0 : index
    %c0_41 = arith.constant 0 : index
    %c16 = arith.constant 16 : index
    %70 = vector.load %arg8[%c0_40, %c0_41, %c16] : memref<16x16x128xf32, #tpu.memory_space<vmem>>, vector<16x16x16xf32>
    %c0_42 = arith.constant 0 : index
    %c0_43 = arith.constant 0 : index
    %c48 = arith.constant 48 : index
    %71 = vector.load %arg8[%c0_42, %c0_43, %c48] : memref<16x16x128xf32, #tpu.memory_space<vmem>>, vector<16x16x16xf32>
    %c0_44 = arith.constant 0 : index
    %c0_45 = arith.constant 0 : index
    %c80 = arith.constant 80 : index
    %72 = vector.load %arg8[%c0_44, %c0_45, %c80] : memref<16x16x128xf32, #tpu.memory_space<vmem>>, vector<16x16x16xf32>
    %c0_46 = arith.constant 0 : index
    %c0_47 = arith.constant 0 : index
    %c112 = arith.constant 112 : index
    %73 = vector.load %arg8[%c0_46, %c0_47, %c112] : memref<16x16x128xf32, #tpu.memory_space<vmem>>, vector<16x16x16xf32>
    %74 = arith.negf %73 : vector<16x16x16xf32>
    %75 = math.exp %74 : vector<16x16x16xf32>
    %cst_48 = arith.constant 1.000000e+00 : f32
    %76 = vector.broadcast %cst_48 : f32 to vector<16x16x16xf32>
    %77 = arith.addf %76, %75 : vector<16x16x16xf32>
    %78 = arith.divf %76, %77 : vector<16x16x16xf32>
    "tpu.trace_start"() <{level = 10 : i32, message = "ijd,ikd->ijk"}> : () -> ()
    %cst_49 = arith.constant dense<0.000000e+00> : vector<16x16x16xf32>
    %79 = tpu.matmul %70, %71, %cst_49 {dimension_numbers = #tpu.dot_dimension_numbers<[2], [2], [1], [1], [0, 0, 0, 1, 1, 1], [0], [0]>} : vector<16x16x16xf32>, vector<16x16x16xf32>, vector<16x16x16xf32> -> vector<16x16x16xf32>
    "tpu.trace_stop"() : () -> ()
    %80 = vector.shape_cast %69 : vector<16x16xf32> to vector<1x16x16xf32>
    %81 = vector.broadcast %80 : vector<1x16x16xf32> to vector<16x16x16xf32>
    %82 = arith.addf %79, %81 : vector<16x16x16xf32>
    %cst_50 = arith.constant dense<0xFF800000> : vector<16x16xf32>
    %83 = vector.multi_reduction <maximumf>, %82, %cst_50 [2] : vector<16x16x16xf32> to vector<16x16xf32>
    %84 = vector.shape_cast %83 : vector<16x16xf32> to vector<16x16x1xf32>
    %85 = vector.broadcast %84 : vector<16x16x1xf32> to vector<16x16x16xf32>
    %86 = arith.subf %82, %85 : vector<16x16x16xf32>
    %87 = math.exp %86 : vector<16x16x16xf32>
    %cst_51 = arith.constant dense<0.000000e+00> : vector<16x16xf32>
    %88 = vector.multi_reduction <add>, %87, %cst_51 [2] : vector<16x16x16xf32> to vector<16x16xf32>
    %89 = vector.shape_cast %88 : vector<16x16xf32> to vector<16x16x1xf32>
    "tpu.trace_start"() <{level = 10 : i32, message = "ijk,ikd->ijd"}> : () -> ()
    %cst_52 = arith.constant dense<0.000000e+00> : vector<16x16x16xf32>
    %90 = tpu.matmul %87, %72, %cst_52 {dimension_numbers = #tpu.dot_dimension_numbers<[2], [1], [1], [2], [0, 0, 0, 1, 1, 2], [0], [0]>} : vector<16x16x16xf32>, vector<16x16x16xf32>, vector<16x16x16xf32> -> vector<16x16x16xf32>
    "tpu.trace_stop"() : () -> ()
    %91 = tpu.reciprocal %89 : vector<16x16x1xf32> -> vector<16x16x1xf32>
    %92 = vector.broadcast %91 : vector<16x16x1xf32> to vector<16x16x16xf32>
    %93 = arith.mulf %90, %92 : vector<16x16x16xf32>
    %94 = arith.mulf %78, %93 : vector<16x16x16xf32>
    %95 = vector.shape_cast %94 : vector<16x16x16xf32> to vector<256x16xf32>
    %c16_53 = arith.constant 16 : index
    %c0_54 = arith.constant 0 : index
    %96 = vector.load %arg6[%c16_53, %c0_54] : memref<32x32xf32, #tpu.memory_space<vmem>>, vector<16x32xf32>
    %cst_55 = arith.constant dense<0.000000e+00> : vector<256x32xf32>
    %97 = tpu.matmul %95, %96, %cst_55 {dimension_numbers = #tpu.dot_dimension_numbers<[1], [0], [0], [1], [0, 0, 1, 1], [], []>} : vector<256x16xf32>, vector<16x32xf32>, vector<256x32xf32> -> vector<256x32xf32>
    %98 = arith.addf %64, %97 : vector<256x32xf32>
    %99 = vector.shape_cast %98 : vector<256x32xf32> to vector<16x16x32xf32>
    %c0_56 = arith.constant 0 : index
    %c0_57 = arith.constant 0 : index
    %c0_58 = arith.constant 0 : index
    %c0_59 = arith.constant 0 : index
    %100 = vector.load %arg7[%c0_56, %c0_57, %c0_58, %c0_59] : memref<1x16x16x32xf32, #tpu.memory_space<vmem>>, vector<1x16x16x32xf32>
    %101 = vector.shape_cast %100 : vector<1x16x16x32xf32> to vector<16x16x32xf32>
    %102 = vector.shape_cast %99 : vector<16x16x32xf32> to vector<1x16x16x32xf32>
    tpu.vector_store %arg7[%c0_56, %c0_57, %c0_58, %c0_59], %102 {strides = array<i32>} : memref<1x16x16x32xf32, #tpu.memory_space<vmem>>, vector<1x16x16x32xf32>,
    return
  }
  func.func @transform_0(%arg0: i32) -> (i32, i32, i32, i32) {
    %c0_i32 = arith.constant 0 : i32
    %c0_i32_0 = arith.constant 0 : i32
    %c0_i32_1 = arith.constant 0 : i32
    %c0_i32_2 = arith.constant 0 : i32
    return %arg0, %c0_i32, %c0_i32_0, %c0_i32_1 : i32, i32, i32, i32
  }
  func.func @transform_1(%arg0: i32) -> (i32, i32) {
    %c0_i32 = arith.constant 0 : i32
    %c0_i32_0 = arith.constant 0 : i32
    %c0_i32_1 = arith.constant 0 : i32
    return %c0_i32, %c0_i32_0 : i32, i32
  }
  func.func @transform_2(%arg0: i32) -> (i32, i32) {
    %c0_i32 = arith.constant 0 : i32
    %c0_i32_0 = arith.constant 0 : i32
    %c0_i32_1 = arith.constant 0 : i32
    return %c0_i32, %c0_i32_0 : i32, i32
  }
  func.func @transform_3(%arg0: i32) -> (i32, i32) {
    %c0_i32 = arith.constant 0 : i32
    %c0_i32_0 = arith.constant 0 : i32
    %c0_i32_1 = arith.constant 0 : i32
    return %c0_i32, %c0_i32_0 : i32, i32
  }
  func.func @transform_4(%arg0: i32) -> (i32, i32) {
    %c0_i32 = arith.constant 0 : i32
    %c0_i32_0 = arith.constant 0 : i32
    %c0_i32_1 = arith.constant 0 : i32
    return %c0_i32, %c0_i32_0 : i32, i32
  }
  func.func @transform_5(%arg0: i32) -> (i32, i32) {
    %c0_i32 = arith.constant 0 : i32
    %c0_i32_0 = arith.constant 0 : i32
    %c0_i32_1 = arith.constant 0 : i32
    return %c0_i32, %c0_i32_0 : i32, i32
  }
  func.func @transform_6(%arg0: i32) -> (i32, i32, i32, i32) {
    %c0_i32 = arith.constant 0 : i32
    %c0_i32_0 = arith.constant 0 : i32
    %c0_i32_1 = arith.constant 0 : i32
    %c0_i32_2 = arith.constant 0 : i32
    return %arg0, %c0_i32, %c0_i32_0, %c0_i32_1 : i32, i32, i32, i32
  }
}

</mosaic_0001>

<bundles_post_ra>
// kernel: tpu_custom_call.1
= control target key start
LH: loop header
LB: loop body
LE: loop exit
PB: predicated region body
PF: predicated region fallthrough
CT: control target
= control target key end

     0   :  { %11 = vsyncpa [#allocation4], 0  ;;  %s15778_s0 = inlined_call_operand.hbm [shape: f32[2,16,16,32], index: 0, kind: input, shape index: {}]   ;;  %s15779_s1 = inlined_call_operand.vmem [shape: f32[1,32], index: 1, kind: input, shape index: {}]   ;;  %s15780_s2 = inlined_call_operand.hbm [shape: f32[1,32], index: 2, kind: input, shape index: {}]   ;;  %s15781_s3 = inlined_call_operand.hbm [shape: f32[32,128], index: 3, kind: input, shape index: {}]   ;;  %s15782_s4 = inlined_call_operand.vmem [shape: f32[2,32], index: 4, kind: input, shape index: {}]   ;;  %s15783_s5 = inlined_call_operand.hbm [shape: f32[32,32], index: 5, kind: input, shape index: {}]   ;;  %s15784_s6 = inlined_call_operand.hbm [shape: f32[2,16,16,32], index: 6, kind: output, shape index: {}]  }
   0x1   :  { %13 = vsyncpa [#allocation4 + $0x1], 0 }
   0x2   :  { %14 = vsyncpa [#allocation7], 0 }
   0x3   :  { %15 = vsyncpa [#allocation10], 0 }
   0x4   :  { %16 = vsyncpa [#allocation5], 0 }
   0x5   :  { %18 = vsyncpa [#allocation5 + $0x1], 0  ;;  %s12062_s21 = smov 0   ;;  %s12064_s22 = smov 0  }
   0x6   :  { %s12066_s23 = smov 0   ;;  %s12068_s24 = smov 0  }
   0x7 LB: > { %s12083_s25 = sadd.s32 4294967295, %s12009_s24   ;;  %s9949_s26 = sadd.s32 4294967294, %s12009_s24   ;;  %s12009_s24 = sphi %s12068_s24, %s16431_s24   ;;  %s12005_s23 = sphi %s12066_s23, %s16430_s23   ;;  %s12001_s22 = sphi %s12064_s22, %s16429_s22   ;;  %s11997_s21 = sphi %s12062_s21, %s16428_s21  }
   0x8   : > { %p44_p0 = scmp.ne.s32.totalorder %s12001_s22, %s11997_s21  ;;  %p15785_p1 = scmp.eq.s32.totalorder %s12083_s25, 0 }
   0x9   : > { %p173_p2 = scmp.eq.s32.totalorder %s12083_s25, 1  ;;  %p179_p3 = scmp.eq.s32.totalorder %s9949_s26, 1 }
   0xa   : > { %p12092_p4 = por %p15785_p1, %p44_p0  ;;  %p9950_p5 = scmp.ge.s32.totalorder %s12009_s24, 1 }
   0xb   : > { %p12097_p6 = por %p179_p3, %p44_p0  ;;  %p186_p7 = scmp.lt.s32.totalorder %s12009_s24, 3 }
   0xc   : > { %s15965_s27 = scalar_select %p12092_p4, 1, 0 }
   0xd   : > { %s15966_s28 = scalar_select %p12097_p6, 1, 0 }
   0xe   : > { %p12102_p8 = pnand %p9950_p5, %p186_p7  ;;  %s12011_s30 = smov [#allocation6]  }
   0xf   : > { %s202_s7 = sshll.u32 %s12011_s30, 4  ;;  %s12012_s8 = smov [#allocation8]   ;;  %s203_s7 = int_to_ptr.vmem [resolvable:$true] %s202_s7 }
  0x10   : > { %s15967_s29 = scalar_select %p12102_p8, 1, 0 }
  0x11   : > { %p11311_p10 = pneg %p12102_p8  ;;  %s212_s9 = sshll.u32 %s12012_s8, 4  ;;  %s12115_s9 = int_to_ptr.vmem [resolvable:$true] %s212_s9 }
  0x12   : > { %s12013_s11 = smov [#allocation9]   ;;  %s11842_s13 = scalar_lea.vmem %s203_s7, 16 }
  0x13   : > { %p12111_p11 = pnand %p11311_p10, %p15785_p1  ;;  %s228_s12 = sshll.u32 %s12013_s11, 4  ;;  %s229_s12 = int_to_ptr.vmem [resolvable:$true] %s228_s12 }
  0x14   : > { %p11843_p13 = scmp.ne.s32.totalorder %s203_s7, %s11842_s13  ;;  %s11849_s14 = scalar_lea.vmem %s203_s7, 32 }
  0x15   : > { %p11833_p12 = pneg %p12111_p11  ;;  %p11850_p5 = scmp.lt.s32.totalorder %s203_s7, %s203_s7 }
  0x16   : > { %p11851_p7 = scmp.lt.s32.totalorder %s11849_s14, %s11842_s13 }
  0x17   : > { %p11845_p0 = pnand %p11843_p13, %p11833_p12 }
  0x18   : > { %p11852_p10 = por %p11851_p7, %p11850_p5 }
  0x19   : > { %p11846_p3 = pneg %p11845_p0 }
  0x1b   : > { %p11853_p9 = pnand %p11852_p10, %p11846_p3 }
  0x1d   : > { %11856 = shalt.err (!%p11853_p9)
}
  0x1e   : > { %11314 = dma.hbm_to_vmem [thread:$0]  (!%p12111_p11), %s15780_s2, 16, %s203_s7, [#allocation7]  }
  0x1f   : > { %s11868_s17 = scalar_lea.vmem %s12115_s9, 512  ;;  %p11876_p5 = scmp.lt.s32.totalorder %s12115_s9, %s12115_s9 }
  0x20   : > { %p11869_p1 = scmp.ne.s32.totalorder %s12115_s9, %s11868_s17  ;;  %p11877_p3 = scmp.lt.s32.totalorder %s11868_s17, %s11868_s17 }
  0x22   : > { %p11871_p13 = pnand %p11869_p1, %p11833_p12  ;;  %p11878_p9 = por %p11877_p3, %p11876_p5 }
  0x24   : > { %p11872_p0 = pneg %p11871_p13 }
  0x26   : > { %p11879_p7 = pnand %p11878_p9, %p11872_p0 }
  0x28   : > { %11882 = shalt.err (!%p11879_p7)
}
  0x29   : > { %s15786_s18 = smov 128   ;;  %s15787_s19 = smov 8  }
  0x2a   : > { %11317 = dma.hbm_to_vmem [thread:$0]  (!%p12111_p11), %s15781_s3, 512, %s12115_s9, [#allocation7], %s15786_s18, %s15786_s18, %s15787_s19  }
  0x2b   : > { %s11894_s30 = scalar_lea.vmem %s229_s12, 512  ;;  %p11902_p0 = scmp.lt.s32.totalorder %s229_s12, %s229_s12 }
  0x2c   : > { %p11895_p1 = scmp.ne.s32.totalorder %s229_s12, %s11894_s30  ;;  %p11903_p5 = scmp.lt.s32.totalorder %s11894_s30, %s11894_s30 }
  0x2e   : > { %p11897_p10 = pnand %p11895_p1, %p11833_p12  ;;  %p11904_p3 = por %p11903_p5, %p11902_p0 }
  0x30   : > { %p11898_p13 = pneg %p11897_p10 }
  0x32   : > { %p11905_p9 = pnand %p11904_p3, %p11898_p13 }
  0x34   : > { %11908 = shalt.err (!%p11905_p9)
}
  0x35   : > { %11320 = dma.hbm_to_vmem [thread:$0]  (!%p12111_p11), %s15783_s5, 512, %s229_s12, [#allocation10], %s15786_s18, %s15786_s18, %s15787_s19  }
  0x36   : > { %s12155_s9 = sadd.s32 1, %s12009_s24   ;;  %s31_s11 = sadd.s32 1, %s12005_s23 }
  0x37   : > { %s28_s10 = ssub.s32 %s12009_s24, %s12155_s9  ;;  %p38_p7 = scmp.ne.s32.totalorder %s12005_s23, %s12001_s22 }
  0x38   : > { %p29_p12 = scmp.eq.s32.totalorder %s28_s10, 0  ;;  %p39_p1 = scmp.eq.s32.totalorder %s12009_s24, 0 }
  0x39   : > { %p11332_p10 = scmp.lt.s32.totalorder %s12009_s24, 2  ;;  %p12169_p0 = por %p173_p2, %p38_p7 }
  0x3a   : > { %s12165_s13 = scalar_select %p29_p12, %s12005_s23, %s31_s11  }
  0x3b   : > { %p40_p13 = por %p39_p1, %p38_p7  ;;  %s242_s15 = sand.u32 1, %s12005_s23  }
  0x3c   : > { %s15969_s14 = scalar_select %p12169_p0, 1, 0 }
  0x3d   : > { %s10325_s16 = sshll.u32 %s12009_s24, 12  ;;  %s9955_s12 = sshll.u32 %s242_s15, 8 }
  0x3e   : > { %s12178_s26 = scalar_lea.hbm %s15778_s0, %s10325_s16  ;;  %s246_s30 = scalar_lea.vmem [#allocation3], %s9955_s12 }
  0x3f   : > { %s253_s7 = sshll.u32 %s246_s30, 4  ;;  %p12180_p11 = pnand %p11332_p10, %p40_p13  ;;  %s12184_s7 = int_to_ptr.vmem [resolvable:$true] %s253_s7 }
  0x40   : > { %s12186_s10 = scalar_lea.sflag [#allocation4], %s242_s15  ;;  %s11909_s11 = scalar_lea.hbm %s12178_s26, 4096 }
  0x41   : > { %p11910_p2 = scmp.ne.s32.totalorder %s12178_s26, %s11909_s11  ;;  %p11911_p5 = pneg %p12180_p11 }
  0x42   : > { %s11914_s12 = scalar_lea.hbm %s15778_s0, 8192  ;;  %p11915_p12 = scmp.lt.s32.totalorder %s12178_s26, %s15778_s0 }
  0x43   : > { %p11912_p3 = pnand %p11911_p5, %p11910_p2  ;;  %p11916_p7 = scmp.lt.s32.totalorder %s11914_s12, %s11909_s11 }
  0x45   : > { %p11913_p9 = pneg %p11912_p3  ;;  %p11917_p1 = por %p11916_p7, %p11915_p12 }
  0x47   : > { %p11918_p10 = pnand %p11917_p1, %p11913_p9 }
  0x49   : > { %11921 = shalt.err (!%p11918_p10)
}
  0x4a   : > { %s11922_s15 = scalar_lea.vmem %s12184_s7, 4096  ;;  %s12016_s18 = smov [#allocation3]  }
  0x4b   : > { %p11923_p13 = scmp.ne.s32.totalorder %s12184_s7, %s11922_s15  ;;  %s11927_s19 = sshll.u32 %s12016_s18, 4  ;;  %s11928_s19 = int_to_ptr.vmem [resolvable:$false] %s11927_s19 }
  0x4c   : > { %s11929_s16 = scalar_lea.vmem %s11928_s19, 8192  ;;  %p11930_p3 = scmp.lt.s32.totalorder %s12184_s7, %s11928_s19 }
  0x4d   : > { %p11925_p6 = pnand %p11923_p13, %p11911_p5  ;;  %p11931_p0 = scmp.lt.s32.totalorder %s11929_s16, %s11922_s15 }
  0x4f   : > { %p11926_p2 = pneg %p11925_p6  ;;  %p11932_p4 = por %p11931_p0, %p11930_p3 }
  0x51   : > { %p11933_p8 = pnand %p11932_p4, %p11926_p2 }
  0x53   : > { %11936 = shalt.err (!%p11933_p8)
}
  0x54   : > { %s15971_s11 = smov 8   ;;  %s15972_s17 = smov 128  }
  0x55   : > { %11324 = dma.hbm_to_vmem [thread:$0]  (!%p12180_p11), %s12178_s26, 4096, %s12184_s7, %s12186_s10, %s15972_s17, %s15972_s17, %s15971_s11  }
  0x56   : > { %p15973_p6 = scmp.ne.s32.totalorder %s15967_s29, 0 }
  0x58   : > { %265 = sbr.rel (%p15973_p6) target bundleno = 2599 (0xa27), region = 44 }
  0x5d   : > { %s12213_s18 = sand.u32 1, %s12001_s22   ;;  %p15974_p4 = scmp.ne.s32.totalorder %s15965_s27, 0 }
  0x5e   : > { %s9959_s19 = sshll.u32 %s12213_s18, 8  ;;  %s268_s12 = scalar_lea.sflag [#allocation4], %s12213_s18 }
  0x5f   : > { %s12219_s8 = scalar_lea.vmem [#allocation3], %s9959_s19 }
  0x60   : > { %11980 = dma.done.wait (%p15974_p4), %s268_s12, 4096  }
  0x61   : > { %11982 = vsyncadd (%p15974_p4), %s268_s12, 4294963200  ;;  %p15975_p8 = scmp.eq.s32.totalorder %s12083_s25, 0 }
  0x63   : > { %11984 = dma.done.wait (%p15975_p8), [#allocation7], 528   ;;  %p15976_p0 = pmov %p15975_p8 }
  0x65   : > { %11986 = vsyncadd (%p15976_p0), [#allocation7], 4294966768  ;;  %p15977_p11 = pmov %p15976_p0 }
  0x66   : > { %p15978_p5 = pmov %p15976_p0 }
  0x67   : > { %11988 = dma.done.wait (%p15977_p11), [#allocation10], 512  }
  0x68   : > { %11990 = vsyncadd (%p15978_p5), [#allocation10], 4294966784  ;;  %vm346_vm0 = vcmask 261120   ;;  %v12234_v0 = vld [vmem:[%s12219_s8] sm:$0xff]  ;;  %v12237_v1 = vld [vmem:[%s12219_s8 + $0x8] sm:$0xff]  ;;  %vm1763_vm1 = vcmask 130048  }
  0x69   : > { %v12240_v2 = vld [vmem:[%s12219_s8 + $0x10] sm:$0xff]  ;;  %v347_v3 = vsel %vm346_vm0, %v12234_v0, 0.0  ;;  %v12247_v5 = vld [vmem:[%s12219_s8 + $0x18] sm:$0xff]  ;;  %v350_v6 = vsel %vm346_vm0, %v12237_v1, 0.0  ;;  %v12254_v8 = vld [vmem:[%s12219_s8 + $0x20] sm:$0xff]  ;;  %s12017_s10 = smov 96  }
  0x6a   : > { %v353_v4 = vsel %vm346_vm0, %v12240_v2, 0.0  ;;  %348 = vadd.xlane.f32.xlu0 %v347_v3  ;;  %v356_v7 = vsel %vm346_vm0, %v12247_v5, 0.0  ;;  %v12257_v9 = vld [vmem:[%s12219_s8 + $0x28] sm:$0xff]  ;;  %v359_v10 = vsel %vm346_vm0, %v12254_v8, 0.0  ;;  %v12264_v12 = vld [vmem:[%s12219_s8 + $0x30] sm:$0xff]  ;;  %v12267_v13 = vld [vmem:[%s12219_s8 + $0x38] sm:$0xff] }
  0x6b   : > { %354 = vadd.xlane.f32.xlu1 %v353_v4  ;;  %v362_v11 = vsel %vm346_vm0, %v12257_v9, 0.0  ;;  %v365_v14 = vsel %vm346_vm0, %v12264_v12, 0.0  ;;  %v368_v15 = vsel %vm346_vm0, %v12267_v13, 0.0  ;;  %v12274_v16 = vld [vmem:[%s12219_s8 + $0x40] sm:$0xff]  ;;  %v12277_v17 = vld [vmem:[%s12219_s8 + $0x48] sm:$0xff]  ;;  %v12284_v20 = vld [vmem:[%s12219_s8 + $0x50] sm:$0xff] }
  0x6c   : > { %v371_v18 = vsel %vm346_vm0, %v12274_v16, 0.0  ;;  %v374_v19 = vsel %vm346_vm0, %v12277_v17, 0.0  ;;  %v12287_v21 = vld [vmem:[%s12219_s8 + $0x58] sm:$0xff]  ;;  %v377_v22 = vsel %vm346_vm0, %v12284_v20, 0.0  ;;  %v12294_v24 = vld [vmem:[%s12219_s8 + $0x60] sm:$0xff]  ;;  %v12297_v25 = vld [vmem:[%s12219_s8 + $0x68] sm:$0xff] }
  0x6d   : > { %v380_v23 = vsel %vm346_vm0, %v12287_v21, 0.0  ;;  %v383_v26 = vsel %vm346_vm0, %v12294_v24, 0.0  ;;  %v386_v27 = vsel %vm346_vm0, %v12297_v25, 0.0  ;;  %v12304_v28 = vld [vmem:[%s12219_s8 + $0x70] sm:$0xff]  ;;  %v12307_v29 = vld [vmem:[%s12219_s8 + $0x78] sm:$0xff]  ;;  %v12314_v32 = vld [vmem:[%s12219_s8 + $0x80] sm:$0xff] }
  0x6e   : > { %351 = vadd.xlane.f32.xlu0 %v350_v6  ;;  %v389_v30 = vsel %vm346_vm0, %v12304_v28, 0.0  ;;  %v392_v31 = vsel %vm346_vm0, %v12307_v29, 0.0  ;;  %v12317_v33 = vld [vmem:[%s12219_s8 + $0x88] sm:$0xff]  ;;  %v395_v34 = vsel %vm346_vm0, %v12314_v32, 0.0  ;;  %v12324_v36 = vld [vmem:[%s12219_s8 + $0x90] sm:$0xff]  ;;  %v12327_v37 = vld [vmem:[%s12219_s8 + $0x98] sm:$0xff] }
  0x6f   : > { %357 = vadd.xlane.f32.xlu1 %v356_v7  ;;  %v398_v35 = vsel %vm346_vm0, %v12317_v33, 0.0  ;;  %v401_v38 = vsel %vm346_vm0, %v12324_v36, 0.0  ;;  %v404_v39 = vsel %vm346_vm0, %v12327_v37, 0.0  ;;  %v12334_v40 = vld [vmem:[%s12219_s8 + $0xa0] sm:$0xff]  ;;  %v12337_v41 = vld [vmem:[%s12219_s8 + $0xa8] sm:$0xff]  ;;  %v12344_v44 = vld [vmem:[%s12219_s8 + $0xb0] sm:$0xff] }
  0x70   : > { %v407_v42 = vsel %vm346_vm0, %v12334_v40, 0.0  ;;  %v410_v43 = vsel %vm346_vm0, %v12337_v41, 0.0  ;;  %v12347_v45 = vld [vmem:[%s12219_s8 + $0xb8] sm:$0xff]  ;;  %v413_v46 = vsel %vm346_vm0, %v12344_v44, 0.0  ;;  %v12354_v48 = vld [vmem:[%s12219_s8 + $0xc0] sm:$0xff]  ;;  %v12357_v49 = vld [vmem:[%s12219_s8 + $0xc8] sm:$0xff] }
  0x71   : > { %v416_v47 = vsel %vm346_vm0, %v12347_v45, 0.0  ;;  %v419_v50 = vsel %vm346_vm0, %v12354_v48, 0.0  ;;  %v422_v51 = vsel %vm346_vm0, %v12357_v49, 0.0  ;;  %v12364_v52 = vld [vmem:[%s12219_s8 + $0xd0] sm:$0xff]  ;;  %v12367_v53 = vld [vmem:[%s12219_s8 + $0xd8] sm:$0xff]  ;;  %v12382_v7 = vld [vmem:[%s12219_s8 + $0xe0] sm:$0xff] }
  0x72   : > { %360 = vadd.xlane.f32.xlu0 %v359_v10  ;;  %v425_v54 = vsel %vm346_vm0, %v12364_v52, 0.0  ;;  %v428_v55 = vsel %vm346_vm0, %v12367_v53, 0.0  ;;  %s12018_s20 = smov 64   ;;  %s12019_s30 = smov 80   ;;  %vm1603_vm2 = vcmask 130112   ;;  %vm1740_vm3 = vcmask 1041409  }
  0x73   : > { %363 = vadd.xlane.f32.xlu1 %v362_v11  ;;  %s12020_s15 = smov 112   ;;  %vm1742_vm4 = vcmask 1042434   ;;  %vm1744_vm5 = vcmask 1043459   ;;  %vm1746_vm6 = vcmask 1044484   ;;  %vm1748_vm7 = vcmask 1045509   ;;  %s12021_s17 = smov 48  }
  0x74   : > { %vm1750_vm8 = vcmask 1046534   ;;  %vm1752_vm9 = vcmask 1047559   ;;  %s12022_s12 = smov 32   ;;  %s15662_s27 = scalar_lea.vmem [#allocation11], %s9959_s19 }
  0x75   : > { %s10326_s19 = sshll.u32 %s12083_s25, 12  ;;  %s9847_s29 = sshll.u32 %s15662_s27, 4  ;;  %s15731_s29 = int_to_ptr.vmem [resolvable:$true] %s9847_s29 }
  0x76   : > { %366 = vadd.xlane.f32.xlu0 %v365_v14  ;;  %s9834_s25 = scalar_lea.sflag [#allocation5], %s12213_s18  ;;  %p16425_p12 = scmp.ne.s32.totalorder %s15969_s14, 0 }
  0x77   : > { %369 = vadd.xlane.f32.xlu1 %v368_v15 }
  0x7a   : > { %372 = vadd.xlane.f32.xlu0 %v371_v18 }
  0x7b   : > { %375 = vadd.xlane.f32.xlu1 %v374_v19 }
  0x7e   : > { %378 = vadd.xlane.f32.xlu0 %v377_v22 }
  0x7f   : > { %381 = vadd.xlane.f32.xlu1 %v380_v23 }
  0x82   : > { %384 = vadd.xlane.f32.xlu0 %v383_v26 }
  0x83   : > { %387 = vadd.xlane.f32.xlu1 %v386_v27 }
  0x86   : > { %390 = vadd.xlane.f32.xlu0 %v389_v30 }
  0x87   : > { %393 = vadd.xlane.f32.xlu1 %v392_v31 }
  0x8a   : > { %396 = vadd.xlane.f32.xlu0 %v395_v34 }
  0x8b   : > { %399 = vadd.xlane.f32.xlu1 %v398_v35  ;;  %v12408_v35 = vld [vmem:[%s12219_s8 + $0xf0] sm:$0xff] }
  0x8e   : > { %402 = vadd.xlane.f32.xlu0 %v401_v38 }
  0x8f   : > { %405 = vadd.xlane.f32.xlu1 %v404_v39 }
  0x92   : > { %408 = vadd.xlane.f32.xlu0 %v407_v42 }
  0x93   : > { %411 = vadd.xlane.f32.xlu1 %v410_v43  ;;  %v437_v43 = vsel %vm346_vm0, %v12408_v35, 0.0 }
  0x96   : > { %414 = vadd.xlane.f32.xlu0 %v413_v46 }
  0x97   : > { %417 = vadd.xlane.f32.xlu1 %v416_v47 }
  0x9a   : > { %420 = vadd.xlane.f32.xlu0 %v419_v50 }
  0x9b   : > { %423 = vadd.xlane.f32.xlu1 %v422_v51 }
  0x9e   : > { %426 = vadd.xlane.f32.xlu0 %v425_v54  ;;  %v12422_v54 = vld [vmem:[%s12219_s8 + $0xf8] sm:$0xff] }
  0x9f   : > { %429 = vadd.xlane.f32.xlu1 %v428_v55 }
  0xf3   : > { %v349_v56 = vpop.xlane.xlu0 %348 }
  0xf4   : > { %v355_v57 = vpop.xlane.xlu1 %354  ;;  %v444_v58 = vmul.f32 0.03125, %v349_v56 }
  0xf5   : > { %v446_v59 = vmul.f32 0.03125, %v355_v57  ;;  %v440_v57 = vsel %vm346_vm0, %v12422_v54, 0.0 }
  0xf6   : > { %v12374_v60 = vsub.f32 %v12234_v0, %v444_v58  ;;  %v431_v0 = vsel %vm346_vm0, %v12382_v7, 0.0 }
  0xf7   : > { %v352_v61 = vpop.xlane.xlu0 %351  ;;  %v12377_v3 = vsub.f32 %v12240_v2, %v446_v59 }
  0xf8   : > { %v358_v62 = vpop.xlane.xlu1 %357  ;;  %v445_v63 = vmul.f32 0.03125, %v352_v61  ;;  %v508_v4 = vmul.f32 %v12374_v60, %v12374_v60 }
  0xf9   : > { %v447_v6 = vmul.f32 0.03125, %v358_v62  ;;  %v510_v19 = vmul.f32 %v12377_v3, %v12377_v3 }
  0xfa   : > { %v12385_v10 = vsub.f32 %v12237_v1, %v445_v63  ;;  %v540_v11 = vsel %vm346_vm0, %v508_v4, 0.0  ;;  %v12398_v1 = vld [vmem:[%s12219_s8 + $0xe8] sm:$0xff]  ;;  %s12023_s8 = smov 16  }
  0xfb   : > { %541 = vadd.xlane.f32.xlu0 %v540_v11  ;;  %v361_v14 = vpop.xlane.xlu0 %360  ;;  %v12391_v2 = vsub.f32 %v12247_v5, %v447_v6  ;;  %v434_v26 = vsel %vm346_vm0, %v12398_v1, 0.0  ;;  %v546_v31 = vsel %vm346_vm0, %v510_v19, 0.0 }
  0xfc   : > { %v364_v15 = vpop.xlane.xlu1 %363  ;;  %v509_v18 = vmul.f32 %v12385_v10, %v12385_v10  ;;  %v448_v22 = vmul.f32 0.03125, %v361_v14 }
  0xfd   : > { %v449_v27 = vmul.f32 0.03125, %v364_v15  ;;  %v511_v38 = vmul.f32 %v12391_v2, %v12391_v2 }
  0xfe   : > { %v543_v23 = vsel %vm346_vm0, %v509_v18, 0.0  ;;  %v12405_v34 = vsub.f32 %v12254_v8, %v448_v22 }
  0xff   : > { %432 = vadd.xlane.f32.xlu0 %v431_v0  ;;  %544 = vadd.xlane.f32.xlu1 %v543_v23  ;;  %v367_v30 = vpop.xlane.xlu0 %366  ;;  %v12413_v42 = vsub.f32 %v12257_v9, %v449_v27  ;;  %v549_v8 = vsel %vm346_vm0, %v511_v38, 0.0 }
 0x100   : > { %v370_v5 = vpop.xlane.xlu1 %369  ;;  %v450_v39 = vmul.f32 0.03125, %v367_v30  ;;  %v512_v55 = vmul.f32 %v12405_v34, %v12405_v34 }
 0x101   : > { %v451_v46 = vmul.f32 0.03125, %v370_v5  ;;  %v513_v59 = vmul.f32 %v12413_v42, %v12413_v42 }
 0x102   : > { %v12419_v51 = vsub.f32 %v12264_v12, %v450_v39  ;;  %v552_v62 = vsel %vm346_vm0, %v512_v55, 0.0 }
 0x103   : > { %547 = vadd.xlane.f32.xlu0 %v546_v31  ;;  %435 = vadd.xlane.f32.xlu1 %v434_v26  ;;  %v373_v47 = vpop.xlane.xlu0 %372  ;;  %v12427_v9 = vsub.f32 %v12267_v13, %v451_v46  ;;  %v555_v11 = vsel %vm346_vm0, %v513_v59, 0.0 }
 0x104   : > { %v376_v50 = vpop.xlane.xlu1 %375  ;;  %v452_v56 = vmul.f32 0.03125, %v373_v47  ;;  %v514_v4 = vmul.f32 %v12419_v51, %v12419_v51 }
 0x105   : > { %v453_v58 = vmul.f32 0.03125, %v376_v50  ;;  %v515_v14 = vmul.f32 %v12427_v9, %v12427_v9 }
 0x106   : > { %v12435_v63 = vsub.f32 %v12274_v16, %v452_v56  ;;  %v558_v16 = vsel %vm346_vm0, %v514_v4, 0.0 }
 0x107   : > { %438 = vadd.xlane.f32.xlu0 %v437_v43  ;;  %550 = vadd.xlane.f32.xlu1 %v549_v8  ;;  %v379_v12 = vpop.xlane.xlu0 %378  ;;  %v12440_v13 = vsub.f32 %v12277_v17, %v453_v58  ;;  %v561_v26 = vsel %vm346_vm0, %v515_v14, 0.0  ;;  %v843_v14 = vld [vmem:[#allocation8 + $0x18] sm:$0xff] }
 0x108   : > { %v382_v61 = vpop.xlane.xlu1 %381  ;;  %v454_v6 = vmul.f32 0.03125, %v379_v12  ;;  %v516_v22 = vmul.f32 %v12435_v63, %v12435_v63  ;;  %10687 = vmatprep.subr.mxu0 %v843_v14 }
 0x109   : > { %v455_v0 = vmul.f32 0.03125, %v382_v61  ;;  %v517_v30 = vmul.f32 %v12440_v13, %v12440_v13  ;;  %10688 = vmatpush3.msra.mxu0 %v843_v14 }
 0x10a   : > { %v12447_v19 = vsub.f32 %v12284_v20, %v454_v6  ;;  %v564_v20 = vsel %vm346_vm0, %v516_v22, 0.0 }
 0x10b   : > { %441 = vadd.xlane.f32.xlu1 %v440_v57  ;;  %553 = vadd.xlane.f32.xlu0 %v552_v62  ;;  %v385_v15 = vpop.xlane.xlu0 %384  ;;  %v12452_v17 = vsub.f32 %v12287_v21, %v455_v0  ;;  %v567_v46 = vsel %vm346_vm0, %v517_v30, 0.0 }
 0x10c   : > { %v388_v18 = vpop.xlane.xlu1 %387  ;;  %v456_v23 = vmul.f32 0.03125, %v385_v15  ;;  %v518_v39 = vmul.f32 %v12447_v19, %v12447_v19 }
 0x10d   : > { %v457_v27 = vmul.f32 0.03125, %v388_v18  ;;  %v519_v50 = vmul.f32 %v12452_v17, %v12452_v17 }
 0x10e   : > { %v12459_v38 = vsub.f32 %v12294_v24, %v456_v23  ;;  %v570_v24 = vsel %vm346_vm0, %v518_v39, 0.0  ;;  %v842_v23 = vld [vmem:[#allocation8 + $0x10] sm:$0xff] }
 0x10f   : > { %556 = vadd.xlane.f32.xlu1 %v555_v11  ;;  %559 = vadd.xlane.f32.xlu0 %v558_v16  ;;  %v391_v5 = vpop.xlane.xlu0 %390  ;;  %v12464_v21 = vsub.f32 %v12297_v25, %v457_v27  ;;  %v573_v59 = vsel %vm346_vm0, %v519_v50, 0.0 }
 0x110   : > { %v394_v31 = vpop.xlane.xlu1 %393  ;;  %v458_v43 = vmul.f32 0.03125, %v391_v5  ;;  %v520_v57 = vmul.f32 %v12459_v38, %v12459_v38  ;;  %10689 = vmatprep.subr.mxu0 %v842_v23 }
 0x111   : > { %v459_v47 = vmul.f32 0.03125, %v394_v31  ;;  %v521_v61 = vmul.f32 %v12464_v21, %v12464_v21  ;;  %10690 = vmatpush3.msra.mxu0 %v842_v23 }
 0x112   : > { %v12471_v56 = vsub.f32 %v12304_v28, %v458_v43  ;;  %v576_v28 = vsel %vm346_vm0, %v520_v57, 0.0 }
 0x113   : > { %562 = vadd.xlane.f32.xlu1 %v561_v26  ;;  %565 = vadd.xlane.f32.xlu0 %v564_v20  ;;  %v397_v8 = vpop.xlane.xlu0 %396  ;;  %v12476_v25 = vsub.f32 %v12307_v29, %v459_v47  ;;  %v579_v15 = vsel %vm346_vm0, %v521_v61, 0.0  ;;  %v840_v47 = vld [vmem:[#allocation8] sm:$0xff] }
 0x114   : > { %v400_v55 = vpop.xlane.xlu1 %399  ;;  %v460_v58 = vmul.f32 0.03125, %v397_v8  ;;  %v522_v11 = vmul.f32 %v12471_v56, %v12471_v56 }
 0x115   : > { %v461_v12 = vmul.f32 0.03125, %v400_v55  ;;  %v523_v16 = vmul.f32 %v12476_v25, %v12476_v25 }
 0x116   : > { %v12483_v6 = vsub.f32 %v12314_v32, %v460_v58  ;;  %v582_v26 = vsel %vm346_vm0, %v522_v11, 0.0 }
 0x117   : > { %568 = vadd.xlane.f32.xlu1 %v567_v46  ;;  %571 = vadd.xlane.f32.xlu0 %v570_v24  ;;  %v403_v62 = vpop.xlane.xlu0 %402  ;;  %v12488_v29 = vsub.f32 %v12317_v33, %v461_v12  ;;  %v841_v33 = vld [vmem:[#allocation8 + $0x8] sm:$0xff]  ;;  %v585_v20 = vsel %vm346_vm0, %v523_v16, 0.0 }
 0x118   : > { %v406_v4 = vpop.xlane.xlu1 %405  ;;  %v462_v0 = vmul.f32 0.03125, %v403_v62  ;;  %v524_v30 = vmul.f32 %v12483_v6, %v12483_v6  ;;  %10691 = vmatprep.subr.mxu0 %v841_v33 }
 0x119   : > { %v463_v18 = vmul.f32 0.03125, %v406_v4  ;;  %10692 = vmatpush3.msra.mxu0 %v841_v33 }
 0x11a   : > { %v12495_v27 = vsub.f32 %v12324_v36, %v462_v0  ;;  %v525_v36 = vmul.f32 %v12488_v29, %v12488_v29  ;;  %v588_v50 = vsel %vm346_vm0, %v524_v30, 0.0  ;;  %10693 = vmatprep.subr.mxu0 %v840_v47 }
 0x11b   : > { %574 = vadd.xlane.f32.xlu1 %v573_v59  ;;  %577 = vadd.xlane.f32.xlu0 %v576_v28  ;;  %v409_v22 = vpop.xlane.xlu0 %408  ;;  %v12500_v31 = vsub.f32 %v12327_v37, %v463_v18 }
 0x11c   : > { %v412_v32 = vpop.xlane.xlu1 %411  ;;  %v464_v5 = vmul.f32 0.03125, %v409_v22  ;;  %v526_v55 = vmul.f32 %v12495_v27, %v12495_v27  ;;  %v591_v57 = vsel %vm346_vm0, %v525_v36, 0.0  ;;  %10694 = vmatpush3.msra.mxu0 %v840_v47 }
 0x11d   : > { %v465_v39 = vmul.f32 0.03125, %v412_v32  ;;  %v527_v59 = vmul.f32 %v12500_v31, %v12500_v31 }
 0x11e   : > { %v12507_v8 = vsub.f32 %v12334_v40, %v464_v5  ;;  %v594_v61 = vsel %vm346_vm0, %v526_v55, 0.0 }
 0x11f   : > { %580 = vadd.xlane.f32.xlu1 %v579_v15  ;;  %583 = vadd.xlane.f32.xlu0 %v582_v26  ;;  %v415_v43 = vpop.xlane.xlu0 %414  ;;  %v12512_v37 = vsub.f32 %v12337_v41, %v465_v39  ;;  %v597_v11 = vsel %vm346_vm0, %v527_v59, 0.0 }
 0x120   : > { %v418_v46 = vpop.xlane.xlu1 %417  ;;  %v466_v24 = vmul.f32 0.03125, %v415_v43  ;;  %v528_v4 = vmul.f32 %v12507_v8, %v12507_v8 }
 0x121   : > { %v467_v58 = vmul.f32 0.03125, %v418_v46  ;;  %v529_v14 = vmul.f32 %v12512_v37, %v12512_v37 }
 0x122   : > { %v12519_v62 = vsub.f32 %v12344_v44, %v466_v24  ;;  %v600_v44 = vsel %vm346_vm0, %v528_v4, 0.0 }
 0x123   : > { %586 = vadd.xlane.f32.xlu1 %v585_v20  ;;  %589 = vadd.xlane.f32.xlu0 %v588_v50  ;;  %v421_v40 = vpop.xlane.xlu0 %420  ;;  %v12524_v41 = vsub.f32 %v12347_v45, %v467_v58  ;;  %v603_v23 = vsel %vm346_vm0, %v529_v14, 0.0 }
 0x124   : > { %v424_v12 = vpop.xlane.xlu1 %423  ;;  %v468_v28 = vmul.f32 0.03125, %v421_v40  ;;  %v530_v16 = vmul.f32 %v12519_v62, %v12519_v62 }
 0x125   : > { %v469_v0 = vmul.f32 0.03125, %v424_v12  ;;  %v531_v26 = vmul.f32 %v12524_v41, %v12524_v41 }
 0x126   : > { %v12531_v18 = vsub.f32 %v12354_v48, %v468_v28  ;;  %v606_v30 = vsel %vm346_vm0, %v530_v16, 0.0 }
 0x127   : > { %592 = vadd.xlane.f32.xlu1 %v591_v57  ;;  %595 = vadd.xlane.f32.xlu0 %v594_v61  ;;  %v427_v15 = vpop.xlane.xlu0 %426  ;;  %v12536_v45 = vsub.f32 %v12357_v49, %v469_v0  ;;  %v609_v20 = vsel %vm346_vm0, %v531_v26, 0.0 }
 0x128   : > { %v470_v22 = vmul.f32 0.03125, %v427_v15  ;;  %v430_v32 = vpop.xlane.xlu1 %429  ;;  %v532_v33 = vmul.f32 %v12531_v18, %v12531_v18 }
 0x129   : > { %v471_v5 = vmul.f32 0.03125, %v430_v32  ;;  %v533_v36 = vmul.f32 %v12536_v45, %v12536_v45 }
 0x12a   : > { %v12543_v48 = vsub.f32 %v12364_v52, %v470_v22  ;;  %v612_v39 = vsel %vm346_vm0, %v532_v33, 0.0 }
 0x12b   : > { %598 = vadd.xlane.f32.xlu1 %v597_v11  ;;  %601 = vadd.xlane.f32.xlu0 %v600_v44  ;;  %v12549_v49 = vsub.f32 %v12367_v53, %v471_v5  ;;  %v615_v43 = vsel %vm346_vm0, %v533_v36, 0.0 }
 0x12c   : > { %v534_v52 = vmul.f32 %v12543_v48, %v12543_v48 }
 0x12d   : > { %v535_v47 = vmul.f32 %v12549_v49, %v12549_v49 }
 0x12e   : > { %v618_v46 = vsel %vm346_vm0, %v534_v52, 0.0 }
 0x12f   : > { %604 = vadd.xlane.f32.xlu1 %v603_v23  ;;  %607 = vadd.xlane.f32.xlu0 %v606_v30  ;;  %v621_v53 = vsel %vm346_vm0, %v535_v47, 0.0 }
 0x133   : > { %610 = vadd.xlane.f32.xlu1 %v609_v20  ;;  %613 = vadd.xlane.f32.xlu0 %v612_v39 }
 0x137   : > { %616 = vadd.xlane.f32.xlu1 %v615_v43  ;;  %619 = vadd.xlane.f32.xlu0 %v618_v46 }
 0x13b   : > { %622 = vadd.xlane.f32.xlu1 %v621_v53 }
 0x184   : > { %v542_v50 = vpop.xlane.xlu0 %541 }
 0x185   : > { %v636_v55 = vmul.f32 0.03125, %v542_v50 }
 0x187   : > { %v668_v24 = vadd.f32 1e-05, %v636_v55 }
 0x188   : > { %v545_v57 = vpop.xlane.xlu1 %544  ;;  %v433_v58 = vpop.xlane.xlu0 %432 }
 0x189   : > { %11383 = vrsqrt.f32 %v668_v24  ;;  %v637_v59 = vmul.f32 0.03125, %v545_v57  ;;  %v472_v40 = vmul.f32 0.03125, %v433_v58 }
 0x18b   : > { %v669_v12 = vadd.f32 1e-05, %v637_v59  ;;  %v12562_v61 = vsub.f32 %v12382_v7, %v472_v40  ;;  %v12590_v59 = vld [vmem:[#allocation6] ss:$0 sm:$0xff] }
 0x18c   : > { %v436_v4 = vpop.xlane.xlu1 %435  ;;  %v548_v28 = vpop.xlane.xlu0 %547 }
 0x18d   : > { %11385 = vrsqrt.f32 %v669_v12  ;;  %v473_v11 = vmul.f32 0.03125, %v436_v4  ;;  %v638_v0 = vmul.f32 0.03125, %v548_v28  ;;  %v536_v14 = vmul.f32 %v12562_v61, %v12562_v61  ;;  %v12596_v4 = vld [vmem:[%s15782_s4] ss:$0 sm:$0xff] }
 0x18f   : > { %v12567_v15 = vsub.f32 %v12398_v1, %v473_v11  ;;  %v670_v44 = vadd.f32 1e-05, %v638_v0  ;;  %v624_v16 = vsel %vm346_vm0, %v536_v14, 0.0 }
 0x190   : > { %v551_v22 = vpop.xlane.xlu1 %550  ;;  %625 = vadd.xlane.f32.xlu0 %v624_v16  ;;  %v439_v32 = vpop.xlane.xlu0 %438 }
 0x191   : > { %11387 = vrsqrt.f32 %v670_v44  ;;  %v639_v7 = vmul.f32 0.03125, %v551_v22  ;;  %v474_v23 = vmul.f32 0.03125, %v439_v32  ;;  %v537_v26 = vmul.f32 %v12567_v15, %v12567_v15 }
 0x193   : > { %v671_v30 = vadd.f32 1e-05, %v639_v7  ;;  %v12573_v5 = vsub.f32 %v12408_v35, %v474_v23  ;;  %v627_v33 = vsel %vm346_vm0, %v537_v26, 0.0  ;;  %v12585_v35 = vld [vmem:[%s15779_s1] ss:$0 sm:$0xff] }
 0x194   : > { %628 = vadd.xlane.f32.xlu1 %v627_v33  ;;  %v442_v1 = vpop.xlane.xlu1 %441  ;;  %v554_v20 = vpop.xlane.xlu0 %553 }
 0x195   : > { %11389 = vrsqrt.f32 %v671_v30  ;;  %v475_v39 = vmul.f32 0.03125, %v442_v1  ;;  %v640_v36 = vmul.f32 0.03125, %v554_v20  ;;  %v538_v52 = vmul.f32 %v12573_v5, %v12573_v5 }
 0x196   : > { %v11384_v43 = vpop.eup %11383 }
 0x197   : > { %v12579_v46 = vsub.f32 %v12422_v54, %v475_v39  ;;  %v672_v47 = vadd.f32 1e-05, %v640_v36  ;;  %v630_v53 = vsel %vm346_vm0, %v538_v52, 0.0  ;;  %v732_v50 = vmul.f32 %v11384_v43, %v12374_v60 }
 0x198   : > { %v557_v55 = vpop.xlane.xlu1 %556  ;;  %631 = vadd.xlane.f32.xlu0 %v630_v53  ;;  %v560_v24 = vpop.xlane.xlu0 %559 }
 0x199   : > { %11391 = vrsqrt.f32 %v672_v47  ;;  %v641_v57 = vmul.f32 0.03125, %v557_v55  ;;  %v642_v58 = vmul.f32 0.03125, %v560_v24  ;;  %v539_v54 = vmul.f32 %v12579_v46, %v12579_v46 }
 0x19a   : > { %v11386_v40 = vpop.eup %11385  ;;  %v770_v12 = vmul.f32 %v12585_v35, %v732_v50 }
 0x19b   : > { %v673_v60 = vadd.f32 1e-05, %v641_v57  ;;  %v674_v28 = vadd.f32 1e-05, %v642_v58  ;;  %v633_v11 = vsel %vm346_vm0, %v539_v54, 0.0  ;;  %v733_v0 = vmul.f32 %v11386_v40, %v12385_v10 }
 0x19c   : > { %634 = vadd.xlane.f32.xlu1 %v633_v11  ;;  %v563_v14 = vpop.xlane.xlu1 %562  ;;  %v566_v44 = vpop.xlane.xlu0 %565  ;;  %v12601_v16 = vadd.f32 %v12590_v59, %v770_v12 }
 0x19d   : > { %11393 = vrsqrt.f32 %v673_v60  ;;  %v643_v22 = vmul.f32 0.03125, %v563_v14  ;;  %v644_v32 = vmul.f32 0.03125, %v566_v44  ;;  %v771_v7 = vmul.f32 %v12585_v35, %v733_v0 }
 0x19e   : > { %15979 = vst [vmem:[#allocation16_spill] sm:$0xff] %v12601_v16  ;;  %v11388_v23 = vpop.eup %11387  ;;  %11395 = vrsqrt.f32 %v674_v28  ;;  %10695 = vmatprep.mubr.msk.f32.mxu0 %vm346_vm0, %v12601_v16  ;;  %v1202_v26 = vmul.f32 %v12596_v4, %v12601_v16 }
 0x19f   : > { %v675_v10 = vadd.f32 1e-05, %v643_v22  ;;  %v676_v30 = vadd.f32 1e-05, %v644_v32  ;;  %v12609_v33 = vadd.f32 %v12590_v59, %v771_v7  ;;  %v734_v1 = vmul.f32 %v11388_v23, %v12377_v3 }
 0x1a0   : > { %v569_v20 = vpop.xlane.xlu1 %568  ;;  %v1234_v39 = vsel %vm346_vm0, %v1202_v26, 0.0  ;;  %v572_v36 = vpop.xlane.xlu0 %571 }
 0x1a1   : > { %15980 = vst [vmem:[#allocation17_spill] sm:$0xff] %v12609_v33  ;;  %11397 = vrsqrt.f32 %v675_v10  ;;  %v645_v52 = vmul.f32 0.03125, %v569_v20  ;;  %1235 = vadd.xlane.f32.xlu0 %v1234_v39  ;;  %v646_v43 = vmul.f32 0.03125, %v572_v36  ;;  %10696 = vmatmul.mubr.msk.f32.vlgmr.msra.gmra.mxu0 %vm346_vm0, %v12609_v33  ;;  %v1203_v47 = vmul.f32 %v12596_v4, %v12609_v33 }
 0x1a2   : > { %v11390_v53 = vpop.eup %11389  ;;  %11399 = vrsqrt.f32 %v676_v30  ;;  %v772_v50 = vmul.f32 %v12585_v35, %v734_v1 }
 0x1a3   : > { %v677_v55 = vadd.f32 1e-05, %v645_v52  ;;  %v678_v3 = vadd.f32 1e-05, %v646_v43  ;;  %v1237_v24 = vsel %vm346_vm0, %v1203_v47, 0.0  ;;  %v735_v57 = vmul.f32 %v11390_v53, %v12391_v2 }
 0x1a4   : > { %1238 = vadd.xlane.f32.xlu1 %v1237_v24  ;;  %v575_v58 = vpop.xlane.xlu1 %574  ;;  %v578_v54 = vpop.xlane.xlu0 %577  ;;  %v12621_v40 = vadd.f32 %v12590_v59, %v772_v50 }
 0x1a5   : > { %11401 = vrsqrt.f32 %v677_v55  ;;  %v647_v12 = vmul.f32 0.03125, %v575_v58  ;;  %v648_v60 = vmul.f32 0.03125, %v578_v54  ;;  %v773_v28 = vmul.f32 %v12585_v35, %v735_v57 }
 0x1a6   : > { %15981 = vst [vmem:[#allocation18_spill] sm:$0xff] %v12621_v40  ;;  %v11392_v11 = vpop.eup %11391  ;;  %11403 = vrsqrt.f32 %v678_v3  ;;  %10698 = vmatprep.mubr.msk.f32.mxu0 %vm346_vm0, %v12621_v40  ;;  %v1204_v0 = vmul.f32 %v12596_v4, %v12621_v40 }
 0x1a7   : > { %v679_v2 = vadd.f32 1e-05, %v647_v12  ;;  %v680_v14 = vadd.f32 1e-05, %v648_v60  ;;  %v12629_v44 = vadd.f32 %v12590_v59, %v773_v28  ;;  %v736_v22 = vmul.f32 %v11392_v11, %v12405_v34 }
 0x1a8   : > { %v581_v32 = vpop.xlane.xlu1 %580  ;;  %v1240_v7 = vsel %vm346_vm0, %v1204_v0, 0.0  ;;  %v584_v23 = vpop.xlane.xlu0 %583 }
 0x1a9   : > { %15982 = vst [vmem:[#allocation19_spill] sm:$0xff] %v12629_v44  ;;  %11405 = vrsqrt.f32 %v679_v2  ;;  %v649_v26 = vmul.f32 0.03125, %v581_v32  ;;  %1241 = vadd.xlane.f32.xlu0 %v1240_v7  ;;  %v650_v10 = vmul.f32 0.03125, %v584_v23  ;;  %10699 = vmatmul.mubr.msk.f32.gmra.mxu0 %vm346_vm0, %v12629_v44  ;;  %v1205_v30 = vmul.f32 %v12596_v4, %v12629_v44 }
 0x1aa   : > { %v11394_v1 = vpop.eup %11393  ;;  %11407 = vrsqrt.f32 %v680_v14  ;;  %v774_v20 = vmul.f32 %v12585_v35, %v736_v22 }
 0x1ab   : > { %v11396_v39 = vpop.eup %11395  ;;  %v681_v34 = vadd.f32 1e-05, %v649_v26  ;;  %v682_v36 = vadd.f32 1e-05, %v650_v10  ;;  %v1243_v52 = vsel %vm346_vm0, %v1205_v30, 0.0  ;;  %v737_v43 = vmul.f32 %v11394_v1, %v12413_v42 }
 0x1ac   : > { %v587_v47 = vpop.xlane.xlu1 %586  ;;  %v590_v53 = vpop.xlane.xlu0 %589  ;;  %v12641_v50 = vadd.f32 %v12590_v59, %v774_v20  ;;  %v738_v55 = vmul.f32 %v11396_v39, %v12419_v51 }
 0x1ad   : > { %11409 = vrsqrt.f32 %v681_v34  ;;  %v651_v3 = vmul.f32 0.03125, %v587_v47  ;;  %1244 = vadd.xlane.f32.xlu0 %v1243_v52  ;;  %v652_v24 = vmul.f32 0.03125, %v590_v53  ;;  %v775_v57 = vmul.f32 %v12585_v35, %v737_v43 }
 0x1ae   : > { %15983 = vst [vmem:[#allocation20_spill] sm:$0xff] %v12641_v50  ;;  %v11398_v58 = vpop.eup %11397  ;;  %11411 = vrsqrt.f32 %v682_v36  ;;  %10701 = vmatprep.mubr.msk.f32.mxu0 %vm346_vm0, %v12641_v50  ;;  %v1206_v42 = vmul.f32 %v12596_v4, %v12641_v50  ;;  %v776_v54 = vmul.f32 %v12585_v35, %v738_v55 }
 0x1af   : > { %v11400_v12 = vpop.eup %11399  ;;  %v683_v60 = vadd.f32 1e-05, %v651_v3  ;;  %v684_v28 = vadd.f32 1e-05, %v652_v24  ;;  %v12651_v51 = vadd.f32 %v12590_v59, %v775_v57  ;;  %v739_v11 = vmul.f32 %v11398_v58, %v12427_v9 }
 0x1b0   : > { %v593_v0 = vpop.xlane.xlu1 %592  ;;  %v1246_v2 = vsel %vm346_vm0, %v1206_v42, 0.0  ;;  %v596_v14 = vpop.xlane.xlu0 %595  ;;  %v12656_v22 = vadd.f32 %v12590_v59, %v776_v54  ;;  %v740_v32 = vmul.f32 %v11400_v12, %v12435_v63 }
 0x1b1   : > { %15984 = vst [vmem:[#allocation21_spill] sm:$0xff] %v12651_v51  ;;  %11413 = vrsqrt.f32 %v683_v60  ;;  %v653_v7 = vmul.f32 0.03125, %v593_v0  ;;  %1247 = vadd.xlane.f32.xlu0 %v1246_v2  ;;  %v654_v23 = vmul.f32 0.03125, %v596_v14  ;;  %10702 = vmatmul.mubr.msk.f32.gmra.mxu0 %vm346_vm0, %v12651_v51  ;;  %v1207_v26 = vmul.f32 %v12596_v4, %v12651_v51 }
 0x1b2   : > { %15985 = vst [vmem:[#allocation22_spill] sm:$0xff] %v12656_v22  ;;  %v11402_v9 = vpop.eup %11401  ;;  %11415 = vrsqrt.f32 %v684_v28  ;;  %10704 = vmatprep.mubr.msk.f32.mxu0 %vm346_vm0, %v12656_v22  ;;  %v777_v10 = vmul.f32 %v12585_v35, %v739_v11  ;;  %v778_v30 = vmul.f32 %v12585_v35, %v740_v32 }
 0x1b3   : > { %v11404_v63 = vpop.eup %11403  ;;  %v685_v1 = vadd.f32 1e-05, %v653_v7  ;;  %v686_v20 = vadd.f32 1e-05, %v654_v23  ;;  %v1249_v39 = vsel %vm346_vm0, %v1207_v26, 0.0  ;;  %v741_v34 = vmul.f32 %v11402_v9, %v12440_v13 }
 0x1b4   : > { %1250 = vadd.xlane.f32.xlu1 %v1249_v39  ;;  %v599_v36 = vpop.xlane.xlu1 %598  ;;  %v602_v52 = vpop.xlane.xlu0 %601  ;;  %v12670_v43 = vadd.f32 %v12590_v59, %v777_v10  ;;  %v12673_v47 = vadd.f32 %v12590_v59, %v778_v30  ;;  %v742_v53 = vmul.f32 %v11404_v63, %v12447_v19 }
 0x1b5   : > { %11417 = vrsqrt.f32 %v685_v1  ;;  %v655_v55 = vmul.f32 0.03125, %v599_v36  ;;  %v656_v3 = vmul.f32 0.03125, %v602_v52  ;;  %v779_v24 = vmul.f32 %v12585_v35, %v741_v34 }
 0x1b6   : > { %15986 = vst [vmem:[#allocation23_spill] sm:$0xff] %v12670_v43  ;;  %15987 = vst [vmem:[#allocation24_spill] sm:$0xff] %v12673_v47  ;;  %v11406_v57 = vpop.eup %11405  ;;  %11419 = vrsqrt.f32 %v686_v20  ;;  %10705 = vmatmul.mubr.msk.f32.gmra.mxu0 %vm346_vm0, %v12670_v43  ;;  %v780_v13 = vmul.f32 %v12585_v35, %v742_v53 }
 0x1b7   : > { %v11408_v58 = vpop.eup %11407  ;;  %v687_v42 = vadd.f32 1e-05, %v655_v55  ;;  %v688_v54 = vadd.f32 1e-05, %v656_v3  ;;  %10707 = vmatprep.mubr.msk.f32.mxu0 %vm346_vm0, %v12673_v47  ;;  %v12683_v19 = vadd.f32 %v12590_v59, %v779_v24  ;;  %v743_v12 = vmul.f32 %v11406_v57, %v12452_v17 }
 0x1b8   : > { %v605_v60 = vpop.xlane.xlu1 %604  ;;  %v608_v28 = vpop.xlane.xlu0 %607  ;;  %v12687_v11 = vadd.f32 %v12590_v59, %v780_v13  ;;  %v744_v0 = vmul.f32 %v11408_v58, %v12459_v38 }
 0x1b9   : > { %15988 = vst [vmem:[#allocation25_spill] sm:$0xff] %v12683_v19  ;;  %11421 = vrsqrt.f32 %v687_v42  ;;  %v657_v2 = vmul.f32 0.03125, %v605_v60  ;;  %v658_v14 = vmul.f32 0.03125, %v608_v28  ;;  %v781_v32 = vmul.f32 %v12585_v35, %v743_v12 }
 0x1ba   : > { %15989 = vst [vmem:[#allocation26_spill] sm:$0xff] %v12687_v11  ;;  %v11410_v7 = vpop.eup %11409  ;;  %11423 = vrsqrt.f32 %v688_v54  ;;  %10708 = vmatmul.mubr.msk.f32.gmra.mxu0 %vm346_vm0, %v12683_v19  ;;  %v782_v23 = vmul.f32 %v12585_v35, %v744_v0 }
 0x1bb   : > { %v11412_v17 = vpop.eup %11411  ;;  %v689_v26 = vadd.f32 1e-05, %v657_v2  ;;  %v690_v9 = vadd.f32 1e-05, %v658_v14  ;;  %10710 = vmatprep.mubr.msk.f32.mxu0 %vm346_vm0, %v12687_v11  ;;  %v12697_v38 = vadd.f32 %v12590_v59, %v781_v32  ;;  %v745_v10 = vmul.f32 %v11410_v7, %v12464_v21 }
 0x1bc   : > { %v611_v30 = vpop.xlane.xlu1 %610  ;;  %v614_v63 = vpop.xlane.xlu0 %613  ;;  %v12701_v1 = vadd.f32 %v12590_v59, %v782_v23  ;;  %v746_v20 = vmul.f32 %v11412_v17, %v12471_v56 }
 0x1bd   : > { %15990 = vst [vmem:[#allocation27_spill] sm:$0xff] %v12697_v38  ;;  %11425 = vrsqrt.f32 %v689_v26  ;;  %v659_v39 = vmul.f32 0.03125, %v611_v30  ;;  %v660_v34 = vmul.f32 0.03125, %v614_v63  ;;  %v783_v36 = vmul.f32 %v12585_v35, %v745_v10 }
 0x1be   : > { %15991 = vst [vmem:[#allocation28_spill] sm:$0xff] %v12701_v1  ;;  %v11414_v52 = vpop.eup %11413  ;;  %11427 = vrsqrt.f32 %v690_v9  ;;  %10711 = vmatmul.mubr.msk.f32.gmra.mxu0 %vm346_vm0, %v12697_v38  ;;  %v784_v53 = vmul.f32 %v12585_v35, %v746_v20 }
 0x1bf   : > { %v11416_v21 = vpop.eup %11415  ;;  %v691_v55 = vadd.f32 1e-05, %v659_v39  ;;  %v692_v3 = vadd.f32 1e-05, %v660_v34  ;;  %10713 = vmatprep.mubr.msk.f32.mxu0 %vm346_vm0, %v12701_v1  ;;  %v12711_v56 = vadd.f32 %v12590_v59, %v783_v36  ;;  %v747_v24 = vmul.f32 %v11414_v52, %v12476_v25 }
 0x1c0   : > { %v617_v57 = vpop.xlane.xlu1 %616  ;;  %v620_v13 = vpop.xlane.xlu0 %619  ;;  %v12715_v58 = vadd.f32 %v12590_v59, %v784_v53  ;;  %v748_v42 = vmul.f32 %v11416_v21, %v12483_v6 }
 0x1c1   : > { %15992 = vst [vmem:[#allocation29_spill] sm:$0xff] %v12711_v56  ;;  %11429 = vrsqrt.f32 %v691_v55  ;;  %v661_v54 = vmul.f32 0.03125, %v617_v57  ;;  %v662_v12 = vmul.f32 0.03125, %v620_v13  ;;  %v785_v60 = vmul.f32 %v12585_v35, %v747_v24 }
 0x1c2   : > { %15993 = vst [vmem:[#allocation30_spill] sm:$0xff] %v12715_v58  ;;  %v11418_v28 = vpop.eup %11417  ;;  %11431 = vrsqrt.f32 %v692_v3  ;;  %10714 = vmatmul.mubr.msk.f32.gmra.mxu0 %vm346_vm0, %v12711_v56  ;;  %v786_v0 = vmul.f32 %v12585_v35, %v748_v42 }
 0x1c3   : > { %v11420_v25 = vpop.eup %11419  ;;  %v693_v2 = vadd.f32 1e-05, %v661_v54  ;;  %v694_v14 = vadd.f32 1e-05, %v662_v12  ;;  %10716 = vmatprep.mubr.msk.f32.mxu0 %vm346_vm0, %v12715_v58  ;;  %v12725_v6 = vadd.f32 %v12590_v59, %v785_v60  ;;  %v749_v32 = vmul.f32 %v11418_v28, %v12488_v29 }
 0x1c4   : > { %v623_v7 = vpop.xlane.xlu1 %622  ;;  %v12729_v23 = vadd.f32 %v12590_v59, %v786_v0  ;;  %v750_v17 = vmul.f32 %v11420_v25, %v12495_v27  ;;  %v1208_v12 = vmul.f32 %v12596_v4, %v12656_v22 }
 0x1c5   : > { %15994 = vst [vmem:[#allocation31_spill] sm:$0xff] %v12725_v6  ;;  %11433 = vrsqrt.f32 %v693_v2  ;;  %v663_v26 = vmul.f32 0.03125, %v623_v7  ;;  %v787_v9 = vmul.f32 %v12585_v35, %v749_v32  ;;  %v1209_v32 = vmul.f32 %v12596_v4, %v12670_v43 }
 0x1c6   : > { %15995 = vst [vmem:[#allocation32_spill] sm:$0xff] %v12729_v23  ;;  %v11422_v10 = vpop.eup %11421  ;;  %11435 = vrsqrt.f32 %v694_v14  ;;  %10717 = vmatmul.mubr.msk.f32.gmra.mxu0 %vm346_vm0, %v12725_v6  ;;  %v1218_v30 = vmul.f32 %v12596_v4, %v12729_v23  ;;  %v788_v29 = vmul.f32 %v12585_v35, %v750_v17  ;;  %v1252_v17 = vsel %vm346_vm0, %v1208_v12, 0.0 }
 0x1c7   : > { %v11424_v63 = vpop.eup %11423  ;;  %v695_v20 = vadd.f32 1e-05, %v663_v26  ;;  %10719 = vmatprep.mubr.msk.f32.mxu0 %vm346_vm0, %v12729_v23  ;;  %v12741_v27 = vadd.f32 %v12590_v59, %v787_v9  ;;  %v751_v39 = vmul.f32 %v11422_v10, %v12500_v31 }
 0x1c8   : > { %v1282_v34 = vsel %vm346_vm0, %v1218_v30, 0.0  ;;  %v12746_v36 = vadd.f32 %v12590_v59, %v788_v29  ;;  %v752_v52 = vmul.f32 %v11424_v63, %v12507_v8 }
 0x1c9   : > { %15996 = vst [vmem:[#allocation33_spill] sm:$0xff] %v12741_v27  ;;  %11437 = vrsqrt.f32 %v695_v20  ;;  %1283 = vadd.xlane.f32.xlu0 %v1282_v34  ;;  %v1219_v53 = vmul.f32 %v12596_v4, %v12741_v27  ;;  %v789_v21 = vmul.f32 %v12585_v35, %v751_v39  ;;  %v1255_v20 = vsel %vm346_vm0, %v1209_v32, 0.0 }
 0x1ca   : > { %15997 = vst [vmem:[#allocation34_spill] sm:$0xff] %v12746_v36  ;;  %v11426_v55 = vpop.eup %11425  ;;  %10720 = vmatmul.mubr.msk.f32.gmra.mxu0 %vm346_vm0, %v12741_v27  ;;  %v1220_v31 = vmul.f32 %v12596_v4, %v12746_v36  ;;  %v790_v3 = vmul.f32 %v12585_v35, %v752_v52  ;;  %v1213_v32 = vmul.f32 %v12596_v4, %v12697_v38 }
 0x1cb   : > { %v11428_v24 = vpop.eup %11427  ;;  %10722 = vmatprep.mubr.msk.f32.mxu0 %vm346_vm0, %v12746_v36  ;;  %v1285_v8 = vsel %vm346_vm0, %v1219_v53, 0.0  ;;  %v12761_v57 = vadd.f32 %v12590_v59, %v789_v21  ;;  %v753_v13 = vmul.f32 %v11426_v55, %v12512_v37  ;;  %v1210_v21 = vmul.f32 %v12596_v4, %v12673_v47 }
 0x1cc   : > { %1286 = vadd.xlane.f32.xlu1 %v1285_v8  ;;  %v1288_v42 = vsel %vm346_vm0, %v1220_v31, 0.0  ;;  %v12766_v54 = vadd.f32 %v12590_v59, %v790_v3  ;;  %v754_v60 = vmul.f32 %v11428_v24, %v12519_v62 }
 0x1cd   : > { %15998 = vst [vmem:[#allocation35_spill] sm:$0xff] %v12761_v57  ;;  %1289 = vadd.xlane.f32.xlu0 %v1288_v42  ;;  %v1221_v28 = vmul.f32 %v12596_v4, %v12761_v57  ;;  %v791_v0 = vmul.f32 %v12585_v35, %v753_v13  ;;  %v1258_v42 = vsel %vm346_vm0, %v1210_v21, 0.0 }
 0x1ce   : > { %15999 = vst [vmem:[#allocation36_spill] sm:$0xff] %v12766_v54  ;;  %v11430_v25 = vpop.eup %11429  ;;  %10723 = vmatmul.mubr.msk.f32.gmra.mxu0 %vm346_vm0, %v12761_v57  ;;  %v792_v37 = vmul.f32 %v12585_v35, %v754_v60  ;;  %v1222_v9 = vmul.f32 %v12596_v4, %v12766_v54 }
 0x1cf   : > { %v11432_v2 = vpop.eup %11431  ;;  %10725 = vmatprep.mubr.msk.f32.mxu0 %vm346_vm0, %v12766_v54  ;;  %v1291_v14 = vsel %vm346_vm0, %v1221_v28, 0.0  ;;  %v12781_v62 = vadd.f32 %v12590_v59, %v791_v0  ;;  %v755_v7 = vmul.f32 %v11430_v25, %v12524_v41 }
 0x1d0   : > { %1292 = vadd.xlane.f32.xlu1 %v1291_v14  ;;  %v12788_v26 = vadd.f32 %v12590_v59, %v792_v37  ;;  %v756_v10 = vmul.f32 %v11432_v2, %v12531_v18  ;;  %v1294_v52 = vsel %vm346_vm0, %v1222_v9, 0.0  ;;  %v1212_v2 = vmul.f32 %v12596_v4, %v12687_v11 }
 0x1d1   : > { %16000 = vst [vmem:[#allocation37_spill] sm:$0xff] %v12781_v62  ;;  %1253 = vadd.xlane.f32.xlu0 %v1252_v17  ;;  %v793_v30 = vmul.f32 %v12585_v35, %v755_v7  ;;  %v1223_v18 = vmul.f32 %v12596_v4, %v12781_v62  ;;  %v1267_v9 = vsel %vm346_vm0, %v1213_v32, 0.0 }
 0x1d2   : > { %16001 = vst [vmem:[#allocation38_spill] sm:$0xff] %v12788_v26  ;;  %v11434_v29 = vpop.eup %11433  ;;  %10726 = vmatmul.mubr.msk.f32.gmra.mxu0 %vm346_vm0, %v12781_v62  ;;  %v794_v41 = vmul.f32 %v12585_v35, %v756_v10  ;;  %v1224_v60 = vmul.f32 %v12596_v4, %v12788_v26  ;;  %v1264_v7 = vsel %vm346_vm0, %v1212_v2, 0.0 }
 0x1d3   : > { %v11436_v63 = vpop.eup %11435  ;;  %10728 = vmatprep.mubr.msk.f32.mxu0 %vm346_vm0, %v12788_v26  ;;  %v12801_v39 = vadd.f32 %v12590_v59, %v793_v30  ;;  %v757_v34 = vmul.f32 %v11434_v29, %v12536_v45  ;;  %v1297_v24 = vsel %vm346_vm0, %v1223_v18, 0.0  ;;  %v1214_v29 = vmul.f32 %v12596_v4, %v12701_v1 }
 0x1d4   : > { %1256 = vadd.xlane.f32.xlu1 %v1255_v20  ;;  %v12808_v53 = vadd.f32 %v12590_v59, %v794_v41  ;;  %v758_v55 = vmul.f32 %v11436_v63, %v12543_v48  ;;  %v1211_v48 = vmul.f32 %v12596_v4, %v12683_v19  ;;  %v1300_v37 = vsel %vm346_vm0, %v1224_v60, 0.0 }
 0x1d5   : > { %16002 = vst [vmem:[#allocation39_spill] sm:$0xff] %v12801_v39  ;;  %1295 = vadd.xlane.f32.xlu0 %v1294_v52  ;;  %v795_v31 = vmul.f32 %v12585_v35, %v757_v34  ;;  %v1225_v25 = vmul.f32 %v12596_v4, %v12801_v39  ;;  %v1215_v63 = vmul.f32 %v12596_v4, %v12711_v56  ;;  %v1270_v20 = vsel %vm346_vm0, %v1214_v29, 0.0 }
 0x1d6   : > { %16003 = vst [vmem:[#allocation40_spill] sm:$0xff] %v12808_v53  ;;  %v11438_v3 = vpop.eup %11437  ;;  %10729 = vmatmul.mubr.msk.f32.gmra.mxu0 %vm346_vm0, %v12801_v39  ;;  %v796_v45 = vmul.f32 %v12585_v35, %v758_v55  ;;  %v1226_v17 = vmul.f32 %v12596_v4, %v12808_v53  ;;  %v1216_v55 = vmul.f32 %v12596_v4, %v12715_v58 }
 0x1d7   : > { %10731 = vmatprep.mubr.msk.f32.mxu0 %vm346_vm0, %v12808_v53  ;;  %v12821_v8 = vadd.f32 %v12590_v59, %v795_v31  ;;  %v759_v13 = vmul.f32 %v11438_v3, %v12549_v49  ;;  %v1261_v49 = vsel %vm346_vm0, %v1211_v48, 0.0  ;;  %v1303_v14 = vsel %vm346_vm0, %v1225_v25, 0.0 }
 0x1d8   : > { %1298 = vadd.xlane.f32.xlu1 %v1297_v24  ;;  %v12828_v12 = vadd.f32 %v12590_v59, %v796_v45  ;;  %v1306_v30 = vsel %vm346_vm0, %v1226_v17, 0.0  ;;  %v1273_v34 = vsel %vm346_vm0, %v1215_v63, 0.0  ;;  %v1217_v3 = vmul.f32 %v12596_v4, %v12725_v6 }
 0x1d9   : > { %16004 = vst [vmem:[#allocation41_spill] sm:$0xff] %v12821_v8  ;;  %1259 = vadd.xlane.f32.xlu0 %v1258_v42  ;;  %v797_v28 = vmul.f32 %v12585_v35, %v759_v13  ;;  %v1227_v10 = vmul.f32 %v12596_v4, %v12821_v8  ;;  %v1276_v45 = vsel %vm346_vm0, %v1216_v55, 0.0 }
 0x1da   : > { %16005 = vst [vmem:[#allocation42_spill] sm:$0xff] %v12828_v12  ;;  %10732 = vmatmul.mubr.msk.f32.gmra.mxu0 %vm346_vm0, %v12821_v8  ;;  %v1228_v18 = vmul.f32 %v12596_v4, %v12828_v12  ;;  %v1279_v24 = vsel %vm346_vm0, %v1217_v3, 0.0 }
 0x1db   : > { %10734 = vmatprep.mubr.msk.f32.mxu0 %vm346_vm0, %v12828_v12  ;;  %v12839_v0 = vadd.f32 %v12590_v59, %v797_v28  ;;  %v1309_v41 = vsel %vm346_vm0, %v1227_v10, 0.0 }
 0x1dc   : > { %1262 = vadd.xlane.f32.xlu1 %v1261_v49  ;;  %v1312_v21 = vsel %vm346_vm0, %v1228_v18, 0.0 }
 0x1dd   : > { %16006 = vst [vmem:[#allocation43_spill] sm:$0xff] %v12839_v0  ;;  %1301 = vadd.xlane.f32.xlu0 %v1300_v37  ;;  %v1229_v52 = vmul.f32 %v12596_v4, %v12839_v0 }
 0x1de   : > { %10735 = vmatmul.mubr.msk.f32.gmra.mxu0 %vm346_vm0, %v12839_v0 }
 0x1df   : > { %v1315_v31 = vsel %vm346_vm0, %v1229_v52, 0.0 }
 0x1e0   : > { %1304 = vadd.xlane.f32.xlu1 %v1303_v14 }
 0x1e1   : > { %1265 = vadd.xlane.f32.xlu0 %v1264_v7 }
 0x1e4   : > { %1268 = vadd.xlane.f32.xlu1 %v1267_v9 }
 0x1e5   : > { %1307 = vadd.xlane.f32.xlu0 %v1306_v30 }
 0x1e8   : > { %1310 = vadd.xlane.f32.xlu1 %v1309_v41 }
 0x1e9   : > { %1271 = vadd.xlane.f32.xlu0 %v1270_v20 }
 0x1ec   : > { %1274 = vadd.xlane.f32.xlu1 %v1273_v34 }
 0x1ed   : > { %1313 = vadd.xlane.f32.xlu0 %v1312_v21 }
 0x1f0   : > { %1316 = vadd.xlane.f32.xlu1 %v1315_v31 }
 0x1f1   : > { %1277 = vadd.xlane.f32.xlu0 %v1276_v45 }
 0x1f4   : > { %1280 = vadd.xlane.f32.xlu1 %v1279_v24 }
 0x219   : > { %v626_v48 = vpop.xlane.xlu0 %625 }
 0x21a   : > { %v664_v13 = vmul.f32 0.03125, %v626_v48 }
 0x21c   : > { %v696_v42 = vadd.f32 1e-05, %v664_v13 }
 0x21d   : > { %v629_v60 = vpop.xlane.xlu1 %628 }
 0x21e   : > { %11439 = vrsqrt.f32 %v696_v42  ;;  %v665_v28 = vmul.f32 0.03125, %v629_v60 }
 0x220   : > { %v697_v49 = vadd.f32 1e-05, %v665_v28 }
 0x221   : > { %v632_v25 = vpop.xlane.xlu0 %631 }
 0x222   : > { %11441 = vrsqrt.f32 %v697_v49  ;;  %v666_v37 = vmul.f32 0.03125, %v632_v25 }
 0x224   : > { %v698_v2 = vadd.f32 1e-05, %v666_v37 }
 0x225   : > { %v635_v14 = vpop.xlane.xlu1 %634 }
 0x226   : > { %11443 = vrsqrt.f32 %v698_v2  ;;  %v667_v32 = vmul.f32 0.03125, %v635_v14 }
 0x228   : > { %v699_v7 = vadd.f32 1e-05, %v667_v32 }
 0x22a   : > { %11445 = vrsqrt.f32 %v699_v7  ;;  %v12949_v25 = vpop.xlane.xlu0 %1235 }
 0x22b   : > { %v11440_v17 = vpop.eup %11439 }
 0x22c   : > { %v760_v9 = vmul.f32 %v11440_v17, %v12562_v61 }
 0x22e   : > { %v798_v10 = vmul.f32 %v12585_v35, %v760_v9 }
 0x22f   : > { %v11442_v30 = vpop.eup %11441 }
 0x230   : > { %v12880_v29 = vadd.f32 %v12590_v59, %v798_v10  ;;  %v761_v41 = vmul.f32 %v11442_v30, %v12567_v15 }
 0x232   : > { %16007 = vst [vmem:[#allocation44_spill] sm:$0xff] %v12880_v29  ;;  %10737 = vmatprep.mubr.msk.f32.mxu0 %vm346_vm0, %v12880_v29  ;;  %v1230_v63 = vmul.f32 %v12596_v4, %v12880_v29  ;;  %v799_v20 = vmul.f32 %v12585_v35, %v761_v41  ;;  %v12959_v14 = vpop.xlane.xlu0 %1241  ;;  %v12977_v41 = vpop.xlane.xlu1 %1238 }
 0x233   : > { %v11444_v18 = vpop.eup %11443 }
 0x234   : > { %v1318_v34 = vsel %vm346_vm0, %v1230_v63, 0.0  ;;  %v12890_v61 = vadd.f32 %v12590_v59, %v799_v20  ;;  %v762_v52 = vmul.f32 %v11444_v18, %v12573_v5 }
 0x235   : > { %1319 = vadd.xlane.f32.xlu0 %v1318_v34 }
 0x236   : > { %16008 = vst [vmem:[#allocation45_spill] sm:$0xff] %v12890_v61  ;;  %10738 = vmatmul.mubr.msk.f32.gmra.mxu0 %vm346_vm0, %v12890_v61  ;;  %v1231_v15 = vmul.f32 %v12596_v4, %v12890_v61  ;;  %v800_v21 = vmul.f32 %v12585_v35, %v762_v52  ;;  %v12971_v9 = vpop.xlane.xlu0 %1244 }
 0x237   : > { %v11446_v55 = vpop.eup %11445 }
 0x238   : > { %v1321_v31 = vsel %vm346_vm0, %v1231_v15, 0.0  ;;  %v12900_v3 = vadd.f32 %v12590_v59, %v800_v21  ;;  %v763_v45 = vmul.f32 %v11446_v55, %v12579_v46 }
 0x239   : > { %1322 = vadd.xlane.f32.xlu1 %v1321_v31 }
 0x23a   : > { %16009 = vst [vmem:[#allocation46_spill] sm:$0xff] %v12900_v3  ;;  %10740 = vmatprep.mubr.msk.f32.mxu0 %vm346_vm0, %v12900_v3  ;;  %v801_v5 = vmul.f32 %v12585_v35, %v763_v45  ;;  %v12981_v20 = vpop.xlane.xlu0 %1247  ;;  %v1232_v45 = vmul.f32 %v12596_v4, %v12900_v3 }
 0x23c   : > { %v12907_v24 = vadd.f32 %v12590_v59, %v801_v5  ;;  %v1324_v58 = vsel %vm346_vm0, %v1232_v45, 0.0 }
 0x23d   : > { %v12987_v34 = vpop.xlane.xlu1 %1250 }
 0x23e   : > { %16010 = vst [vmem:[#allocation47_spill] sm:$0xff] %v12907_v24  ;;  %10741 = vmatmul.mubr.msk.f32.gmra.mxu0 %vm346_vm0, %v12907_v24  ;;  %v1233_v29 = vmul.f32 %v12596_v4, %v12907_v24 }
 0x240   : > { %v1327_v1 = vsel %vm346_vm0, %v1233_v29, 0.0 }
 0x252   : > { %v12989_v52 = vpop.xlane.xlu0 %1283 }
 0x255   : > { %v12991_v15 = vpop.xlane.xlu1 %1286 }
 0x256   : > { %v12993_v21 = vpop.xlane.xlu0 %1289 }
 0x259   : > { %v12995_v55 = vpop.xlane.xlu1 %1292 }
 0x25a   : > { %v12997_v31 = vpop.xlane.xlu0 %1253 }
 0x25d   : > { %v13001_v5 = vpop.xlane.xlu1 %1256 }
 0x25e   : > { %v13006_v12 = vpop.xlane.xlu0 %1295 }
 0x261   : > { %v12911_v48 = vpop.f32.mrf.mxu0  ;;  %v13008_v61 = vpop.xlane.xlu1 %1298 }
 0x262   : > { %16011 = vst [vmem:[#allocation48_spill] sm:$0xff] %v12911_v48  ;;  %1558 = vrot.lane.b32.xlu0 %v12911_v48, %s12017_s10  ;;  %v13011_v6 = vpop.xlane.xlu0 %1259 }
 0x263   : > { %v12915_v46 = vpop.f32.mrf.mxu0 }
 0x264   : > { %16012 = vst [vmem:[#allocation49_spill] sm:$0xff] %v12915_v46  ;;  %1556 = vrot.lane.b32.xlu1 %v12915_v46, %s12017_s10  ;;  %10747 = vmatprep.mubr.msk.f32.mxu1 %vm1763_vm1, %v12915_v46 }
 0x265   : > { %v13013_v53 = vpop.xlane.xlu1 %1262 }
 0x266   : > { %v13017_v0 = vpop.xlane.xlu0 %1301 }
 0x269   : > { %v12921_v35 = vpop.f32.mrf.mxu0  ;;  %v13019_v11 = vpop.xlane.xlu1 %1304 }
 0x26a   : > { %16013 = vst [vmem:[#allocation50_spill] sm:$0xff] %v12921_v35  ;;  %1851 = vrot.lane.b32.xlu1 %v12921_v35, %s12017_s10  ;;  %v13023_v45 = vpop.xlane.xlu0 %1265 }
 0x26b   : > { %v12925_v59 = vpop.f32.mrf.mxu0 }
 0x26c   : > { %16014 = vst [vmem:[#allocation51_spill] sm:$0xff] %v12925_v59 }
 0x26d   : > { %v13027_v24 = vpop.xlane.xlu1 %1268 }
 0x26e   : > { %1849 = vrot.lane.b32.xlu1 %v12925_v59, %s12017_s10  ;;  %v13035_v29 = vpop.xlane.xlu0 %1307 }
 0x26f   : > { %16033 = vst [vmem:[#allocation70_spill] sm:$0xff] %v13035_v29 }
 0x271   : > { %v12929_v13 = vpop.f32.mrf.mxu0  ;;  %v13039_v56 = vpop.xlane.xlu1 %1310 }
 0x272   : > { %16015 = vst [vmem:[#allocation52_spill] sm:$0xff] %v12929_v13  ;;  %1940 = vrot.lane.b32.xlu0 %v12929_v13, %s12017_s10  ;;  %v13047_v8 = vpop.xlane.xlu0 %1271 }
 0x273   : > { %v12933_v42 = vpop.f32.mrf.mxu0 }
 0x274   : > { %16016 = vst [vmem:[#allocation53_spill] sm:$0xff] %v12933_v42  ;;  %1938 = vrot.lane.b32.xlu1 %v12933_v42, %s12017_s10 }
 0x275   : > { %v13053_v38 = vpop.xlane.xlu1 %1274 }
 0x276   : > { %v12937_v60 = vpop.f32.mrf.mxu0  ;;  %v13061_v39 = vpop.xlane.xlu0 %1313 }
 0x277   : > { %16017 = vst [vmem:[#allocation54_spill] sm:$0xff] %v12937_v60  ;;  %2029 = vrot.lane.b32.xlu0 %v12937_v60, %s12017_s10  ;;  %16037 = vst [vmem:[#allocation74_spill] sm:$0xff] %v13061_v39 }
 0x278   : > { %v12941_v28 = vpop.f32.mrf.mxu0 }
 0x279   : > { %16018 = vst [vmem:[#allocation55_spill] sm:$0xff] %v12941_v28  ;;  %2027 = vrot.lane.b32.xlu1 %v12941_v28, %s12017_s10  ;;  %v13065_v22 = vpop.xlane.xlu1 %1316 }
 0x27a   : > { %v12945_v49 = vpop.f32.mrf.mxu0  ;;  %v13073_v36 = vpop.xlane.xlu0 %1277 }
 0x27b   : > { %16019 = vst [vmem:[#allocation56_spill] sm:$0xff] %v12945_v49  ;;  %2118 = vrot.lane.b32.xlu0 %v12945_v49, %s12017_s10 }
 0x27c   : > { %v12951_v37 = vpop.f32.mrf.mxu0 }
 0x27d   : > { %16020 = vst [vmem:[#allocation57_spill] sm:$0xff] %v12951_v37  ;;  %2116 = vrot.lane.b32.xlu1 %v12951_v37, %s12017_s10  ;;  %v13079_v23 = vpop.xlane.xlu1 %1280 }
 0x27e   : > { %v12955_v2 = vpop.f32.mrf.mxu0 }
 0x27f   : > { %16021 = vst [vmem:[#allocation58_spill] sm:$0xff] %v12955_v2  ;;  %2207 = vrot.lane.b32.xlu0 %v12955_v2, %s12017_s10 }
 0x280   : > { %v12961_v32 = vpop.f32.mrf.mxu0 }
 0x281   : > { %16022 = vst [vmem:[#allocation59_spill] sm:$0xff] %v12961_v32  ;;  %2205 = vrot.lane.b32.xlu1 %v12961_v32, %s12017_s10 }
 0x282   : > { %v12965_v7 = vpop.f32.mrf.mxu0 }
 0x283   : > { %16023 = vst [vmem:[#allocation60_spill] sm:$0xff] %v12965_v7  ;;  %2296 = vrot.lane.b32.xlu0 %v12965_v7, %s12017_s10 }
 0x284   : > { %v12969_v17 = vpop.f32.mrf.mxu0 }
 0x285   : > { %16024 = vst [vmem:[#allocation61_spill] sm:$0xff] %v12969_v17 }
 0x286   : > { %v12973_v10 = vpop.f32.mrf.mxu0 }
 0x287   : > { %16025 = vst [vmem:[#allocation62_spill] sm:$0xff] %v12973_v10 }
 0x288   : > { %v12975_v30 = vpop.f32.mrf.mxu0 }
 0x289   : > { %16026 = vst [vmem:[#allocation63_spill] sm:$0xff] %v12975_v30 }
 0x28a   : > { %v12979_v63 = vpop.f32.mrf.mxu0 }
 0x28b   : > { %16027 = vst [vmem:[#allocation64_spill] sm:$0xff] %v12979_v63 }
 0x28c   : > { %v12983_v18 = vpop.f32.mrf.mxu0 }
 0x28d   : > { %16028 = vst [vmem:[#allocation65_spill] sm:$0xff] %v12983_v18  ;;  %10803 = vmatprep.mubr.msk.f32.mxu0 %vm1763_vm1, %v12983_v18 }
 0x28e   : > { %v13015_v3 = vpop.f32.mrf.mxu0 }
 0x28f   : > { %16029 = vst [vmem:[#allocation66_spill] sm:$0xff] %v13015_v3 }
 0x290   : > { %v13021_v4 = vpop.f32.mrf.mxu0 }
 0x291   : > { %16030 = vst [vmem:[#allocation67_spill] sm:$0xff] %v13021_v4 }
 0x2a2   : > { %1325 = vadd.xlane.f32.xlu0 %v1324_v58  ;;  %v13025_v58 = vpop.f32.mrf.mxu0 }
 0x2a3   : > { %16031 = vst [vmem:[#allocation68_spill] sm:$0xff] %v13025_v58 }
 0x2a5   : > { %1328 = vadd.xlane.f32.xlu1 %v1327_v1  ;;  %v13033_v1 = vpop.f32.mrf.mxu0 }
 0x2a6   : > { %16032 = vst [vmem:[#allocation69_spill] sm:$0xff] %v13033_v1 }
 0x2a7   : > { %v13043_v26 = vpop.f32.mrf.mxu0 }
 0x2a8   : > { %16034 = vst [vmem:[#allocation71_spill] sm:$0xff] %v13043_v26 }
 0x2a9   : > { %v13051_v47 = vpop.f32.mrf.mxu0 }
 0x2aa   : > { %16035 = vst [vmem:[#allocation72_spill] sm:$0xff] %v13051_v47 }
 0x2ab   : > { %v13059_v54 = vpop.f32.mrf.mxu0 }
 0x2ac   : > { %16036 = vst [vmem:[#allocation73_spill] sm:$0xff] %v13059_v54 }
 0x2ad   : > { %v13069_v19 = vpop.f32.mrf.mxu0 }
 0x2ae   : > { %16038 = vst [vmem:[#allocation75_spill] sm:$0xff] %v13069_v19 }
 0x2af   : > { %v13077_v62 = vpop.f32.mrf.mxu0 }
 0x2b0   : > { %16039 = vst [vmem:[#allocation76_spill] sm:$0xff] %v13077_v62 }
 0x2b1   : > { %v13087_v50 = vpop.f32.mrf.mxu0 }
 0x2b2   : > { %16041 = vst [vmem:[#allocation78_spill] sm:$0xff] %v13087_v50 }
 0x2b6   : > { %2294 = vrot.lane.b32.xlu1 %v12969_v17, %s12017_s10 }
 0x2b8   : > { %2385 = vrot.lane.b32.xlu0 %v12973_v10, %s12017_s10 }
 0x2ba   : > { %2383 = vrot.lane.b32.xlu1 %v12975_v30, %s12017_s10 }
 0x2bc   : > { %2474 = vrot.lane.b32.xlu0 %v12979_v63, %s12017_s10 }
 0x2be   : > { %2472 = vrot.lane.b32.xlu1 %v12983_v18, %s12017_s10  ;;  %v13083_v43 = vpop.xlane.xlu0 %1319 }
 0x2bf   : > { %16040 = vst [vmem:[#allocation77_spill] sm:$0xff] %v13083_v43 }
 0x2c0   : > { %2563 = vrot.lane.b32.xlu0 %v13015_v3, %s12017_s10 }
 0x2c2   : > { %2561 = vrot.lane.b32.xlu1 %v13021_v4, %s12017_s10  ;;  %v13089_v57 = vpop.xlane.xlu1 %1322 }
 0x2c3   : > { %16042 = vst [vmem:[#allocation79_spill] sm:$0xff] %v13089_v57 }
 0x2c4   : > { %2652 = vrot.lane.b32.xlu0 %v13025_v58, %s12017_s10 }
 0x2c6   : > { %2650 = vrot.lane.b32.xlu1 %v13033_v1, %s12017_s10 }
 0x2c8   : > { %2741 = vrot.lane.b32.xlu0 %v13043_v26, %s12017_s10 }
 0x2ca   : > { %2739 = vrot.lane.b32.xlu1 %v13051_v47, %s12017_s10 }
 0x2cc   : > { %2830 = vrot.lane.b32.xlu0 %v13059_v54, %s12017_s10 }
 0x2ce   : > { %2828 = vrot.lane.b32.xlu1 %v13069_v19, %s12017_s10 }
 0x2d0   : > { %2919 = vrot.lane.b32.xlu0 %v13077_v62, %s12017_s10 }
 0x2d2   : > { %2917 = vrot.lane.b32.xlu1 %v13087_v50, %s12017_s10 }
 0x2d4   : > { %v1559_v44 = vpop.permute.xlu0 %1558 }
 0x2d5   : > { %10743 = vmatprep.subr.msk.mxu1 %vm1763_vm1, %v1559_v44 }
 0x2d6   : > { %v1557_v27 = vpop.permute.xlu1 %1556  ;;  %10744 = vmatpush3.xpose.msk.msra.mxu1 %vm1763_vm1, %v1559_v44 }
 0x2d7   : > { %10745 = vmatprep.subr.msk.mxu1 %vm1763_vm1, %v1557_v27 }
 0x2da   : > { %10746 = vmatpush3.xpose.msk.msra.mxu1 %vm1763_vm1, %v1557_v27 }
 0x2dc   : > { %v1852_v40 = vpop.permute.xlu1 %1851 }
 0x2dd   : > { %10748 = vmatmul.mubr.msk.f32.vlgmr.msra.gmra.mxu1 %vm1763_vm1, %v12911_v48  ;;  %10750 = vmatprep.subr.msk.mxu1 %vm1763_vm1, %v1852_v40 }
 0x2de   : > { %10751 = vmatpush3.xpose.msk.msra.mxu1 %vm1763_vm1, %v1852_v40  ;;  %10754 = vmatprep.mubr.msk.f32.mxu1 %vm1763_vm1, %v12925_v59 }
 0x2e0   : > { %v1850_v51 = vpop.permute.xlu1 %1849 }
 0x2e1   : > { %10752 = vmatprep.subr.msk.mxu1 %vm1763_vm1, %v1850_v51 }
 0x2e2   : > { %10753 = vmatpush3.xpose.msk.msra.mxu1 %vm1763_vm1, %v1850_v51 }
 0x2e4   : > { %v1941_v44 = vpop.permute.xlu0 %1940 }
 0x2e5   : > { %10755 = vmatmul.mubr.msk.f32.vlgmr.msra.gmra.mxu1 %vm1763_vm1, %v12921_v35  ;;  %10757 = vmatprep.subr.msk.mxu1 %vm1763_vm1, %v1941_v44 }
 0x2e6   : > { %v1939_v27 = vpop.permute.xlu1 %1938  ;;  %10758 = vmatpush3.xpose.msk.msra.mxu1 %vm1763_vm1, %v1941_v44  ;;  %10761 = vmatprep.mubr.msk.f32.mxu1 %vm1763_vm1, %v12933_v42 }
 0x2e7   : > { %10759 = vmatprep.subr.msk.mxu1 %vm1763_vm1, %v1939_v27 }
 0x2e9   : > { %v2030_v40 = vpop.permute.xlu0 %2029 }
 0x2ea   : > { %10760 = vmatpush3.xpose.msk.msra.mxu1 %vm1763_vm1, %v1939_v27 }
 0x2eb   : > { %10764 = vmatprep.subr.msk.mxu1 %vm1763_vm1, %v2030_v40  ;;  %v2028_v51 = vpop.permute.xlu1 %2027 }
 0x2ed   : > { %10762 = vmatmul.mubr.msk.f32.vlgmr.msra.gmra.mxu1 %vm1763_vm1, %v12929_v13  ;;  %v2119_v44 = vpop.permute.xlu0 %2118 }
 0x2ee   : > { %10765 = vmatpush3.xpose.msk.msra.mxu1 %vm1763_vm1, %v2030_v40  ;;  %10768 = vmatprep.mubr.msk.f32.mxu1 %vm1763_vm1, %v12941_v28 }
 0x2ef   : > { %10766 = vmatprep.subr.msk.mxu1 %vm1763_vm1, %v2028_v51  ;;  %v2117_v27 = vpop.permute.xlu1 %2116 }
 0x2f2   : > { %10767 = vmatpush3.xpose.msk.msra.mxu1 %vm1763_vm1, %v2028_v51  ;;  %v2208_v51 = vpop.permute.xlu0 %2207 }
 0x2f3   : > { %10771 = vmatprep.subr.msk.mxu1 %vm1763_vm1, %v2119_v44 }
 0x2f5   : > { %10769 = vmatmul.mubr.msk.f32.vlgmr.msra.gmra.mxu1 %vm1763_vm1, %v12937_v60 }
 0x2f6   : > { %v13124_v16 = vpop.f32.mrf.mxu0  ;;  %10772 = vmatpush3.xpose.msk.msra.mxu1 %vm1763_vm1, %v2119_v44  ;;  %10775 = vmatprep.mubr.msk.f32.mxu1 %vm1763_vm1, %v12951_v37  ;;  %v2206_v44 = vpop.permute.xlu1 %2205 }
 0x2f7   : > { %16043 = vst [vmem:[#allocation80_spill] sm:$0xff] %v13124_v16  ;;  %3008 = vrot.lane.b32.xlu0 %v13124_v16, %s12017_s10  ;;  %10773 = vmatprep.subr.msk.mxu1 %vm1763_vm1, %v2117_v27 }
 0x2f8   : > { %v13132_v40 = vpop.f32.mrf.mxu0 }
 0x2f9   : > { %16044 = vst [vmem:[#allocation81_spill] sm:$0xff] %v13132_v40  ;;  %3006 = vrot.lane.b32.xlu1 %v13132_v40, %s12017_s10 }
 0x2fa   : > { %10774 = vmatpush3.xpose.msk.msra.mxu1 %vm1763_vm1, %v2117_v27  ;;  %v2297_v27 = vpop.permute.xlu0 %2296 }
 0x2fb   : > { %10778 = vmatprep.subr.msk.mxu1 %vm1763_vm1, %v2208_v51 }
 0x2fd   : > { %3470 = vrot.lane.b32.xlu1 %v12915_v46, %s12018_s20  ;;  %10776 = vmatmul.mubr.msk.f32.vlgmr.msra.gmra.mxu1 %vm1763_vm1, %v12945_v49 }
 0x2fe   : > { %v13142_v33 = vpop.f32.mrf.mxu0  ;;  %10779 = vmatpush3.xpose.msk.msra.mxu1 %vm1763_vm1, %v2208_v51  ;;  %10782 = vmatprep.mubr.msk.f32.mxu1 %vm1763_vm1, %v12961_v32 }
 0x2ff   : > { %16045 = vst [vmem:[#allocation82_spill] sm:$0xff] %v13142_v33  ;;  %3097 = vrot.lane.b32.xlu0 %v13142_v33, %s12017_s10  ;;  %10780 = vmatprep.subr.msk.mxu1 %vm1763_vm1, %v2206_v44 }
 0x301   : > { %3646 = vrot.lane.b32.xlu1 %v12929_v13, %s12018_s20 }
 0x302   : > { %10781 = vmatpush3.xpose.msk.msra.mxu1 %vm1763_vm1, %v2206_v44 }
 0x303   : > { %3472 = vrot.lane.b32.xlu0 %v12911_v48, %s12018_s20  ;;  %10785 = vmatprep.subr.msk.mxu1 %vm1763_vm1, %v2297_v27 }
 0x305   : > { %3557 = vrot.lane.b32.xlu1 %v12925_v59, %s12018_s20  ;;  %10783 = vmatmul.mubr.msk.f32.vlgmr.msra.gmra.mxu1 %vm1763_vm1, %v12955_v2 }
 0x306   : > { %10786 = vmatpush3.xpose.msk.msra.mxu1 %vm1763_vm1, %v2297_v27  ;;  %10789 = vmatprep.mubr.msk.f32.mxu1 %vm1763_vm1, %v12969_v17 }
 0x307   : > { %3559 = vrot.lane.b32.xlu0 %v12921_v35, %s12018_s20 }
 0x309   : > { %3644 = vrot.lane.b32.xlu1 %v12933_v42, %s12018_s20 }
 0x30b   : > { %3733 = vrot.lane.b32.xlu0 %v12937_v60, %s12018_s20 }
 0x30d   : > { %3820 = vrot.lane.b32.xlu1 %v12945_v49, %s12018_s20 }
 0x30f   : > { %3731 = vrot.lane.b32.xlu0 %v12941_v28, %s12018_s20 }
 0x311   : > { %3994 = vrot.lane.b32.xlu1 %v12965_v7, %s12018_s20 }
 0x313   : > { %3818 = vrot.lane.b32.xlu0 %v12951_v37, %s12018_s20 }
 0x315   : > { %3992 = vrot.lane.b32.xlu1 %v12969_v17, %s12018_s20 }
 0x317   : > { %3907 = vrot.lane.b32.xlu0 %v12955_v2, %s12018_s20 }
 0x319   : > { %4168 = vrot.lane.b32.xlu1 %v12979_v63, %s12018_s20 }
 0x31b   : > { %3905 = vrot.lane.b32.xlu0 %v12961_v32, %s12018_s20 }
 0x31d   : > { %4166 = vrot.lane.b32.xlu1 %v12983_v18, %s12018_s20 }
 0x31f   : > { %4081 = vrot.lane.b32.xlu0 %v12973_v10, %s12018_s20 }
 0x321   : > { %4342 = vrot.lane.b32.xlu1 %v13025_v58, %s12018_s20 }
 0x323   : > { %4079 = vrot.lane.b32.xlu0 %v12975_v30, %s12018_s20 }
 0x325   : > { %4340 = vrot.lane.b32.xlu1 %v13033_v1, %s12018_s20 }
 0x327   : > { %4255 = vrot.lane.b32.xlu0 %v13015_v3, %s12018_s20 }
 0x329   : > { %4516 = vrot.lane.b32.xlu1 %v13059_v54, %s12018_s20 }
 0x32b   : > { %v13199_v51 = vpop.xlane.xlu0 %1325  ;;  %4253 = vrot.lane.b32.xlu0 %v13021_v4, %s12018_s20 }
 0x32c   : > { %16046 = vst [vmem:[#allocation83_spill] sm:$0xff] %v13199_v51  ;;  %v13216_v51 = vpop.f32.mrf.mxu0 }
 0x32d   : > { %4514 = vrot.lane.b32.xlu1 %v13069_v19, %s12018_s20  ;;  %16048 = vst [vmem:[#allocation85_spill] sm:$0xff] %v13216_v51 }
 0x32e   : > { %v13205_v44 = vpop.xlane.xlu1 %1328 }
 0x32f   : > { %16047 = vst [vmem:[#allocation84_spill] sm:$0xff] %v13205_v44  ;;  %v2386_v27 = vpop.permute.xlu0 %2385  ;;  %4429 = vrot.lane.b32.xlu0 %v13043_v26, %s12018_s20 }
 0x331   : > { %4690 = vrot.lane.b32.xlu1 %v13124_v16, %s12018_s20 }
 0x332   : > { %v2295_v43 = vpop.permute.xlu1 %2294 }
 0x333   : > { %10787 = vmatprep.subr.msk.mxu1 %vm1763_vm1, %v2295_v43  ;;  %v2475_v39 = vpop.permute.xlu0 %2474  ;;  %4427 = vrot.lane.b32.xlu0 %v13051_v47, %s12018_s20 }
 0x334   : > { %10788 = vmatpush3.xpose.msk.msra.mxu1 %vm1763_vm1, %v2295_v43  ;;  %10799 = vmatprep.subr.msk.mxu0 %vm1763_vm1, %v2475_v39 }
 0x335   : > { %10792 = vmatprep.subr.msk.mxu1 %vm1763_vm1, %v2386_v27  ;;  %10800 = vmatpush3.xpose.msk.msra.mxu0 %vm1763_vm1, %v2475_v39 }
 0x336   : > { %v2384_v44 = vpop.permute.xlu1 %2383  ;;  %3095 = vrot.lane.b32.xlu1 %v13216_v51, %s12017_s10 }
 0x337   : > { %10790 = vmatmul.mubr.msk.f32.vlgmr.msra.gmra.mxu1 %vm1763_vm1, %v12965_v7  ;;  %v2564_v57 = vpop.permute.xlu0 %2563  ;;  %4603 = vrot.lane.b32.xlu0 %v13077_v62, %s12018_s20 }
 0x338   : > { %10793 = vmatpush3.xpose.msk.msra.mxu1 %vm1763_vm1, %v2386_v27  ;;  %10796 = vmatprep.mubr.msk.f32.mxu1 %vm1763_vm1, %v12975_v30 }
 0x339   : > { %10794 = vmatprep.subr.msk.mxu1 %vm1763_vm1, %v2384_v44 }
 0x33a   : > { %v2473_v43 = vpop.permute.xlu1 %2472  ;;  %4688 = vrot.lane.b32.xlu1 %v13132_v40, %s12018_s20 }
 0x33b   : > { %10801 = vmatprep.subr.msk.mxu0 %vm1763_vm1, %v2473_v43  ;;  %v2653_v39 = vpop.permute.xlu0 %2652  ;;  %4601 = vrot.lane.b32.xlu0 %v13087_v50, %s12018_s20 }
 0x33c   : > { %10795 = vmatpush3.xpose.msk.msra.mxu1 %vm1763_vm1, %v2384_v44  ;;  %10802 = vmatpush3.xpose.msk.msra.mxu0 %vm1763_vm1, %v2473_v43 }
 0x33d   : > { %10806 = vmatprep.subr.msk.mxu1 %vm1763_vm1, %v2564_v57  ;;  %10813 = vmatprep.subr.msk.mxu0 %vm1763_vm1, %v2653_v39 }
 0x33e   : > { %v2562_v27 = vpop.permute.xlu1 %2561  ;;  %5453 = vrot.lane.b32.xlu1 %v12911_v48, %s12019_s30 }
 0x33f   : > { %10797 = vmatmul.mubr.msk.f32.vlgmr.msra.gmra.mxu1 %vm1763_vm1, %v12973_v10  ;;  %10804 = vmatmul.mubr.msk.f32.vlgmr.msra.gmra.mxu0 %vm1763_vm1, %v12979_v63  ;;  %v2742_v29 = vpop.permute.xlu0 %2741 }
 0x340   : > { %4777 = vrot.lane.b32.xlu0 %v13142_v33, %s12018_s20  ;;  %10807 = vmatpush3.xpose.msk.msra.mxu1 %vm1763_vm1, %v2564_v57 }
 0x341   : > { %10810 = vmatprep.mubr.msk.f32.mxu1 %vm1763_vm1, %v13021_v4  ;;  %10814 = vmatpush3.xpose.msk.msra.mxu0 %vm1763_vm1, %v2653_v39 }
 0x342   : > { %10817 = vmatprep.mubr.msk.f32.mxu0 %vm1763_vm1, %v13033_v1  ;;  %10808 = vmatprep.subr.msk.mxu1 %vm1763_vm1, %v2562_v27  ;;  %v2651_v44 = vpop.permute.xlu1 %2650 }
 0x343   : > { %5451 = vrot.lane.b32.xlu1 %v12915_v46, %s12019_s30  ;;  %10815 = vmatprep.subr.msk.mxu0 %vm1763_vm1, %v2651_v44  ;;  %v2831_v43 = vpop.permute.xlu0 %2830 }
 0x344   : > { %5738 = vrot.lane.b32.xlu0 %v12921_v35, %s12019_s30  ;;  %10809 = vmatpush3.xpose.msk.msra.mxu1 %vm1763_vm1, %v2562_v27 }
 0x345   : > { %10816 = vmatpush3.xpose.msk.msra.mxu0 %vm1763_vm1, %v2651_v44  ;;  %10820 = vmatprep.subr.msk.mxu1 %vm1763_vm1, %v2742_v29 }
 0x346   : > { %10827 = vmatprep.subr.msk.mxu0 %vm1763_vm1, %v2831_v43  ;;  %v2740_v57 = vpop.permute.xlu1 %2739 }
 0x347   : > { %5447 = vrot.lane.b32.xlu1 %v12915_v46, %s12020_s15  ;;  %10811 = vmatmul.mubr.msk.f32.vlgmr.msra.gmra.mxu1 %vm1763_vm1, %v13015_v3 }
 0x348   : > { %10818 = vmatmul.mubr.msk.f32.vlgmr.msra.gmra.mxu0 %vm1763_vm1, %v13025_v58  ;;  %5449 = vrot.lane.b32.xlu0 %v12911_v48, %s12020_s15 }
 0x349   : > { %10821 = vmatpush3.xpose.msk.msra.mxu1 %vm1763_vm1, %v2742_v29  ;;  %10824 = vmatprep.mubr.msk.f32.mxu1 %vm1763_vm1, %v13051_v47  ;;  %v2920_v29 = vpop.permute.xlu0 %2919 }
 0x34a   : > { %10828 = vmatpush3.xpose.msk.msra.mxu0 %vm1763_vm1, %v2831_v43  ;;  %10831 = vmatprep.mubr.msk.f32.mxu0 %vm1763_vm1, %v13069_v19  ;;  %v2829_v39 = vpop.permute.xlu1 %2828 }
 0x34b   : > { %10822 = vmatprep.subr.msk.mxu1 %vm1763_vm1, %v2740_v57  ;;  %5736 = vrot.lane.b32.xlu1 %v12925_v59, %s12019_s30 }
 0x34c   : > { %10829 = vmatprep.subr.msk.mxu0 %vm1763_vm1, %v2829_v39  ;;  %5831 = vrot.lane.b32.xlu0 %v12929_v13, %s12019_s30 }
 0x34d   : > { %10823 = vmatpush3.xpose.msk.msra.mxu1 %vm1763_vm1, %v2740_v57 }
 0x34e   : > { %10830 = vmatpush3.xpose.msk.msra.mxu0 %vm1763_vm1, %v2829_v39  ;;  %10834 = vmatprep.subr.msk.mxu1 %vm1763_vm1, %v2920_v29  ;;  %v2918_v27 = vpop.permute.xlu1 %2917 }
 0x34f   : > { %5732 = vrot.lane.b32.xlu1 %v12925_v59, %s12020_s15 }
 0x350   : > { %10825 = vmatmul.mubr.msk.f32.vlgmr.msra.gmra.mxu1 %vm1763_vm1, %v13043_v26  ;;  %5734 = vrot.lane.b32.xlu0 %v12921_v35, %s12020_s15 }
 0x351   : > { %10832 = vmatmul.mubr.msk.f32.vlgmr.msra.gmra.mxu0 %vm1763_vm1, %v13059_v54  ;;  %10835 = vmatpush3.xpose.msk.msra.mxu1 %vm1763_vm1, %v2920_v29 }
 0x352   : > { %10838 = vmatprep.mubr.msk.f32.mxu1 %vm1763_vm1, %v13087_v50  ;;  %10845 = vmatprep.mubr.msk.f32.mxu0 %vm1763_vm1, %v13132_v40 }
 0x353   : > { %10836 = vmatprep.subr.msk.mxu1 %vm1763_vm1, %v2918_v27  ;;  %5829 = vrot.lane.b32.xlu1 %v12933_v42, %s12019_s30 }
 0x354   : > { %5924 = vrot.lane.b32.xlu0 %v12937_v60, %s12019_s30 }
 0x355   : > { %10837 = vmatpush3.xpose.msk.msra.mxu1 %vm1763_vm1, %v2918_v27 }
 0x357   : > { %5825 = vrot.lane.b32.xlu1 %v12933_v42, %s12020_s15 }
 0x358   : > { %10839 = vmatmul.mubr.msk.f32.vlgmr.msra.gmra.mxu1 %vm1763_vm1, %v13077_v62  ;;  %5827 = vrot.lane.b32.xlu0 %v12929_v13, %s12020_s15 }
 0x359   : > { %10852 = vmatprep.mubr.msk.f32.mxu1 %vm1763_vm1, %v13216_v51 }
 0x35b   : > { %5922 = vrot.lane.b32.xlu1 %v12941_v28, %s12019_s30 }
 0x35c   : > { %6017 = vrot.lane.b32.xlu0 %v12945_v49, %s12019_s30 }
 0x35f   : > { %5918 = vrot.lane.b32.xlu1 %v12941_v28, %s12020_s15 }
 0x360   : > { %5920 = vrot.lane.b32.xlu0 %v12937_v60, %s12020_s15 }
 0x363   : > { %6015 = vrot.lane.b32.xlu1 %v12951_v37, %s12019_s30 }
 0x364   : > { %6110 = vrot.lane.b32.xlu0 %v12955_v2, %s12019_s30 }
 0x367   : > { %6011 = vrot.lane.b32.xlu1 %v12951_v37, %s12020_s15 }
 0x368   : > { %6013 = vrot.lane.b32.xlu0 %v12945_v49, %s12020_s15 }
 0x369   : > { %v3009_v44 = vpop.permute.xlu0 %3008 }
 0x36a   : > { %10841 = vmatprep.subr.msk.mxu0 %vm1763_vm1, %v3009_v44 }
 0x36b   : > { %6108 = vrot.lane.b32.xlu1 %v12961_v32, %s12019_s30  ;;  %v3007_v43 = vpop.permute.xlu1 %3006  ;;  %10842 = vmatpush3.xpose.msk.msra.mxu0 %vm1763_vm1, %v3009_v44 }
 0x36c   : > { %6203 = vrot.lane.b32.xlu0 %v12965_v7, %s12019_s30  ;;  %10843 = vmatprep.subr.msk.mxu0 %vm1763_vm1, %v3007_v43 }
 0x36f   : > { %6104 = vrot.lane.b32.xlu1 %v12961_v32, %s12020_s15  ;;  %v3471_v57 = vpop.permute.xlu1 %3470  ;;  %10844 = vmatpush3.xpose.msk.msra.mxu0 %vm1763_vm1, %v3007_v43 }
 0x370   : > { %6106 = vrot.lane.b32.xlu0 %v12955_v2, %s12020_s15 }
 0x371   : > { %v3098_v39 = vpop.permute.xlu0 %3097 }
 0x372   : > { %10846 = vmatmul.mubr.msk.f32.vlgmr.msra.gmra.mxu0 %vm1763_vm1, %v13124_v16  ;;  %10848 = vmatprep.subr.msk.mxu1 %vm1763_vm1, %v3098_v39 }
 0x373   : > { %6201 = vrot.lane.b32.xlu1 %v12969_v17, %s12019_s30  ;;  %v13346_v29 = vpop.permute.xlu1 %3646  ;;  %10849 = vmatpush3.xpose.msk.msra.mxu1 %vm1763_vm1, %v3098_v39 }
 0x374   : > { %6296 = vrot.lane.b32.xlu0 %v12973_v10, %s12019_s30 }
 0x375   : > { %v3473_v27 = vpop.permute.xlu0 %3472 }
 0x376   : > { %10855 = vmatprep.subr.mxu0 %v3473_v27 }
 0x377   : > { %6197 = vrot.lane.b32.xlu1 %v12969_v17, %s12020_s15  ;;  %v13353_v44 = vpop.permute.xlu1 %3557  ;;  %10856 = vmatpush3.msra.mxu0 %v3473_v27 }
 0x378   : > { %6199 = vrot.lane.b32.xlu0 %v12965_v7, %s12020_s15  ;;  %10857 = vmatprep.subr.mxu0 %v3471_v57 }
 0x379   : > { %10858 = vmatpush3.msra.mxu0 %v3471_v57  ;;  %v3560_v43 = vpop.permute.xlu0 %3559 }
 0x37a   : > { %10869 = vmatprep.subr.mxu0 %v13346_v29 }
 0x37b   : > { %6294 = vrot.lane.b32.xlu1 %v12975_v30, %s12019_s30  ;;  %v13360_v39 = vpop.permute.xlu1 %3644 }
 0x37c   : > { %6389 = vrot.lane.b32.xlu0 %v12979_v63, %s12019_s30 }
 0x37d   : > { %v13364_v17 = vpop.permute.xlu0 %3733 }
 0x37f   : > { %6290 = vrot.lane.b32.xlu1 %v12975_v30, %s12020_s15  ;;  %v13368_v27 = vpop.permute.xlu1 %3820 }
 0x380   : > { %6292 = vrot.lane.b32.xlu0 %v12973_v10, %s12020_s15 }
 0x381   : > { %v13372_v57 = vpop.permute.xlu0 %3731 }
 0x383   : > { %6387 = vrot.lane.b32.xlu1 %v12983_v18, %s12019_s30  ;;  %v13376_v32 = vpop.permute.xlu1 %3994 }
 0x384   : > { %6482 = vrot.lane.b32.xlu0 %v13015_v3, %s12019_s30 }
 0x385   : > { %v13380_v37 = vpop.permute.xlu0 %3818 }
 0x387   : > { %6383 = vrot.lane.b32.xlu1 %v12983_v18, %s12020_s15  ;;  %v13384_v30 = vpop.permute.xlu1 %3992 }
 0x388   : > { %6385 = vrot.lane.b32.xlu0 %v12979_v63, %s12020_s15 }
 0x389   : > { %v13388_v28 = vpop.permute.xlu0 %3907 }
 0x38b   : > { %6480 = vrot.lane.b32.xlu1 %v13021_v4, %s12019_s30  ;;  %v13392_v42 = vpop.permute.xlu1 %4168 }
 0x38c   : > { %6575 = vrot.lane.b32.xlu0 %v13025_v58, %s12019_s30 }
 0x38d   : > { %v13396_v10 = vpop.permute.xlu0 %3905 }
 0x38f   : > { %6476 = vrot.lane.b32.xlu1 %v13021_v4, %s12020_s15  ;;  %v13400_v18 = vpop.permute.xlu1 %4166 }
 0x390   : > { %16049 = vst [vmem:[#allocation86_spill] sm:$0xff] %v13400_v18  ;;  %6478 = vrot.lane.b32.xlu0 %v13015_v3, %s12020_s15 }
 0x391   : > { %v13404_v63 = vpop.permute.xlu0 %4081 }
 0x393   : > { %6573 = vrot.lane.b32.xlu1 %v13033_v1, %s12019_s30  ;;  %v13408_v59 = vpop.permute.xlu1 %4342 }
 0x394   : > { %16050 = vst [vmem:[#allocation87_spill] sm:$0xff] %v13408_v59  ;;  %6668 = vrot.lane.b32.xlu0 %v13043_v26, %s12019_s30 }
 0x395   : > { %v13412_v7 = vpop.permute.xlu0 %4079 }
 0x397   : > { %6569 = vrot.lane.b32.xlu1 %v13033_v1, %s12020_s15  ;;  %v13416_v4 = vpop.permute.xlu1 %4340 }
 0x398   : > { %16051 = vst [vmem:[#allocation88_spill] sm:$0xff] %v13416_v4  ;;  %6571 = vrot.lane.b32.xlu0 %v13025_v58, %s12020_s15 }
 0x399   : > { %v13420_v3 = vpop.permute.xlu0 %4255 }
 0x39b   : > { %6666 = vrot.lane.b32.xlu1 %v13051_v47, %s12019_s30  ;;  %v13424_v35 = vpop.permute.xlu1 %4516 }
 0x39c   : > { %16052 = vst [vmem:[#allocation89_spill] sm:$0xff] %v13424_v35  ;;  %6761 = vrot.lane.b32.xlu0 %v13059_v54, %s12019_s30 }
 0x39d   : > { %v13428_v2 = vpop.permute.xlu0 %4253 }
 0x39f   : > { %6662 = vrot.lane.b32.xlu1 %v13051_v47, %s12020_s15  ;;  %v13432_v1 = vpop.permute.xlu1 %4514 }
 0x3a0   : > { %16053 = vst [vmem:[#allocation90_spill] sm:$0xff] %v13432_v1  ;;  %6664 = vrot.lane.b32.xlu0 %v13043_v26, %s12020_s15 }
 0x3a1   : > { %v13436_v58 = vpop.permute.xlu0 %4429 }
 0x3a3   : > { %6759 = vrot.lane.b32.xlu1 %v13069_v19, %s12019_s30  ;;  %v13440_v48 = vpop.permute.xlu1 %4690 }
 0x3a4   : > { %16054 = vst [vmem:[#allocation91_spill] sm:$0xff] %v13440_v48  ;;  %6854 = vrot.lane.b32.xlu0 %v13077_v62, %s12019_s30 }
 0x3a5   : > { %v13444_v49 = vpop.permute.xlu0 %4427 }
 0x3a7   : > { %6755 = vrot.lane.b32.xlu1 %v13069_v19, %s12020_s15 }
 0x3a8   : > { %v3096_v47 = vpop.permute.xlu1 %3095  ;;  %6757 = vrot.lane.b32.xlu0 %v13059_v54, %s12020_s15 }
 0x3a9   : > { %10850 = vmatprep.subr.msk.mxu1 %vm1763_vm1, %v3096_v47  ;;  %v13451_v26 = vpop.permute.xlu0 %4603 }
 0x3aa   : > { %10851 = vmatpush3.xpose.msk.msra.mxu1 %vm1763_vm1, %v3096_v47 }
 0x3ab   : > { %6852 = vrot.lane.b32.xlu1 %v13087_v50, %s12019_s30  ;;  %10862 = vmatprep.subr.mxu1 %v3560_v43 }
 0x3ac   : > { %v13456_v60 = vpop.permute.xlu1 %4688  ;;  %6947 = vrot.lane.b32.xlu0 %v13124_v16, %s12019_s30 }
 0x3ad   : > { %16055 = vst [vmem:[#allocation92_spill] sm:$0xff] %v13456_v60  ;;  %10853 = vmatmul.mubr.msk.f32.vlgmr.msra.gmra.mxu1 %vm1763_vm1, %v13142_v33  ;;  %v13462_v19 = vpop.permute.xlu0 %4601 }
 0x3ae   : > { %10863 = vmatpush3.msra.mxu1 %v3560_v43 }
 0x3af   : > { %6848 = vrot.lane.b32.xlu1 %v13087_v50, %s12020_s15  ;;  %10864 = vmatprep.subr.mxu1 %v13353_v44 }
 0x3b0   : > { %v13467_v47 = vpop.permute.xlu1 %5453  ;;  %6850 = vrot.lane.b32.xlu0 %v13077_v62, %s12020_s15  ;;  %10865 = vmatpush3.msra.mxu1 %v13353_v44  ;;  %v1592_v62 = vlaneseq }
 0x3b1   : > { %16056 = vst [vmem:[#allocation93_spill] sm:$0xff] %v13467_v47  ;;  %10876 = vmatprep.subr.mxu1 %v13364_v17 }
 0x3b2   : > { %v13473_v54 = vpop.permute.xlu0 %4777  ;;  %v1593_v46 = vand.u32 127, %v1592_v62 }
 0x3b3   : > { %6945 = vrot.lane.b32.xlu1 %v13132_v40, %s12019_s30 }
 0x3b4   : > { %7040 = vrot.lane.b32.xlu0 %v13142_v33, %s12019_s30 }
 0x3b5   : > { %v13479_v43 = vpop.permute.xlu1 %5451 }
 0x3b6   : > { %16057 = vst [vmem:[#allocation94_spill] sm:$0xff] %v13479_v43  ;;  %v13481_v50 = vpop.permute.xlu0 %5738 }
 0x3b7   : > { %16058 = vst [vmem:[#allocation95_spill] sm:$0xff] %v13481_v50  ;;  %6941 = vrot.lane.b32.xlu1 %v13132_v40, %s12020_s15  ;;  %v1598_v50 = vadd.s32 4294967288, %v1593_v46  ;;  %v1595_v40 = vshrl.u32 %v1592_v62, 7 }
 0x3b8   : > { %6943 = vrot.lane.b32.xlu0 %v13124_v16, %s12020_s15 }
 0x3b9   : > { %v13487_v44 = vpop.permute.xlu1 %5447  ;;  %v13499_v60 = vsub.s32 %v1598_v50, %v1595_v40 }
 0x3ba   : > { %16059 = vst [vmem:[#allocation96_spill] sm:$0xff] %v13487_v44  ;;  %v13489_v13 = vpop.permute.xlu0 %5449 }
 0x3bb   : > { %16060 = vst [vmem:[#allocation97_spill] sm:$0xff] %v13489_v13  ;;  %7038 = vrot.lane.b32.xlu1 %v13216_v51, %s12019_s30  ;;  %16063 = vst [vmem:[#allocation100_spill] sm:$0xff] %v13499_v60  ;;  %v13505_v13 = vsub.s32 %v1593_v46, %v1595_v40  ;;  %v1612_v48 = vrot.slane %v12971_v9, %v13499_v60  ;;  %v1621_v1 = vrot.slane %v12987_v34, %v13499_v60  ;;  %s12024_s30 = smov [#allocation11]  }
 0x3bc   : > { %4775 = vrot.lane.b32.xlu0 %v13216_v51, %s12018_s20  ;;  %s11937_s20 = scalar_lea.vmem %s15731_s29, 4096 }
 0x3bd   : > { %v13495_v43 = vpop.permute.xlu1 %5736  ;;  %16066 = vst [vmem:[#allocation103_spill] sm:$0xff] %v13505_v13  ;;  %v1608_v50 = vrot.slane %v12959_v14, %v13505_v13  ;;  %v1617_v46 = vrot.slane %v12981_v20, %v13505_v13  ;;  %v1597_v9 = vrot.slane %v12949_v25, %v13505_v13  ;;  %v1684_v20 = vrot.slane %v12995_v55, %v13499_v60  ;;  %p11938_p9 = scmp.ne.s32.totalorder %s15731_s29, %s11937_s20 }
 0x3be   : > { %16061 = vst [vmem:[#allocation98_spill] sm:$0xff] %v13495_v43  ;;  %v13497_v47 = vpop.permute.xlu0 %5831  ;;  %v1602_v43 = vrot.slane %v12977_v41, %v13499_v60  ;;  %v1630_v41 = vrot.slane %v13001_v5, %v13499_v60  ;;  %v1639_v5 = vrot.slane %v13013_v53, %v13499_v60  ;;  %v1680_v55 = vrot.slane %v12993_v21, %v13505_v13 }
 0x3bf   : > { %16062 = vst [vmem:[#allocation99_spill] sm:$0xff] %v13497_v47  ;;  %v1613_v34 = vsel %vm1603_vm2, %v1612_v48, %v1608_v50  ;;  %v1622_v14 = vsel %vm1603_vm2, %v1621_v1, %v1617_v46  ;;  %v1626_v48 = vrot.slane %v12997_v31, %v13505_v13  ;;  %v1635_v53 = vrot.slane %v13011_v6, %v13505_v13  ;;  %p11939_p7 = pnand %p11938_p9, %p16425_p12 }
 0x3c0   : > { %v1604_v25 = vsel %vm1603_vm2, %v1602_v43, %v1597_v9  ;;  %v1693_v43 = vrot.slane %v13008_v61, %v13499_v60  ;;  %v1648_v9 = vrot.slane %v13027_v24, %v13499_v60  ;;  %v1689_v21 = vrot.slane %v13006_v12, %v13505_v13 }
 0x3c1   : > { %v13501_v16 = vpop.permute.xlu1 %5732  ;;  %v1741_v1 = vsel %vm1740_vm3, %v1613_v34, %v1604_v25  ;;  %v1631_v31 = vsel %vm1603_vm2, %v1630_v41, %v1626_v48  ;;  %v1657_v61 = vrot.slane %v13053_v38, %v13499_v60  ;;  %v1702_v41 = vrot.slane %v13019_v11, %v13499_v60  ;;  %p11940_p1 = pneg %p11939_p7 }
 0x3c2   : > { %16064 = vst [vmem:[#allocation101_spill] sm:$0xff] %v13501_v16  ;;  %v13503_v44 = vpop.permute.xlu0 %5734  ;;  %v1743_v46 = vsel %vm1742_vm4, %v1622_v14, %v1741_v1  ;;  %v1640_v14 = vsel %vm1603_vm2, %v1639_v5, %v1635_v53  ;;  %v1644_v6 = vrot.slane %v13023_v45, %v13505_v13  ;;  %v1666_v24 = vrot.slane %v13079_v23, %v13499_v60  ;;  %v16074_v53 = vld [vmem:[#allocation74_spill] sm:$0xff] }
 0x3c3   : > { %16065 = vst [vmem:[#allocation102_spill] sm:$0xff] %v13503_v44  ;;  %v1675_v44 = vrot.slane %v12991_v15, %v13499_v60  ;;  %v1671_v15 = vrot.slane %v12989_v52, %v13505_v13  ;;  %v1685_v52 = vsel %vm1603_vm2, %v1684_v20, %v1680_v55  ;;  %v1745_v20 = vsel %vm1744_vm5, %v1631_v31, %v1743_v46  ;;  %v16073_v46 = vld [vmem:[#allocation79_spill] sm:$0xff] }
 0x3c4   : > { %v1694_v12 = vsel %vm1603_vm2, %v1693_v43, %v1689_v21  ;;  %v1711_v38 = vrot.slane %v13039_v56, %v13499_v60  ;;  %v1653_v48 = vrot.slane %v13047_v8, %v13505_v13  ;;  %v1698_v11 = vrot.slane %v13017_v0, %v13505_v13  ;;  %v16072_v56 = vld [vmem:[#allocation70_spill] sm:$0xff] }
 0x3c5   : > { %v13524_v40 = vpop.permute.xlu1 %5829  ;;  %v1676_v34 = vsel %vm1603_vm2, %v1675_v44, %v1671_v15  ;;  %v1649_v45 = vsel %vm1603_vm2, %v1648_v9, %v1644_v6  ;;  %v1720_v23 = vrot.slane %v13065_v22, %v13499_v60  ;;  %v1662_v1 = vrot.slane %v13073_v36, %v13505_v13  ;;  %v16075_v36 = vld [vmem:[#allocation84_spill] sm:$0xff] }
 0x3c6   : > { %v13515_v62 = vpop.permute.xlu0 %5924  ;;  %16068 = vst [vmem:[#allocation105_spill] sm:$0xff] %v13524_v40  ;;  %v1747_v55 = vsel %vm1746_vm6, %v1640_v14, %v1745_v20  ;;  %v1707_v43 = vrot.slane %v16072_v56, %v13505_v13  ;;  %v1658_v8 = vsel %vm1603_vm2, %v1657_v61, %v1653_v48  ;;  %v1729_v0 = vrot.slane %v16073_v46, %v13499_v60  ;;  %v16076_v61 = vld [vmem:[#allocation77_spill] sm:$0xff] }
 0x3c7   : > { %16067 = vst [vmem:[#allocation104_spill] sm:$0xff] %v13515_v62  ;;  %v13531_v62 = vpop.f32.mrf.mxu1  ;;  %v1703_v31 = vsel %vm1603_vm2, %v1702_v41, %v1698_v11  ;;  %v1716_v22 = vrot.slane %v16074_v53, %v13505_v13  ;;  %v1667_v9 = vsel %vm1603_vm2, %v1666_v24, %v1662_v1  ;;  %v1738_v21 = vrot.slane %v16075_v36, %v13499_v60  ;;  %v16077_v24 = vld [vmem:[#allocation83_spill] sm:$0xff] }
 0x3c8   : > { %v1754_v14 = vsel %vm1740_vm3, %v1685_v52, %v1676_v34  ;;  %v1749_v6 = vsel %vm1748_vm7, %v1649_v45, %v1747_v55  ;;  %v1712_v20 = vsel %vm1603_vm2, %v1711_v38, %v1707_v43  ;;  %v1725_v48 = vrot.slane %v16076_v61, %v13505_v13 }
 0x3c9   : > { %v1838_v25 = vpop.f32.mrf.mxu1  ;;  %v13566_v44 = vpop.permute.xlu1 %5825  ;;  %v1755_v41 = vsel %vm1742_vm4, %v1694_v12, %v1754_v14  ;;  %v1751_v11 = vsel %vm1750_vm8, %v1658_v8, %v1749_v6  ;;  %v1721_v46 = vsel %vm1603_vm2, %v1720_v23, %v1716_v22  ;;  %v1734_v1 = vrot.slane %v16077_v24, %v13505_v13 }
 0x3ca   : > { %v13538_v50 = vpop.permute.xlu0 %5827  ;;  %16070 = vst [vmem:[#allocation107_spill] sm:$0xff] %v13566_v44  ;;  %v1756_v34 = vsel %vm1744_vm5, %v1703_v31, %v1755_v41  ;;  %v13609_v52 = vsel %vm1752_vm9, %v1667_v9, %v1751_v11  ;;  %v1730_v38 = vsel %vm1603_vm2, %v1729_v0, %v1725_v48 }
 0x3cb   : > { %16069 = vst [vmem:[#allocation106_spill] sm:$0xff] %v13538_v50  ;;  %v10756_v5 = vpop.f32.mrf.mxu1  ;;  %v1757_v55 = vsel %vm1746_vm6, %v1712_v20, %v1756_v34  ;;  %v1739_v12 = vsel %vm1603_vm2, %v1738_v21, %v1734_v1  ;;  %v13615_v43 = vadd.f32 %v1838_v25, %v13609_v52 }
 0x3cc   : > { %v1758_v8 = vsel %vm1748_vm7, %v1721_v46, %v1757_v55 }
 0x3cd   : > { %v1927_v56 = vpop.f32.mrf.mxu1  ;;  %v13605_v53 = vpop.permute.xlu1 %5922  ;;  %v1759_v22 = vsel %vm1750_vm8, %v1730_v38, %v1758_v8  ;;  %v3182_v25 = vsel %vm1763_vm1, %v13615_v43, -inf }
 0x3ce   : > { %v13581_v15 = vpop.permute.xlu0 %6017  ;;  %16078 = vst [vmem:[#allocation70_spill] sm:$0xff] %v13605_v53  ;;  %v13622_v31 = vsel %vm1752_vm9, %v1739_v12, %v1759_v22  ;;  %v13638_v20 = vadd.f32 %v1927_v56, %v13609_v52 }
 0x3cf   : > { %16071 = vst [vmem:[#allocation108_spill] sm:$0xff] %v13581_v15  ;;  %v10763_v45 = vpop.f32.mrf.mxu1  ;;  %v13626_v0 = vadd.f32 %v13531_v62, %v13622_v31  ;;  %v13629_v36 = vadd.f32 %v10756_v5, %v13622_v31 }
 0x3d0   : > { %v13641_v61 = vadd.f32 %v10763_v45, %v13622_v31  ;;  %v3188_v34 = vsel %vm1763_vm1, %v13638_v20, -inf }
 0x3d1   : > { %v2016_v9 = vpop.f32.mrf.mxu1  ;;  %v13631_v21 = vpop.permute.xlu1 %5918  ;;  %v3185_v62 = vsel %vm1763_vm1, %v13626_v0, -inf  ;;  %v3191_v5 = vsel %vm1763_vm1, %v13629_v36, -inf }
 0x3d2   : > { %v13617_v23 = vpop.permute.xlu0 %5920  ;;  %16080 = vst [vmem:[#allocation74_spill] sm:$0xff] %v13631_v21  ;;  %v13650_v46 = vadd.f32 %v2016_v9, %v13609_v52  ;;  %v3197_v1 = vsel %vm1763_vm1, %v13641_v61, -inf }
 0x3d3   : > { %16079 = vst [vmem:[#allocation79_spill] sm:$0xff] %v13617_v23  ;;  %v10770_v14 = vpop.f32.mrf.mxu1 }
 0x3d4   : > { %v13653_v56 = vadd.f32 %v10770_v14, %v13622_v31  ;;  %v3194_v8 = vsel %vm1763_vm1, %v13650_v46, -inf }
 0x3d5   : > { %v2105_v48 = vpop.f32.mrf.mxu1  ;;  %v13647_v41 = vpop.permute.xlu1 %6015 }
 0x3d6   : > { %v13635_v6 = vpop.permute.xlu0 %6110  ;;  %16082 = vst [vmem:[#allocation77_spill] sm:$0xff] %v13647_v41  ;;  %v13662_v45 = vadd.f32 %v2105_v48, %v13609_v52  ;;  %v3203_v22 = vsel %vm1763_vm1, %v13653_v56, -inf }
 0x3d7   : > { %16081 = vst [vmem:[#allocation84_spill] sm:$0xff] %v13635_v6  ;;  %v10777_v11 = vpop.f32.mrf.mxu1 }
 0x3d8   : > { %v13665_v55 = vadd.f32 %v10777_v11, %v13622_v31 }
 0x3d9   : > { %v2194_v38 = vpop.f32.mrf.mxu1  ;;  %v13667_v12 = vpop.permute.xlu1 %6011 }
 0x3da   : > { %v13655_v24 = vpop.permute.xlu0 %6013  ;;  %16084 = vst [vmem:[#allocation109_spill] sm:$0xff] %v13667_v12 }
 0x3db   : > { %3183 = vmax.xlane.f32.xlu0 %v3182_v25  ;;  %16083 = vst [vmem:[#allocation83_spill] sm:$0xff] %v13655_v24  ;;  %v10784_v9 = vpop.f32.mrf.mxu1 }
 0x3dc   : > { %v13676_v14 = vadd.f32 %v10784_v9, %v13622_v31 }
 0x3dd   : > { %v2283_v48 = vpop.f32.mrf.mxu1  ;;  %v13682_v11 = vpop.permute.xlu1 %6108 }
 0x3de   : > { %v13673_v25 = vpop.permute.xlu0 %6203  ;;  %16086 = vst [vmem:[#allocation111_spill] sm:$0xff] %v13682_v11 }
 0x3df   : > { %3186 = vmax.xlane.f32.xlu1 %v3185_v62  ;;  %3192 = vmax.xlane.f32.xlu0 %v3191_v5  ;;  %16085 = vst [vmem:[#allocation110_spill] sm:$0xff] %v13673_v25  ;;  %v3209_v62 = vsel %vm1763_vm1, %v13665_v55, -inf  ;;  %v3200_v5 = vsel %vm1763_vm1, %v13662_v45, -inf }
 0x3e3   : > { %3198 = vmax.xlane.f32.xlu1 %v3197_v1  ;;  %3189 = vmax.xlane.f32.xlu0 %v3188_v34  ;;  %v13685_v1 = vadd.f32 %v2283_v48, %v13609_v52  ;;  %v13687_v34 = vpop.permute.xlu0 %6106 }
 0x3e4   : > { %16087 = vst [vmem:[#allocation112_spill] sm:$0xff] %v13687_v34 }
 0x3e5   : > { %v3212_v9 = vsel %vm1763_vm1, %v13685_v1, -inf }
 0x3e7   : > { %3195 = vmax.xlane.f32.xlu1 %v3194_v8  ;;  %3204 = vmax.xlane.f32.xlu0 %v3203_v22  ;;  %v3215_v8 = vsel %vm1763_vm1, %v13676_v14, -inf  ;;  %v13691_v22 = vpop.permute.xlu1 %6104  ;;  %v13695_v13 = vpop.permute.xlu0 %6296 }
 0x3e8   : > { %16088 = vst [vmem:[#allocation113_spill] sm:$0xff] %v13691_v22  ;;  %16089 = vst [vmem:[#allocation114_spill] sm:$0xff] %v13695_v13  ;;  %v13712_v13 = vadd.f32 %v2194_v38, %v13609_v52 }
 0x3ea   : > { %v3206_v38 = vsel %vm1763_vm1, %v13712_v13, -inf }
 0x3eb   : > { %3210 = vmax.xlane.f32.xlu1 %v3209_v62  ;;  %3201 = vmax.xlane.f32.xlu0 %v3200_v5  ;;  %v13697_v62 = vpop.permute.xlu1 %6201  ;;  %v13699_v60 = vpop.permute.xlu0 %6199 }
 0x3ec   : > { %16090 = vst [vmem:[#allocation115_spill] sm:$0xff] %v13697_v62  ;;  %16091 = vst [vmem:[#allocation116_spill] sm:$0xff] %v13699_v60 }
 0x3ef   : > { %3216 = vmax.xlane.f32.xlu0 %v3215_v8  ;;  %v13701_v11 = vpop.permute.xlu1 %6197  ;;  %v13703_v6 = vpop.permute.xlu0 %6389 }
 0x3f0   : > { %16092 = vst [vmem:[#allocation117_spill] sm:$0xff] %v13701_v11  ;;  %16093 = vst [vmem:[#allocation118_spill] sm:$0xff] %v13703_v6 }
 0x3f3   : > { %3213 = vmax.xlane.f32.xlu0 %v3212_v9 }
 0x3f7   : > { %v10791_v5 = vpop.f32.mrf.mxu1 }
 0x3f9   : > { %v2372_v48 = vpop.f32.mrf.mxu1 }
 0x3ff   : > { %v10798_v34 = vpop.f32.mrf.mxu1  ;;  %v10805_v23 = vpop.f32.mrf.mxu0 }
 0x400   : > { %v13706_v8 = vadd.f32 %v10798_v34, %v13622_v31  ;;  %v13709_v22 = vadd.f32 %v10805_v23, %v13622_v31  ;;  %v13721_v34 = vpop.permute.xlu1 %6294  ;;  %v13723_v23 = vpop.permute.xlu0 %6292 }
 0x401   : > { %v2461_v9 = vpop.f32.mrf.mxu1  ;;  %v2550_v60 = vpop.f32.mrf.mxu0  ;;  %16094 = vst [vmem:[#allocation119_spill] sm:$0xff] %v13721_v34  ;;  %16095 = vst [vmem:[#allocation120_spill] sm:$0xff] %v13723_v23 }
 0x402   : > { %v13715_v53 = vadd.f32 %v2461_v9, %v13609_v52  ;;  %v3233_v21 = vsel %vm1763_vm1, %v13709_v22, -inf  ;;  %v3227_v16 = vsel %vm1763_vm1, %v13706_v8, -inf  ;;  %v13726_v6 = vadd.f32 %v2550_v60, %v13609_v52 }
 0x403   : > { %3234 = vmax.xlane.f32.xlu1 %v3233_v21  ;;  %3228 = vmax.xlane.f32.xlu0 %v3227_v16 }
 0x404   : > { %v3224_v9 = vsel %vm1763_vm1, %v13715_v53, -inf  ;;  %v13735_v34 = vpop.permute.xlu1 %6290  ;;  %v3230_v24 = vsel %vm1763_vm1, %v13726_v6, -inf }
 0x405   : > { %16096 = vst [vmem:[#allocation121_spill] sm:$0xff] %v13735_v34 }
 0x407   : > { %3207 = vmax.xlane.f32.xlu1 %v3206_v38  ;;  %v10812_v62 = vpop.f32.mrf.mxu1  ;;  %3225 = vmax.xlane.f32.xlu0 %v3224_v9 }
 0x408   : > { %v13733_v11 = vadd.f32 %v10812_v62, %v13622_v31  ;;  %v10819_v16 = vpop.f32.mrf.mxu0  ;;  %v13747_v62 = vpop.permute.xlu0 %6482 }
 0x409   : > { %v2639_v21 = vpop.f32.mrf.mxu1  ;;  %v13738_v23 = vadd.f32 %v10819_v16, %v13622_v31  ;;  %16097 = vst [vmem:[#allocation122_spill] sm:$0xff] %v13747_v62  ;;  %v13756_v34 = vpop.permute.xlu1 %6387 }
 0x40a   : > { %v13741_v60 = vadd.f32 %v2639_v21, %v13609_v52  ;;  %v3239_v38 = vsel %vm1763_vm1, %v13733_v11, -inf  ;;  %v2728_v9 = vpop.f32.mrf.mxu0  ;;  %16098 = vst [vmem:[#allocation123_spill] sm:$0xff] %v13756_v34 }
 0x40b   : > { %3231 = vmax.xlane.f32.xlu1 %v3230_v24  ;;  %3240 = vmax.xlane.f32.xlu0 %v3239_v38  ;;  %v13750_v25 = vadd.f32 %v2728_v9, %v13609_v52  ;;  %v3245_v16 = vsel %vm1763_vm1, %v13738_v23, -inf  ;;  %v13762_v24 = vadd.f32 %v10791_v5, %v13622_v31 }
 0x40c   : > { %v3236_v21 = vsel %vm1763_vm1, %v13741_v60, -inf  ;;  %v13764_v38 = vpop.permute.xlu0 %6385 }
 0x40d   : > { %16099 = vst [vmem:[#allocation124_spill] sm:$0xff] %v13764_v38  ;;  %v3242_v62 = vsel %vm1763_vm1, %v13750_v25, -inf }
 0x40f   : > { %3246 = vmax.xlane.f32.xlu1 %v3245_v16  ;;  %3237 = vmax.xlane.f32.xlu0 %v3236_v21  ;;  %v3221_v21 = vsel %vm1763_vm1, %v13762_v24, -inf }
 0x410   : > { %v10826_v41 = vpop.f32.mrf.mxu1  ;;  %v13782_v34 = vpop.permute.xlu0 %6575 }
 0x411   : > { %v13759_v12 = vadd.f32 %v10826_v41, %v13622_v31  ;;  %v10833_v50 = vpop.f32.mrf.mxu0  ;;  %v13773_v41 = vpop.permute.xlu1 %6383  ;;  %16101 = vst [vmem:[#allocation126_spill] sm:$0xff] %v13782_v34 }
 0x412   : > { %v2817_v9 = vpop.f32.mrf.mxu1  ;;  %16100 = vst [vmem:[#allocation125_spill] sm:$0xff] %v13773_v41  ;;  %v13776_v5 = vadd.f32 %v10833_v50, %v13622_v31 }
 0x413   : > { %v13769_v15 = vadd.f32 %v2817_v9, %v13609_v52  ;;  %3243 = vmax.xlane.f32.xlu1 %v3242_v62  ;;  %v3251_v16 = vsel %vm1763_vm1, %v13759_v12, -inf  ;;  %v2906_v41 = vpop.f32.mrf.mxu0 }
 0x414   : > { %3252 = vmax.xlane.f32.xlu0 %v3251_v16  ;;  %v13788_v16 = vadd.f32 %v2372_v48, %v13609_v52  ;;  %v3257_v50 = vsel %vm1763_vm1, %v13776_v5, -inf  ;;  %v13796_v34 = vpop.permute.xlu0 %6478 }
 0x415   : > { %v3248_v38 = vsel %vm1763_vm1, %v13769_v15, -inf  ;;  %v13794_v40 = vpop.permute.xlu1 %6480  ;;  %16104 = vst [vmem:[#allocation129_spill] sm:$0xff] %v13796_v34 }
 0x416   : > { %16103 = vst [vmem:[#allocation128_spill] sm:$0xff] %v13794_v40  ;;  %v3218_v48 = vsel %vm1763_vm1, %v13788_v16, -inf }
 0x417   : > { %3222 = vmax.xlane.f32.xlu1 %v3221_v21 }
 0x418   : > { %v10840_v9 = vpop.f32.mrf.mxu1  ;;  %3249 = vmax.xlane.f32.xlu0 %v3248_v38  ;;  %v13799_v38 = vadd.f32 %v2906_v41, %v13609_v52  ;;  %v13807_v44 = vpop.permute.xlu0 %6668 }
 0x419   : > { %v13785_v62 = vadd.f32 %v10840_v9, %v13622_v31  ;;  %v13803_v9 = vpop.permute.xlu1 %6476  ;;  %16106 = vst [vmem:[#allocation131_spill] sm:$0xff] %v13807_v44 }
 0x41a   : > { %16105 = vst [vmem:[#allocation130_spill] sm:$0xff] %v13803_v9 }
 0x41b   : > { %16102 = vst [vmem:[#allocation127_spill] sm:$0xff] %v13785_v62  ;;  %3258 = vmax.xlane.f32.xlu1 %v3257_v50  ;;  %v3263_v21 = vsel %vm1763_vm1, %v13785_v62, -inf  ;;  %v3254_v50 = vsel %vm1763_vm1, %v13799_v38, -inf }
 0x41c   : > { %3264 = vmax.xlane.f32.xlu0 %v3263_v21  ;;  %v13811_v21 = vpop.permute.xlu0 %6571 }
 0x41d   : > { %v13809_v47 = vpop.permute.xlu1 %6573  ;;  %16108 = vst [vmem:[#allocation133_spill] sm:$0xff] %v13811_v21  ;;  %v2995_v21 = vpop.f32.mrf.mxu1 }
 0x41e   : > { %16107 = vst [vmem:[#allocation132_spill] sm:$0xff] %v13809_v47  ;;  %v13830_v47 = vadd.f32 %v2995_v21, %v13609_v52 }
 0x41f   : > { %3219 = vmax.xlane.f32.xlu1 %v3218_v48 }
 0x420   : > { %v13815_v41 = vpop.permute.xlu0 %6761  ;;  %16115 = vst [vmem:[#allocation140_spill] sm:$0xff] %v13830_v47 }
 0x421   : > { %v13813_v34 = vpop.permute.xlu1 %6569  ;;  %16110 = vst [vmem:[#allocation135_spill] sm:$0xff] %v13815_v41 }
 0x422   : > { %16109 = vst [vmem:[#allocation134_spill] sm:$0xff] %v13813_v34 }
 0x423   : > { %3255 = vmax.xlane.f32.xlu1 %v3254_v50 }
 0x424   : > { %v13827_v44 = vpop.permute.xlu0 %6664 }
 0x425   : > { %v13820_v48 = vpop.permute.xlu1 %6666  ;;  %16114 = vst [vmem:[#allocation139_spill] sm:$0xff] %v13827_v44 }
 0x426   : > { %16112 = vst [vmem:[#allocation137_spill] sm:$0xff] %v13820_v48 }
 0x428   : > { %v13836_v48 = vpop.permute.xlu0 %6854 }
 0x429   : > { %v13834_v41 = vpop.permute.xlu1 %6662  ;;  %16117 = vst [vmem:[#allocation142_spill] sm:$0xff] %v13836_v48 }
 0x42a   : > { %16116 = vst [vmem:[#allocation141_spill] sm:$0xff] %v13834_v41 }
 0x42c   : > { %v13842_v44 = vpop.permute.xlu0 %6757 }
 0x42d   : > { %v13840_v34 = vpop.permute.xlu1 %6759  ;;  %16119 = vst [vmem:[#allocation144_spill] sm:$0xff] %v13842_v44 }
 0x42e   : > { %16118 = vst [vmem:[#allocation143_spill] sm:$0xff] %v13840_v34 }
 0x430   : > { %v13846_v21 = vpop.permute.xlu0 %6947 }
 0x431   : > { %16121 = vst [vmem:[#allocation146_spill] sm:$0xff] %v13846_v21 }
 0x432   : > { %v10847_v40 = vpop.f32.mrf.mxu0 }
 0x433   : > { %v13818_v62 = vadd.f32 %v10847_v40, %v13622_v31 }
 0x434   : > { %v3084_v9 = vpop.f32.mrf.mxu0 }
 0x435   : > { %16111 = vst [vmem:[#allocation136_spill] sm:$0xff] %v13818_v62  ;;  %v13823_v35 = vadd.f32 %v3084_v9, %v13609_v52  ;;  %v3269_v50 = vsel %vm1763_vm1, %v13818_v62, -inf  ;;  %v3260_v9 = vsel %vm1763_vm1, %v13830_v47, -inf }
 0x436   : > { %3270 = vmax.xlane.f32.xlu1 %v3269_v50  ;;  %v13844_v50 = vpop.permute.xlu1 %6755 }
 0x437   : > { %16113 = vst [vmem:[#allocation138_spill] sm:$0xff] %v13823_v35  ;;  %v3266_v40 = vsel %vm1763_vm1, %v13823_v35, -inf  ;;  %16120 = vst [vmem:[#allocation145_spill] sm:$0xff] %v13844_v50  ;;  %v13850_v35 = vpop.permute.xlu0 %6850 }
 0x438   : > { %16123 = vst [vmem:[#allocation148_spill] sm:$0xff] %v13850_v35 }
 0x43a   : > { %3267 = vmax.xlane.f32.xlu1 %v3266_v40  ;;  %v13848_v4 = vpop.permute.xlu1 %6852 }
 0x43b   : > { %16122 = vst [vmem:[#allocation147_spill] sm:$0xff] %v13848_v4  ;;  %v13854_v40 = vpop.permute.xlu0 %7040 }
 0x43c   : > { %16125 = vst [vmem:[#allocation150_spill] sm:$0xff] %v13854_v40 }
 0x43e   : > { %3261 = vmax.xlane.f32.xlu1 %v3260_v9  ;;  %v13852_v41 = vpop.permute.xlu1 %6848 }
 0x43f   : > { %16124 = vst [vmem:[#allocation149_spill] sm:$0xff] %v13852_v41  ;;  %v13858_v47 = vpop.permute.xlu0 %6943 }
 0x440   : > { %16127 = vst [vmem:[#allocation152_spill] sm:$0xff] %v13858_v47 }
 0x442   : > { %v13856_v48 = vpop.permute.xlu1 %6945 }
 0x443   : > { %16126 = vst [vmem:[#allocation151_spill] sm:$0xff] %v13856_v48  ;;  %v13862_v34 = vpop.permute.xlu0 %4775 }
 0x444   : > { %16129 = vst [vmem:[#allocation154_spill] sm:$0xff] %v13862_v34 }
 0x446   : > { %v13860_v9 = vpop.permute.xlu1 %6941 }
 0x447   : > { %16128 = vst [vmem:[#allocation153_spill] sm:$0xff] %v13860_v9 }
 0x44a   : > { %v13864_v44 = vpop.permute.xlu1 %7038 }
 0x44b   : > { %16130 = vst [vmem:[#allocation155_spill] sm:$0xff] %v13864_v44 }
 0x464   : > { %v3184_v50 = vpop.xlane.xlu0 %3183 }
 0x465   : > { %v3278_v21 = vsub.f32 %v13615_v43, %v3184_v50 }
 0x467   : > { %v3310_v4 = vmul.f32 1.442695, %v3278_v21 }
 0x468   : > { %v3187_v62 = vpop.xlane.xlu1 %3186  ;;  %v3193_v35 = vpop.xlane.xlu0 %3192 }
 0x469   : > { %11447 = vpow2.f32 %v3310_v4  ;;  %v3279_v41 = vsub.f32 %v13626_v0, %v3187_v62  ;;  %v3281_v48 = vsub.f32 %v13629_v36, %v3193_v35 }
 0x46b   : > { %v3312_v40 = vmul.f32 1.442695, %v3279_v41  ;;  %v3316_v43 = vmul.f32 1.442695, %v3281_v48 }
 0x46c   : > { %v3199_v59 = vpop.xlane.xlu1 %3198  ;;  %v3190_v47 = vpop.xlane.xlu0 %3189 }
 0x46d   : > { %11449 = vpow2.f32 %v3312_v40  ;;  %v3280_v9 = vsub.f32 %v13638_v20, %v3190_v47  ;;  %v10854_v34 = vpop.f32.mrf.mxu1  ;;  %v3283_v44 = vsub.f32 %v13641_v61, %v3199_v59 }
 0x46e   : > { %v13872_v18 = vadd.f32 %v10854_v34, %v13622_v31 }
 0x46f   : > { %v3314_v50 = vmul.f32 1.442695, %v3280_v9  ;;  %v3173_v21 = vpop.f32.mrf.mxu1  ;;  %v3320_v47 = vmul.f32 1.442695, %v3283_v44 }
 0x470   : > { %v3196_v4 = vpop.xlane.xlu1 %3195  ;;  %v13875_v0 = vadd.f32 %v3173_v21, %v13609_v52  ;;  %v3205_v62 = vpop.xlane.xlu0 %3204  ;;  %v3275_v35 = vsel %vm1763_vm1, %v13872_v18, -inf }
 0x471   : > { %v3282_v36 = vsub.f32 %v13650_v46, %v3196_v4  ;;  %3276 = vmax.xlane.f32.xlu1 %v3275_v35  ;;  %11451 = vpow2.f32 %v3314_v50  ;;  %v3285_v20 = vsub.f32 %v13653_v56, %v3205_v62 }
 0x472   : > { %v3272_v59 = vsel %vm1763_vm1, %v13875_v0, -inf  ;;  %11453 = vpow2.f32 %v3316_v43 }
 0x473   : > { %v3318_v31 = vmul.f32 1.442695, %v3282_v36  ;;  %3273 = vmax.xlane.f32.xlu0 %v3272_v59  ;;  %v3324_v41 = vmul.f32 1.442695, %v3285_v20 }
 0x474   : > { %v3202_v61 = vpop.xlane.xlu0 %3201  ;;  %v3211_v21 = vpop.xlane.xlu1 %3210 }
 0x475   : > { %11455 = vpow2.f32 %v3318_v31  ;;  %v3284_v52 = vsub.f32 %v13662_v45, %v3202_v61 }
 0x476   : > { %v13884_v34 = vpop.eup %11447  ;;  %11457 = vpow2.f32 %v3320_v47 }
 0x477   : > { %v3322_v46 = vmul.f32 1.442695, %v3284_v52  ;;  %10859 = vmatprep.mubr.msk.f32.mxu0 %vm1763_vm1, %v13884_v34 }
 0x478   : > { %v3217_v44 = vpop.xlane.xlu0 %3216 }
 0x479   : > { %11459 = vpow2.f32 %v3322_v46  ;;  %v3289_v40 = vsub.f32 %v13676_v14, %v3217_v44 }
 0x47a   : > { %v13888_v48 = vpop.eup %11449  ;;  %11461 = vpow2.f32 %v3324_v41 }
 0x47b   : > { %10860 = vmatmul.mubr.msk.f32.vlgmr.msra.gmra.mxu0 %vm1763_vm1, %v13888_v48  ;;  %v3332_v9 = vmul.f32 1.442695, %v3289_v40 }
 0x47c   : > { %10870 = vmatpush3.msra.mxu0 %v13346_v29  ;;  %v3214_v56 = vpop.xlane.xlu0 %3213 }
 0x47d   : > { %10871 = vmatprep.subr.mxu0 %v13360_v39  ;;  %v3288_v45 = vsub.f32 %v13685_v1, %v3214_v56 }
 0x47e   : > { %10872 = vmatpush3.msra.mxu0 %v13360_v39  ;;  %v13897_v43 = vpop.eup %11451 }
 0x47f   : > { %v3330_v50 = vmul.f32 1.442695, %v3288_v45  ;;  %10883 = vmatprep.subr.mxu0 %v13368_v27  ;;  %v13900_v14 = vpop.eup %11453  ;;  %10866 = vmatprep.mubr.msk.f32.mxu1 %vm1763_vm1, %v13897_v43 }
 0x480   : > { %10867 = vmatmul.mubr.msk.f32.vlgmr.msra.gmra.mxu1 %vm1763_vm1, %v13900_v14 }
 0x481   : > { %11463 = vpow2.f32 %v3330_v50  ;;  %10877 = vmatpush3.msra.mxu1 %v13364_v17 }
 0x482   : > { %v13906_v29 = vpop.eup %11455  ;;  %11465 = vpow2.f32 %v3332_v9  ;;  %7036 = vrot.lane.b32.xlu1 %v13142_v33, %s12020_s15  ;;  %10878 = vmatprep.subr.mxu1 %v13372_v57 }
 0x483   : > { %v13911_v39 = vpop.eup %11457  ;;  %10873 = vmatprep.mubr.msk.f32.mxu0 %vm1763_vm1, %v13906_v29  ;;  %10879 = vmatpush3.msra.mxu1 %v13372_v57 }
 0x484   : > { %10874 = vmatmul.mubr.msk.f32.vlgmr.msra.gmra.mxu0 %vm1763_vm1, %v13911_v39  ;;  %10890 = vmatprep.subr.mxu1 %v13388_v28 }
 0x485   : > { %10884 = vmatpush3.msra.mxu0 %v13368_v27 }
 0x486   : > { %10885 = vmatprep.subr.mxu0 %v13380_v37  ;;  %v13922_v17 = vpop.eup %11459 }
 0x487   : > { %10886 = vmatpush3.msra.mxu0 %v13380_v37  ;;  %v13925_v1 = vpop.eup %11461  ;;  %10880 = vmatprep.mubr.msk.f32.mxu1 %vm1763_vm1, %v13922_v17  ;;  %v3287_v37 = vsub.f32 %v13665_v55, %v3211_v21  ;;  %v16131_v21 = vld [vmem:[#allocation17_spill] sm:$0xff] }
 0x488   : > { %10897 = vmatprep.subr.mxu0 %v13376_v32  ;;  %10881 = vmatmul.mubr.msk.f32.vlgmr.msra.gmra.mxu1 %vm1763_vm1, %v13925_v1 }
 0x489   : > { %7034 = vrot.lane.b32.xlu0 %v13216_v51, %s12020_s15  ;;  %10891 = vmatpush3.msra.mxu1 %v13388_v28  ;;  %v3328_v28 = vmul.f32 1.442695, %v3287_v37 }
 0x48a   : > { %10892 = vmatprep.subr.mxu1 %v13396_v10 }
 0x48b   : > { %10893 = vmatpush3.msra.mxu1 %v13396_v10  ;;  %11467 = vpow2.f32 %v3328_v28 }
 0x48c   : > { %v13938_v27 = vpop.xlane.xlu1 %3234  ;;  %v3229_v57 = vpop.xlane.xlu0 %3228  ;;  %10904 = vmatprep.subr.mxu1 %v13404_v63 }
 0x48d   : > { %v3293_v35 = vsub.f32 %v13706_v8, %v3229_v57 }
 0x48e   : > { %v13941_v4 = vpop.eup %11463 }
 0x48f   : > { %v13943_v62 = vpop.eup %11465  ;;  %10894 = vmatprep.mubr.msk.f32.mxu1 %vm1763_vm1, %v13941_v4  ;;  %v3340_v59 = vmul.f32 1.442695, %v3293_v35 }
 0x490   : > { %v3208_v36 = vpop.xlane.xlu1 %3207  ;;  %10895 = vmatmul.mubr.msk.f32.vlgmr.msra.gmra.mxu1 %vm1763_vm1, %v13943_v62  ;;  %v3226_v10 = vpop.xlane.xlu0 %3225 }
 0x491   : > { %v3286_v55 = vsub.f32 %v13712_v13, %v3208_v36  ;;  %10905 = vmatpush3.msra.mxu1 %v13404_v63  ;;  %v3292_v47 = vsub.f32 %v13715_v53, %v3226_v10 }
 0x492   : > { %10906 = vmatprep.subr.mxu1 %v13412_v7 }
 0x493   : > { %v3326_v31 = vmul.f32 1.442695, %v3286_v55  ;;  %v3338_v8 = vmul.f32 1.442695, %v3292_v47  ;;  %10907 = vmatpush3.msra.mxu1 %v13412_v7 }
 0x494   : > { %10918 = vmatprep.subr.mxu1 %v13420_v3  ;;  %v3232_v20 = vpop.xlane.xlu1 %3231  ;;  %v3241_v61 = vpop.xlane.xlu0 %3240 }
 0x495   : > { %11469 = vpow2.f32 %v3326_v31  ;;  %v3297_v13 = vsub.f32 %v13733_v11, %v3241_v61  ;;  %v13968_v11 = vld [vmem:[%s15782_s4 + $0x1] ss:$0 sm:$0xff]  ;;  %v16134_v61 = vld [vmem:[#allocation18_spill] sm:$0xff] }
 0x496   : > { %11471 = vpow2.f32 %v3338_v8  ;;  %v5094_v37 = vmul.f32 %v13968_v11, %v16131_v21 }
 0x497   : > { %11473 = vpow2.f32 %v3340_v59  ;;  %v3348_v41 = vmul.f32 1.442695, %v3297_v13  ;;  %v16133_v59 = vld [vmem:[#allocation21_spill] sm:$0xff] }
 0x498   : > { %v13957_v63 = vpop.xlane.xlu1 %3246  ;;  %v3238_v53 = vpop.xlane.xlu0 %3237  ;;  %v5128_v47 = vsel %vm346_vm0, %v5094_v37, 0.0  ;;  %v5098_v31 = vmul.f32 %v13968_v11, %v16133_v59 }
 0x499   : > { %v3296_v52 = vsub.f32 %v13741_v60, %v3238_v53  ;;  %v13963_v45 = vpop.eup %11467 }
 0x49b   : > { %v3346_v46 = vmul.f32 1.442695, %v3296_v52 }
 0x49c   : > { %v13960_v44 = vpop.xlane.xlu1 %3243 }
 0x49d   : > { %v3253_v7 = vpop.xlane.xlu0 %3252  ;;  %11475 = vpow2.f32 %v3346_v46 }
 0x49e   : > { %11477 = vpow2.f32 %v3348_v41  ;;  %v3301_v40 = vsub.f32 %v13759_v12, %v3253_v7 }
 0x4a0   : > { %v3223_v56 = vpop.xlane.xlu1 %3222  ;;  %v3356_v35 = vmul.f32 1.442695, %v3301_v40 }
 0x4a1   : > { %v3250_v9 = vpop.xlane.xlu0 %3249  ;;  %v3291_v55 = vsub.f32 %v13762_v24, %v3223_v56  ;;  %v16136_v56 = vld [vmem:[#allocation19_spill] sm:$0xff] }
 0x4a2   : > { %v13970_v50 = vpop.eup %11469  ;;  %v3300_v60 = vsub.f32 %v13769_v15, %v3250_v9  ;;  %v16132_v15 = vld [vmem:[#allocation16_spill] sm:$0xff]  ;;  %v5096_v9 = vmul.f32 %v13968_v11, %v16136_v56 }
 0x4a3   : > { %v13975_v57 = vpop.eup %11471  ;;  %10887 = vmatprep.mubr.msk.f32.mxu0 %vm1763_vm1, %v13970_v50  ;;  %v5093_v10 = vmul.f32 %v13968_v11, %v16132_v15  ;;  %v3336_v53 = vmul.f32 1.442695, %v3291_v55 }
 0x4a4   : > { %v13979_v12 = vpop.eup %11473  ;;  %v3354_v28 = vmul.f32 1.442695, %v3300_v60  ;;  %10908 = vmatprep.mubr.msk.f32.mxu1 %vm1763_vm1, %v13975_v57  ;;  %v13983_v36 = vpop.xlane.xlu1 %3258  ;;  %10888 = vmatmul.mubr.msk.f32.vlgmr.msra.gmra.mxu0 %vm1763_vm1, %v13963_v45  ;;  %v16137_v60 = vld [vmem:[#allocation35_spill] sm:$0xff] }
 0x4a5   : > { %10898 = vmatpush3.msra.mxu0 %v13376_v32  ;;  %10909 = vmatmul.mubr.msk.f32.vlgmr.msra.gmra.mxu1 %vm1763_vm1, %v13979_v12  ;;  %v3294_v32 = vsub.f32 %v13726_v6, %v3232_v20  ;;  %v5125_v8 = vsel %vm346_vm0, %v5093_v10, 0.0  ;;  %v5095_v6 = vmul.f32 %v13968_v11, %v16134_v61  ;;  %v16135_v20 = vld [vmem:[#allocation33_spill] sm:$0xff]  ;;  %v5112_v21 = vmul.f32 %v13968_v11, %v16137_v60  ;;  %v16148_v60 = vld [vmem:[#allocation136_spill] sm:$0xff] }
 0x4a6   : > { %11479 = vpow2.f32 %v3354_v28  ;;  %10919 = vmatpush3.msra.mxu1 %v13420_v3  ;;  %10899 = vmatprep.subr.mxu0 %v13384_v30  ;;  %v5110_v13 = vmul.f32 %v13968_v11, %v16135_v20 }
 0x4a7   : > { %11481 = vpow2.f32 %v3356_v35  ;;  %10920 = vmatprep.subr.mxu1 %v13428_v2  ;;  %5129 = vadd.xlane.f32.xlu1 %v5128_v47  ;;  %v3342_v41 = vmul.f32 1.442695, %v3294_v32  ;;  %v5182_v55 = vsel %vm346_vm0, %v5112_v21, 0.0  ;;  %v16140_v32 = vld [vmem:[#allocation32_spill] sm:$0xff] }
 0x4a8   : > { %10900 = vmatpush3.msra.mxu0 %v13384_v30  ;;  %10921 = vmatpush3.msra.mxu1 %v13428_v2  ;;  %v3220_v24 = vpop.xlane.xlu1 %3219  ;;  %v3295_v30 = vsub.f32 %v13709_v22, %v13938_v27  ;;  %v5140_v2 = vsel %vm346_vm0, %v5098_v31, 0.0  ;;  %v5131_v22 = vsel %vm346_vm0, %v5095_v6, 0.0  ;;  %v5176_v27 = vsel %vm346_vm0, %v5110_v13, 0.0  ;;  %v16142_v6 = vld [vmem:[#allocation34_spill] sm:$0xff] }
 0x4a9   : > { %10911 = vmatprep.subr.mxu0 %v13392_v42  ;;  %10932 = vmatprep.subr.mxu1 %v13436_v58  ;;  %v3290_v3 = vsub.f32 %v13788_v16, %v3220_v24  ;;  %v3298_v16 = vsub.f32 %v13750_v25, %v13960_v44  ;;  %v3299_v44 = vsub.f32 %v13738_v23, %v13957_v63  ;;  %v5134_v23 = vsel %vm346_vm0, %v5096_v9, 0.0  ;;  %v16138_v63 = vld [vmem:[#allocation20_spill] sm:$0xff] }
 0x4aa   : > { %5126 = vadd.xlane.f32.xlu0 %v5125_v8  ;;  %v14013_v52 = vpop.eup %11475  ;;  %v3344_v25 = vmul.f32 1.442695, %v3295_v30  ;;  %v5097_v28 = vmul.f32 %v13968_v11, %v16138_v63  ;;  %v5111_v20 = vmul.f32 %v13968_v11, %v16142_v6  ;;  %v16143_v30 = vld [vmem:[#allocation25_spill] sm:$0xff]  ;;  %v3265_v63 = vpop.xlane.xlu0 %3264 }
 0x4ab   : > { %v3334_v46 = vmul.f32 1.442695, %v3290_v3  ;;  %5141 = vadd.xlane.f32.xlu1 %v5140_v2  ;;  %v14017_v7 = vpop.eup %11477  ;;  %10922 = vmatprep.mubr.msk.f32.mxu1 %vm1763_vm1, %v14013_v52  ;;  %v3350_v37 = vmul.f32 1.442695, %v3298_v16  ;;  %v3352_v10 = vmul.f32 1.442695, %v3299_v44 }
 0x4ac   : > { %v3256_v40 = vpop.xlane.xlu1 %3255  ;;  %10923 = vmatmul.mubr.msk.f32.vlgmr.msra.gmra.mxu1 %vm1763_vm1, %v14017_v7  ;;  %v5137_v31 = vsel %vm346_vm0, %v5097_v28, 0.0  ;;  %v16141_v3 = vld [vmem:[#allocation37_spill] sm:$0xff]  ;;  %v16144_v16 = vld [vmem:[#allocation22_spill] sm:$0xff]  ;;  %v16147_v44 = vld [vmem:[#allocation87_spill] sm:$0xff] }
 0x4ad   : > { %11483 = vpow2.f32 %v3334_v46  ;;  %10933 = vmatpush3.msra.mxu1 %v13436_v58  ;;  %v3302_v35 = vsub.f32 %v13799_v38, %v3256_v40  ;;  %v16139_v58 = vld [vmem:[#allocation23_spill] sm:$0xff]  ;;  %v3303_v38 = vsub.f32 %v13776_v5, %v13983_v36  ;;  %v5109_v5 = vmul.f32 %v13968_v11, %v16140_v32  ;;  %v16145_v40 = vld [vmem:[#allocation86_spill] sm:$0xff]  ;;  %v16150_v28 = vld [vmem:[#allocation88_spill] sm:$0xff] }
 0x4ae   : > { %11485 = vpow2.f32 %v3336_v53  ;;  %5132 = vadd.xlane.f32.xlu0 %v5131_v22  ;;  %10934 = vmatprep.subr.mxu1 %v13444_v49  ;;  %v5100_v15 = vmul.f32 %v13968_v11, %v16139_v58  ;;  %v5114_v8 = vmul.f32 %v13968_v11, %v16141_v3  ;;  %v5102_v53 = vmul.f32 %v13968_v11, %v16143_v30  ;;  %v16153_v32 = vld [vmem:[#allocation138_spill] sm:$0xff] }
 0x4af   : > { %11487 = vpow2.f32 %v3342_v41  ;;  %5177 = vadd.xlane.f32.xlu1 %v5176_v27  ;;  %10935 = vmatpush3.msra.mxu1 %v13444_v49  ;;  %v3358_v49 = vmul.f32 1.442695, %v3302_v35  ;;  %v3360_v36 = vmul.f32 1.442695, %v3303_v38  ;;  %v5173_v61 = vsel %vm346_vm0, %v5109_v5, 0.0  ;;  %v16146_v27 = vld [vmem:[#allocation39_spill] sm:$0xff] }
 0x4b0   : > { %10946 = vmatprep.subr.mxu1 %v13451_v26  ;;  %11489 = vpow2.f32 %v3344_v25  ;;  %v5146_v24 = vsel %vm346_vm0, %v5100_v15, 0.0  ;;  %v5179_v41 = vsel %vm346_vm0, %v5111_v20, 0.0  ;;  %v5099_v46 = vmul.f32 %v13968_v11, %v16144_v16  ;;  %v16149_v35 = vld [vmem:[#allocation36_spill] sm:$0xff]  ;;  %v16151_v15 = vld [vmem:[#allocation27_spill] sm:$0xff] }
 0x4b1   : > { %11491 = vpow2.f32 %v3350_v37  ;;  %v5152_v22 = vsel %vm346_vm0, %v5102_v53, 0.0  ;;  %v5116_v56 = vmul.f32 %v13968_v11, %v16146_v27  ;;  %v16157_v53 = vld [vmem:[#allocation41_spill] sm:$0xff] }
 0x4b2   : > { %5135 = vadd.xlane.f32.xlu0 %v5134_v23  ;;  %11493 = vpow2.f32 %v3352_v10  ;;  %v5143_v37 = vsel %vm346_vm0, %v5099_v46, 0.0  ;;  %v5113_v23 = vmul.f32 %v13968_v11, %v16149_v35  ;;  %v5104_v10 = vmul.f32 %v13968_v11, %v16151_v15  ;;  %v16164_v15 = vld [vmem:[#allocation26_spill] sm:$0xff] }
 0x4b3   : > { %v14044_v47 = vpop.eup %11479  ;;  %5183 = vadd.xlane.f32.xlu1 %v5182_v55  ;;  %11495 = vpow2.f32 %v3358_v49  ;;  %v5194_v58 = vsel %vm346_vm0, %v5116_v56, 0.0 }
 0x4b4   : > { %v14046_v59 = vpop.eup %11481  ;;  %10936 = vmatprep.mubr.msk.f32.mxu1 %vm1763_vm1, %v14044_v47  ;;  %11497 = vpow2.f32 %v3360_v36  ;;  %v16154_v36 = vld [vmem:[#allocation127_spill] sm:$0xff]  ;;  %v5158_v30 = vsel %vm346_vm0, %v5104_v10, 0.0  ;;  %v5103_v10 = vmul.f32 %v13968_v11, %v16164_v15  ;;  %v16177_v15 = vld [vmem:[#allocation30_spill] sm:$0xff] }
 0x4b5   : > { %10937 = vmatmul.mubr.msk.f32.vlgmr.msra.gmra.mxu1 %vm1763_vm1, %v14046_v59 }
 0x4b6   : > { %5138 = vadd.xlane.f32.xlu0 %v5137_v31  ;;  %10947 = vmatpush3.msra.mxu1 %v13451_v26  ;;  %v5188_v26 = vsel %vm346_vm0, %v5114_v8, 0.0  ;;  %v16152_v31 = vld [vmem:[#allocation89_spill] sm:$0xff]  ;;  %v5185_v8 = vsel %vm346_vm0, %v5113_v23, 0.0 }
 0x4b7   : > { %10948 = vmatprep.subr.mxu1 %v13462_v19  ;;  %5147 = vadd.xlane.f32.xlu1 %v5146_v24  ;;  %v3305_v24 = vsub.f32 %v16154_v36, %v3265_v63  ;;  %v16162_v23 = vld [vmem:[#allocation29_spill] sm:$0xff]  ;;  %v16166_v36 = vld [vmem:[#allocation40_spill] sm:$0xff] }
 0x4b8   : > { %10949 = vmatpush3.msra.mxu1 %v13462_v19  ;;  %v5106_v63 = vmul.f32 %v13968_v11, %v16162_v23 }
 0x4b9   : > { %10960 = vmatprep.subr.mxu1 %v13473_v54  ;;  %v3364_v56 = vmul.f32 1.442695, %v3305_v24  ;;  %v5117_v24 = vmul.f32 %v13968_v11, %v16166_v36  ;;  %v16181_v36 = vld [vmem:[#allocation105_spill] sm:$0xff] }
 0x4ba   : > { %v14065_v13 = vpop.eup %11483  ;;  %5174 = vadd.xlane.f32.xlu0 %v5173_v61  ;;  %v16155_v61 = vld [vmem:[#allocation24_spill] sm:$0xff] }
 0x4bb   : > { %v14070_v2 = vpop.eup %11485  ;;  %5189 = vadd.xlane.f32.xlu1 %v5188_v26  ;;  %10901 = vmatprep.mubr.msk.f32.mxu0 %vm1763_vm1, %v14065_v13  ;;  %v5101_v6 = vmul.f32 %v13968_v11, %v16155_v61  ;;  %v16156_v26 = vld [vmem:[#allocation90_spill] sm:$0xff] }
 0x4bc   : > { %v14074_v19 = vpop.eup %11487  ;;  %10902 = vmatmul.mubr.msk.f32.vlgmr.msra.gmra.mxu0 %vm1763_vm1, %v14070_v2 }
 0x4bd   : > { %10912 = vmatpush3.msra.mxu0 %v13392_v42  ;;  %10915 = vmatprep.mubr.msk.f32.mxu0 %vm1763_vm1, %v14074_v19  ;;  %v14088_v9 = vpop.eup %11489 }
 0x4be   : > { %5180 = vadd.xlane.f32.xlu0 %v5179_v41  ;;  %10913 = vmatprep.subr.mxu0 %v16145_v40  ;;  %v14091_v25 = vpop.eup %11491  ;;  %v5118_v41 = vmul.f32 %v13968_v11, %v16157_v53 }
 0x4bf   : > { %5153 = vadd.xlane.f32.xlu1 %v5152_v22  ;;  %10914 = vmatpush3.msra.mxu0 %v16145_v40  ;;  %v3271_v42 = vpop.xlane.xlu1 %3270  ;;  %v14107_v38 = vpop.eup %11493  ;;  %v16158_v40 = vld [vmem:[#allocation91_spill] sm:$0xff]  ;;  %v16159_v22 = vld [vmem:[#allocation140_spill] sm:$0xff] }
 0x4c0   : > { %10925 = vmatprep.subr.mxu0 %v16147_v44  ;;  %10916 = vmatmul.mubr.msk.f32.vlgmr.msra.gmra.mxu0 %vm1763_vm1, %v14088_v9  ;;  %v3307_v21 = vsub.f32 %v16148_v60, %v3271_v42  ;;  %v14110_v49 = vpop.eup %11495  ;;  %v5149_v42 = vsel %vm346_vm0, %v5101_v6, 0.0  ;;  %v5200_v35 = vsel %vm346_vm0, %v5118_v41, 0.0 }
 0x4c1   : > { %10926 = vmatpush3.msra.mxu0 %v16147_v44  ;;  %10929 = vmatprep.mubr.msk.f32.mxu0 %vm1763_vm1, %v14091_v25  ;;  %v14127_v16 = vpop.eup %11497  ;;  %v16160_v44 = vld [vmem:[#allocation38_spill] sm:$0xff] }
 0x4c2   : > { %5144 = vadd.xlane.f32.xlu0 %v5143_v37  ;;  %10927 = vmatprep.subr.mxu0 %v16150_v28  ;;  %v3368_v3 = vmul.f32 1.442695, %v3307_v21  ;;  %v5115_v60 = vmul.f32 %v13968_v11, %v16160_v44  ;;  %v16161_v37 = vld [vmem:[#allocation92_spill] sm:$0xff]  ;;  %v16173_v44 = vld [vmem:[#allocation42_spill] sm:$0xff] }
 0x4c3   : > { %5195 = vadd.xlane.f32.xlu1 %v5194_v58  ;;  %10928 = vmatpush3.msra.mxu0 %v16150_v28  ;;  %v3268_v55 = vpop.xlane.xlu1 %3267  ;;  %v16163_v28 = vld [vmem:[#allocation93_spill] sm:$0xff] }
 0x4c4   : > { %10939 = vmatprep.subr.mxu0 %v16152_v31  ;;  %v3306_v5 = vsub.f32 %v16153_v32, %v3268_v55  ;;  %10930 = vmatmul.mubr.msk.f32.vlgmr.msra.gmra.mxu0 %vm1763_vm1, %v14107_v38  ;;  %v5191_v58 = vsel %vm346_vm0, %v5115_v60, 0.0  ;;  %v5164_v55 = vsel %vm346_vm0, %v5106_v63, 0.0  ;;  %v5119_v60 = vmul.f32 %v13968_v11, %v16173_v44  ;;  %v16192_v44 = vld [vmem:[#allocation115_spill] sm:$0xff] }
 0x4c5   : > { %10940 = vmatpush3.msra.mxu0 %v16152_v31  ;;  %10943 = vmatprep.mubr.msk.f32.mxu0 %vm1763_vm1, %v14110_v49  ;;  %v16165_v31 = vld [vmem:[#allocation43_spill] sm:$0xff] }
 0x4c6   : > { %v3366_v20 = vmul.f32 1.442695, %v3306_v5  ;;  %5186 = vadd.xlane.f32.xlu0 %v5185_v8  ;;  %10941 = vmatprep.subr.mxu0 %v16156_v26  ;;  %v5120_v32 = vmul.f32 %v13968_v11, %v16165_v31  ;;  %v5155_v5 = vsel %vm346_vm0, %v5103_v10, 0.0  ;;  %v16167_v8 = vld [vmem:[#allocation31_spill] sm:$0xff]  ;;  %v5203_v63 = vsel %vm346_vm0, %v5119_v60, 0.0  ;;  %v16193_v60 = vld [vmem:[#allocation52_spill] sm:$0xff] }
 0x4c7   : > { %5159 = vadd.xlane.f32.xlu1 %v5158_v30  ;;  %10942 = vmatpush3.msra.mxu0 %v16156_v26  ;;  %v3262_v46 = vpop.xlane.xlu1 %3261  ;;  %v5108_v61 = vmul.f32 %v13968_v11, %v16167_v8  ;;  %v16168_v26 = vld [vmem:[#allocation28_spill] sm:$0xff]  ;;  %v5107_v10 = vmul.f32 %v13968_v11, %v16177_v15  ;;  %v16179_v31 = vld [vmem:[#allocation95_spill] sm:$0xff] }
 0x4c8   : > { %11499 = vpow2.f32 %v3366_v20  ;;  %10953 = vmatprep.subr.mxu0 %v16158_v40  ;;  %v3304_v27 = vsub.f32 %v16159_v22, %v3262_v46  ;;  %10944 = vmatmul.mubr.msk.f32.vlgmr.msra.gmra.mxu0 %vm1763_vm1, %v14127_v16  ;;  %v5197_v20 = vsel %vm346_vm0, %v5117_v24, 0.0  ;;  %v5105_v30 = vmul.f32 %v13968_v11, %v16168_v26  ;;  %v16170_v46 = vld [vmem:[#allocation45_spill] sm:$0xff]  ;;  %v16171_v22 = vld [vmem:[#allocation96_spill] sm:$0xff] }
 0x4c9   : > { %11501 = vpow2.f32 %v3368_v3  ;;  %10954 = vmatpush3.msra.mxu0 %v16158_v40  ;;  %v5206_v3 = vsel %vm346_vm0, %v5120_v32, 0.0  ;;  %v5170_v41 = vsel %vm346_vm0, %v5108_v61, 0.0  ;;  %v5122_v40 = vmul.f32 %v13968_v11, %v16170_v46  ;;  %v16182_v24 = vld [vmem:[#allocation44_spill] sm:$0xff] }
 0x4ca   : > { %v3362_v21 = vmul.f32 1.442695, %v3304_v27  ;;  %5150 = vadd.xlane.f32.xlu0 %v5149_v42  ;;  %10955 = vmatprep.subr.mxu0 %v16161_v37  ;;  %v16172_v42 = vld [vmem:[#allocation94_spill] sm:$0xff]  ;;  %v5167_v32 = vsel %vm346_vm0, %v5107_v10, 0.0  ;;  %v16183_v61 = vld [vmem:[#allocation108_spill] sm:$0xff] }
 0x4cb   : > { %5201 = vadd.xlane.f32.xlu1 %v5200_v35  ;;  %10956 = vmatpush3.msra.mxu0 %v16161_v37  ;;  %v5212_v37 = vsel %vm346_vm0, %v5122_v40, 0.0  ;;  %v16174_v35 = vld [vmem:[#allocation47_spill] sm:$0xff]  ;;  %v16187_v40 = vld [vmem:[#allocation77_spill] sm:$0xff]  ;;  %v16199_v10 = vld [vmem:[#allocation56_spill] sm:$0xff] }
 0x4cc   : > { %11503 = vpow2.f32 %v3362_v21  ;;  %10967 = vmatprep.subr.msk.mxu0 %vm1763_vm1, %v16163_v28  ;;  %v5124_v23 = vmul.f32 %v13968_v11, %v16174_v35  ;;  %v16195_v35 = vld [vmem:[#allocation116_spill] sm:$0xff] }
 0x4cd   : > { %11505 = vpow2.f32 %v3364_v56  ;;  %v5161_v56 = vsel %vm346_vm0, %v5105_v30, 0.0  ;;  %v16185_v30 = vld [vmem:[#allocation106_spill] sm:$0xff] }
 0x4ce   : > { %5192 = vadd.xlane.f32.xlu0 %v5191_v58  ;;  %v16176_v58 = vld [vmem:[#allocation99_spill] sm:$0xff] }
 0x4cf   : > { %5165 = vadd.xlane.f32.xlu1 %v5164_v55  ;;  %v5218_v55 = vsel %vm346_vm0, %v5124_v23, 0.0  ;;  %v16196_v23 = vld [vmem:[#allocation54_spill] sm:$0xff] }
 0x4d2   : > { %5156 = vadd.xlane.f32.xlu0 %v5155_v5  ;;  %v16180_v5 = vld [vmem:[#allocation107_spill] sm:$0xff] }
 0x4d3   : > { %5207 = vadd.xlane.f32.xlu1 %v5206_v3  ;;  %v5121_v3 = vmul.f32 %v13968_v11, %v16182_v24  ;;  %v16201_v24 = vld [vmem:[#allocation124_spill] sm:$0xff] }
 0x4d5   : > { %v14157_v6 = vpop.eup %11499  ;;  %v5209_v8 = vsel %vm346_vm0, %v5121_v3, 0.0  ;;  %v16202_v3 = vld [vmem:[#allocation48_spill] sm:$0xff] }
 0x4d6   : > { %v14162_v53 = vpop.eup %11501  ;;  %5198 = vadd.xlane.f32.xlu0 %v5197_v20  ;;  %10957 = vmatprep.mubr.msk.f32.mxu0 %vm1763_vm1, %v14157_v6  ;;  %v16184_v20 = vld [vmem:[#allocation46_spill] sm:$0xff] }
 0x4d7   : > { %16169 = vst [vmem:[#allocation17_spill] sm:$0xff] %v14162_v53  ;;  %5171 = vadd.xlane.f32.xlu1 %v5170_v41  ;;  %10958 = vmatmul.mubr.msk.f32.vlgmr.msra.gmra.mxu0 %vm1763_vm1, %v14162_v53  ;;  %v5123_v26 = vmul.f32 %v13968_v11, %v16184_v20  ;;  %v16186_v41 = vld [vmem:[#allocation109_spill] sm:$0xff]  ;;  %v16188_v11 = vld [vmem:[#allocation110_spill] sm:$0xff]  ;;  %v16207_v20 = vld [vmem:[#allocation60_spill] sm:$0xff]  ;;  %v3395_v53 = vsel %vm1763_vm1, %v13925_v1, 0.0  ;;  %v3401_v1 = vsel %vm1763_vm1, %v13963_v45, 0.0 }
 0x4d8   : > { %10968 = vmatpush3.xpose.msk.msra.mxu0 %vm1763_vm1, %v16163_v28  ;;  %10971 = vmatprep.mubr.msk.f32.mxu0 %vm1763_vm1, %v16171_v22  ;;  %v16175_v28 = vld [vmem:[#allocation154_spill] sm:$0xff]  ;;  %v16189_v22 = vld [vmem:[#allocation83_spill] sm:$0xff]  ;;  %v3407_v45 = vsel %vm1763_vm1, %v13943_v62, 0.0 }
 0x4d9   : > { %v14175_v27 = vpop.eup %11503  ;;  %10969 = vmatprep.subr.msk.mxu0 %vm1763_vm1, %v16172_v42  ;;  %v5215_v46 = vsel %vm346_vm0, %v5123_v26, 0.0  ;;  %v16208_v26 = vld [vmem:[#allocation135_spill] sm:$0xff] }
 0x4da   : > { %v14182_v21 = vpop.eup %11505  ;;  %5162 = vadd.xlane.f32.xlu0 %v5161_v56  ;;  %10950 = vmatprep.mubr.msk.f32.mxu1 %vm1763_vm1, %v14175_v27  ;;  %v16190_v56 = vld [vmem:[#allocation49_spill] sm:$0xff] }
 0x4db   : > { %5213 = vadd.xlane.f32.xlu1 %v5212_v37  ;;  %10951 = vmatmul.mubr.msk.f32.vlgmr.msra.gmra.mxu1 %vm1763_vm1, %v14182_v21  ;;  %v16194_v37 = vld [vmem:[#allocation118_spill] sm:$0xff] }
 0x4dc   : > { %10961 = vmatpush3.msra.mxu1 %v13473_v54  ;;  %10970 = vmatpush3.xpose.msk.msra.mxu0 %vm1763_vm1, %v16172_v42  ;;  %v16178_v54 = vld [vmem:[#allocation97_spill] sm:$0xff] }
 0x4dd   : > { %10962 = vmatprep.subr.mxu1 %v16175_v28  ;;  %10981 = vmatprep.subr.msk.mxu0 %vm1763_vm1, %v16176_v58  ;;  %v16191_v42 = vld [vmem:[#allocation117_spill] sm:$0xff] }
 0x4de   : > { %5204 = vadd.xlane.f32.xlu0 %v5203_v63  ;;  %10963 = vmatpush3.msra.mxu1 %v16175_v28  ;;  %v16197_v63 = vld [vmem:[#allocation125_spill] sm:$0xff]  ;;  %v16198_v28 = vld [vmem:[#allocation123_spill] sm:$0xff] }
 0x4df   : > { %5219 = vadd.xlane.f32.xlu1 %v5218_v55  ;;  %10972 = vmatmul.mubr.msk.f32.vlgmr.msra.gmra.mxu0 %vm1763_vm1, %v16178_v54 }
 0x4e0   : > { %10974 = vmatprep.subr.msk.mxu1 %vm1763_vm1, %v16179_v31  ;;  %10982 = vmatpush3.xpose.msk.msra.mxu0 %vm1763_vm1, %v16176_v58 }
 0x4e1   : > { %10985 = vmatprep.mubr.msk.f32.mxu0 %vm1763_vm1, %v16180_v5  ;;  %10983 = vmatprep.subr.msk.mxu0 %vm1763_vm1, %v16181_v36 }
 0x4e2   : > { %5168 = vadd.xlane.f32.xlu0 %v5167_v32  ;;  %v16200_v32 = vld [vmem:[#allocation126_spill] sm:$0xff] }
 0x4e4   : > { %10984 = vmatpush3.xpose.msk.msra.mxu0 %vm1763_vm1, %v16181_v36 }
 0x4e5   : > { %10995 = vmatprep.subr.msk.mxu0 %vm1763_vm1, %v16183_v61 }
 0x4e6   : > { %5210 = vadd.xlane.f32.xlu0 %v5209_v8  ;;  %v16204_v8 = vld [vmem:[#allocation134_spill] sm:$0xff] }
 0x4e7   : > { %10986 = vmatmul.mubr.msk.f32.vlgmr.msra.gmra.mxu0 %vm1763_vm1, %v16185_v30  ;;  %v16209_v30 = vld [vmem:[#allocation51_spill] sm:$0xff] }
 0x4e8   : > { %10996 = vmatpush3.xpose.msk.msra.mxu0 %vm1763_vm1, %v16183_v61  ;;  %10999 = vmatprep.mubr.msk.f32.mxu0 %vm1763_vm1, %v16186_v41  ;;  %v16206_v61 = vld [vmem:[#allocation50_spill] sm:$0xff] }
 0x4e9   : > { %10997 = vmatprep.subr.msk.mxu0 %vm1763_vm1, %v16187_v40  ;;  %v16210_v41 = vld [vmem:[#allocation62_spill] sm:$0xff] }
 0x4ea   : > { %5216 = vadd.xlane.f32.xlu0 %v5215_v46  ;;  %v16211_v46 = vld [vmem:[#allocation133_spill] sm:$0xff] }
 0x4ec   : > { %10998 = vmatpush3.xpose.msk.msra.mxu0 %vm1763_vm1, %v16187_v40  ;;  %v16212_v40 = vld [vmem:[#allocation145_spill] sm:$0xff] }
 0x4ed   : > { %11009 = vmatprep.subr.msk.mxu0 %vm1763_vm1, %v16188_v11 }
 0x4ef   : > { %11000 = vmatmul.mubr.msk.f32.vlgmr.msra.gmra.mxu0 %vm1763_vm1, %v16189_v22  ;;  %v16214_v22 = vld [vmem:[#allocation53_spill] sm:$0xff] }
 0x4f0   : > { %7413 = vrot.lane.b32.xlu1 %v16190_v56, %s12021_s17  ;;  %11010 = vmatpush3.xpose.msk.msra.mxu0 %vm1763_vm1, %v16188_v11  ;;  %v16213_v11 = vld [vmem:[#allocation143_spill] sm:$0xff] }
 0x4f1   : > { %11013 = vmatprep.mubr.msk.f32.mxu0 %vm1763_vm1, %v16191_v42  ;;  %11011 = vmatprep.subr.msk.mxu0 %vm1763_vm1, %v16192_v44  ;;  %v16215_v42 = vld [vmem:[#allocation64_spill] sm:$0xff] }
 0x4f4   : > { %7589 = vrot.lane.b32.xlu1 %v16193_v60, %s12021_s17  ;;  %11012 = vmatpush3.xpose.msk.msra.mxu0 %vm1763_vm1, %v16192_v44 }
 0x4f5   : > { %11023 = vmatprep.subr.msk.mxu0 %vm1763_vm1, %v16194_v37 }
 0x4f7   : > { %11014 = vmatmul.mubr.msk.f32.vlgmr.msra.gmra.mxu0 %vm1763_vm1, %v16195_v35 }
 0x4f8   : > { %7676 = vrot.lane.b32.xlu1 %v16196_v23, %s12021_s17  ;;  %11024 = vmatpush3.xpose.msk.msra.mxu0 %vm1763_vm1, %v16194_v37  ;;  %v16217_v37 = vld [vmem:[#allocation146_spill] sm:$0xff] }
 0x4f9   : > { %11027 = vmatprep.mubr.msk.f32.mxu0 %vm1763_vm1, %v16197_v63  ;;  %11025 = vmatprep.subr.msk.mxu0 %vm1763_vm1, %v16198_v28  ;;  %v16219_v63 = vld [vmem:[#allocation55_spill] sm:$0xff] }
 0x4fa   : > { %v3277_v58 = vpop.xlane.xlu1 %3276 }
 0x4fb   : > { %v3309_v15 = vsub.f32 %v13872_v18, %v3277_v58  ;;  %v16203_v18 = vld [vmem:[#allocation58_spill] sm:$0xff]  ;;  %v16221_v58 = vld [vmem:[#allocation144_spill] sm:$0xff] }
 0x4fc   : > { %7763 = vrot.lane.b32.xlu1 %v16199_v10, %s12021_s17  ;;  %11026 = vmatpush3.xpose.msk.msra.mxu0 %vm1763_vm1, %v16198_v28  ;;  %v3274_v55 = vpop.xlane.xlu0 %3273  ;;  %v16220_v28 = vld [vmem:[#allocation66_spill] sm:$0xff] }
 0x4fd   : > { %v3308_v54 = vsub.f32 %v13875_v0, %v3274_v55  ;;  %11037 = vmatprep.subr.msk.mxu0 %vm1763_vm1, %v16200_v32  ;;  %v3372_v5 = vmul.f32 1.442695, %v3309_v15  ;;  %v16205_v0 = vld [vmem:[#allocation132_spill] sm:$0xff]  ;;  %v16222_v15 = vld [vmem:[#allocation153_spill] sm:$0xff]  ;;  %v16223_v55 = vld [vmem:[#allocation98_spill] sm:$0xff] }
 0x4ff   : > { %v3370_v36 = vmul.f32 1.442695, %v3308_v54  ;;  %11028 = vmatmul.mubr.msk.f32.vlgmr.msra.gmra.mxu0 %vm1763_vm1, %v16201_v24  ;;  %v16224_v54 = vld [vmem:[#allocation101_spill] sm:$0xff]  ;;  %v16229_v24 = vld [vmem:[#allocation59_spill] sm:$0xff] }
 0x500   : > { %7415 = vrot.lane.b32.xlu0 %v16202_v3, %s12021_s17  ;;  %7850 = vrot.lane.b32.xlu1 %v16203_v18, %s12021_s17 }
 0x501   : > { %11507 = vpow2.f32 %v3370_v36  ;;  %11038 = vmatpush3.xpose.msk.msra.mxu0 %vm1763_vm1, %v16200_v32  ;;  %11041 = vmatprep.mubr.msk.f32.mxu0 %vm1763_vm1, %v16204_v8  ;;  %v16225_v32 = vld [vmem:[#allocation151_spill] sm:$0xff]  ;;  %v16228_v36 = vld [vmem:[#allocation104_spill] sm:$0xff]  ;;  %v16230_v8 = vld [vmem:[#allocation69_spill] sm:$0xff] }
 0x502   : > { %11039 = vmatprep.subr.msk.mxu0 %vm1763_vm1, %v16205_v0  ;;  %11509 = vpow2.f32 %v3372_v5  ;;  %v16226_v5 = vld [vmem:[#allocation57_spill] sm:$0xff] }
 0x504   : > { %7502 = vrot.lane.b32.xlu0 %v16206_v61, %s12021_s17  ;;  %7937 = vrot.lane.b32.xlu1 %v16207_v20, %s12021_s17  ;;  %v16267_v20 = vld [vmem:[#allocation150_spill] sm:$0xff] }
 0x505   : > { %11040 = vmatpush3.xpose.msk.msra.mxu0 %vm1763_vm1, %v16205_v0  ;;  %v16231_v0 = vld [vmem:[#allocation102_spill] sm:$0xff] }
 0x506   : > { %11051 = vmatprep.subr.msk.mxu0 %vm1763_vm1, %v16208_v26 }
 0x508   : > { %7500 = vrot.lane.b32.xlu0 %v16209_v30, %s12021_s17  ;;  %8024 = vrot.lane.b32.xlu1 %v16210_v41, %s12021_s17  ;;  %v16266_v41 = vld [vmem:[#allocation147_spill] sm:$0xff] }
 0x509   : > { %11042 = vmatmul.mubr.msk.f32.vlgmr.msra.gmra.mxu0 %vm1763_vm1, %v16211_v46  ;;  %v16233_v46 = vld [vmem:[#allocation74_spill] sm:$0xff] }
 0x50a   : > { %11052 = vmatpush3.xpose.msk.msra.mxu0 %vm1763_vm1, %v16208_v26  ;;  %11055 = vmatprep.mubr.msk.f32.mxu0 %vm1763_vm1, %v16212_v40  ;;  %v16232_v26 = vld [vmem:[#allocation152_spill] sm:$0xff]  ;;  %v16234_v40 = vld [vmem:[#allocation70_spill] sm:$0xff] }
 0x50b   : > { %11053 = vmatprep.subr.msk.mxu0 %vm1763_vm1, %v16213_v11 }
 0x50c   : > { %7587 = vrot.lane.b32.xlu0 %v16214_v22, %s12021_s17  ;;  %8111 = vrot.lane.b32.xlu1 %v16215_v42, %s12021_s17  ;;  %v3380_v22 = vsel %vm1763_vm1, %v13897_v43, 0.0 }
 0x50e   : > { %v14305_v44 = vpop.eup %11507  ;;  %11054 = vmatpush3.xpose.msk.msra.mxu0 %vm1763_vm1, %v16213_v11  ;;  %v16235_v11 = vld [vmem:[#allocation61_spill] sm:$0xff] }
 0x50f   : > { %16216 = vst [vmem:[#allocation16_spill] sm:$0xff] %v14305_v44  ;;  %11065 = vmatprep.subr.msk.mxu0 %vm1763_vm1, %v16217_v37  ;;  %10964 = vmatprep.mubr.msk.f32.mxu1 %vm1763_vm1, %v14305_v44  ;;  %v14313_v35 = vpop.eup %11509 }
 0x510   : > { %16218 = vst [vmem:[#allocation21_spill] sm:$0xff] %v14313_v35  ;;  %7674 = vrot.lane.b32.xlu0 %v16219_v63, %s12021_s17  ;;  %8198 = vrot.lane.b32.xlu1 %v16220_v28, %s12021_s17  ;;  %v16260_v28 = vld [vmem:[#allocation129_spill] sm:$0xff]  ;;  %v3377_v63 = vsel %vm1763_vm1, %v13888_v48, 0.0 }
 0x511   : > { %11056 = vmatmul.mubr.msk.f32.vlgmr.msra.gmra.mxu0 %vm1763_vm1, %v16221_v58  ;;  %10965 = vmatmul.mubr.msk.f32.vlgmr.msra.gmra.mxu1 %vm1763_vm1, %v14313_v35  ;;  %v16237_v58 = vld [vmem:[#allocation84_spill] sm:$0xff]  ;;  %v3392_v35 = vsel %vm1763_vm1, %v13922_v17, 0.0  ;;  %v3398_v17 = vsel %vm1763_vm1, %v13970_v50, 0.0 }
 0x512   : > { %10975 = vmatpush3.xpose.msk.msra.mxu1 %vm1763_vm1, %v16179_v31  ;;  %11066 = vmatpush3.xpose.msk.msra.mxu0 %vm1763_vm1, %v16217_v37  ;;  %v16227_v31 = vld [vmem:[#allocation67_spill] sm:$0xff]  ;;  %v16236_v37 = vld [vmem:[#allocation72_spill] sm:$0xff] }
 0x513   : > { %11069 = vmatprep.mubr.msk.f32.mxu0 %vm1763_vm1, %v16222_v15  ;;  %10976 = vmatprep.subr.msk.mxu1 %vm1763_vm1, %v16223_v55  ;;  %v16238_v15 = vld [vmem:[#allocation63_spill] sm:$0xff] }
 0x514   : > { %10978 = vmatprep.mubr.msk.f32.mxu1 %vm1763_vm1, %v16224_v54  ;;  %11067 = vmatprep.subr.msk.mxu0 %vm1763_vm1, %v16225_v32  ;;  %v16240_v54 = vld [vmem:[#allocation79_spill] sm:$0xff] }
 0x515   : > { %7761 = vrot.lane.b32.xlu0 %v16226_v5, %s12021_s17  ;;  %8196 = vrot.lane.b32.xlu1 %v16227_v31, %s12021_s17  ;;  %v16262_v31 = vld [vmem:[#allocation137_spill] sm:$0xff]  ;;  %v3374_v5 = vsel %vm1763_vm1, %v13884_v34, 0.0  ;;  %v3383_v34 = vsel %vm1763_vm1, %v13900_v14, 0.0  ;;  %v3389_v14 = vsel %vm1763_vm1, %v13911_v39, 0.0 }
 0x516   : > { %10977 = vmatpush3.xpose.msk.msra.mxu1 %vm1763_vm1, %v16223_v55  ;;  %11068 = vmatpush3.xpose.msk.msra.mxu0 %vm1763_vm1, %v16225_v32  ;;  %v16239_v55 = vld [vmem:[#allocation75_spill] sm:$0xff]  ;;  %v16241_v32 = vld [vmem:[#allocation113_spill] sm:$0xff] }
 0x517   : > { %10988 = vmatprep.subr.msk.mxu1 %vm1763_vm1, %v16228_v36 }
 0x519   : > { %7848 = vrot.lane.b32.xlu0 %v16229_v24, %s12021_s17  ;;  %8283 = vrot.lane.b32.xlu1 %v16230_v8, %s12021_s17  ;;  %v16257_v8 = vld [vmem:[#allocation76_spill] sm:$0xff] }
 0x51a   : > { %10979 = vmatmul.mubr.msk.f32.vlgmr.msra.gmra.mxu1 %vm1763_vm1, %v16231_v0  ;;  %11070 = vmatmul.mubr.msk.f32.vlgmr.msra.gmra.mxu0 %vm1763_vm1, %v16232_v26  ;;  %v16243_v0 = vld [vmem:[#allocation65_spill] sm:$0xff]  ;;  %v16244_v26 = vld [vmem:[#allocation78_spill] sm:$0xff] }
 0x51b   : > { %10989 = vmatpush3.xpose.msk.msra.mxu1 %vm1763_vm1, %v16228_v36  ;;  %10992 = vmatprep.mubr.msk.f32.mxu1 %vm1763_vm1, %v16233_v46  ;;  %v16242_v36 = vld [vmem:[#allocation111_spill] sm:$0xff]  ;;  %v16245_v46 = vld [vmem:[#allocation114_spill] sm:$0xff] }
 0x51c   : > { %10990 = vmatprep.subr.msk.mxu1 %vm1763_vm1, %v16234_v40 }
 0x51d   : > { %7935 = vrot.lane.b32.xlu0 %v16235_v11, %s12021_s17  ;;  %8370 = vrot.lane.b32.xlu1 %v16236_v37, %s12021_s17  ;;  %v16254_v37 = vld [vmem:[#allocation120_spill] sm:$0xff]  ;;  %v16269_v11 = vld [vmem:[#allocation155_spill] sm:$0xff] }
 0x51f   : > { %10991 = vmatpush3.xpose.msk.msra.mxu1 %vm1763_vm1, %v16234_v40  ;;  %v16246_v40 = vld [vmem:[#allocation68_spill] sm:$0xff] }
 0x520   : > { %11002 = vmatprep.subr.msk.mxu1 %vm1763_vm1, %v16237_v58 }
 0x521   : > { %8022 = vrot.lane.b32.xlu0 %v16238_v15, %s12021_s17  ;;  %8457 = vrot.lane.b32.xlu1 %v16239_v55, %s12021_s17  ;;  %v16251_v55 = vld [vmem:[#allocation71_spill] sm:$0xff] }
 0x522   : > { %10993 = vmatmul.mubr.msk.f32.vlgmr.msra.gmra.mxu1 %vm1763_vm1, %v16240_v54  ;;  %v16248_v54 = vld [vmem:[#allocation112_spill] sm:$0xff] }
 0x523   : > { %11003 = vmatpush3.xpose.msk.msra.mxu1 %vm1763_vm1, %v16237_v58  ;;  %11006 = vmatprep.mubr.msk.f32.mxu1 %vm1763_vm1, %v16241_v32  ;;  %v16247_v58 = vld [vmem:[#allocation81_spill] sm:$0xff] }
 0x524   : > { %11004 = vmatprep.subr.msk.mxu1 %vm1763_vm1, %v16242_v36  ;;  %v16249_v32 = vld [vmem:[#allocation121_spill] sm:$0xff] }
 0x525   : > { %8109 = vrot.lane.b32.xlu0 %v16243_v0, %s12021_s17  ;;  %8544 = vrot.lane.b32.xlu1 %v16244_v26, %s12021_s17  ;;  %v7037_v26 = vpop.permute.xlu1 %7036  ;;  %v16265_v0 = vld [vmem:[#allocation149_spill] sm:$0xff] }
 0x527   : > { %11005 = vmatpush3.xpose.msk.msra.mxu1 %vm1763_vm1, %v16242_v36  ;;  %v16250_v36 = vld [vmem:[#allocation119_spill] sm:$0xff] }
 0x528   : > { %11016 = vmatprep.subr.msk.mxu1 %vm1763_vm1, %v16245_v46 }
 0x529   : > { %8285 = vrot.lane.b32.xlu0 %v16246_v40, %s12021_s17  ;;  %8631 = vrot.lane.b32.xlu1 %v16247_v58, %s12021_s17  ;;  %v7035_v58 = vpop.permute.xlu0 %7034 }
 0x52a   : > { %11007 = vmatmul.mubr.msk.f32.vlgmr.msra.gmra.mxu1 %vm1763_vm1, %v16248_v54  ;;  %v16252_v54 = vld [vmem:[#allocation122_spill] sm:$0xff] }
 0x52b   : > { %11017 = vmatpush3.xpose.msk.msra.mxu1 %vm1763_vm1, %v16245_v46  ;;  %11020 = vmatprep.mubr.msk.f32.mxu1 %vm1763_vm1, %v16249_v32  ;;  %v16253_v32 = vld [vmem:[#allocation73_spill] sm:$0xff] }
 0x52c   : > { %11018 = vmatprep.subr.msk.mxu1 %vm1763_vm1, %v16250_v36 }
 0x52d   : > { %8372 = vrot.lane.b32.xlu0 %v16251_v55, %s12021_s17  ;;  %8718 = vrot.lane.b32.xlu1 %v13216_v51, %s12021_s17  ;;  %v16255_v55 = vld [vmem:[#allocation130_spill] sm:$0xff] }
 0x52f   : > { %11019 = vmatpush3.xpose.msk.msra.mxu1 %vm1763_vm1, %v16250_v36  ;;  %v16256_v36 = vld [vmem:[#allocation128_spill] sm:$0xff] }
 0x530   : > { %11030 = vmatprep.subr.msk.mxu1 %vm1763_vm1, %v16252_v54  ;;  %v14407_v46 = vpop.xlane.xlu1 %5129 }
 0x531   : > { %8459 = vrot.lane.b32.xlu0 %v16253_v32, %s12021_s17  ;;  %v16258_v32 = vld [vmem:[#allocation131_spill] sm:$0xff] }
 0x532   : > { %11021 = vmatmul.mubr.msk.f32.vlgmr.msra.gmra.mxu1 %vm1763_vm1, %v16254_v37 }
 0x533   : > { %11031 = vmatpush3.xpose.msk.msra.mxu1 %vm1763_vm1, %v16252_v54  ;;  %11034 = vmatprep.mubr.msk.f32.mxu1 %vm1763_vm1, %v16255_v55  ;;  %v14417_v51 = vpop.xlane.xlu0 %5126  ;;  %v16259_v55 = vld [vmem:[#allocation80_spill] sm:$0xff] }
 0x534   : > { %11032 = vmatprep.subr.msk.mxu1 %vm1763_vm1, %v16256_v36  ;;  %v14421_v40 = vpop.xlane.xlu1 %5141 }
 0x535   : > { %8546 = vrot.lane.b32.xlu0 %v16257_v8, %s12021_s17  ;;  %v16261_v8 = vld [vmem:[#allocation141_spill] sm:$0xff] }
 0x537   : > { %11033 = vmatpush3.xpose.msk.msra.mxu1 %vm1763_vm1, %v16256_v36  ;;  %v14427_v37 = vpop.xlane.xlu0 %5132 }
 0x538   : > { %11044 = vmatprep.subr.msk.mxu1 %vm1763_vm1, %v16258_v32  ;;  %v14431_v54 = vpop.xlane.xlu1 %5177 }
 0x539   : > { %8633 = vrot.lane.b32.xlu0 %v16259_v55, %s12021_s17  ;;  %v16263_v55 = vld [vmem:[#allocation142_spill] sm:$0xff] }
 0x53a   : > { %11035 = vmatmul.mubr.msk.f32.vlgmr.msra.gmra.mxu1 %vm1763_vm1, %v16260_v28 }
 0x53b   : > { %11045 = vmatpush3.xpose.msk.msra.mxu1 %vm1763_vm1, %v16258_v32  ;;  %11048 = vmatprep.mubr.msk.f32.mxu1 %vm1763_vm1, %v16261_v8  ;;  %v14441_v36 = vpop.xlane.xlu0 %5135  ;;  %v16264_v8 = vld [vmem:[#allocation139_spill] sm:$0xff]  ;;  %v14525_v48 = vpop.f32.mrf.mxu0 }
 0x53c   : > { %11046 = vmatprep.subr.msk.mxu1 %vm1763_vm1, %v16262_v31  ;;  %v14445_v42 = vpop.xlane.xlu1 %5183 }
 0x53d   : > { %8720 = vrot.lane.b32.xlu0 %v13142_v33, %s12021_s17  ;;  %v14531_v43 = vpop.f32.mrf.mxu0 }
 0x53e   : > { %16270 = vst [vmem:[#allocation18_spill] sm:$0xff] %v14531_v43 }
 0x53f   : > { %11047 = vmatpush3.xpose.msk.msra.mxu1 %vm1763_vm1, %v16262_v31  ;;  %v14451_v28 = vpop.xlane.xlu0 %5138 }
 0x540   : > { %11058 = vmatprep.subr.msk.mxu1 %vm1763_vm1, %v16263_v55  ;;  %v14455_v32 = vpop.xlane.xlu1 %5147 }
 0x542   : > { %11049 = vmatmul.mubr.msk.f32.vlgmr.msra.gmra.mxu1 %vm1763_vm1, %v16264_v8 }
 0x543   : > { %11059 = vmatpush3.xpose.msk.msra.mxu1 %vm1763_vm1, %v16263_v55  ;;  %11062 = vmatprep.mubr.msk.f32.mxu1 %vm1763_vm1, %v16265_v0  ;;  %v14463_v33 = vpop.xlane.xlu0 %5174  ;;  %v16268_v55 = vld [vmem:[#allocation148_spill] sm:$0xff] }
 0x544   : > { %11060 = vmatprep.subr.msk.mxu1 %vm1763_vm1, %v16266_v41  ;;  %v14467_v31 = vpop.xlane.xlu1 %5189 }
 0x547   : > { %11061 = vmatpush3.xpose.msk.msra.mxu1 %vm1763_vm1, %v16266_v41  ;;  %v14471_v15 = vpop.xlane.xlu0 %5180 }
 0x548   : > { %11072 = vmatprep.subr.msk.mxu1 %vm1763_vm1, %v16267_v20  ;;  %v14475_v8 = vpop.xlane.xlu1 %5153 }
 0x54a   : > { %11063 = vmatmul.mubr.msk.f32.vlgmr.msra.gmra.mxu1 %vm1763_vm1, %v16268_v55 }
 0x54b   : > { %11073 = vmatpush3.xpose.msk.msra.mxu1 %vm1763_vm1, %v16267_v20  ;;  %11076 = vmatprep.mubr.msk.f32.mxu1 %vm1763_vm1, %v7035_v58  ;;  %v14482_v0 = vpop.xlane.xlu0 %5144 }
 0x54c   : > { %11074 = vmatprep.subr.msk.mxu1 %vm1763_vm1, %v16269_v11  ;;  %v14486_v41 = vpop.xlane.xlu1 %5195 }
 0x54f   : > { %11075 = vmatpush3.xpose.msk.msra.mxu1 %vm1763_vm1, %v16269_v11  ;;  %v14490_v18 = vpop.xlane.xlu0 %5186 }
 0x550   : > { %v14492_v24 = vpop.xlane.xlu1 %5159 }
 0x552   : > { %11077 = vmatmul.mubr.msk.f32.vlgmr.msra.gmra.mxu1 %vm1763_vm1, %v7037_v26 }
 0x553   : > { %v14495_v55 = vpop.xlane.xlu0 %5150 }
 0x554   : > { %v14497_v20 = vpop.xlane.xlu1 %5201 }
 0x557   : > { %v14499_v58 = vpop.xlane.xlu0 %5192 }
 0x558   : > { %v14501_v10 = vpop.xlane.xlu1 %5165 }
 0x55b   : > { %v14505_v23 = vpop.xlane.xlu0 %5156 }
 0x55c   : > { %3375 = vadd.xlane.f32.xlu0 %v3374_v5  ;;  %v14507_v11 = vpop.xlane.xlu1 %5207 }
 0x55f   : > { %v14511_v26 = vpop.xlane.xlu0 %5198 }
 0x560   : > { %3378 = vadd.xlane.f32.xlu0 %v3377_v63  ;;  %v14513_v60 = vpop.xlane.xlu1 %5171  ;;  %v3386_v63 = vsel %vm1763_vm1, %v13906_v29, 0.0 }
 0x563   : > { %v14517_v61 = vpop.xlane.xlu0 %5162 }
 0x564   : > { %3381 = vadd.xlane.f32.xlu0 %v3380_v22  ;;  %v14523_v30 = vpop.xlane.xlu1 %5213 }
 0x567   : > { %v14521_v5 = vpop.xlane.xlu0 %5204 }
 0x568   : > { %3384 = vadd.xlane.f32.xlu0 %v3383_v34  ;;  %v14533_v56 = vpop.xlane.xlu1 %5219  ;;  %v14539_v34 = vpop.f32.mrf.mxu0 }
 0x569   : > { %16271 = vst [vmem:[#allocation33_spill] sm:$0xff] %v14539_v34 }
 0x56a   : > { %v14545_v29 = vpop.f32.mrf.mxu0 }
 0x56b   : > { %v14529_v3 = vpop.xlane.xlu0 %5168  ;;  %16272 = vst [vmem:[#allocation19_spill] sm:$0xff] %v14545_v29 }
 0x56c   : > { %3387 = vadd.xlane.f32.xlu0 %v3386_v63  ;;  %v7414_v63 = vpop.permute.xlu1 %7413  ;;  %v14547_v43 = vpop.f32.mrf.mxu0 }
 0x56d   : > { %16273 = vst [vmem:[#allocation35_spill] sm:$0xff] %v14547_v43 }
 0x56e   : > { %v14551_v34 = vpop.f32.mrf.mxu0 }
 0x56f   : > { %v14537_v22 = vpop.xlane.xlu0 %5210  ;;  %16274 = vst [vmem:[#allocation20_spill] sm:$0xff] %v14551_v34 }
 0x570   : > { %3390 = vadd.xlane.f32.xlu0 %v3389_v14  ;;  %v14553_v14 = vpop.permute.xlu1 %7589 }
 0x573   : > { %v14543_v44 = vpop.xlane.xlu0 %5216 }
 0x574   : > { %3393 = vadd.xlane.f32.xlu0 %v3392_v35  ;;  %v14564_v34 = vpop.permute.xlu1 %7676 }
 0x577   : > { %v7416_v39 = vpop.permute.xlu0 %7415 }
 0x578   : > { %3396 = vadd.xlane.f32.xlu0 %v3395_v53  ;;  %11079 = vmatprep.subr.mxu0 %v7416_v39 }
 0x579   : > { %11080 = vmatpush3.msra.mxu0 %v7416_v39 }
 0x57a   : > { %11081 = vmatprep.subr.mxu0 %v7414_v63 }
 0x57b   : > { %11082 = vmatpush3.msra.mxu0 %v7414_v63  ;;  %v7503_v35 = vpop.permute.xlu0 %7502  ;;  %v3404_v63 = vsel %vm1763_vm1, %v13941_v4, 0.0 }
 0x57c   : > { %3399 = vadd.xlane.f32.xlu0 %v3398_v17  ;;  %11086 = vmatprep.subr.mxu1 %v7503_v35  ;;  %v14557_v43 = vpop.f32.mrf.mxu0 }
 0x57d   : > { %16275 = vst [vmem:[#allocation23_spill] sm:$0xff] %v14557_v43  ;;  %11093 = vmatprep.subr.mxu0 %v14553_v14  ;;  %11087 = vmatpush3.msra.mxu1 %v7503_v35 }
 0x57e   : > { %v14562_v39 = vpop.f32.mrf.mxu0 }
 0x57f   : > { %v7501_v53 = vpop.permute.xlu0 %7500  ;;  %16276 = vst [vmem:[#allocation32_spill] sm:$0xff] %v14562_v39 }
 0x580   : > { %3402 = vadd.xlane.f32.xlu0 %v3401_v1  ;;  %11088 = vmatprep.subr.mxu1 %v7501_v53  ;;  %v14567_v50 = vpop.f32.mrf.mxu0  ;;  %v16280_v1 = vld [vmem:[#allocation100_spill] sm:$0xff] }
 0x581   : > { %11089 = vmatpush3.msra.mxu1 %v7501_v53  ;;  %16277 = vst [vmem:[#allocation37_spill] sm:$0xff] %v14567_v50  ;;  %v5503_v43 = vrot.slane %v14441_v36, %v16280_v1  ;;  %v16281_v53 = vld [vmem:[#allocation103_spill] sm:$0xff]  ;;  %v5494_v36 = vrot.slane %v14407_v46, %v16280_v1 }
 0x582   : > { %11100 = vmatprep.subr.mxu1 %v14564_v34  ;;  %v14571_v17 = vpop.f32.mrf.mxu0  ;;  %v5508_v39 = vrot.slane %v14451_v28, %v16281_v53  ;;  %v5490_v50 = vrot.slane %v14417_v51, %v16281_v53  ;;  %v5499_v4 = vrot.slane %v14427_v37, %v16281_v53  ;;  %v5571_v62 = vrot.slane %v14471_v15, %v16281_v53 }
 0x583   : > { %16278 = vst [vmem:[#allocation34_spill] sm:$0xff] %v14571_v17  ;;  %v5575_v28 = vrot.slane %v14445_v42, %v16280_v1  ;;  %v5562_v37 = vrot.slane %v14463_v33, %v16281_v53  ;;  %v5517_v15 = vrot.slane %v14482_v0, %v16281_v53  ;;  %v5580_v42 = vrot.slane %v14490_v18, %v16281_v53 }
 0x584   : > { %3405 = vadd.xlane.f32.xlu0 %v3404_v63  ;;  %v14575_v35 = vpop.f32.mrf.mxu0  ;;  %v5512_v63 = vrot.slane %v14421_v40, %v16280_v1  ;;  %v5495_v40 = vsel %vm1603_vm2, %v5494_v36, %v5490_v50  ;;  %v5521_v33 = vrot.slane %v14455_v32, %v16280_v1  ;;  %v5589_v0 = vrot.slane %v14499_v58, %v16281_v53 }
 0x585   : > { %16279 = vst [vmem:[#allocation25_spill] sm:$0xff] %v14575_v35  ;;  %v5504_v35 = vsel %vm1603_vm2, %v5503_v43, %v5499_v4  ;;  %v5576_v43 = vsel %vm1603_vm2, %v5575_v28, %v5571_v62  ;;  %v5598_v18 = vrot.slane %v14511_v26, %v16281_v53  ;;  %v5593_v32 = vrot.slane %v14486_v41, %v16280_v1 }
 0x586   : > { %v5513_v51 = vsel %vm1603_vm2, %v5512_v63, %v5508_v39  ;;  %v5631_v46 = vsel %vm1740_vm3, %v5504_v35, %v5495_v40  ;;  %v5530_v35 = vrot.slane %v14475_v8, %v16280_v1  ;;  %v5522_v62 = vsel %vm1603_vm2, %v5521_v33, %v5517_v15 }
 0x587   : > { %v5632_v39 = vsel %vm1742_vm4, %v5513_v51, %v5631_v46  ;;  %v5607_v58 = vrot.slane %v14521_v5, %v16281_v53  ;;  %v5602_v8 = vrot.slane %v14497_v20, %v16280_v1  ;;  %v5616_v26 = vrot.slane %v14537_v22, %v16281_v53 }
 0x588   : > { %3408 = vadd.xlane.f32.xlu0 %v3407_v45  ;;  %v14589_v45 = vpop.f32.mrf.mxu0  ;;  %v5594_v28 = vsel %vm1603_vm2, %v5593_v32, %v5589_v0  ;;  %v5535_v41 = vrot.slane %v14505_v23, %v16281_v53  ;;  %v5611_v5 = vrot.slane %v14507_v11, %v16280_v1  ;;  %v5625_v51 = vrot.slane %v14543_v44, %v16281_v53 }
 0x589   : > { %16282 = vst [vmem:[#allocation22_spill] sm:$0xff] %v14589_v45  ;;  %v5566_v45 = vrot.slane %v14431_v54, %v16280_v1  ;;  %v5584_v54 = vrot.slane %v14467_v31, %v16280_v1  ;;  %v5526_v31 = vrot.slane %v14495_v55, %v16281_v53  ;;  %v5539_v55 = vrot.slane %v14492_v24, %v16280_v1 }
 0x58a   : > { %v14608_v4 = vpop.f32.mrf.mxu0  ;;  %v5603_v20 = vsel %vm1603_vm2, %v5602_v8, %v5598_v18  ;;  %v5544_v22 = vrot.slane %v14517_v61, %v16281_v53  ;;  %v5612_v11 = vsel %vm1603_vm2, %v5611_v5, %v5607_v58  ;;  %v5629_v44 = vrot.slane %v14533_v56, %v16280_v1 }
 0x58b   : > { %16283 = vst [vmem:[#allocation86_spill] sm:$0xff] %v14608_v4  ;;  %v5567_v50 = vsel %vm1603_vm2, %v5566_v45, %v5562_v37  ;;  %v5585_v45 = vsel %vm1603_vm2, %v5584_v54, %v5580_v42  ;;  %v5620_v37 = vrot.slane %v14523_v30, %v16280_v1  ;;  %v5553_v24 = vrot.slane %v14529_v3, %v16281_v53 }
 0x58c   : > { %v5638_v63 = vsel %vm1740_vm3, %v5576_v43, %v5567_v50  ;;  %v14635_v36 = vpop.f32.mrf.mxu0  ;;  %v5531_v15 = vsel %vm1603_vm2, %v5530_v35, %v5526_v31  ;;  %v5548_v61 = vrot.slane %v14501_v10, %v16280_v1  ;;  %v14664_v43 = vpop.permute.xlu0 %7587  ;;  %v5540_v42 = vsel %vm1603_vm2, %v5539_v55, %v5535_v41 }
 0x58d   : > { %16284 = vst [vmem:[#allocation39_spill] sm:$0xff] %v14635_v36  ;;  %v5639_v23 = vsel %vm1742_vm4, %v5585_v45, %v5638_v63  ;;  %v5621_v30 = vsel %vm1603_vm2, %v5620_v37, %v5616_v26  ;;  %v5557_v56 = vrot.slane %v14513_v60, %v16280_v1  ;;  %v5630_v3 = vsel %vm1603_vm2, %v5629_v44, %v5625_v51  ;;  %v14704_v55 = vpop.f32.mrf.mxu1 }
 0x58e   : > { %v5640_v46 = vsel %vm1744_vm5, %v5594_v28, %v5639_v23  ;;  %v5633_v53 = vsel %vm1744_vm5, %v5522_v62, %v5632_v39  ;;  %v5549_v0 = vsel %vm1603_vm2, %v5548_v61, %v5544_v22  ;;  %16287 = vst [vmem:[#allocation36_spill] sm:$0xff] %v14704_v55 }
 0x58f   : > { %v5641_v33 = vsel %vm1746_vm6, %v5603_v20, %v5640_v46  ;;  %v5634_v54 = vsel %vm1746_vm6, %v5531_v15, %v5633_v53  ;;  %v5558_v35 = vsel %vm1603_vm2, %v5557_v56, %v5553_v24 }
 0x590   : > { %v5642_v50 = vsel %vm1748_vm7, %v5612_v11, %v5641_v33  ;;  %v5635_v63 = vsel %vm1748_vm7, %v5540_v42, %v5634_v54  ;;  %v14690_v58 = vpop.permute.xlu0 %7674  ;;  %v14715_v11 = vpop.f32.mrf.mxu1 }
 0x591   : > { %v5643_v18 = vsel %vm1750_vm8, %v5621_v30, %v5642_v50  ;;  %v5636_v39 = vsel %vm1750_vm8, %v5549_v0, %v5635_v63 }
 0x592   : > { %v14681_v60 = vsel %vm1752_vm9, %v5630_v3, %v5643_v18  ;;  %v14688_v32 = vsel %vm1752_vm9, %v5558_v35, %v5636_v39  ;;  %v14717_v24 = vpop.f32.mrf.mxu1 }
 0x593   : > { %16289 = vst [vmem:[#allocation27_spill] sm:$0xff] %v14717_v24 }
 0x594   : > { %v14699_v28 = vpop.permute.xlu0 %7761  ;;  %v14729_v33 = vpop.f32.mrf.mxu1 }
 0x595   : > { %16290 = vst [vmem:[#allocation89_spill] sm:$0xff] %v14729_v33 }
 0x596   : > { %v14733_v3 = vpop.f32.mrf.mxu1 }
 0x597   : > { %v14651_v40 = vpop.f32.mrf.mxu0  ;;  %16291 = vst [vmem:[#allocation138_spill] sm:$0xff] %v14733_v3 }
 0x598   : > { %16285 = vst [vmem:[#allocation87_spill] sm:$0xff] %v14651_v40  ;;  %v14713_v23 = vpop.permute.xlu0 %7848  ;;  %v14737_v0 = vpop.f32.mrf.mxu1 }
 0x599   : > { %v14674_v10 = vpop.f32.mrf.mxu0  ;;  %16288 = vst [vmem:[#allocation88_spill] sm:$0xff] %v14713_v23  ;;  %16293 = vst [vmem:[#allocation24_spill] sm:$0xff] %v14737_v0 }
 0x59a   : > { %16286 = vst [vmem:[#allocation136_spill] sm:$0xff] %v14674_v10  ;;  %v14739_v50 = vpop.f32.mrf.mxu1 }
 0x59b   : > { %16294 = vst [vmem:[#allocation90_spill] sm:$0xff] %v14739_v50 }
 0x59c   : > { %v14727_v42 = vpop.permute.xlu0 %7935  ;;  %v14743_v35 = vpop.f32.mrf.mxu1 }
 0x59d   : > { %16296 = vst [vmem:[#allocation91_spill] sm:$0xff] %v14743_v35 }
 0x59e   : > { %v14745_v18 = vpop.f32.mrf.mxu1 }
 0x59f   : > { %v10973_v1 = vpop.f32.mrf.mxu0  ;;  %16297 = vst [vmem:[#allocation140_spill] sm:$0xff] %v14745_v18 }
 0x5a0   : > { %v14685_v62 = vadd.f32 %v10973_v1, %v14681_v60  ;;  %v14735_v53 = vpop.permute.xlu0 %8022  ;;  %v14749_v1 = vpop.f32.mrf.mxu1 }
 0x5a1   : > { %v5721_v45 = vpop.f32.mrf.mxu0  ;;  %16292 = vst [vmem:[#allocation127_spill] sm:$0xff] %v14735_v53  ;;  %16299 = vst [vmem:[#allocation92_spill] sm:$0xff] %v14749_v1 }
 0x5a2   : > { %v14693_v31 = vadd.f32 %v5721_v45, %v14688_v32  ;;  %v7128_v8 = vsel %vm1763_vm1, %v14685_v62, -inf  ;;  %v14751_v39 = vpop.f32.mrf.mxu1 }
 0x5a3   : > { %7129 = vmax.xlane.f32.xlu1 %v7128_v8  ;;  %16300 = vst [vmem:[#allocation29_spill] sm:$0xff] %v14751_v39 }
 0x5a4   : > { %v7125_v26 = vsel %vm1763_vm1, %v14693_v31, -inf  ;;  %v14741_v54 = vpop.permute.xlu0 %8109  ;;  %v14755_v8 = vpop.f32.mrf.mxu1 }
 0x5a5   : > { %7126 = vmax.xlane.f32.xlu0 %v7125_v26  ;;  %16295 = vst [vmem:[#allocation41_spill] sm:$0xff] %v14741_v54  ;;  %16302 = vst [vmem:[#allocation26_spill] sm:$0xff] %v14755_v8 }
 0x5a6   : > { %v14757_v26 = vpop.f32.mrf.mxu1 }
 0x5a7   : > { %v10987_v41 = vpop.f32.mrf.mxu0  ;;  %16303 = vst [vmem:[#allocation43_spill] sm:$0xff] %v14757_v26 }
 0x5a8   : > { %v14702_v5 = vadd.f32 %v10987_v41, %v14681_v60  ;;  %v14747_v63 = vpop.permute.xlu0 %8285 }
 0x5a9   : > { %v5907_v51 = vpop.f32.mrf.mxu0  ;;  %16298 = vst [vmem:[#allocation38_spill] sm:$0xff] %v14747_v63 }
 0x5aa   : > { %v14707_v20 = vadd.f32 %v5907_v51, %v14688_v32  ;;  %v7140_v22 = vsel %vm1763_vm1, %v14702_v5, -inf  ;;  %v14761_v51 = vpop.f32.mrf.mxu1 }
 0x5ab   : > { %7141 = vmax.xlane.f32.xlu1 %v7140_v22  ;;  %16305 = vst [vmem:[#allocation31_spill] sm:$0xff] %v14761_v51 }
 0x5ac   : > { %v7137_v37 = vsel %vm1763_vm1, %v14707_v20, -inf  ;;  %v14753_v45 = vpop.permute.xlu0 %8372 }
 0x5ad   : > { %7138 = vmax.xlane.f32.xlu0 %v7137_v37  ;;  %16301 = vst [vmem:[#allocation93_spill] sm:$0xff] %v14753_v45 }
 0x5af   : > { %v11001_v44 = vpop.f32.mrf.mxu0 }
 0x5b0   : > { %v14720_v15 = vadd.f32 %v11001_v44, %v14681_v60  ;;  %v14759_v41 = vpop.permute.xlu0 %8459 }
 0x5b1   : > { %v6093_v46 = vpop.f32.mrf.mxu0  ;;  %16304 = vst [vmem:[#allocation40_spill] sm:$0xff] %v14759_v41 }
 0x5b2   : > { %v14723_v61 = vadd.f32 %v6093_v46, %v14688_v32  ;;  %v7152_v30 = vsel %vm1763_vm1, %v14720_v15, -inf }
 0x5b3   : > { %7153 = vmax.xlane.f32.xlu1 %v7152_v30 }
 0x5b4   : > { %v7149_v56 = vsel %vm1763_vm1, %v14723_v61, -inf  ;;  %v14765_v37 = vpop.permute.xlu0 %8546 }
 0x5b5   : > { %7150 = vmax.xlane.f32.xlu0 %v7149_v56  ;;  %16307 = vst [vmem:[#allocation45_spill] sm:$0xff] %v14765_v37 }
 0x5b7   : > { %v11015_v44 = vpop.f32.mrf.mxu0 }
 0x5b8   : > { %v14773_v4 = vadd.f32 %v11015_v44, %v14681_v60  ;;  %v14780_v51 = vpop.permute.xlu0 %8633 }
 0x5b9   : > { %v6279_v40 = vpop.f32.mrf.mxu0  ;;  %16309 = vst [vmem:[#allocation94_spill] sm:$0xff] %v14780_v51 }
 0x5bc   : > { %v14799_v1 = vpop.permute.xlu0 %8720 }
 0x5bd   : > { %16310 = vst [vmem:[#allocation42_spill] sm:$0xff] %v14799_v1 }
 0x5bf   : > { %v11029_v36 = vpop.f32.mrf.mxu0 }
 0x5c0   : > { %v14792_v18 = vadd.f32 %v11029_v36, %v14681_v60 }
 0x5c1   : > { %v6465_v44 = vpop.f32.mrf.mxu0 }
 0x5c2   : > { %v14804_v50 = vadd.f32 %v6465_v44, %v14688_v32  ;;  %v7176_v35 = vsel %vm1763_vm1, %v14792_v18, -inf }
 0x5c9   : > { %v11043_v36 = vpop.f32.mrf.mxu0 }
 0x5ca   : > { %v14820_v0 = vadd.f32 %v11043_v36, %v14681_v60 }
 0x5cb   : > { %v6651_v1 = vpop.f32.mrf.mxu0 }
 0x5d1   : > { %v14763_v22 = vpop.f32.mrf.mxu1 }
 0x5d2   : > { %16306 = vst [vmem:[#allocation28_spill] sm:$0xff] %v14763_v22 }
 0x5d3   : > { %v14767_v46 = vpop.f32.mrf.mxu1 }
 0x5d4   : > { %16308 = vst [vmem:[#allocation96_spill] sm:$0xff] %v14767_v46  ;;  %v14782_v46 = vpop.permute.xlu1 %7763 }
 0x5da   : > { %v10980_v30 = vpop.f32.mrf.mxu1 }
 0x5db   : > { %v14770_v56 = vadd.f32 %v10980_v30, %v14681_v60  ;;  %v14785_v30 = vadd.f32 %v6279_v40, %v14688_v32 }
 0x5dc   : > { %v5814_v10 = vpop.f32.mrf.mxu1 }
 0x5dd   : > { %v14776_v26 = vadd.f32 %v5814_v10, %v14688_v32  ;;  %v7134_v22 = vsel %vm1763_vm1, %v14770_v56, -inf  ;;  %v7164_v10 = vsel %vm1763_vm1, %v14773_v4, -inf  ;;  %v7161_v40 = vsel %vm1763_vm1, %v14785_v30, -inf }
 0x5de   : > { %7135 = vmax.xlane.f32.xlu1 %v7134_v22 }
 0x5df   : > { %v7131_v39 = vsel %vm1763_vm1, %v14776_v26, -inf }
 0x5e0   : > { %7132 = vmax.xlane.f32.xlu0 %v7131_v39  ;;  %v14801_v39 = vpop.permute.xlu1 %7850 }
 0x5e1   : > { %16311 = vst [vmem:[#allocation47_spill] sm:$0xff] %v14801_v39 }
 0x5e2   : > { %v10994_v8 = vpop.f32.mrf.mxu1  ;;  %7165 = vmax.xlane.f32.xlu1 %v7164_v10 }
 0x5e3   : > { %v14795_v22 = vadd.f32 %v10994_v8, %v14681_v60 }
 0x5e4   : > { %v6000_v17 = vpop.f32.mrf.mxu1  ;;  %7162 = vmax.xlane.f32.xlu0 %v7161_v40  ;;  %v7173_v40 = vsel %vm1763_vm1, %v14804_v50, -inf  ;;  %v14817_v3 = vpop.permute.xlu1 %7937 }
 0x5e5   : > { %v7146_v10 = vsel %vm1763_vm1, %v14795_v22, -inf  ;;  %v14809_v8 = vadd.f32 %v6000_v17, %v14688_v32  ;;  %v14813_v37 = vpop.xlane.xlu0 %3375 }
 0x5e6   : > { %7147 = vmax.xlane.f32.xlu1 %v7146_v10 }
 0x5e7   : > { %v7143_v10 = vsel %vm1763_vm1, %v14809_v8, -inf }
 0x5e8   : > { %7177 = vmax.xlane.f32.xlu0 %v7176_v35  ;;  %v14828_v35 = vadd.f32 %v6651_v1, %v14688_v32  ;;  %v14839_v51 = vpop.permute.xlu1 %8024  ;;  %v11057_v1 = vpop.f32.mrf.mxu0 }
 0x5e9   : > { %16312 = vst [vmem:[#allocation154_spill] sm:$0xff] %v14839_v51 }
 0x5ea   : > { %v11008_v44 = vpop.f32.mrf.mxu1  ;;  %7174 = vmax.xlane.f32.xlu1 %v7173_v40  ;;  %v14832_v40 = vpop.xlane.xlu0 %3378 }
 0x5eb   : > { %v14823_v17 = vadd.f32 %v11008_v44, %v14681_v60  ;;  %v7188_v44 = vsel %vm1763_vm1, %v14820_v0, -inf  ;;  %v6837_v41 = vpop.f32.mrf.mxu0  ;;  %11511 = vrcp.f32 %v14832_v40  ;;  %v3419_v40 = vsel %vm1763_vm1, %v13979_v12, 0.0 }
 0x5ec   : > { %v6186_v45 = vpop.f32.mrf.mxu1  ;;  %7144 = vmax.xlane.f32.xlu0 %v7143_v10  ;;  %v7185_v10 = vsel %vm1763_vm1, %v14828_v35, -inf  ;;  %v14860_v29 = vpop.permute.xlu1 %8111  ;;  %v14863_v63 = vadd.f32 %v6837_v41, %v14688_v32 }
 0x5ed   : > { %v7158_v53 = vsel %vm1763_vm1, %v14823_v17, -inf  ;;  %v14835_v36 = vadd.f32 %v6186_v45, %v14688_v32 }
 0x5ee   : > { %7159 = vmax.xlane.f32.xlu1 %v7158_v53  ;;  %v14848_v45 = vpop.xlane.xlu0 %3381  ;;  %16316 = vst [vmem:[#allocation95_spill] sm:$0xff] %v14863_v63  ;;  %v7197_v41 = vsel %vm1763_vm1, %v14863_v63, -inf }
 0x5ef   : > { %v7155_v53 = vsel %vm1763_vm1, %v14835_v36, -inf }
 0x5f0   : > { %7189 = vmax.xlane.f32.xlu0 %v7188_v44  ;;  %v14879_v39 = vpop.permute.xlu1 %8198 }
 0x5f1   : > { %16319 = vst [vmem:[#allocation44_spill] sm:$0xff] %v14879_v39 }
 0x5f2   : > { %v11022_v24 = vpop.f32.mrf.mxu1  ;;  %7186 = vmax.xlane.f32.xlu1 %v7185_v10  ;;  %v14856_v10 = vadd.f32 %v11057_v1, %v14681_v60  ;;  %v14867_v54 = vpop.xlane.xlu0 %3384 }
 0x5f3   : > { %v14844_v33 = vadd.f32 %v11022_v24, %v14681_v60  ;;  %v3410_v24 = vsel %vm1763_vm1, %v14065_v13, 0.0 }
 0x5f4   : > { %v6372_v23 = vpop.f32.mrf.mxu1  ;;  %7156 = vmax.xlane.f32.xlu0 %v7155_v53  ;;  %16315 = vst [vmem:[#allocation97_spill] sm:$0xff] %v14856_v10  ;;  %v11071_v53 = vpop.f32.mrf.mxu0  ;;  %v7200_v13 = vsel %vm1763_vm1, %v14856_v10, -inf }
 0x5f5   : > { %16313 = vst [vmem:[#allocation99_spill] sm:$0xff] %v14844_v33  ;;  %v14851_v44 = vadd.f32 %v6372_v23, %v14688_v32  ;;  %v7170_v51 = vsel %vm1763_vm1, %v14844_v33, -inf }
 0x5f6   : > { %7171 = vmax.xlane.f32.xlu1 %v7170_v51  ;;  %v14886_v33 = vpop.xlane.xlu0 %3387 }
 0x5f7   : > { %16314 = vst [vmem:[#allocation30_spill] sm:$0xff] %v14851_v44  ;;  %v7167_v23 = vsel %vm1763_vm1, %v14851_v44, -inf  ;;  %v7023_v44 = vpop.f32.mrf.mxu0 }
 0x5f8   : > { %3411 = vadd.xlane.f32.xlu0 %v3410_v24 }
 0x5fa   : > { %v11036_v55 = vpop.f32.mrf.mxu1  ;;  %7168 = vmax.xlane.f32.xlu1 %v7167_v23  ;;  %v14882_v23 = vadd.f32 %v11071_v53, %v14681_v60  ;;  %v14905_v10 = vpop.xlane.xlu0 %3390 }
 0x5fb   : > { %v14870_v51 = vadd.f32 %v11036_v55, %v14681_v60 }
 0x5fc   : > { %v6558_v1 = vpop.f32.mrf.mxu1  ;;  %7201 = vmax.xlane.f32.xlu0 %v7200_v13  ;;  %16320 = vst [vmem:[#allocation108_spill] sm:$0xff] %v14882_v23  ;;  %v14889_v13 = vadd.f32 %v7023_v44, %v14688_v32  ;;  %v7212_v53 = vsel %vm1763_vm1, %v14882_v23, -inf }
 0x5fd   : > { %16317 = vst [vmem:[#allocation107_spill] sm:$0xff] %v14870_v51  ;;  %v14875_v24 = vadd.f32 %v6558_v1, %v14688_v32  ;;  %v7182_v55 = vsel %vm1763_vm1, %v14870_v51, -inf }
 0x5fe   : > { %7198 = vmax.xlane.f32.xlu1 %v7197_v41  ;;  %16321 = vst [vmem:[#allocation46_spill] sm:$0xff] %v14889_v13  ;;  %v14898_v41 = vpop.permute.xlu1 %8196  ;;  %v7209_v44 = vsel %vm1763_vm1, %v14889_v13, -inf }
 0x5ff   : > { %16318 = vst [vmem:[#allocation105_spill] sm:$0xff] %v14875_v24  ;;  %v7179_v1 = vsel %vm1763_vm1, %v14875_v24, -inf  ;;  %16323 = vst [vmem:[#allocation109_spill] sm:$0xff] %v14898_v41 }
 0x600   : > { %7183 = vmax.xlane.f32.xlu0 %v7182_v55 }
 0x602   : > { %v11050_v63 = vpop.f32.mrf.mxu1  ;;  %7180 = vmax.xlane.f32.xlu1 %v7179_v1  ;;  %v14911_v23 = vpop.permute.xlu1 %8283 }
 0x603   : > { %v14894_v39 = vadd.f32 %v11050_v63, %v14681_v60  ;;  %16325 = vst [vmem:[#allocation110_spill] sm:$0xff] %v14911_v23 }
 0x604   : > { %v6744_v51 = vpop.f32.mrf.mxu1  ;;  %7213 = vmax.xlane.f32.xlu0 %v7212_v53  ;;  %v14916_v53 = vpop.xlane.xlu0 %3393 }
 0x605   : > { %16322 = vst [vmem:[#allocation106_spill] sm:$0xff] %v14894_v39  ;;  %v14901_v55 = vadd.f32 %v6744_v51, %v14688_v32  ;;  %v7194_v63 = vsel %vm1763_vm1, %v14894_v39, -inf }
 0x606   : > { %7210 = vmax.xlane.f32.xlu1 %v7209_v44 }
 0x607   : > { %16324 = vst [vmem:[#allocation77_spill] sm:$0xff] %v14901_v55  ;;  %v7191_v1 = vsel %vm1763_vm1, %v14901_v55, -inf  ;;  %v14925_v55 = vpop.permute.xlu1 %8370 }
 0x608   : > { %7195 = vmax.xlane.f32.xlu0 %v7194_v63  ;;  %16327 = vst [vmem:[#allocation117_spill] sm:$0xff] %v14925_v55 }
 0x60a   : > { %v11064_v41 = vpop.f32.mrf.mxu1  ;;  %7192 = vmax.xlane.f32.xlu1 %v7191_v1  ;;  %v14927_v1 = vpop.xlane.xlu0 %3396 }
 0x60b   : > { %v14914_v51 = vadd.f32 %v11064_v41, %v14681_v60 }
 0x60c   : > { %v6930_v13 = vpop.f32.mrf.mxu1 }
 0x60d   : > { %16326 = vst [vmem:[#allocation83_spill] sm:$0xff] %v14914_v51  ;;  %v14919_v24 = vadd.f32 %v6930_v13, %v14688_v32  ;;  %v7206_v44 = vsel %vm1763_vm1, %v14914_v51, -inf }
 0x60e   : > { %7207 = vmax.xlane.f32.xlu0 %v7206_v44  ;;  %v14937_v44 = vpop.permute.xlu1 %8457  ;;  %v14942_v55 = vpop.xlane.xlu0 %3399 }
 0x60f   : > { %v7203_v63 = vsel %vm1763_vm1, %v14919_v24, -inf }
 0x610   : > { %7204 = vmax.xlane.f32.xlu1 %v7203_v63 }
 0x612   : > { %v11078_v41 = vpop.f32.mrf.mxu1 }
 0x613   : > { %v14930_v39 = vadd.f32 %v11078_v41, %v14681_v60  ;;  %v3413_v60 = vsel %vm1763_vm1, %v14070_v2, 0.0  ;;  %v14950_v41 = vpop.xlane.xlu0 %3402  ;;  %v3422_v2 = vsel %vm1763_vm1, %v14074_v19, 0.0 }
 0x614   : > { %v7116_v23 = vpop.f32.mrf.mxu1 }
 0x615   : > { %16328 = vst [vmem:[#allocation115_spill] sm:$0xff] %v14930_v39  ;;  %v14933_v13 = vadd.f32 %v7116_v23, %v14688_v32  ;;  %v7218_v51 = vsel %vm1763_vm1, %v14930_v39, -inf  ;;  %v14946_v32 = vpop.permute.xlu1 %8544  ;;  %v3416_v23 = vsel %vm1763_vm1, %v13975_v57, 0.0  ;;  %v3425_v57 = vsel %vm1763_vm1, %v14088_v9, 0.0 }
 0x616   : > { %7219 = vmax.xlane.f32.xlu0 %v7218_v51  ;;  %16330 = vst [vmem:[#allocation116_spill] sm:$0xff] %v14946_v32 }
 0x617   : > { %16329 = vst [vmem:[#allocation118_spill] sm:$0xff] %v14933_v13  ;;  %v7215_v63 = vsel %vm1763_vm1, %v14933_v13, -inf  ;;  %v11512_v13 = vpop.eup %11511 }
 0x618   : > { %7216 = vmax.xlane.f32.xlu1 %v7215_v63  ;;  %v14956_v63 = vpop.xlane.xlu0 %3405 }
 0x619   : > { %v14954_v51 = vpop.permute.xlu1 %8631 }
 0x61a   : > { %3414 = vadd.xlane.f32.xlu0 %v3413_v60  ;;  %v4895_v60 = vmul.f32 %v11512_v13, %v14525_v48 }
 0x61c   : > { %v14966_v12 = vpop.xlane.xlu0 %3408 }
 0x61d   : > { %v14961_v32 = vpop.permute.xlu1 %8718 }
 0x61e   : > { %3417 = vadd.xlane.f32.xlu0 %v3416_v23 }
 0x622   : > { %3420 = vadd.xlane.f32.xlu0 %v3419_v40  ;;  %v3428_v40 = vsel %vm1763_vm1, %v14013_v52, 0.0 }
 0x626   : > { %3423 = vadd.xlane.f32.xlu0 %v3422_v2 }
 0x629   : > { %4960 = vrot.lane.b32.xlu1 %v4895_v60, %s12017_s10  ;;  %v3431_v60 = vsel %vm1763_vm1, %v14017_v7, 0.0 }
 0x62a   : > { %3426 = vadd.xlane.f32.xlu0 %v3425_v57  ;;  %v3434_v57 = vsel %vm1763_vm1, %v14091_v25, 0.0 }
 0x62c   : > { %v7130_v23 = vpop.xlane.xlu1 %7129 }
 0x62d   : > { %v7222_v39 = vsub.f32 %v14685_v62, %v7130_v23 }
 0x62e   : > { %3429 = vadd.xlane.f32.xlu0 %v3428_v40  ;;  %v7127_v19 = vpop.xlane.xlu0 %7126 }
 0x62f   : > { %v7221_v48 = vsub.f32 %v14693_v31, %v7127_v19  ;;  %v7255_v13 = vmul.f32 1.442695, %v7222_v39  ;;  %v3437_v39 = vsel %vm1763_vm1, %v14107_v38, 0.0  ;;  %v3440_v19 = vsel %vm1763_vm1, %v14044_v47, 0.0 }
 0x630   : > { %v3443_v38 = vsel %vm1763_vm1, %v14046_v59, 0.0  ;;  %v3446_v47 = vsel %vm1763_vm1, %v14110_v49, 0.0  ;;  %v3452_v49 = vsel %vm1763_vm1, %v14175_v27, 0.0  ;;  %v3458_v27 = vsel %vm1763_vm1, %v14157_v6, 0.0 }
 0x631   : > { %v7253_v2 = vmul.f32 1.442695, %v7221_v48 }
 0x632   : > { %3432 = vadd.xlane.f32.xlu0 %v3431_v60 }
 0x633   : > { %11513 = vpow2.f32 %v7253_v2 }
 0x634   : > { %11515 = vpow2.f32 %v7255_v13  ;;  %v7142_v9 = vpop.xlane.xlu1 %7141 }
 0x635   : > { %v7226_v52 = vsub.f32 %v14702_v5, %v7142_v9 }
 0x636   : > { %3435 = vadd.xlane.f32.xlu0 %v3434_v57  ;;  %v7139_v62 = vpop.xlane.xlu0 %7138  ;;  %v16333_v57 = vld [vmem:[#allocation21_spill] sm:$0xff] }
 0x637   : > { %v7225_v23 = vsub.f32 %v14707_v20, %v7139_v62  ;;  %v7263_v40 = vmul.f32 1.442695, %v7226_v52  ;;  %v3467_v52 = vsel %vm1763_vm1, %v16333_v57, 0.0 }
 0x639   : > { %v7261_v31 = vmul.f32 1.442695, %v7225_v23 }
 0x63a   : > { %3438 = vadd.xlane.f32.xlu0 %v3437_v39 }
 0x63b   : > { %11517 = vpow2.f32 %v7261_v31 }
 0x63c   : > { %11519 = vpow2.f32 %v7263_v40  ;;  %v7154_v7 = vpop.xlane.xlu1 %7153 }
 0x63d   : > { %v7230_v25 = vsub.f32 %v14720_v15, %v7154_v7 }
 0x63e   : > { %3441 = vadd.xlane.f32.xlu0 %v3440_v19  ;;  %v7151_v5 = vpop.xlane.xlu0 %7150 }
 0x63f   : > { %v7229_v48 = vsub.f32 %v14723_v61, %v7151_v5  ;;  %v7271_v20 = vmul.f32 1.442695, %v7230_v25  ;;  %v3449_v61 = vsel %vm1763_vm1, %v14127_v16, 0.0 }
 0x640   : > { %v14984_v13 = vpop.eup %11513 }
 0x641   : > { %v11516_v2 = vpop.eup %11515  ;;  %v7269_v60 = vmul.f32 1.442695, %v7229_v48  ;;  %11083 = vmatprep.mubr.msk.f32.mxu0 %vm1763_vm1, %v14984_v13 }
 0x642   : > { %3444 = vadd.xlane.f32.xlu0 %v3443_v38  ;;  %11084 = vmatmul.mubr.msk.f32.vlgmr.msra.gmra.mxu0 %vm1763_vm1, %v11516_v2 }
 0x643   : > { %11521 = vpow2.f32 %v7269_v60  ;;  %11094 = vmatpush3.msra.mxu0 %v14553_v14 }
 0x644   : > { %11523 = vpow2.f32 %v7271_v20  ;;  %11095 = vmatprep.subr.mxu0 %v14664_v43 }
 0x645   : > { %11096 = vmatpush3.msra.mxu0 %v14664_v43  ;;  %v3455_v43 = vsel %vm1763_vm1, %v14182_v21, 0.0  ;;  %v16331_v21 = vld [vmem:[#allocation17_spill] sm:$0xff]  ;;  %11525 = vrcp.f32 %v14813_v37 }
 0x646   : > { %3447 = vadd.xlane.f32.xlu0 %v3446_v47  ;;  %11107 = vmatprep.subr.mxu0 %v14782_v46  ;;  %11527 = vrcp.f32 %v14848_v45 }
 0x648   : > { %v14997_v59 = vpop.eup %11517 }
 0x649   : > { %v14999_v15 = vpop.eup %11519  ;;  %11097 = vmatprep.mubr.msk.f32.mxu0 %vm1763_vm1, %v14997_v59 }
 0x64a   : > { %3450 = vadd.xlane.f32.xlu0 %v3449_v61  ;;  %11098 = vmatmul.mubr.msk.f32.vlgmr.msra.gmra.mxu0 %vm1763_vm1, %v14999_v15 }
 0x64b   : > { %11108 = vmatpush3.msra.mxu0 %v14782_v46  ;;  %v16332_v46 = vld [vmem:[#allocation16_spill] sm:$0xff] }
 0x64c   : > { %11109 = vmatprep.subr.mxu0 %v14699_v28  ;;  %v3464_v9 = vsel %vm1763_vm1, %v16332_v46, 0.0 }
 0x64d   : > { %11110 = vmatpush3.msra.mxu0 %v14699_v28  ;;  %v3461_v28 = vsel %vm1763_vm1, %v16331_v21, 0.0 }
 0x64e   : > { %3453 = vadd.xlane.f32.xlu0 %v3452_v49  ;;  %11121 = vmatprep.subr.mxu0 %v14817_v3 }
 0x650   : > { %v15013_v16 = vpop.eup %11521 }
 0x651   : > { %v15015_v14 = vpop.eup %11523  ;;  %11111 = vmatprep.mubr.msk.f32.mxu0 %vm1763_vm1, %v15013_v16 }
 0x652   : > { %3456 = vadd.xlane.f32.xlu0 %v3455_v43  ;;  %11112 = vmatmul.mubr.msk.f32.vlgmr.msra.gmra.mxu0 %vm1763_vm1, %v15015_v14  ;;  %v11526_v47 = vpop.eup %11525 }
 0x653   : > { %11122 = vmatpush3.msra.mxu0 %v14817_v3  ;;  %v7320_v3 = vsel %vm1763_vm1, %v11516_v2, 0.0  ;;  %v11528_v43 = vpop.eup %11527 }
 0x654   : > { %11123 = vmatprep.subr.mxu0 %v14727_v42 }
 0x655   : > { %11124 = vmatpush3.msra.mxu0 %v14727_v42 }
 0x656   : > { %3459 = vadd.xlane.f32.xlu0 %v3458_v27  ;;  %11135 = vmatprep.subr.mxu0 %v14860_v29 }
 0x65a   : > { %3462 = vadd.xlane.f32.xlu0 %v3461_v28 }
 0x65e   : > { %3465 = vadd.xlane.f32.xlu0 %v3464_v9 }
 0x662   : > { %7321 = vadd.xlane.f32.xlu0 %v7320_v3 }
 0x666   : > { %3468 = vadd.xlane.f32.xlu0 %v3467_v52 }
 0x667   : > { %v7136_v6 = vpop.xlane.xlu1 %7135 }
 0x668   : > { %v7224_v42 = vsub.f32 %v14770_v56, %v7136_v6 }
 0x669   : > { %v7133_v62 = vpop.xlane.xlu0 %7132 }
 0x66a   : > { %v7223_v23 = vsub.f32 %v14776_v26, %v7133_v62  ;;  %v7259_v40 = vmul.f32 1.442695, %v7224_v42  ;;  %v16337_v62 = vld [vmem:[#allocation36_spill] sm:$0xff] }
 0x66b   : > { %v7166_v31 = vpop.xlane.xlu1 %7165 }
 0x66c   : > { %v7257_v39 = vmul.f32 1.442695, %v7223_v23  ;;  %v7234_v7 = vsub.f32 %v14773_v4, %v7166_v31 }
 0x66d   : > { %v7163_v19 = vpop.xlane.xlu0 %7162 }
 0x66e   : > { %11529 = vpow2.f32 %v7257_v39  ;;  %v7233_v25 = vsub.f32 %v14785_v30, %v7163_v19  ;;  %v7279_v48 = vmul.f32 1.442695, %v7234_v7  ;;  %v16338_v39 = vld [vmem:[#allocation41_spill] sm:$0xff]  ;;  %v16339_v7 = vld [vmem:[#allocation30_spill] sm:$0xff] }
 0x66f   : > { %11531 = vpow2.f32 %v7259_v40  ;;  %v7148_v5 = vpop.xlane.xlu1 %7147 }
 0x670   : > { %v7277_v56 = vmul.f32 1.442695, %v7233_v25  ;;  %11533 = vrcp.f32 %v14867_v54  ;;  %v7228_v4 = vsub.f32 %v14795_v22, %v7148_v5  ;;  %v16334_v22 = vld [vmem:[#allocation18_spill] sm:$0xff] }
 0x671   : > { %v7178_v37 = vpop.xlane.xlu0 %7177  ;;  %v4894_v27 = vmul.f32 %v11526_v47, %v16334_v22 }
 0x672   : > { %11535 = vpow2.f32 %v7277_v56  ;;  %v7238_v26 = vsub.f32 %v14792_v18, %v7178_v37  ;;  %v7267_v61 = vmul.f32 1.442695, %v7228_v4  ;;  %v16340_v37 = vld [vmem:[#allocation38_spill] sm:$0xff]  ;;  %v16342_v4 = vld [vmem:[#allocation19_spill] sm:$0xff] }
 0x673   : > { %v7175_v20 = vpop.xlane.xlu1 %7174  ;;  %11537 = vpow2.f32 %v7279_v48 }
 0x674   : > { %v7237_v45 = vsub.f32 %v14804_v50, %v7175_v20  ;;  %v7287_v2 = vmul.f32 1.442695, %v7238_v26  ;;  %11539 = vrcp.f32 %v14886_v33  ;;  %v16341_v26 = vld [vmem:[#allocation97_spill] sm:$0xff] }
 0x675   : > { %v7145_v60 = vpop.xlane.xlu0 %7144  ;;  %11541 = vrcp.f32 %v14905_v10 }
 0x676   : > { %v7285_v30 = vmul.f32 1.442695, %v7237_v45  ;;  %v7227_v38 = vsub.f32 %v14809_v8, %v7145_v60 }
 0x677   : > { %v7160_v54 = vpop.xlane.xlu1 %7159 }
 0x678   : > { %11543 = vpow2.f32 %v7285_v30  ;;  %v7265_v18 = vmul.f32 1.442695, %v7227_v38  ;;  %v7232_v8 = vsub.f32 %v14823_v17, %v7160_v54  ;;  %v16343_v30 = vld [vmem:[#allocation95_spill] sm:$0xff]  ;;  %v16344_v54 = vld [vmem:[#allocation110_spill] sm:$0xff] }
 0x679   : > { %11545 = vpow2.f32 %v7287_v2  ;;  %v7190_v49 = vpop.xlane.xlu0 %7189 }
 0x67a   : > { %11547 = vpow2.f32 %v7265_v18  ;;  %v7242_v50 = vsub.f32 %v14820_v0, %v7190_v49  ;;  %v7275_v6 = vmul.f32 1.442695, %v7232_v8  ;;  %v16345_v49 = vld [vmem:[#allocation107_spill] sm:$0xff] }
 0x67b   : > { %v15051_v21 = vpop.eup %11529  ;;  %v7187_v33 = vpop.xlane.xlu1 %7186  ;;  %11549 = vpow2.f32 %v7267_v61 }
 0x67c   : > { %v15053_v28 = vpop.eup %11531  ;;  %v7241_v10 = vsub.f32 %v14828_v35, %v7187_v33  ;;  %4958 = vrot.lane.b32.xlu0 %v4894_v27, %s12017_s10  ;;  %11090 = vmatprep.mubr.msk.f32.mxu1 %vm1763_vm1, %v15051_v21  ;;  %v7295_v46 = vmul.f32 1.442695, %v7242_v50  ;;  %11551 = vrcp.f32 %v14916_v53  ;;  %v4896_v35 = vmul.f32 %v11528_v43, %v14715_v11  ;;  %v16336_v11 = vld [vmem:[#allocation47_spill] sm:$0xff]  ;;  %v16346_v50 = vld [vmem:[#allocation33_spill] sm:$0xff]  ;;  %v16347_v33 = vld [vmem:[#allocation40_spill] sm:$0xff] }
 0x67d   : > { %11091 = vmatmul.mubr.msk.f32.vlgmr.msra.gmra.mxu1 %vm1763_vm1, %v15053_v28  ;;  %v7157_v0 = vpop.xlane.xlu0 %7156  ;;  %v11534_v9 = vpop.eup %11533  ;;  %11553 = vrcp.f32 %v14927_v1 }
 0x67e   : > { %v7293_v3 = vmul.f32 1.442695, %v7241_v10  ;;  %11101 = vmatpush3.msra.mxu1 %v14564_v34  ;;  %v7231_v17 = vsub.f32 %v14835_v36, %v7157_v0  ;;  %v16335_v34 = vld [vmem:[#allocation99_spill] sm:$0xff] }
 0x67f   : > { %v15066_v57 = vpop.eup %11535  ;;  %11102 = vmatprep.subr.mxu1 %v14690_v58  ;;  %v7172_v52 = vpop.xlane.xlu1 %7171 }
 0x680   : > { %11555 = vpow2.f32 %v7293_v3  ;;  %v7273_v42 = vmul.f32 1.442695, %v7231_v17  ;;  %11103 = vmatpush3.msra.mxu1 %v14690_v58  ;;  %4962 = vrot.lane.b32.xlu0 %v4896_v35, %s12017_s10  ;;  %v15072_v53 = vpop.eup %11537  ;;  %v7236_v36 = vsub.f32 %v16335_v34, %v7172_v52  ;;  %v4897_v58 = vmul.f32 %v11534_v9, %v16337_v62 }
 0x681   : > { %11557 = vpow2.f32 %v7295_v46  ;;  %11114 = vmatprep.subr.mxu1 %v16336_v11  ;;  %11125 = vmatprep.mubr.msk.f32.mxu0 %vm1763_vm1, %v15066_v57  ;;  %v15078_v1 = vpop.xlane.xlu0 %3411  ;;  %v11540_v23 = vpop.eup %11539  ;;  %v16348_v46 = vld [vmem:[#allocation88_spill] sm:$0xff] }
 0x682   : > { %11559 = vpow2.f32 %v7273_v42  ;;  %11126 = vmatmul.mubr.msk.f32.vlgmr.msra.gmra.mxu0 %vm1763_vm1, %v15072_v53  ;;  %v11542_v31 = vpop.eup %11541  ;;  %v7283_v5 = vmul.f32 1.442695, %v7236_v36  ;;  %v4898_v45 = vmul.f32 %v11540_v23, %v16342_v4  ;;  %v16351_v42 = vld [vmem:[#allocation108_spill] sm:$0xff]  ;;  %v16352_v36 = vld [vmem:[#allocation89_spill] sm:$0xff]  ;;  %v16353_v23 = vld [vmem:[#allocation46_spill] sm:$0xff] }
 0x683   : > { %11136 = vmatpush3.msra.mxu0 %v14860_v29  ;;  %v7169_v40 = vpop.xlane.xlu1 %7168  ;;  %11561 = vpow2.f32 %v7275_v6  ;;  %v4899_v22 = vmul.f32 %v11542_v31, %v16346_v50  ;;  %v16350_v6 = vld [vmem:[#allocation154_spill] sm:$0xff]  ;;  %v16357_v4 = vld [vmem:[#allocation127_spill] sm:$0xff] }
 0x684   : > { %11137 = vmatprep.subr.mxu0 %v16338_v39  ;;  %v7235_v19 = vsub.f32 %v16339_v7, %v7169_v40  ;;  %4964 = vrot.lane.b32.xlu0 %v4897_v58, %s12017_s10  ;;  %11563 = vrcp.f32 %v14942_v55 }
 0x685   : > { %v15087_v25 = vpop.eup %11543  ;;  %11138 = vmatpush3.msra.mxu0 %v16338_v39  ;;  %v7202_v48 = vpop.xlane.xlu0 %7201 }
 0x686   : > { %v15090_v56 = vpop.eup %11545  ;;  %v7281_v29 = vmul.f32 1.442695, %v7235_v19  ;;  %11149 = vmatprep.subr.mxu0 %v16340_v37  ;;  %v7246_v20 = vsub.f32 %v16341_v26, %v7202_v48  ;;  %11139 = vmatprep.mubr.msk.f32.mxu0 %vm1763_vm1, %v15087_v25  ;;  %v16354_v19 = vld [vmem:[#allocation106_spill] sm:$0xff]  ;;  %v16355_v48 = vld [vmem:[#allocation27_spill] sm:$0xff] }
 0x687   : > { %v15098_v2 = vpop.eup %11547  ;;  %v7199_v60 = vpop.xlane.xlu1 %7198  ;;  %11140 = vmatmul.mubr.msk.f32.vlgmr.msra.gmra.mxu0 %vm1763_vm1, %v15090_v56  ;;  %v16356_v26 = vld [vmem:[#allocation94_spill] sm:$0xff] }
 0x688   : > { %11565 = vpow2.f32 %v7281_v29  ;;  %v7245_v38 = vsub.f32 %v16343_v30, %v7199_v60  ;;  %11150 = vmatpush3.msra.mxu0 %v16340_v37  ;;  %4966 = vrot.lane.b32.xlu0 %v4898_v45, %s12017_s10  ;;  %v15105_v55 = vpop.eup %11549  ;;  %v7303_v47 = vmul.f32 1.442695, %v7246_v20 }
 0x689   : > { %11567 = vpow2.f32 %v7283_v5  ;;  %11104 = vmatprep.mubr.msk.f32.mxu1 %vm1763_vm1, %v15098_v2  ;;  %11151 = vmatprep.subr.mxu0 %v16344_v54  ;;  %v7184_v61 = vpop.xlane.xlu0 %7183  ;;  %v11552_v27 = vpop.eup %11551 }
 0x68a   : > { %11569 = vrcp.f32 %v14950_v41  ;;  %v7301_v18 = vmul.f32 1.442695, %v7245_v38  ;;  %11105 = vmatmul.mubr.msk.f32.vlgmr.msra.gmra.mxu1 %vm1763_vm1, %v15105_v55  ;;  %11152 = vmatpush3.msra.mxu0 %v16344_v54  ;;  %v7240_v43 = vsub.f32 %v16345_v49, %v7184_v61  ;;  %v11554_v10 = vpop.eup %11553  ;;  %v16349_v41 = vld [vmem:[#allocation105_spill] sm:$0xff]  ;;  %v16360_v54 = vld [vmem:[#allocation20_spill] sm:$0xff] }
 0x68b   : > { %11115 = vmatpush3.msra.mxu1 %v16336_v11  ;;  %11163 = vmatprep.subr.mxu0 %v16347_v33  ;;  %v7181_v8 = vpop.xlane.xlu1 %7180  ;;  %v4900_v11 = vmul.f32 %v11552_v27, %v16352_v36  ;;  %v4901_v29 = vmul.f32 %v11554_v10, %v16355_v48  ;;  %v16363_v10 = vld [vmem:[#allocation35_spill] sm:$0xff] }
 0x68c   : > { %11571 = vpow2.f32 %v7301_v18  ;;  %11116 = vmatprep.subr.mxu1 %v16348_v46  ;;  %v7239_v0 = vsub.f32 %v16349_v41, %v7181_v8  ;;  %4968 = vrot.lane.b32.xlu0 %v4899_v22, %s12017_s10  ;;  %v7291_v3 = vmul.f32 1.442695, %v7240_v43  ;;  %v16361_v43 = vld [vmem:[#allocation83_spill] sm:$0xff]  ;;  %v16362_v22 = vld [vmem:[#allocation109_spill] sm:$0xff] }
 0x68d   : > { %v15121_v9 = vpop.eup %11555  ;;  %11573 = vpow2.f32 %v7303_v47  ;;  %11117 = vmatpush3.msra.mxu1 %v16348_v46  ;;  %v7214_v17 = vpop.xlane.xlu0 %7213  ;;  %v16359_v47 = vld [vmem:[#allocation44_spill] sm:$0xff] }
 0x68e   : > { %v15124_v35 = vpop.eup %11557  ;;  %11575 = vrcp.f32 %v14956_v63  ;;  %v7289_v52 = vmul.f32 1.442695, %v7239_v0  ;;  %11128 = vmatprep.subr.mxu1 %v16350_v6  ;;  %v7250_v34 = vsub.f32 %v16351_v42, %v7214_v17  ;;  %11153 = vmatprep.mubr.msk.f32.mxu0 %vm1763_vm1, %v15121_v9 }
 0x68f   : > { %v15132_v62 = vpop.eup %11559  ;;  %v7211_v58 = vpop.xlane.xlu1 %7210  ;;  %11154 = vmatmul.mubr.msk.f32.vlgmr.msra.gmra.mxu0 %vm1763_vm1, %v15124_v35 }
 0x690   : > { %11577 = vpow2.f32 %v7289_v52  ;;  %v7249_v40 = vsub.f32 %v16353_v23, %v7211_v58  ;;  %11164 = vmatpush3.msra.mxu0 %v16347_v33  ;;  %4970 = vrot.lane.b32.xlu0 %v4900_v11, %s12017_s10  ;;  %v15139_v63 = vpop.eup %11561  ;;  %v7311_v31 = vmul.f32 1.442695, %v7250_v34  ;;  %v16366_v11 = vld [vmem:[#allocation115_spill] sm:$0xff] }
 0x691   : > { %11579 = vpow2.f32 %v7291_v3  ;;  %11118 = vmatprep.mubr.msk.f32.mxu1 %vm1763_vm1, %v15132_v62  ;;  %11165 = vmatprep.subr.mxu0 %v14937_v44  ;;  %v7196_v39 = vpop.xlane.xlu0 %7195  ;;  %v11564_v37 = vpop.eup %11563  ;;  %v16364_v3 = vld [vmem:[#allocation93_spill] sm:$0xff] }
 0x692   : > { %11581 = vrcp.f32 %v14966_v12  ;;  %v7309_v7 = vmul.f32 1.442695, %v7249_v40  ;;  %11119 = vmatmul.mubr.msk.f32.vlgmr.msra.gmra.mxu1 %vm1763_vm1, %v15139_v63  ;;  %11166 = vmatpush3.msra.mxu0 %v14937_v44  ;;  %v7244_v5 = vsub.f32 %v16354_v19, %v7196_v39  ;;  %v16358_v12 = vld [vmem:[#allocation77_spill] sm:$0xff]  ;;  %v4902_v61 = vmul.f32 %v11564_v37, %v16360_v54  ;;  %v16368_v39 = vld [vmem:[#allocation118_spill] sm:$0xff] }
 0x693   : > { %11129 = vmatpush3.msra.mxu1 %v16350_v6  ;;  %11177 = vmatprep.subr.mxu0 %v16356_v26  ;;  %v7193_v20 = vpop.xlane.xlu1 %7192  ;;  %v16365_v6 = vld [vmem:[#allocation24_spill] sm:$0xff]  ;;  %v16369_v19 = vld [vmem:[#allocation138_spill] sm:$0xff]  ;;  %v16370_v37 = vld [vmem:[#allocation45_spill] sm:$0xff] }
 0x694   : > { %11583 = vpow2.f32 %v7309_v7  ;;  %11130 = vmatprep.subr.mxu1 %v16357_v4  ;;  %v7243_v45 = vsub.f32 %v16358_v12, %v7193_v20  ;;  %4972 = vrot.lane.b32.xlu0 %v4901_v29, %s12017_s10  ;;  %v7299_v44 = vmul.f32 1.442695, %v7244_v5 }
 0x695   : > { %v15155_v60 = vpop.eup %11565  ;;  %11585 = vpow2.f32 %v7311_v31  ;;  %11131 = vmatpush3.msra.mxu1 %v16357_v4 }
 0x696   : > { %v15158_v30 = vpop.eup %11567  ;;  %11587 = vrcp.f32 %v15078_v1  ;;  %v7297_v38 = vmul.f32 1.442695, %v7243_v45  ;;  %11142 = vmatprep.subr.mxu1 %v16359_v47  ;;  %11132 = vmatprep.mubr.msk.f32.mxu1 %vm1763_vm1, %v15155_v60  ;;  %v16371_v45 = vld [vmem:[#allocation32_spill] sm:$0xff] }
 0x697   : > { %v11570_v18 = vpop.eup %11569  ;;  %11133 = vmatmul.mubr.msk.f32.vlgmr.msra.gmra.mxu1 %vm1763_vm1, %v15158_v30  ;;  %v7208_v49 = vpop.xlane.xlu0 %7207 }
 0x698   : > { %11589 = vpow2.f32 %v7297_v38  ;;  %11143 = vmatpush3.msra.mxu1 %v16359_v47  ;;  %v7248_v50 = vsub.f32 %v16361_v43, %v7208_v49  ;;  %4974 = vrot.lane.b32.xlu0 %v4902_v61, %s12017_s10  ;;  %v4903_v46 = vmul.f32 %v11570_v18, %v16363_v10  ;;  %v16372_v47 = vld [vmem:[#allocation116_spill] sm:$0xff]  ;;  %v16373_v61 = vld [vmem:[#allocation42_spill] sm:$0xff] }
 0x699   : > { %v15170_v1 = vpop.eup %11571  ;;  %11591 = vpow2.f32 %v7299_v44  ;;  %11144 = vmatprep.subr.mxu1 %v16362_v22  ;;  %v7205_v27 = vpop.xlane.xlu1 %7204 }
 0x69a   : > { %v15173_v33 = vpop.eup %11573  ;;  %v7247_v8 = vsub.f32 %v14919_v24, %v7205_v27  ;;  %11145 = vmatpush3.msra.mxu1 %v16362_v22  ;;  %11167 = vmatprep.mubr.msk.f32.mxu0 %vm1763_vm1, %v15170_v1  ;;  %v7307_v0 = vmul.f32 1.442695, %v7248_v50 }
 0x69b   : > { %v11576_v41 = vpop.eup %11575  ;;  %11156 = vmatprep.subr.mxu1 %v16364_v3  ;;  %11168 = vmatmul.mubr.msk.f32.vlgmr.msra.gmra.mxu0 %vm1763_vm1, %v15173_v33 }
 0x69c   : > { %v7305_v17 = vmul.f32 1.442695, %v7247_v8  ;;  %11178 = vmatpush3.msra.mxu0 %v16356_v26  ;;  %4976 = vrot.lane.b32.xlu0 %v4903_v46, %s12017_s10  ;;  %v4904_v42 = vmul.f32 %v11576_v41, %v16365_v6  ;;  %v16374_v8 = vld [vmem:[#allocation23_spill] sm:$0xff]  ;;  %v16376_v6 = vld [vmem:[#allocation90_spill] sm:$0xff] }
 0x69d   : > { %v15185_v24 = vpop.eup %11577  ;;  %11179 = vmatprep.subr.mxu0 %v14954_v51 }
 0x69e   : > { %v15188_v52 = vpop.eup %11579  ;;  %11593 = vpow2.f32 %v7305_v17  ;;  %11180 = vmatpush3.msra.mxu0 %v14954_v51  ;;  %11146 = vmatprep.mubr.msk.f32.mxu1 %vm1763_vm1, %v15185_v24  ;;  %v16367_v51 = vld [vmem:[#allocation117_spill] sm:$0xff] }
 0x69f   : > { %v11582_v34 = vpop.eup %11581  ;;  %11595 = vpow2.f32 %v7307_v0  ;;  %11147 = vmatmul.mubr.msk.f32.vlgmr.msra.gmra.mxu1 %vm1763_vm1, %v15188_v52  ;;  %v7220_v36 = vpop.xlane.xlu0 %7219 }
 0x6a0   : > { %11157 = vmatpush3.msra.mxu1 %v16364_v3  ;;  %v7252_v58 = vsub.f32 %v16366_v11, %v7220_v36  ;;  %4978 = vrot.lane.b32.xlu0 %v4904_v42, %s12017_s10  ;;  %v4905_v5 = vmul.f32 %v11582_v34, %v16369_v19  ;;  %v16377_v11 = vld [vmem:[#allocation34_spill] sm:$0xff] }
 0x6a1   : > { %v15199_v23 = vpop.eup %11583  ;;  %11158 = vmatprep.subr.mxu1 %v16367_v51  ;;  %v7217_v40 = vpop.xlane.xlu1 %7216 }
 0x6a2   : > { %v15202_v31 = vpop.eup %11585  ;;  %v7251_v7 = vsub.f32 %v16368_v39, %v7217_v40  ;;  %11159 = vmatpush3.msra.mxu1 %v16367_v51  ;;  %11181 = vmatprep.mubr.msk.f32.mxu0 %vm1763_vm1, %v15199_v23  ;;  %v7315_v29 = vmul.f32 1.442695, %v7252_v58  ;;  %v16378_v39 = vld [vmem:[#allocation37_spill] sm:$0xff] }
 0x6a3   : > { %v11588_v48 = vpop.eup %11587  ;;  %11170 = vmatprep.subr.mxu1 %v16370_v37  ;;  %11182 = vmatmul.mubr.msk.f32.vlgmr.msra.gmra.mxu0 %vm1763_vm1, %v15202_v31  ;;  %v3415_v26 = vpop.xlane.xlu0 %3414 }
 0x6a4   : > { %v7313_v20 = vmul.f32 1.442695, %v7251_v7  ;;  %4980 = vrot.lane.b32.xlu0 %v4905_v5, %s12017_s10  ;;  %11597 = vrcp.f32 %v3415_v26  ;;  %v4906_v44 = vmul.f32 %v11588_v48, %v16371_v45  ;;  %v16379_v48 = vld [vmem:[#allocation92_spill] sm:$0xff] }
 0x6a5   : > { %v15213_v4 = vpop.eup %11589 }
 0x6a6   : > { %v15215_v12 = vpop.eup %11591  ;;  %11599 = vpow2.f32 %v7313_v20  ;;  %11160 = vmatprep.mubr.msk.f32.mxu1 %vm1763_vm1, %v15213_v4  ;;  %v16380_v20 = vld [vmem:[#allocation140_spill] sm:$0xff] }
 0x6a7   : > { %11601 = vpow2.f32 %v7315_v29  ;;  %11161 = vmatmul.mubr.msk.f32.vlgmr.msra.gmra.mxu1 %vm1763_vm1, %v15215_v12  ;;  %v3418_v38 = vpop.xlane.xlu0 %3417 }
 0x6a8   : > { %11171 = vmatpush3.msra.mxu1 %v16370_v37  ;;  %11603 = vrcp.f32 %v3418_v38  ;;  %4982 = vrot.lane.b32.xlu0 %v4906_v44, %s12017_s10 }
 0x6a9   : > { %11172 = vmatprep.subr.mxu1 %v16372_v47 }
 0x6aa   : > { %11173 = vmatpush3.msra.mxu1 %v16372_v47  ;;  %v16381_v47 = vld [vmem:[#allocation49_spill] sm:$0xff] }
 0x6ab   : > { %v15226_v54 = vpop.eup %11593  ;;  %11184 = vmatprep.subr.mxu1 %v16373_v61  ;;  %v3421_v18 = vpop.xlane.xlu0 %3420 }
 0x6ac   : > { %v15229_v49 = vpop.eup %11595  ;;  %11605 = vrcp.f32 %v3421_v18  ;;  %11174 = vmatprep.mubr.msk.f32.mxu1 %vm1763_vm1, %v15226_v54  ;;  %v16382_v18 = vld [vmem:[#allocation22_spill] sm:$0xff] }
 0x6ad   : > { %11175 = vmatmul.mubr.msk.f32.vlgmr.msra.gmra.mxu1 %vm1763_vm1, %v15229_v49 }
 0x6ae   : > { %11185 = vmatpush3.msra.mxu1 %v16373_v61  ;;  %v9999_v61 = vmul.f32 -1.442695, %v16381_v47 }
 0x6af   : > { %11186 = vmatprep.subr.mxu1 %v14961_v32  ;;  %v3424_v43 = vpop.xlane.xlu0 %3423 }
 0x6b0   : > { %11187 = vmatpush3.msra.mxu1 %v14961_v32  ;;  %11607 = vrcp.f32 %v3424_v43  ;;  %v16375_v32 = vld [vmem:[#allocation91_spill] sm:$0xff] }
 0x6b1   : > { %v11598_v50 = vpop.eup %11597 }
 0x6b2   : > { %v4907_v10 = vmul.f32 %v11598_v50, %v16374_v8  ;;  %v16383_v8 = vld [vmem:[#allocation48_spill] sm:$0xff] }
 0x6b3   : > { %v15238_v22 = vpop.eup %11599  ;;  %v3427_v27 = vpop.xlane.xlu0 %3426 }
 0x6b4   : > { %v15241_v46 = vpop.eup %11601  ;;  %11609 = vrcp.f32 %v3427_v27  ;;  %11188 = vmatprep.mubr.msk.f32.mxu1 %vm1763_vm1, %v15238_v22  ;;  %4984 = vrot.lane.b32.xlu0 %v4907_v10, %s12017_s10  ;;  %v10000_v10 = vmul.f32 -1.442695, %v16383_v8 }
 0x6b5   : > { %v11604_v41 = vpop.eup %11603  ;;  %11189 = vmatmul.mubr.msk.f32.vlgmr.msra.gmra.mxu1 %vm1763_vm1, %v15241_v46 }
 0x6b6   : > { %v4908_v0 = vmul.f32 %v11604_v41, %v16375_v32  ;;  %v16384_v41 = vld [vmem:[#allocation25_spill] sm:$0xff] }
 0x6b7   : > { %v3430_v3 = vpop.xlane.xlu0 %3429 }
 0x6b8   : > { %11611 = vrcp.f32 %v3430_v3  ;;  %4986 = vrot.lane.b32.xlu0 %v4908_v0, %s12017_s10 }
 0x6b9   : > { %v11606_v17 = vpop.eup %11605 }
 0x6ba   : > { %v4909_v42 = vmul.f32 %v11606_v17, %v16376_v6  ;;  %v16385_v17 = vld [vmem:[#allocation51_spill] sm:$0xff] }
 0x6bb   : > { %v3433_v34 = vpop.xlane.xlu0 %3432  ;;  %v10001_v6 = vmul.f32 -1.442695, %v16385_v17 }
 0x6bc   : > { %11613 = vrcp.f32 %v3433_v34  ;;  %4988 = vrot.lane.b32.xlu0 %v4909_v42, %s12017_s10  ;;  %v16386_v42 = vld [vmem:[#allocation26_spill] sm:$0xff] }
 0x6bd   : > { %v11608_v36 = vpop.eup %11607 }
 0x6be   : > { %v4910_v58 = vmul.f32 %v11608_v36, %v16377_v11 }
 0x6bf   : > { %v3436_v51 = vpop.xlane.xlu0 %3435 }
 0x6c0   : > { %11615 = vrcp.f32 %v3436_v51  ;;  %4990 = vrot.lane.b32.xlu0 %v4910_v58, %s12017_s10  ;;  %v16387_v58 = vld [vmem:[#allocation50_spill] sm:$0xff] }
 0x6c1   : > { %v11610_v40 = vpop.eup %11609  ;;  %v10002_v51 = vmul.f32 -1.442695, %v16387_v58  ;;  %v16396_v58 = vld [vmem:[#allocation43_spill] sm:$0xff] }
 0x6c2   : > { %v4911_v7 = vmul.f32 %v11610_v40, %v16378_v39  ;;  %v16388_v40 = vld [vmem:[#allocation29_spill] sm:$0xff] }
 0x6c3   : > { %v3439_v19 = vpop.xlane.xlu0 %3438 }
 0x6c4   : > { %11617 = vrcp.f32 %v3439_v19  ;;  %4992 = vrot.lane.b32.xlu0 %v4911_v7, %s12017_s10 }
 0x6c5   : > { %v11612_v5 = vpop.eup %11611 }
 0x6c6   : > { %v4912_v29 = vmul.f32 %v11612_v5, %v16379_v48  ;;  %v16389_v5 = vld [vmem:[#allocation53_spill] sm:$0xff] }
 0x6c7   : > { %v3442_v37 = vpop.xlane.xlu0 %3441  ;;  %v10003_v48 = vmul.f32 -1.442695, %v16389_v5 }
 0x6c8   : > { %11619 = vrcp.f32 %v3442_v37  ;;  %4994 = vrot.lane.b32.xlu0 %v4912_v29, %s12017_s10  ;;  %v16390_v29 = vld [vmem:[#allocation39_spill] sm:$0xff] }
 0x6c9   : > { %v11614_v26 = vpop.eup %11613 }
 0x6ca   : > { %v4913_v45 = vmul.f32 %v11614_v26, %v16380_v20 }
 0x6cb   : > { %v3445_v44 = vpop.xlane.xlu0 %3444 }
 0x6cc   : > { %11621 = vrcp.f32 %v3445_v44  ;;  %4996 = vrot.lane.b32.xlu0 %v4913_v45, %s12017_s10  ;;  %v16391_v44 = vld [vmem:[#allocation52_spill] sm:$0xff] }
 0x6cd   : > { %v11616_v38 = vpop.eup %11615 }
 0x6ce   : > { %v4914_v43 = vmul.f32 %v11616_v38, %v16382_v18  ;;  %v10004_v38 = vmul.f32 -1.442695, %v16391_v44 }
 0x6cf   : > { %v3448_v50 = vpop.xlane.xlu0 %3447 }
 0x6d0   : > { %11623 = vrcp.f32 %v3448_v50  ;;  %4998 = vrot.lane.b32.xlu0 %v4914_v43, %s12017_s10 }
 0x6d1   : > { %v11618_v27 = vpop.eup %11617  ;;  %11625 = vpow2.f32 %v9999_v61  ;;  %v16392_v61 = vld [vmem:[#allocation86_spill] sm:$0xff] }
 0x6d2   : > { %v4915_v32 = vmul.f32 %v11618_v27, %v16384_v41 }
 0x6d3   : > { %v3451_v0 = vpop.xlane.xlu0 %3450 }
 0x6d4   : > { %11627 = vrcp.f32 %v3451_v0  ;;  %5000 = vrot.lane.b32.xlu0 %v4915_v32, %s12017_s10  ;;  %v16394_v32 = vld [vmem:[#allocation31_spill] sm:$0xff] }
 0x6d5   : > { %v11620_v3 = vpop.eup %11619  ;;  %11629 = vpow2.f32 %v10000_v10  ;;  %v16393_v10 = vld [vmem:[#allocation55_spill] sm:$0xff] }
 0x6d6   : > { %v4916_v34 = vmul.f32 %v11620_v3, %v16386_v42  ;;  %v10005_v41 = vmul.f32 -1.442695, %v16393_v10  ;;  %v16395_v42 = vld [vmem:[#allocation54_spill] sm:$0xff] }
 0x6d7   : > { %v3454_v36 = vpop.xlane.xlu0 %3453 }
 0x6d8   : > { %11631 = vrcp.f32 %v3454_v36  ;;  %5002 = vrot.lane.b32.xlu0 %v4916_v34, %s12017_s10  ;;  %v10006_v34 = vmul.f32 -1.442695, %v16395_v42  ;;  %v5087_v36 = vld [vmem:[#allocation9 + $0x8] sm:$0xff] }
 0x6d9   : > { %v11622_v11 = vpop.eup %11621  ;;  %11633 = vpow2.f32 %v10001_v6  ;;  %11243 = vmatprep.subr.mxu1 %v5087_v36 }
 0x6da   : > { %v4917_v39 = vmul.f32 %v11622_v11, %v16388_v40  ;;  %11244 = vmatpush3.msra.mxu1 %v5087_v36 }
 0x6db   : > { %v3457_v7 = vpop.xlane.xlu0 %3456 }
 0x6dc   : > { %11635 = vrcp.f32 %v3457_v7  ;;  %5004 = vrot.lane.b32.xlu0 %v4917_v39, %s12017_s10  ;;  %v5086_v7 = vld [vmem:[#allocation9] sm:$0xff] }
 0x6dd   : > { %v11624_v19 = vpop.eup %11623  ;;  %11637 = vpow2.f32 %v10002_v51  ;;  %11245 = vmatprep.subr.mxu1 %v5086_v7 }
 0x6de   : > { %v4918_v37 = vmul.f32 %v11624_v19, %v16390_v29  ;;  %v11626_v26 = vpop.eup %11625  ;;  %11246 = vmatpush3.msra.mxu1 %v5086_v7 }
 0x6df   : > { %v3460_v20 = vpop.xlane.xlu0 %3459  ;;  %v1458_v43 = vadd.f32 1.0, %v11626_v26 }
 0x6e0   : > { %11639 = vrcp.f32 %v3460_v20  ;;  %5006 = vrot.lane.b32.xlu0 %v4918_v37, %s12017_s10  ;;  %v16398_v37 = vld [vmem:[#allocation136_spill] sm:$0xff] }
 0x6e1   : > { %v11628_v45 = vpop.eup %11627  ;;  %11641 = vpow2.f32 %v10003_v48  ;;  %v16397_v48 = vld [vmem:[#allocation57_spill] sm:$0xff] }
 0x6e2   : > { %v11630_v47 = vpop.eup %11629  ;;  %v4919_v18 = vmul.f32 %v11628_v45, %v16392_v61  ;;  %v10007_v29 = vmul.f32 -1.442695, %v16397_v48 }
 0x6e3   : > { %v3463_v50 = vpop.xlane.xlu0 %3462  ;;  %v1459_v8 = vadd.f32 1.0, %v11630_v47 }
 0x6e4   : > { %11643 = vrcp.f32 %v3463_v50  ;;  %5008 = vrot.lane.b32.xlu0 %v4919_v18, %s12017_s10  ;;  %v16400_v18 = vld [vmem:[#allocation87_spill] sm:$0xff] }
 0x6e5   : > { %v11632_v27 = vpop.eup %11631  ;;  %11645 = vpow2.f32 %v10004_v38  ;;  %v16399_v38 = vld [vmem:[#allocation56_spill] sm:$0xff] }
 0x6e6   : > { %v4920_v0 = vmul.f32 %v11632_v27, %v16394_v32  ;;  %11647 = vrcp.f32 %v1458_v43  ;;  %v11634_v3 = vpop.eup %11633  ;;  %v10008_v47 = vmul.f32 -1.442695, %v16399_v38  ;;  %v16401_v32 = vld [vmem:[#allocation59_spill] sm:$0xff] }
 0x6e7   : > { %v3466_v17 = vpop.xlane.xlu0 %3465  ;;  %v1460_v40 = vadd.f32 1.0, %v11634_v3  ;;  %v4961_v3 = vpop.permute.xlu1 %4960 }
 0x6e8   : > { %11649 = vrcp.f32 %v3466_v17  ;;  %5010 = vrot.lane.b32.xlu0 %v4920_v0, %s12017_s10  ;;  %v10009_v0 = vmul.f32 -1.442695, %v16401_v32 }
 0x6e9   : > { %v11636_v6 = vpop.eup %11635  ;;  %11651 = vrcp.f32 %v1459_v8 }
 0x6ea   : > { %v11638_v11 = vpop.eup %11637  ;;  %v4921_v51 = vmul.f32 %v11636_v6, %v16396_v58  ;;  %11653 = vpow2.f32 %v10005_v41  ;;  %v16402_v6 = vld [vmem:[#allocation96_spill] sm:$0xff] }
 0x6eb   : > { %v15283_v39 = vpop.xlane.xlu0 %7321  ;;  %11655 = vpow2.f32 %v10006_v34  ;;  %v1461_v5 = vadd.f32 1.0, %v11638_v11 }
 0x6ec   : > { %5012 = vrot.lane.b32.xlu0 %v4921_v51, %s12017_s10  ;;  %11657 = vrcp.f32 %v1460_v40  ;;  %v16403_v51 = vld [vmem:[#allocation58_spill] sm:$0xff] }
 0x6ed   : > { %v11640_v19 = vpop.eup %11639  ;;  %v10010_v40 = vmul.f32 -1.442695, %v16403_v51 }
 0x6ee   : > { %v4922_v26 = vmul.f32 %v11640_v19, %v16398_v37  ;;  %v11642_v20 = vpop.eup %11641 }
 0x6ef   : > { %v3469_v45 = vpop.xlane.xlu0 %3468  ;;  %v1462_v50 = vadd.f32 1.0, %v11642_v20 }
 0x6f0   : > { %11659 = vrcp.f32 %v3469_v45  ;;  %5014 = vrot.lane.b32.xlu0 %v4922_v26, %s12017_s10  ;;  %v16404_v26 = vld [vmem:[#allocation61_spill] sm:$0xff] }
 0x6f1   : > { %v11644_v44 = vpop.eup %11643  ;;  %11661 = vrcp.f32 %v1461_v5  ;;  %v10011_v20 = vmul.f32 -1.442695, %v16404_v26 }
 0x6f2   : > { %v11646_v61 = vpop.eup %11645  ;;  %11663 = vpow2.f32 %v10007_v29  ;;  %v4923_v43 = vmul.f32 %v11644_v44, %v16400_v18  ;;  %v16405_v44 = vld [vmem:[#allocation28_spill] sm:$0xff] }
 0x6f3   : > { %v15291_v27 = vpop.eup %11647  ;;  %v4959_v8 = vpop.permute.xlu0 %4958  ;;  %11665 = vpow2.f32 %v10008_v47  ;;  %v1463_v34 = vadd.f32 1.0, %v11646_v61 }
 0x6f4   : > { %v5054_v10 = vmul.f32 %v15291_v27, %v4959_v8  ;;  %5016 = vrot.lane.b32.xlu0 %v4923_v43, %s12017_s10  ;;  %11667 = vrcp.f32 %v1462_v50  ;;  %v16406_v50 = vld [vmem:[#allocation60_spill] sm:$0xff] }
 0x6f5   : > { %v11650_v41 = vpop.eup %11649  ;;  %11669 = vpow2.f32 %v10009_v0  ;;  %v10012_v8 = vmul.f32 -1.442695, %v16406_v50 }
 0x6f6   : > { %v15296_v17 = vpop.eup %11651  ;;  %9448 = vrot.lane.b32.xlu1 %v5054_v10, %s12022_s12  ;;  %v4924_v42 = vmul.f32 %v11650_v41, %v16402_v6  ;;  %11671 = vrcp.f32 %v1463_v34  ;;  %v16407_v6 = vld [vmem:[#allocation63_spill] sm:$0xff] }
 0x6f7   : > { %v11654_v36 = vpop.eup %11653  ;;  %v4963_v11 = vpop.permute.xlu0 %4962  ;;  %v5055_v58 = vmul.f32 %v15296_v17, %v4961_v3  ;;  %11673 = vpow2.f32 %v10010_v40  ;;  %v16408_v40 = vld [vmem:[#allocation62_spill] sm:$0xff] }
 0x6f8   : > { %5018 = vrot.lane.b32.xlu0 %v4924_v42, %s12017_s10  ;;  %v11656_v7 = vpop.eup %11655  ;;  %v1464_v19 = vadd.f32 1.0, %v11654_v36  ;;  %v10013_v42 = vmul.f32 -1.442695, %v16407_v6 }
 0x6f9   : > { %v15304_v5 = vpop.eup %11657  ;;  %v1465_v47 = vadd.f32 1.0, %v11656_v7  ;;  %v10014_v7 = vmul.f32 -1.442695, %v16408_v40 }
 0x6fa   : > { %9450 = vrot.lane.b32.xlu1 %v5055_v58, %s12022_s12  ;;  %v5056_v29 = vmul.f32 %v15304_v5, %v4963_v11  ;;  %11675 = vrcp.f32 %v1464_v19 }
 0x6fb   : > { %v4965_v48 = vpop.permute.xlu0 %4964  ;;  %11677 = vpow2.f32 %v10011_v20 }
 0x6fc   : > { %11679 = vrcp.f32 %v1465_v47 }
 0x6fd   : > { %v11660_v37 = vpop.eup %11659  ;;  %11681 = vpow2.f32 %v10012_v8 }
 0x6fe   : > { %v15308_v45 = vpop.eup %11661  ;;  %9452 = vrot.lane.b32.xlu1 %v5056_v29, %s12022_s12  ;;  %v4925_v38 = vmul.f32 %v11660_v37, %v16405_v44 }
 0x6ff   : > { %v11664_v61 = vpop.eup %11663  ;;  %v4967_v18 = vpop.permute.xlu0 %4966  ;;  %v5057_v43 = vmul.f32 %v15308_v45, %v4965_v48 }
 0x700   : > { %5020 = vrot.lane.b32.xlu0 %v4925_v38, %s12017_s10  ;;  %v11666_v10 = vpop.eup %11665  ;;  %v1466_v41 = vadd.f32 1.0, %v11664_v61  ;;  %s15729_s10 = scalar_lea.hbm %s15784_s6, %s10326_s19 }
 0x701   : > { %v15316_v32 = vpop.eup %11667  ;;  %v1467_v36 = vadd.f32 1.0, %v11666_v10 }
 0x702   : > { %9454 = vrot.lane.b32.xlu1 %v5057_v43, %s12022_s12  ;;  %v5058_v3 = vmul.f32 %v15316_v32, %v4967_v18  ;;  %v11670_v34 = vpop.eup %11669  ;;  %11683 = vrcp.f32 %v1466_v41 }
 0x703   : > { %v4969_v0 = vpop.permute.xlu0 %4968  ;;  %v15321_v11 = vpop.eup %11671  ;;  %11685 = vpow2.f32 %v10013_v42  ;;  %v1468_v48 = vadd.f32 1.0, %v11670_v34 }
 0x704   : > { %v5059_v51 = vmul.f32 %v15321_v11, %v4969_v0  ;;  %v11674_v19 = vpop.eup %11673  ;;  %11687 = vrcp.f32 %v1467_v36 }
 0x705   : > { %11689 = vpow2.f32 %v10014_v7  ;;  %v1469_v44 = vadd.f32 1.0, %v11674_v19 }
 0x706   : > { %9456 = vrot.lane.b32.xlu1 %v5058_v3, %s12022_s12  ;;  %11691 = vrcp.f32 %v1468_v48 }
 0x707   : > { %v4971_v58 = vpop.permute.xlu0 %4970  ;;  %v15326_v29 = vpop.eup %11675  ;;  %11693 = vrcp.f32 %v1469_v44 }
 0x708   : > { %v5060_v26 = vmul.f32 %v15326_v29, %v4971_v58  ;;  %v11678_v20 = vpop.eup %11677 }
 0x709   : > { %v15330_v38 = vpop.eup %11679  ;;  %v1470_v43 = vadd.f32 1.0, %v11678_v20 }
 0x70a   : > { %9458 = vrot.lane.b32.xlu1 %v5059_v51, %s12022_s12  ;;  %v11682_v18 = vpop.eup %11681 }
 0x70b   : > { %v4973_v37 = vpop.permute.xlu0 %4972  ;;  %11695 = vrcp.f32 %v1470_v43  ;;  %v1471_v0 = vadd.f32 1.0, %v11682_v18 }
 0x70c   : > { %v5061_v61 = vmul.f32 %v15330_v38, %v4973_v37 }
 0x70d   : > { %11697 = vrcp.f32 %v1471_v0 }
 0x70e   : > { %9460 = vrot.lane.b32.xlu1 %v5060_v26, %s12022_s12 }
 0x70f   : > { %v4975_v47 = vpop.permute.xlu0 %4974  ;;  %v15334_v50 = vpop.eup %11683 }
 0x710   : > { %v5062_v10 = vmul.f32 %v15334_v50, %v4975_v47  ;;  %v11686_v41 = vpop.eup %11685 }
 0x711   : > { %v15338_v3 = vpop.eup %11687  ;;  %v1472_v36 = vadd.f32 1.0, %v11686_v41 }
 0x712   : > { %9462 = vrot.lane.b32.xlu1 %v5061_v61, %s12022_s12  ;;  %v11690_v34 = vpop.eup %11689 }
 0x713   : > { %v4977_v8 = vpop.permute.xlu0 %4976  ;;  %v15342_v58 = vpop.eup %11691  ;;  %11699 = vrcp.f32 %v1472_v36  ;;  %v1473_v7 = vadd.f32 1.0, %v11690_v34  ;;  %v7329_v34 = vsel %vm1763_vm1, %v14997_v59, 0.0  ;;  %v7344_v36 = vsel %vm1763_vm1, %v15015_v14, 0.0 }
 0x714   : > { %v5063_v42 = vmul.f32 %v15338_v3, %v4977_v8  ;;  %v15346_v19 = vpop.eup %11693  ;;  %v7356_v59 = vsel %vm1763_vm1, %v15072_v53, 0.0  ;;  %v7338_v53 = vsel %vm1763_vm1, %v15105_v55, 0.0  ;;  %v7365_v55 = vsel %vm1763_vm1, %v15087_v25, 0.0 }
 0x715   : > { %11701 = vrcp.f32 %v1473_v7  ;;  %v7347_v25 = vsel %vm1763_vm1, %v15132_v62, 0.0  ;;  %v7392_v62 = vsel %vm1763_vm1, %v15173_v33, 0.0  ;;  %v7404_v33 = vsel %vm1763_vm1, %v15202_v31, 0.0 }
 0x716   : > { %9464 = vrot.lane.b32.xlu1 %v5062_v10, %s12022_s12  ;;  %v7398_v31 = vsel %vm1763_vm1, %v15229_v49, 0.0  ;;  %11703 = vrcp.f32 %v15283_v39 }
 0x717   : > { %v4979_v6 = vpop.permute.xlu0 %4978 }
 0x718   : > { %v5064_v40 = vmul.f32 %v15342_v58, %v4979_v6  ;;  %v15350_v26 = vpop.eup %11695  ;;  %v7317_v6 = vsel %vm1763_vm1, %v14984_v13, 0.0  ;;  %v7326_v13 = vsel %vm1763_vm1, %v15053_v28, 0.0  ;;  %v7353_v28 = vsel %vm1763_vm1, %v15066_v57, 0.0 }
 0x719   : > { %v7335_v57 = vsel %vm1763_vm1, %v15098_v2, 0.0  ;;  %v7380_v2 = vsel %vm1763_vm1, %v15124_v35, 0.0  ;;  %v7362_v35 = vsel %vm1763_vm1, %v15158_v30, 0.0  ;;  %v7389_v30 = vsel %vm1763_vm1, %v15170_v1, 0.0 }
 0x71a   : > { %9466 = vrot.lane.b32.xlu1 %v5063_v42, %s12022_s12  ;;  %v15354_v44 = vpop.eup %11697  ;;  %v7332_v42 = vsel %vm1763_vm1, %v14999_v15, 0.0  ;;  %v7386_v1 = vsel %vm1763_vm1, %v15215_v12, 0.0  ;;  %v7407_v12 = vsel %vm1763_vm1, %v15238_v22, 0.0 }
 0x71b   : > { %v4981_v51 = vpop.permute.xlu0 %4980 }
 0x71c   : > { %v5065_v48 = vmul.f32 %v15346_v19, %v4981_v51  ;;  %v7341_v51 = vsel %vm1763_vm1, %v15013_v16, 0.0  ;;  %v7323_v16 = vsel %vm1763_vm1, %v15051_v21, 0.0  ;;  %v7368_v21 = vsel %vm1763_vm1, %v15090_v56, 0.0 }
 0x71d   : > { %v7350_v56 = vsel %vm1763_vm1, %v15139_v63, 0.0  ;;  %v7377_v63 = vsel %vm1763_vm1, %v15121_v9, 0.0  ;;  %v7359_v9 = vsel %vm1763_vm1, %v15155_v60, 0.0  ;;  %v7401_v60 = vsel %vm1763_vm1, %v15199_v23, 0.0 }
 0x71e   : > { %9468 = vrot.lane.b32.xlu1 %v5064_v40, %s12022_s12  ;;  %v7410_v23 = vsel %vm1763_vm1, %v15241_v46, 0.0 }
 0x71f   : > { %v4983_v37 = vpop.permute.xlu0 %4982 }
 0x720   : > { %v5066_v20 = vmul.f32 %v15350_v26, %v4983_v37  ;;  %v15358_v18 = vpop.eup %11699 }
 0x722   : > { %9470 = vrot.lane.b32.xlu1 %v5065_v48, %s12022_s12  ;;  %v15362_v10 = vpop.eup %11701 }
 0x726   : > { %9472 = vrot.lane.b32.xlu1 %v5066_v20, %s12022_s12  ;;  %v4985_v47 = vpop.permute.xlu0 %4984 }
 0x727   : > { %v5067_v61 = vmul.f32 %v15354_v44, %v4985_v47 }
 0x72a   : > { %9474 = vrot.lane.b32.xlu1 %v5067_v61, %s12022_s12  ;;  %v4987_v43 = vpop.permute.xlu0 %4986 }
 0x72b   : > { %v5068_v8 = vmul.f32 %v15358_v18, %v4987_v43 }
 0x72e   : > { %9476 = vrot.lane.b32.xlu1 %v5068_v8, %s12022_s12  ;;  %v4989_v41 = vpop.permute.xlu0 %4988 }
 0x72f   : > { %v5069_v0 = vmul.f32 %v15362_v10, %v4989_v41 }
 0x732   : > { %9478 = vrot.lane.b32.xlu1 %v5069_v0, %s12022_s12 }
 0x756   : > { %7318 = vadd.xlane.f32.xlu1 %v7317_v6 }
 0x75a   : > { %7333 = vadd.xlane.f32.xlu1 %v7332_v42 }
 0x75e   : > { %7330 = vadd.xlane.f32.xlu1 %v7329_v34 }
 0x762   : > { %7345 = vadd.xlane.f32.xlu1 %v7344_v36  ;;  %v7374_v36 = vsel %vm1763_vm1, %v15188_v52, 0.0  ;;  %v7383_v52 = vsel %vm1763_vm1, %v15213_v4, 0.0  ;;  %v11085_v4 = vpop.f32.mrf.mxu0 }
 0x766   : > { %7342 = vadd.xlane.f32.xlu1 %v7341_v51  ;;  %v7371_v51 = vsel %vm1763_vm1, %v15185_v24, 0.0  ;;  %v7395_v24 = vsel %vm1763_vm1, %v15226_v54, 0.0 }
 0x768   : > { %v9449_v40 = vpop.permute.xlu1 %9448 }
 0x769   : > { %11247 = vmatprep.mubr.msk.f32.mxu1 %vm1763_vm1, %v9449_v40  ;;  %v11704_v40 = vpop.eup %11703 }
 0x76a   : > { %7327 = vadd.xlane.f32.xlu1 %v7326_v13  ;;  %v8838_v13 = vmul.f32 %v11704_v40, %v11085_v4 }
 0x76c   : > { %v9451_v15 = vpop.permute.xlu1 %9450 }
 0x76d   : > { %11248 = vmatmul.mubr.msk.f32.vlgmr.msra.gmra.mxu1 %vm1763_vm1, %v9451_v15 }
 0x76e   : > { %7357 = vadd.xlane.f32.xlu1 %v7356_v59 }
 0x770   : > { %v9453_v14 = vpop.permute.xlu1 %9452 }
 0x771   : > { %11250 = vmatprep.mubr.msk.f32.mxu1 %vm1763_vm1, %v9453_v14  ;;  %v7491_v14 = vpop.f32.mrf.mxu0 }
 0x772   : > { %7324 = vadd.xlane.f32.xlu1 %v7323_v16 }
 0x774   : > { %v9455_v7 = vpop.permute.xlu1 %9454 }
 0x775   : > { %11251 = vmatmul.mubr.msk.f32.gmra.mxu1 %vm1763_vm1, %v9455_v7  ;;  %v11099_v7 = vpop.f32.mrf.mxu0 }
 0x776   : > { %7354 = vadd.xlane.f32.xlu1 %v7353_v28 }
 0x778   : > { %v9457_v48 = vpop.permute.xlu1 %9456 }
 0x779   : > { %11253 = vmatprep.mubr.msk.f32.mxu1 %vm1763_vm1, %v9457_v48 }
 0x77a   : > { %7339 = vadd.xlane.f32.xlu1 %v7338_v53 }
 0x77c   : > { %v9459_v37 = vpop.permute.xlu1 %9458 }
 0x77d   : > { %11254 = vmatmul.mubr.msk.f32.gmra.mxu1 %vm1763_vm1, %v9459_v37  ;;  %v7665_v37 = vpop.f32.mrf.mxu0 }
 0x77e   : > { %7369 = vadd.xlane.f32.xlu1 %v7368_v21 }
 0x780   : > { %v9461_v20 = vpop.permute.xlu1 %9460 }
 0x781   : > { %11256 = vmatprep.mubr.msk.f32.mxu1 %vm1763_vm1, %v9461_v20 }
 0x782   : > { %7336 = vadd.xlane.f32.xlu1 %v7335_v57 }
 0x784   : > { %v9463_v47 = vpop.permute.xlu1 %9462 }
 0x785   : > { %11257 = vmatmul.mubr.msk.f32.gmra.mxu1 %vm1763_vm1, %v9463_v47  ;;  %v11113_v47 = vpop.f32.mrf.mxu0 }
 0x786   : > { %7366 = vadd.xlane.f32.xlu1 %v7365_v55 }
 0x788   : > { %v9465_v61 = vpop.permute.xlu1 %9464 }
 0x789   : > { %11259 = vmatprep.mubr.msk.f32.mxu1 %vm1763_vm1, %v9465_v61 }
 0x78a   : > { %7351 = vadd.xlane.f32.xlu1 %v7350_v56 }
 0x78c   : > { %v9467_v43 = vpop.permute.xlu1 %9466 }
 0x78d   : > { %11260 = vmatmul.mubr.msk.f32.gmra.mxu1 %vm1763_vm1, %v9467_v43  ;;  %v7839_v43 = vpop.f32.mrf.mxu0 }
 0x78e   : > { %7381 = vadd.xlane.f32.xlu1 %v7380_v2 }
 0x790   : > { %v9469_v8 = vpop.permute.xlu1 %9468 }
 0x791   : > { %11262 = vmatprep.mubr.msk.f32.mxu1 %vm1763_vm1, %v9469_v8 }
 0x792   : > { %7348 = vadd.xlane.f32.xlu1 %v7347_v25 }
 0x794   : > { %v9471_v41 = vpop.permute.xlu1 %9470 }
 0x795   : > { %11263 = vmatmul.mubr.msk.f32.gmra.mxu1 %vm1763_vm1, %v9471_v41  ;;  %v11092_v41 = vpop.f32.mrf.mxu1 }
 0x796   : > { %7378 = vadd.xlane.f32.xlu1 %v7377_v63 }
 0x798   : > { %v9473_v0 = vpop.permute.xlu1 %9472 }
 0x799   : > { %11265 = vmatprep.mubr.msk.f32.mxu1 %vm1763_vm1, %v9473_v0 }
 0x79a   : > { %7363 = vadd.xlane.f32.xlu1 %v7362_v35 }
 0x79c   : > { %v9475_v6 = vpop.permute.xlu1 %9474 }
 0x79d   : > { %11266 = vmatmul.mubr.msk.f32.gmra.mxu1 %vm1763_vm1, %v9475_v6  ;;  %v11127_v6 = vpop.f32.mrf.mxu0 }
 0x79e   : > { %7393 = vadd.xlane.f32.xlu1 %v7392_v62 }
 0x7a0   : > { %v9477_v42 = vpop.permute.xlu1 %9476 }
 0x7a1   : > { %11268 = vmatprep.mubr.msk.f32.mxu1 %vm1763_vm1, %v9477_v42 }
 0x7a2   : > { %7360 = vadd.xlane.f32.xlu1 %v7359_v9 }
 0x7a4   : > { %v9479_v34 = vpop.permute.xlu1 %9478 }
 0x7a5   : > { %11269 = vmatmul.mubr.msk.f32.gmra.mxu1 %vm1763_vm1, %v9479_v34  ;;  %v7578_v34 = vpop.f32.mrf.mxu1 }
 0x7a6   : > { %7390 = vadd.xlane.f32.xlu1 %v7389_v30 }
 0x7aa   : > { %7375 = vadd.xlane.f32.xlu1 %v7374_v36 }
 0x7ae   : > { %7405 = vadd.xlane.f32.xlu1 %v7404_v33 }
 0x7b2   : > { %7372 = vadd.xlane.f32.xlu1 %v7371_v51  ;;  %v8013_v51 = vpop.f32.mrf.mxu0 }
 0x7b4   : > { %v11141_v4 = vpop.f32.mrf.mxu0 }
 0x7b6   : > { %7402 = vadd.xlane.f32.xlu1 %v7401_v60 }
 0x7ba   : > { %7387 = vadd.xlane.f32.xlu1 %v7386_v1 }
 0x7be   : > { %7384 = vadd.xlane.f32.xlu1 %v7383_v52 }
 0x7c2   : > { %7399 = vadd.xlane.f32.xlu1 %v7398_v31  ;;  %v11106_v31 = vpop.f32.mrf.mxu1 }
 0x7c6   : > { %7396 = vadd.xlane.f32.xlu1 %v7395_v24 }
 0x7ca   : > { %7411 = vadd.xlane.f32.xlu1 %v7410_v23 }
 0x7ce   : > { %7408 = vadd.xlane.f32.xlu1 %v7407_v12 }
 0x7df   : > { %8903 = vrot.lane.b32.xlu1 %v8838_v13, %s12020_s15  ;;  %v7319_v49 = vpop.xlane.xlu1 %7318 }
 0x7e0   : > { %11705 = vrcp.f32 %v7319_v49 }
 0x7e3   : > { %v7334_v15 = vpop.xlane.xlu1 %7333 }
 0x7e4   : > { %11707 = vrcp.f32 %v7334_v15  ;;  %v7752_v15 = vpop.f32.mrf.mxu1 }
 0x7e7   : > { %v7331_v54 = vpop.xlane.xlu1 %7330 }
 0x7e8   : > { %11709 = vrcp.f32 %v7331_v54 }
 0x7eb   : > { %v7346_v59 = vpop.xlane.xlu1 %7345 }
 0x7ec   : > { %11711 = vrcp.f32 %v7346_v59 }
 0x7ed   : > { %v11706_v46 = vpop.eup %11705 }
 0x7ee   : > { %v8837_v16 = vmul.f32 %v11706_v46, %v7491_v14  ;;  %v8187_v14 = vpop.f32.mrf.mxu0 }
 0x7ef   : > { %v7343_v22 = vpop.xlane.xlu1 %7342 }
 0x7f0   : > { %11713 = vrcp.f32 %v7343_v22  ;;  %8901 = vrot.lane.b32.xlu1 %v8837_v16, %s12020_s15 }
 0x7f1   : > { %v11708_v39 = vpop.eup %11707 }
 0x7f2   : > { %v8842_v28 = vmul.f32 %v11708_v39, %v11099_v7  ;;  %v11120_v7 = vpop.f32.mrf.mxu1 }
 0x7f3   : > { %v7328_v48 = vpop.xlane.xlu1 %7327 }
 0x7f4   : > { %11715 = vrcp.f32 %v7328_v48  ;;  %8911 = vrot.lane.b32.xlu1 %v8842_v28, %s12020_s15 }
 0x7f5   : > { %v11710_v53 = vpop.eup %11709 }
 0x7f6   : > { %v8841_v21 = vmul.f32 %v11710_v53, %v7665_v37  ;;  %v11155_v37 = vpop.f32.mrf.mxu0 }
 0x7f7   : > { %v7358_v20 = vpop.xlane.xlu1 %7357 }
 0x7f8   : > { %11717 = vrcp.f32 %v7358_v20  ;;  %8909 = vrot.lane.b32.xlu1 %v8841_v21, %s12020_s15 }
 0x7f9   : > { %v11712_v57 = vpop.eup %11711 }
 0x7fa   : > { %v8846_v55 = vmul.f32 %v11712_v57, %v11113_v47  ;;  %v7926_v47 = vpop.f32.mrf.mxu1 }
 0x7fb   : > { %v7325_v61 = vpop.xlane.xlu1 %7324 }
 0x7fc   : > { %11719 = vrcp.f32 %v7325_v61  ;;  %8919 = vrot.lane.b32.xlu1 %v8846_v55, %s12020_s15 }
 0x7fd   : > { %v11714_v56 = vpop.eup %11713 }
 0x7fe   : > { %v8845_v2 = vmul.f32 %v11714_v56, %v7839_v43  ;;  %v8361_v43 = vpop.f32.mrf.mxu0 }
 0x7ff   : > { %v7355_v8 = vpop.xlane.xlu1 %7354 }
 0x800   : > { %11721 = vrcp.f32 %v7355_v8  ;;  %8917 = vrot.lane.b32.xlu1 %v8845_v2, %s12020_s15 }
 0x801   : > { %v11716_v25 = vpop.eup %11715 }
 0x802   : > { %v8840_v63 = vmul.f32 %v11716_v25, %v11092_v41  ;;  %v11134_v41 = vpop.f32.mrf.mxu1 }
 0x803   : > { %v7340_v0 = vpop.xlane.xlu1 %7339 }
 0x804   : > { %11723 = vrcp.f32 %v7340_v0  ;;  %8907 = vrot.lane.b32.xlu1 %v8840_v63, %s12020_s15 }
 0x805   : > { %v11718_v35 = vpop.eup %11717 }
 0x806   : > { %v8850_v62 = vmul.f32 %v11718_v35, %v11127_v6  ;;  %v11169_v6 = vpop.f32.mrf.mxu0 }
 0x807   : > { %v7370_v42 = vpop.xlane.xlu1 %7369 }
 0x808   : > { %11725 = vrcp.f32 %v7370_v42  ;;  %8927 = vrot.lane.b32.xlu1 %v8850_v62, %s12020_s15 }
 0x809   : > { %v11720_v9 = vpop.eup %11719 }
 0x80a   : > { %v8839_v30 = vmul.f32 %v11720_v9, %v7578_v34  ;;  %v8100_v34 = vpop.f32.mrf.mxu1 }
 0x80b   : > { %v7337_v36 = vpop.xlane.xlu1 %7336 }
 0x80c   : > { %11727 = vrcp.f32 %v7337_v36  ;;  %8905 = vrot.lane.b32.xlu1 %v8839_v30, %s12020_s15 }
 0x80d   : > { %v11722_v33 = vpop.eup %11721 }
 0x80e   : > { %v8849_v60 = vmul.f32 %v11722_v33, %v8013_v51  ;;  %v8535_v51 = vpop.f32.mrf.mxu0 }
 0x80f   : > { %v7367_v1 = vpop.xlane.xlu1 %7366 }
 0x810   : > { %11729 = vrcp.f32 %v7367_v1  ;;  %8925 = vrot.lane.b32.xlu1 %v8849_v60, %s12020_s15 }
 0x811   : > { %v11724_v52 = vpop.eup %11723 }
 0x812   : > { %v8844_v24 = vmul.f32 %v11724_v52, %v11106_v31  ;;  %v11148_v31 = vpop.f32.mrf.mxu1 }
 0x813   : > { %v7352_v23 = vpop.xlane.xlu1 %7351 }
 0x814   : > { %11731 = vrcp.f32 %v7352_v23  ;;  %8915 = vrot.lane.b32.xlu1 %v8844_v24, %s12020_s15  ;;  %v16409_v23 = vld [vmem:[#allocation65_spill] sm:$0xff] }
 0x815   : > { %v11726_v12 = vpop.eup %11725 }
 0x816   : > { %v8854_v40 = vmul.f32 %v11726_v12, %v11141_v4  ;;  %v10015_v12 = vmul.f32 -1.442695, %v16409_v23 }
 0x817   : > { %v7382_v13 = vpop.xlane.xlu1 %7381 }
 0x818   : > { %11733 = vrcp.f32 %v7382_v13  ;;  %8935 = vrot.lane.b32.xlu1 %v8854_v40, %s12020_s15  ;;  %v11183_v13 = vpop.f32.mrf.mxu0 }
 0x819   : > { %v11728_v49 = vpop.eup %11727 }
 0x81a   : > { %v8843_v54 = vmul.f32 %v11728_v49, %v7752_v15  ;;  %v16410_v15 = vld [vmem:[#allocation64_spill] sm:$0xff] }
 0x81b   : > { %v7349_v59 = vpop.xlane.xlu1 %7348 }
 0x81c   : > { %11735 = vrcp.f32 %v7349_v59  ;;  %8913 = vrot.lane.b32.xlu1 %v8843_v54, %s12020_s15  ;;  %v10016_v54 = vmul.f32 -1.442695, %v16410_v15  ;;  %v16416_v15 = vld [vmem:[#allocation71_spill] sm:$0xff] }
 0x81d   : > { %v11730_v46 = vpop.eup %11729 }
 0x81e   : > { %v8853_v16 = vmul.f32 %v11730_v46, %v8187_v14  ;;  %v8274_v14 = vpop.f32.mrf.mxu1 }
 0x81f   : > { %v7379_v22 = vpop.xlane.xlu1 %7378 }
 0x820   : > { %11737 = vrcp.f32 %v7379_v22  ;;  %8933 = vrot.lane.b32.xlu1 %v8853_v16, %s12020_s15  ;;  %v16411_v22 = vld [vmem:[#allocation67_spill] sm:$0xff] }
 0x821   : > { %v11732_v39 = vpop.eup %11731 }
 0x822   : > { %v8848_v28 = vmul.f32 %v11732_v39, %v11120_v7  ;;  %v10017_v39 = vmul.f32 -1.442695, %v16411_v22  ;;  %v15472_v7 = vpop.permute.xlu0 %4990 }
 0x823   : > { %v7364_v48 = vpop.xlane.xlu1 %7363 }
 0x824   : > { %11739 = vrcp.f32 %v7364_v48  ;;  %8923 = vrot.lane.b32.xlu1 %v8848_v28, %s12020_s15 }
 0x825   : > { %v11734_v53 = vpop.eup %11733 }
 0x826   : > { %v8858_v21 = vmul.f32 %v11734_v53, %v11155_v37  ;;  %v8709_v53 = vpop.f32.mrf.mxu0 }
 0x827   : > { %v7394_v20 = vpop.xlane.xlu1 %7393 }
 0x828   : > { %11741 = vrcp.f32 %v7394_v20  ;;  %8943 = vrot.lane.b32.xlu1 %v8858_v21, %s12020_s15  ;;  %v16412_v21 = vld [vmem:[#allocation66_spill] sm:$0xff] }
 0x829   : > { %v11736_v57 = vpop.eup %11735  ;;  %v10018_v20 = vmul.f32 -1.442695, %v16412_v21 }
 0x82a   : > { %v8847_v55 = vmul.f32 %v11736_v57, %v7926_v47 }
 0x82b   : > { %v7361_v61 = vpop.xlane.xlu1 %7360 }
 0x82c   : > { %11743 = vrcp.f32 %v7361_v61  ;;  %8921 = vrot.lane.b32.xlu1 %v8847_v55, %s12020_s15  ;;  %v15477_v55 = vpop.permute.xlu0 %4992  ;;  %v11162_v61 = vpop.f32.mrf.mxu1 }
 0x82d   : > { %v11738_v56 = vpop.eup %11737 }
 0x82e   : > { %v8857_v2 = vmul.f32 %v11738_v56, %v8361_v43  ;;  %v16413_v43 = vld [vmem:[#allocation69_spill] sm:$0xff] }
 0x82f   : > { %v7391_v8 = vpop.xlane.xlu1 %7390 }
 0x830   : > { %11745 = vrcp.f32 %v7391_v8  ;;  %8941 = vrot.lane.b32.xlu1 %v8857_v2, %s12020_s15  ;;  %v10019_v2 = vmul.f32 -1.442695, %v16413_v43 }
 0x831   : > { %v11740_v25 = vpop.eup %11739 }
 0x832   : > { %v8852_v63 = vmul.f32 %v11740_v25, %v11134_v41  ;;  %v9030_v25 = vld [vmem:[#allocation9 + $0x18] sm:$0xff] }
 0x833   : > { %v7376_v0 = vpop.xlane.xlu1 %7375  ;;  %11191 = vmatprep.subr.mxu0 %v9030_v25 }
 0x834   : > { %11747 = vrcp.f32 %v7376_v0  ;;  %8931 = vrot.lane.b32.xlu1 %v8852_v63, %s12020_s15  ;;  %v8448_v0 = vpop.f32.mrf.mxu1  ;;  %11192 = vmatpush3.msra.mxu0 %v9030_v25 }
 0x835   : > { %v11742_v35 = vpop.eup %11741 }
 0x836   : > { %v8862_v62 = vmul.f32 %v11742_v35, %v11169_v6  ;;  %v16414_v6 = vld [vmem:[#allocation68_spill] sm:$0xff] }
 0x837   : > { %v7406_v42 = vpop.xlane.xlu1 %7405 }
 0x838   : > { %11749 = vrcp.f32 %v7406_v42  ;;  %8951 = vrot.lane.b32.xlu1 %v8862_v62, %s12020_s15  ;;  %v10020_v62 = vmul.f32 -1.442695, %v16414_v6  ;;  %v15482_v42 = vpop.permute.xlu0 %4994 }
 0x839   : > { %v11744_v9 = vpop.eup %11743 }
 0x83a   : > { %v8851_v30 = vmul.f32 %v11744_v9, %v8100_v34  ;;  %v9029_v34 = vld [vmem:[#allocation9 + $0x10] sm:$0xff] }
 0x83b   : > { %v7373_v36 = vpop.xlane.xlu1 %7372  ;;  %11193 = vmatprep.subr.mxu0 %v9029_v34 }
 0x83c   : > { %11751 = vrcp.f32 %v7373_v36  ;;  %8929 = vrot.lane.b32.xlu1 %v8851_v30, %s12020_s15  ;;  %11194 = vmatpush3.msra.mxu0 %v9029_v34 }
 0x83d   : > { %v11746_v33 = vpop.eup %11745 }
 0x83e   : > { %v8861_v60 = vmul.f32 %v11746_v33, %v8535_v51  ;;  %v11176_v51 = vpop.f32.mrf.mxu1 }
 0x83f   : > { %v7403_v1 = vpop.xlane.xlu1 %7402 }
 0x840   : > { %11753 = vrcp.f32 %v7403_v1  ;;  %8949 = vrot.lane.b32.xlu1 %v8861_v60, %s12020_s15  ;;  %v16415_v1 = vld [vmem:[#allocation72_spill] sm:$0xff] }
 0x841   : > { %v11748_v52 = vpop.eup %11747 }
 0x842   : > { %v8856_v24 = vmul.f32 %v11748_v52, %v11148_v31  ;;  %v10021_v52 = vmul.f32 -1.442695, %v16415_v1 }
 0x843   : > { %v7388_v4 = vpop.xlane.xlu1 %7387 }
 0x844   : > { %11755 = vrcp.f32 %v7388_v4  ;;  %8939 = vrot.lane.b32.xlu1 %v8856_v24, %s12020_s15 }
 0x845   : > { %v11750_v40 = vpop.eup %11749  ;;  %11757 = vpow2.f32 %v10015_v12 }
 0x846   : > { %v8866_v49 = vmul.f32 %v11750_v40, %v11183_v13  ;;  %v15488_v40 = vpop.permute.xlu0 %4996  ;;  %v8622_v13 = vpop.f32.mrf.mxu1 }
 0x847   : > { %v7385_v59 = vpop.xlane.xlu1 %7384 }
 0x848   : > { %11759 = vrcp.f32 %v7385_v59  ;;  %8959 = vrot.lane.b32.xlu1 %v8866_v49, %s12020_s15 }
 0x849   : > { %v11752_v46 = vpop.eup %11751  ;;  %11761 = vpow2.f32 %v10016_v54  ;;  %v10022_v54 = vmul.f32 -1.442695, %v16416_v15 }
 0x84a   : > { %v8855_v16 = vmul.f32 %v11752_v46, %v8274_v14 }
 0x84b   : > { %v7400_v28 = vpop.xlane.xlu1 %7399 }
 0x84c   : > { %11763 = vrcp.f32 %v7400_v28  ;;  %8937 = vrot.lane.b32.xlu1 %v8855_v16, %s12020_s15 }
 0x84d   : > { %v11754_v48 = vpop.eup %11753  ;;  %11765 = vpow2.f32 %v10017_v39  ;;  %v16417_v39 = vld [vmem:[#allocation75_spill] sm:$0xff] }
 0x84e   : > { %v8865_v37 = vmul.f32 %v11754_v48, %v8709_v53  ;;  %v10023_v28 = vmul.f32 -1.442695, %v16417_v39  ;;  %v15494_v48 = vpop.permute.xlu0 %4998 }
 0x84f   : > { %v7397_v57 = vpop.xlane.xlu1 %7396 }
 0x850   : > { %11767 = vrcp.f32 %v7397_v57  ;;  %8957 = vrot.lane.b32.xlu1 %v8865_v37, %s12020_s15 }
 0x851   : > { %v11756_v47 = vpop.eup %11755  ;;  %11769 = vpow2.f32 %v10018_v20 }
 0x852   : > { %v8860_v56 = vmul.f32 %v11756_v47, %v11162_v61  ;;  %v11758_v41 = vpop.eup %11757 }
 0x853   : > { %v7412_v8 = vpop.xlane.xlu1 %7411  ;;  %v1474_v36 = vadd.f32 1.0, %v11758_v41  ;;  %v5001_v41 = vpop.permute.xlu0 %5000 }
 0x854   : > { %11771 = vrcp.f32 %v7412_v8  ;;  %8947 = vrot.lane.b32.xlu1 %v8860_v56, %s12020_s15  ;;  %v16418_v56 = vld [vmem:[#allocation73_spill] sm:$0xff] }
 0x855   : > { %v11760_v63 = vpop.eup %11759  ;;  %11773 = vpow2.f32 %v10019_v2  ;;  %v10024_v43 = vmul.f32 -1.442695, %v16418_v56  ;;  %v16424_v56 = vld [vmem:[#allocation82_spill] sm:$0xff] }
 0x856   : > { %v8859_v35 = vmul.f32 %v11760_v63, %v8448_v0  ;;  %v11762_v30 = vpop.eup %11761 }
 0x857   : > { %v7409_v9 = vpop.xlane.xlu1 %7408  ;;  %v1475_v23 = vadd.f32 1.0, %v11762_v30 }
 0x858   : > { %11775 = vrcp.f32 %v7409_v9  ;;  %8945 = vrot.lane.b32.xlu1 %v8859_v35, %s12020_s15  ;;  %v16419_v35 = vld [vmem:[#allocation78_spill] sm:$0xff] }
 0x859   : > { %v11764_v33 = vpop.eup %11763  ;;  %11777 = vpow2.f32 %v10020_v62  ;;  %v10025_v6 = vmul.f32 -1.442695, %v16419_v35 }
 0x85a   : > { %v8864_v60 = vmul.f32 %v11764_v33, %v11176_v51  ;;  %v11766_v24 = vpop.eup %11765  ;;  %11779 = vrcp.f32 %v1474_v36  ;;  %v5003_v51 = vpop.permute.xlu0 %5002 }
 0x85b   : > { %v8904_v31 = vpop.permute.xlu1 %8903  ;;  %11781 = vpow2.f32 %v10021_v52  ;;  %v1476_v46 = vadd.f32 1.0, %v11766_v24 }
 0x85c   : > { %v8998_v12 = vmul.f32 %v15296_v17, %v8904_v31  ;;  %8955 = vrot.lane.b32.xlu1 %v8864_v60, %s12020_s15  ;;  %11783 = vrcp.f32 %v1475_v23  ;;  %v11190_v17 = vpop.f32.mrf.mxu1 }
 0x85d   : > { %v11768_v4 = vpop.eup %11767  ;;  %11785 = vpow2.f32 %v10022_v54 }
 0x85e   : > { %9065 = vrot.lane.b32.xlu0 %v8998_v12, %s12023_s8  ;;  %v8863_v49 = vmul.f32 %v11768_v4, %v8622_v13  ;;  %v11770_v59 = vpop.eup %11769  ;;  %11787 = vrcp.f32 %v1476_v46  ;;  %v8796_v57 = vpop.f32.mrf.mxu1  ;;  %v16421_v4 = vld [vmem:[#allocation81_spill] sm:$0xff]  ;;  %v16422_v46 = vld [vmem:[#allocation80_spill] sm:$0xff] }
 0x85f   : > { %v1477_v21 = vadd.f32 1.0, %v11770_v59  ;;  %11789 = vpow2.f32 %v10023_v28 }
 0x860   : > { %8953 = vrot.lane.b32.xlu1 %v8863_v49, %s12020_s15  ;;  %v5005_v49 = vpop.permute.xlu0 %5004 }
 0x861   : > { %v11772_v14 = vpop.eup %11771  ;;  %11791 = vrcp.f32 %v1477_v21 }
 0x862   : > { %v8902_v16 = vpop.permute.xlu1 %8901  ;;  %v8868_v22 = vmul.f32 %v11772_v14, %v11190_v17  ;;  %v11774_v37 = vpop.eup %11773  ;;  %11793 = vpow2.f32 %v10024_v43  ;;  %v10028_v14 = vmul.f32 -1.442695, %v16422_v46 }
 0x863   : > { %v8997_v53 = vmul.f32 %v15291_v27, %v8902_v16  ;;  %v1478_v25 = vadd.f32 1.0, %v11774_v37 }
 0x864   : > { %8963 = vrot.lane.b32.xlu1 %v8868_v22, %s12020_s15 }
 0x865   : > { %v11776_v20 = vpop.eup %11775  ;;  %9063 = vrot.lane.b32.xlu0 %v8997_v53, %s12023_s8  ;;  %11795 = vrcp.f32 %v1478_v25  ;;  %v16423_v53 = vld [vmem:[#allocation85_spill] sm:$0xff] }
 0x866   : > { %v8912_v47 = vpop.permute.xlu1 %8911  ;;  %v8867_v61 = vmul.f32 %v11776_v20, %v8796_v57  ;;  %v11778_v8 = vpop.eup %11777  ;;  %11797 = vpow2.f32 %v10025_v6  ;;  %v10029_v37 = vmul.f32 -1.442695, %v16423_v53 }
 0x867   : > { %v9002_v2 = vmul.f32 %v15321_v11, %v8912_v47  ;;  %v15502_v27 = vpop.eup %11779  ;;  %v1479_v9 = vadd.f32 1.0, %v11778_v8 }
 0x868   : > { %8961 = vrot.lane.b32.xlu1 %v8867_v61, %s12020_s15  ;;  %v5070_v63 = vmul.f32 %v15502_v27, %v15472_v7  ;;  %v11782_v11 = vpop.eup %11781  ;;  %v16420_v7 = vld [vmem:[#allocation76_spill] sm:$0xff]  ;;  %s11941_s15 = sshll.u32 %s12024_s30, 4  ;;  %s11942_s15 = int_to_ptr.vmem [resolvable:$false] %s11941_s15 }
 0x869   : > { %9073 = vrot.lane.b32.xlu0 %v9002_v2, %s12023_s8  ;;  %v15510_v34 = vpop.eup %11783  ;;  %v10026_v33 = vmul.f32 -1.442695, %v16420_v7  ;;  %11799 = vrcp.f32 %v1479_v9  ;;  %v1480_v1 = vadd.f32 1.0, %v11782_v11  ;;  %s11943_s16 = scalar_lea.vmem %s11942_s15, 8192  ;;  %p11944_p10 = scmp.lt.s32.totalorder %s15731_s29, %s11942_s15 }
 0x86a   : > { %v8910_v0 = vpop.permute.xlu1 %8909  ;;  %v5071_v30 = vmul.f32 %v15510_v34, %v15477_v55  ;;  %p11945_p13 = scmp.lt.s32.totalorder %s11943_s16, %s11937_s20 }
 0x86b   : > { %v9001_v62 = vmul.f32 %v15316_v32, %v8910_v0  ;;  %v11786_v32 = vpop.eup %11785  ;;  %11801 = vpow2.f32 %v10026_v33 }
 0x86c   : > { %9480 = vrot.lane.b32.xlu1 %v5070_v63, %s12022_s12  ;;  %v15518_v52 = vpop.eup %11787  ;;  %v1481_v24 = vadd.f32 1.0, %v11786_v32  ;;  %11803 = vrcp.f32 %v1480_v1  ;;  %p11946_p2 = por %p11945_p13, %p11944_p10 }
 0x86d   : > { %9071 = vrot.lane.b32.xlu0 %v9001_v62, %s12023_s8  ;;  %v5072_v31 = vmul.f32 %v15518_v52, %v15482_v42  ;;  %v11790_v12 = vpop.eup %11789 }
 0x86e   : > { %v8920_v36 = vpop.permute.xlu1 %8919  ;;  %v15526_v13 = vpop.eup %11791  ;;  %11805 = vrcp.f32 %v1481_v24  ;;  %v1482_v54 = vadd.f32 1.0, %v11790_v12  ;;  %p11947_p3 = pnand %p11946_p2, %p11940_p1 }
 0x86f   : > { %v9006_v60 = vmul.f32 %v15338_v3, %v8920_v36  ;;  %v10027_v3 = vmul.f32 -1.442695, %v16421_v4  ;;  %v5073_v15 = vmul.f32 %v15526_v13, %v15488_v40  ;;  %v5007_v40 = vpop.permute.xlu0 %5006 }
 0x870   : > { %9482 = vrot.lane.b32.xlu1 %v5071_v30, %s12022_s12 }
 0x871   : > { %9081 = vrot.lane.b32.xlu0 %v9006_v60, %s12023_s8  ;;  %11807 = vpow2.f32 %v10027_v3 }
 0x872   : > { %v8918_v55 = vpop.permute.xlu1 %8917  ;;  %11809 = vrcp.f32 %v1482_v54 }
 0x873   : > { %v9005_v23 = vmul.f32 %v15334_v50, %v8918_v55  ;;  %v11794_v50 = vpop.eup %11793  ;;  %11811 = vpow2.f32 %v10028_v14  ;;  %v5009_v2 = vpop.permute.xlu0 %5008 }
 0x874   : > { %9484 = vrot.lane.b32.xlu1 %v5072_v31, %s12022_s12  ;;  %v15534_v17 = vpop.eup %11795  ;;  %v1483_v39 = vadd.f32 1.0, %v11794_v50 }
 0x875   : > { %9079 = vrot.lane.b32.xlu0 %v9005_v23, %s12023_s8  ;;  %v5074_v16 = vmul.f32 %v15534_v17, %v15494_v48 }
 0x876   : > { %v8908_v42 = vpop.permute.xlu1 %8907  ;;  %11813 = vrcp.f32 %v1483_v39 }
 0x877   : > { %v9000_v59 = vmul.f32 %v15308_v45, %v8908_v42  ;;  %v11798_v45 = vpop.eup %11797  ;;  %11815 = vpow2.f32 %v10029_v37  ;;  %v5011_v62 = vpop.permute.xlu0 %5010 }
 0x878   : > { %9486 = vrot.lane.b32.xlu1 %v5073_v15, %s12022_s12  ;;  %v15542_v21 = vpop.eup %11799  ;;  %v1484_v48 = vadd.f32 1.0, %v11798_v45 }
 0x879   : > { %9069 = vrot.lane.b32.xlu0 %v9000_v59, %s12023_s8  ;;  %v5075_v20 = vmul.f32 %v15542_v21, %v5001_v41  ;;  %v11802_v61 = vpop.eup %11801 }
 0x87a   : > { %v8928_v22 = vpop.permute.xlu1 %8927  ;;  %v15549_v43 = vpop.eup %11803  ;;  %11817 = vrcp.f32 %v1484_v48 }
 0x87b   : > { %v9010_v28 = vmul.f32 %v15354_v44, %v8928_v22  ;;  %v10030_v44 = vmul.f32 -1.442695, %v16424_v56  ;;  %v5076_v8 = vmul.f32 %v15549_v43, %v5003_v51  ;;  %v15554_v63 = vpop.eup %11805  ;;  %v5013_v32 = vpop.permute.xlu0 %5012 }
 0x87c   : > { %9488 = vrot.lane.b32.xlu1 %v5074_v16, %s12022_s12  ;;  %v5077_v35 = vmul.f32 %v15554_v63, %v5005_v49 }
 0x87d   : > { %9089 = vrot.lane.b32.xlu0 %v9010_v28, %s12023_s8  ;;  %11819 = vpow2.f32 %v10030_v44 }
 0x87e   : > { %v8906_v57 = vpop.permute.xlu1 %8905  ;;  %v11808_v0 = vpop.eup %11807 }
 0x87f   : > { %v8999_v47 = vmul.f32 %v15304_v5, %v8906_v57  ;;  %v1485_v5 = vadd.f32 1.0, %v11802_v61  ;;  %v15560_v9 = vpop.eup %11809  ;;  %v1486_v30 = vadd.f32 1.0, %v11808_v0  ;;  %v5015_v3 = vpop.permute.xlu0 %5014 }
 0x880   : > { %9490 = vrot.lane.b32.xlu1 %v5075_v20, %s12022_s12  ;;  %v5078_v36 = vmul.f32 %v15560_v9, %v5007_v40 }
 0x881   : > { %9067 = vrot.lane.b32.xlu0 %v8999_v47, %s12023_s8  ;;  %11821 = vrcp.f32 %v1485_v5 }
 0x882   : > { %v8926_v25 = vpop.permute.xlu1 %8925  ;;  %11823 = vrcp.f32 %v1486_v30 }
 0x883   : > { %v9009_v41 = vmul.f32 %v15350_v26, %v8926_v25  ;;  %v11812_v26 = vpop.eup %11811  ;;  %v5017_v46 = vpop.permute.xlu0 %5016 }
 0x884   : > { %9492 = vrot.lane.b32.xlu1 %v5076_v8, %s12022_s12  ;;  %v11814_v51 = vpop.eup %11813  ;;  %v1487_v60 = vadd.f32 1.0, %v11812_v26 }
 0x885   : > { %9087 = vrot.lane.b32.xlu0 %v9009_v41, %s12023_s8  ;;  %v5079_v1 = vmul.f32 %v11814_v51, %v5009_v2 }
 0x886   : > { %v8916_v6 = vpop.permute.xlu1 %8915  ;;  %11825 = vrcp.f32 %v1487_v60 }
 0x887   : > { %v9004_v11 = vmul.f32 %v15330_v38, %v8916_v6  ;;  %v11816_v38 = vpop.eup %11815  ;;  %v5019_v28 = vpop.permute.xlu0 %5018 }
 0x888   : > { %9494 = vrot.lane.b32.xlu1 %v5077_v35, %s12022_s12  ;;  %v15569_v24 = vpop.eup %11817  ;;  %v1488_v23 = vadd.f32 1.0, %v11816_v38 }
 0x889   : > { %9077 = vrot.lane.b32.xlu0 %v9004_v11, %s12023_s8  ;;  %v5080_v12 = vmul.f32 %v15569_v24, %v5011_v62 }
 0x88a   : > { %v8936_v7 = vpop.permute.xlu1 %8935  ;;  %11827 = vrcp.f32 %v1488_v23 }
 0x88b   : > { %v9014_v33 = vmul.f32 %v15510_v34, %v8936_v7  ;;  %v11820_v34 = vpop.eup %11819  ;;  %v5021_v20 = vpop.permute.xlu0 %5020 }
 0x88c   : > { %9496 = vrot.lane.b32.xlu1 %v5078_v36, %s12022_s12  ;;  %v1489_v15 = vadd.f32 1.0, %v11820_v34 }
 0x88d   : > { %9097 = vrot.lane.b32.xlu0 %v9014_v33, %s12023_s8 }
 0x88e   : > { %v8914_v31 = vpop.permute.xlu1 %8913  ;;  %11829 = vrcp.f32 %v1489_v15 }
 0x88f   : > { %v9003_v55 = vmul.f32 %v15326_v29, %v8914_v31  ;;  %v11822_v29 = vpop.eup %11821 }
 0x890   : > { %9498 = vrot.lane.b32.xlu1 %v5079_v1, %s12022_s12  ;;  %v5081_v42 = vmul.f32 %v11822_v29, %v5013_v32  ;;  %v11824_v50 = vpop.eup %11823 }
 0x891   : > { %9075 = vrot.lane.b32.xlu0 %v9003_v55, %s12023_s8  ;;  %v5082_v14 = vmul.f32 %v11824_v50, %v5015_v3 }
 0x892   : > { %v8934_v4 = vpop.permute.xlu1 %8933 }
 0x893   : > { %v9013_v49 = vmul.f32 %v15502_v27, %v8934_v4  ;;  %v11826_v22 = vpop.eup %11825 }
 0x894   : > { %9500 = vrot.lane.b32.xlu1 %v5080_v12, %s12022_s12  ;;  %v5083_v40 = vmul.f32 %v11826_v22, %v5017_v46 }
 0x895   : > { %9095 = vrot.lane.b32.xlu0 %v9013_v49, %s12023_s8 }
 0x896   : > { %v8924_v54 = vpop.permute.xlu1 %8923 }
 0x897   : > { %v9008_v59 = vmul.f32 %v15346_v19, %v8924_v54  ;;  %v11828_v45 = vpop.eup %11827 }
 0x898   : > { %9502 = vrot.lane.b32.xlu1 %v5081_v42, %s12022_s12  ;;  %v5084_v53 = vmul.f32 %v11828_v45, %v5019_v28 }
 0x899   : > { %9085 = vrot.lane.b32.xlu0 %v9008_v59, %s12023_s8 }
 0x89a   : > { %v8944_v27 = vpop.permute.xlu1 %8943 }
 0x89b   : > { %v9018_v16 = vmul.f32 %v15542_v21, %v8944_v27  ;;  %v11830_v57 = vpop.eup %11829 }
 0x89c   : > { %9504 = vrot.lane.b32.xlu1 %v5082_v14, %s12022_s12  ;;  %v5085_v48 = vmul.f32 %v11830_v57, %v5021_v20 }
 0x89d   : > { %9105 = vrot.lane.b32.xlu0 %v9018_v16, %s12023_s8 }
 0x89e   : > { %v8922_v39 = vpop.permute.xlu1 %8921 }
 0x89f   : > { %v9007_v19 = vmul.f32 %v15342_v58, %v8922_v39 }
 0x8a0   : > { %9506 = vrot.lane.b32.xlu1 %v5083_v40, %s12022_s12 }
 0x8a1   : > { %9083 = vrot.lane.b32.xlu0 %v9007_v19, %s12023_s8 }
 0x8a2   : > { %v8942_v37 = vpop.permute.xlu1 %8941 }
 0x8a3   : > { %v9017_v21 = vmul.f32 %v15534_v17, %v8942_v37 }
 0x8a4   : > { %9508 = vrot.lane.b32.xlu1 %v5084_v53, %s12022_s12 }
 0x8a5   : > { %9103 = vrot.lane.b32.xlu0 %v9017_v21, %s12023_s8 }
 0x8a6   : > { %v8932_v47 = vpop.permute.xlu1 %8931 }
 0x8a7   : > { %v9012_v61 = vmul.f32 %v15362_v10, %v8932_v47 }
 0x8a8   : > { %9510 = vrot.lane.b32.xlu1 %v5085_v48, %s12022_s12 }
 0x8a9   : > { %9093 = vrot.lane.b32.xlu0 %v9012_v61, %s12023_s8 }
 0x8aa   : > { %v8952_v58 = vpop.permute.xlu1 %8951 }
 0x8ab   : > { %v9022_v56 = vmul.f32 %v11814_v51, %v8952_v58 }
 0x8ad   : > { %9113 = vrot.lane.b32.xlu0 %v9022_v56, %s12023_s8 }
 0x8ae   : > { %v8930_v44 = vpop.permute.xlu1 %8929 }
 0x8af   : > { %v9011_v17 = vmul.f32 %v15358_v18, %v8930_v44 }
 0x8b1   : > { %9091 = vrot.lane.b32.xlu0 %v9011_v17, %s12023_s8 }
 0x8b2   : > { %v8950_v2 = vpop.permute.xlu1 %8949 }
 0x8b3   : > { %v9021_v8 = vmul.f32 %v15560_v9, %v8950_v2 }
 0x8b5   : > { %9111 = vrot.lane.b32.xlu0 %v9021_v8, %s12023_s8 }
 0x8b6   : > { %v8940_v25 = vpop.permute.xlu1 %8939 }
 0x8b7   : > { %v9016_v10 = vmul.f32 %v15526_v13, %v8940_v25 }
 0x8b9   : > { %9101 = vrot.lane.b32.xlu0 %v9016_v10, %s12023_s8 }
 0x8ba   : > { %v8960_v41 = vpop.permute.xlu1 %8959 }
 0x8bb   : > { %v9026_v33 = vmul.f32 %v11826_v22, %v8960_v41 }
 0x8be   : > { %v8938_v5 = vpop.permute.xlu1 %8937 }
 0x8bf   : > { %v9015_v0 = vmul.f32 %v15518_v52, %v8938_v5 }
 0x8c1   : > { %9099 = vrot.lane.b32.xlu0 %v9015_v0, %s12023_s8  ;;  %v11249_v0 = vpop.f32.mrf.mxu1 }
 0x8c2   : > { %v8958_v35 = vpop.permute.xlu1 %8957 }
 0x8c3   : > { %v9025_v18 = vmul.f32 %v11824_v50, %v8958_v35 }
 0x8c5   : > { %9119 = vrot.lane.b32.xlu0 %v9025_v18, %s12023_s8 }
 0x8c6   : > { %v8948_v6 = vpop.permute.xlu1 %8947 }
 0x8c7   : > { %v9020_v62 = vmul.f32 %v15554_v63, %v8948_v6  ;;  %v9642_v6 = vpop.f32.mrf.mxu1 }
 0x8c9   : > { %9109 = vrot.lane.b32.xlu0 %v9020_v62, %s12023_s8 }
 0x8ca   : > { %v8946_v11 = vpop.permute.xlu1 %8945 }
 0x8cb   : > { %v9019_v13 = vmul.f32 %v15549_v43, %v8946_v11 }
 0x8cd   : > { %9107 = vrot.lane.b32.xlu0 %v9019_v13, %s12023_s8  ;;  %v11252_v13 = vpop.f32.mrf.mxu1 }
 0x8ce   : > { %v8956_v9 = vpop.permute.xlu1 %8955 }
 0x8cf   : > { %v9024_v30 = vmul.f32 %v11822_v29, %v8956_v9  ;;  %v9652_v9 = vpop.f32.mrf.mxu1 }
 0x8d0   : > { %v9066_v26 = vpop.permute.xlu0 %9065 }
 0x8d1   : > { %9117 = vrot.lane.b32.xlu0 %v9024_v30, %s12023_s8 }
 0x8d2   : > { %v8954_v52 = vpop.permute.xlu1 %8953 }
 0x8d3   : > { %v9023_v36 = vmul.f32 %v15569_v24, %v8954_v52 }
 0x8d5   : > { %9115 = vrot.lane.b32.xlu0 %v9023_v36, %s12023_s8 }
 0x8d6   : > { %v8964_v7 = vpop.permute.xlu1 %8963 }
 0x8d7   : > { %v9064_v63 = vpop.permute.xlu0 %9063  ;;  %v9028_v32 = vmul.f32 %v11830_v57, %v8964_v7 }
 0x8d8   : > { %11195 = vmatprep.mubr.msk.f32.mxu0 %vm1763_vm1, %v9064_v63 }
 0x8d9   : > { %9121 = vrot.lane.b32.xlu0 %v9026_v33, %s12023_s8  ;;  %11196 = vmatmul.mubr.msk.f32.vlgmr.msra.gmra.mxu0 %vm1763_vm1, %v9066_v26  ;;  %v11255_v26 = vpop.f32.mrf.mxu1 }
 0x8da   : > { %v8962_v43 = vpop.permute.xlu1 %8961 }
 0x8db   : > { %v9027_v51 = vmul.f32 %v11828_v45, %v8962_v43  ;;  %v9074_v60 = vpop.permute.xlu0 %9073  ;;  %v9662_v43 = vpop.f32.mrf.mxu1 }
 0x8dd   : > { %9123 = vrot.lane.b32.xlu0 %v9027_v51, %s12023_s8 }
 0x8de   : > { %v9481_v38 = vpop.permute.xlu1 %9480 }
 0x8df   : > { %11271 = vmatprep.mubr.msk.f32.mxu1 %vm1763_vm1, %v9481_v38  ;;  %v9072_v1 = vpop.permute.xlu0 %9071  ;;  %v11258_v38 = vpop.f32.mrf.mxu1 }
 0x8e1   : > { %9125 = vrot.lane.b32.xlu0 %v9028_v32, %s12023_s8  ;;  %v9672_v32 = vpop.f32.mrf.mxu1 }
 0x8e2   : > { %v9483_v31 = vpop.permute.xlu1 %9482 }
 0x8e3   : > { %11272 = vmatmul.mubr.msk.f32.gmra.mxu1 %vm1763_vm1, %v9483_v31  ;;  %v9082_v55 = vpop.permute.xlu0 %9081 }
 0x8e6   : > { %v9485_v24 = vpop.permute.xlu1 %9484 }
 0x8e7   : > { %11274 = vmatprep.mubr.msk.f32.mxu1 %vm1763_vm1, %v9485_v24  ;;  %v9080_v23 = vpop.permute.xlu0 %9079 }
 0x8ea   : > { %v9487_v34 = vpop.permute.xlu1 %9486 }
 0x8eb   : > { %11275 = vmatmul.mubr.msk.f32.gmra.mxu1 %vm1763_vm1, %v9487_v34  ;;  %v9070_v12 = vpop.permute.xlu0 %9069 }
 0x8ee   : > { %v9489_v4 = vpop.permute.xlu1 %9488 }
 0x8ef   : > { %11277 = vmatprep.mubr.msk.f32.mxu1 %vm1763_vm1, %v9489_v4  ;;  %v9090_v3 = vpop.permute.xlu0 %9089 }
 0x8f2   : > { %v9491_v49 = vpop.permute.xlu1 %9490 }
 0x8f3   : > { %11278 = vmatmul.mubr.msk.f32.gmra.mxu1 %vm1763_vm1, %v9491_v49  ;;  %v9068_v15 = vpop.permute.xlu0 %9067 }
 0x8f4   : > { %11198 = vmatprep.mubr.msk.f32.mxu0 %vm1763_vm1, %v9068_v15 }
 0x8f5   : > { %11199 = vmatmul.mubr.msk.f32.gmra.mxu0 %vm1763_vm1, %v9070_v12 }
 0x8f6   : > { %v9493_v29 = vpop.permute.xlu1 %9492  ;;  %11201 = vmatprep.mubr.msk.f32.mxu0 %vm1763_vm1, %v9072_v1 }
 0x8f7   : > { %11280 = vmatprep.mubr.msk.f32.mxu1 %vm1763_vm1, %v9493_v29  ;;  %v9088_v42 = vpop.permute.xlu0 %9087 }
 0x8f9   : > { %11202 = vmatmul.mubr.msk.f32.gmra.mxu0 %vm1763_vm1, %v9074_v60 }
 0x8fa   : > { %v9495_v54 = vpop.permute.xlu1 %9494 }
 0x8fb   : > { %11281 = vmatmul.mubr.msk.f32.gmra.mxu1 %vm1763_vm1, %v9495_v54  ;;  %v9078_v59 = vpop.permute.xlu0 %9077 }
 0x8fe   : > { %v9497_v50 = vpop.permute.xlu1 %9496 }
 0x8ff   : > { %11283 = vmatprep.mubr.msk.f32.mxu1 %vm1763_vm1, %v9497_v50  ;;  %v9098_v46 = vpop.permute.xlu0 %9097 }
 0x902   : > { %v9499_v14 = vpop.permute.xlu1 %9498 }
 0x903   : > { %11284 = vmatmul.mubr.msk.f32.gmra.mxu1 %vm1763_vm1, %v9499_v14  ;;  %v9076_v27 = vpop.permute.xlu0 %9075 }
 0x904   : > { %11204 = vmatprep.mubr.msk.f32.mxu0 %vm1763_vm1, %v9076_v27 }
 0x905   : > { %11205 = vmatmul.mubr.msk.f32.gmra.mxu0 %vm1763_vm1, %v9078_v59 }
 0x906   : > { %v9501_v16 = vpop.permute.xlu1 %9500  ;;  %11207 = vmatprep.mubr.msk.f32.mxu0 %vm1763_vm1, %v9080_v23 }
 0x907   : > { %11286 = vmatprep.mubr.msk.f32.mxu1 %vm1763_vm1, %v9501_v16  ;;  %v9096_v22 = vpop.permute.xlu0 %9095 }
 0x909   : > { %11208 = vmatmul.mubr.msk.f32.gmra.mxu0 %vm1763_vm1, %v9082_v55  ;;  %v11261_v55 = vpop.f32.mrf.mxu1 }
 0x90a   : > { %v9503_v40 = vpop.permute.xlu1 %9502 }
 0x90b   : > { %11287 = vmatmul.mubr.msk.f32.gmra.mxu1 %vm1763_vm1, %v9503_v40  ;;  %v9086_v39 = vpop.permute.xlu0 %9085  ;;  %v9682_v4 = vpop.f32.mrf.mxu1 }
 0x90d   : > { %v11264_v15 = vpop.f32.mrf.mxu1 }
 0x90e   : > { %v9505_v28 = vpop.permute.xlu1 %9504 }
 0x90f   : > { %11289 = vmatprep.mubr.msk.f32.mxu1 %vm1763_vm1, %v9505_v28  ;;  %v9106_v19 = vpop.permute.xlu0 %9105  ;;  %v9692_v29 = vpop.f32.mrf.mxu1 }
 0x911   : > { %v11267_v59 = vpop.f32.mrf.mxu1 }
 0x912   : > { %v9507_v45 = vpop.permute.xlu1 %9506 }
 0x913   : > { %11290 = vmatmul.mubr.msk.f32.gmra.mxu1 %vm1763_vm1, %v9507_v45  ;;  %v9084_v53 = vpop.permute.xlu0 %9083  ;;  %v9702_v16 = vpop.f32.mrf.mxu1 }
 0x914   : > { %11210 = vmatprep.mubr.msk.f32.mxu0 %vm1763_vm1, %v9084_v53 }
 0x915   : > { %11211 = vmatmul.mubr.msk.f32.gmra.mxu0 %vm1763_vm1, %v9086_v39  ;;  %v11270_v39 = vpop.f32.mrf.mxu1 }
 0x916   : > { %v9509_v37 = vpop.permute.xlu1 %9508  ;;  %11213 = vmatprep.mubr.msk.f32.mxu0 %vm1763_vm1, %v9088_v42 }
 0x917   : > { %11292 = vmatprep.mubr.msk.f32.mxu1 %vm1763_vm1, %v9509_v37  ;;  %v9104_v20 = vpop.permute.xlu0 %9103  ;;  %v9712_v28 = vpop.f32.mrf.mxu1 }
 0x919   : > { %11214 = vmatmul.mubr.msk.f32.gmra.mxu0 %vm1763_vm1, %v9090_v3 }
 0x91a   : > { %v9511_v21 = vpop.permute.xlu1 %9510 }
 0x91b   : > { %11293 = vmatmul.mubr.msk.f32.gmra.mxu1 %vm1763_vm1, %v9511_v21  ;;  %v9094_v57 = vpop.permute.xlu0 %9093 }
 0x91f   : > { %v9114_v48 = vpop.permute.xlu0 %9113 }
 0x923   : > { %v9092_v47 = vpop.permute.xlu0 %9091 }
 0x924   : > { %11216 = vmatprep.mubr.msk.f32.mxu0 %vm1763_vm1, %v9092_v47 }
 0x925   : > { %11217 = vmatmul.mubr.msk.f32.gmra.mxu0 %vm1763_vm1, %v9094_v57 }
 0x926   : > { %11219 = vmatprep.mubr.msk.f32.mxu0 %vm1763_vm1, %v9096_v22 }
 0x927   : > { %v9112_v61 = vpop.permute.xlu0 %9111 }
 0x929   : > { %11220 = vmatmul.mubr.msk.f32.gmra.mxu0 %vm1763_vm1, %v9098_v46 }
 0x92b   : > { %v9102_v58 = vpop.permute.xlu0 %9101 }
 0x933   : > { %v9100_v56 = vpop.permute.xlu0 %9099 }
 0x934   : > { %11222 = vmatprep.mubr.msk.f32.mxu0 %vm1763_vm1, %v9100_v56 }
 0x935   : > { %11223 = vmatmul.mubr.msk.f32.gmra.mxu0 %vm1763_vm1, %v9102_v58 }
 0x936   : > { %11225 = vmatprep.mubr.msk.f32.mxu0 %vm1763_vm1, %v9104_v20 }
 0x937   : > { %v9120_v44 = vpop.permute.xlu0 %9119 }
 0x939   : > { %11226 = vmatmul.mubr.msk.f32.gmra.mxu0 %vm1763_vm1, %v9106_v19 }
 0x93b   : > { %v9110_v17 = vpop.permute.xlu0 %9109 }
 0x93f   : > { %v9108_v2 = vpop.permute.xlu0 %9107 }
 0x940   : > { %11228 = vmatprep.mubr.msk.f32.mxu0 %vm1763_vm1, %v9108_v2 }
 0x941   : > { %11229 = vmatmul.mubr.msk.f32.gmra.mxu0 %vm1763_vm1, %v9110_v17 }
 0x942   : > { %11231 = vmatprep.mubr.msk.f32.mxu0 %vm1763_vm1, %v9112_v61 }
 0x943   : > { %v9118_v8 = vpop.permute.xlu0 %9117 }
 0x945   : > { %11232 = vmatmul.mubr.msk.f32.gmra.mxu0 %vm1763_vm1, %v9114_v48 }
 0x947   : > { %v9116_v25 = vpop.permute.xlu0 %9115 }
 0x948   : > { %11234 = vmatprep.mubr.msk.f32.mxu0 %vm1763_vm1, %v9116_v25 }
 0x949   : > { %11235 = vmatmul.mubr.msk.f32.gmra.mxu0 %vm1763_vm1, %v9118_v8 }
 0x94a   : > { %11237 = vmatprep.mubr.msk.f32.mxu0 %vm1763_vm1, %v9120_v44 }
 0x94b   : > { %v9122_v10 = vpop.permute.xlu0 %9121 }
 0x94d   : > { %11238 = vmatmul.mubr.msk.f32.gmra.mxu0 %vm1763_vm1, %v9122_v10 }
 0x94f   : > { %v9124_v41 = vpop.permute.xlu0 %9123 }
 0x950   : > { %11240 = vmatprep.mubr.msk.f32.mxu0 %vm1763_vm1, %v9124_v41 }
 0x953   : > { %v9126_v5 = vpop.permute.xlu0 %9125 }
 0x954   : > { %11241 = vmatmul.mubr.msk.f32.gmra.mxu0 %vm1763_vm1, %v9126_v5 }
 0x999   : > { %v11197_v35 = vpop.f32.mrf.mxu0 }
 0x99a   : > { %v9648_v18 = vadd.f32 %v11249_v0, %v11197_v35 }
 0x99b   : > { %v9257_v62 = vpop.f32.mrf.mxu0 }
 0x99c   : > { %9802 = vst.msk [vmem:[%s15662_s27 + $0x8] sm:$0xff] %vm346_vm0, %v9648_v18  ;;  %v9643_v11 = vadd.f32 %v9642_v6, %v9257_v62 }
 0x99e   : > { %9801 = vst.msk [vmem:[%s15662_s27] sm:$0xff] %vm346_vm0, %v9643_v11 }
 0x9a3   : > { %v11273_v53 = vpop.f32.mrf.mxu1 }
 0x9a5   : > { %v9722_v48 = vpop.f32.mrf.mxu1 }
 0x9ab   : > { %v11276_v58 = vpop.f32.mrf.mxu1 }
 0x9ad   : > { %v9732_v56 = vpop.f32.mrf.mxu1 }
 0x9b3   : > { %v11279_v44 = vpop.f32.mrf.mxu1 }
 0x9b5   : > { %v11200_v30 = vpop.f32.mrf.mxu0  ;;  %v9742_v8 = vpop.f32.mrf.mxu1 }
 0x9b6   : > { %v9658_v52 = vadd.f32 %v11252_v13, %v11200_v30 }
 0x9b7   : > { %v9267_v36 = vpop.f32.mrf.mxu0 }
 0x9b8   : > { %9804 = vst.msk [vmem:[%s15662_s27 + $0x18] sm:$0xff] %vm346_vm0, %v9658_v52  ;;  %v9653_v7 = vadd.f32 %v9652_v9, %v9267_v36 }
 0x9b9   : > { %v11203_v33 = vpop.f32.mrf.mxu0 }
 0x9ba   : > { %9803 = vst.msk [vmem:[%s15662_s27 + $0x10] sm:$0xff] %vm346_vm0, %v9653_v7  ;;  %v9668_v63 = vadd.f32 %v11255_v26, %v11203_v33 }
 0x9bb   : > { %v9277_v51 = vpop.f32.mrf.mxu0  ;;  %v11282_v41 = vpop.f32.mrf.mxu1 }
 0x9bc   : > { %9806 = vst.msk [vmem:[%s15662_s27 + $0x28] sm:$0xff] %vm346_vm0, %v9668_v63  ;;  %v9663_v60 = vadd.f32 %v9662_v43, %v9277_v51 }
 0x9bd   : > { %v9752_v6 = vpop.f32.mrf.mxu1 }
 0x9be   : > { %9805 = vst.msk [vmem:[%s15662_s27 + $0x20] sm:$0xff] %vm346_vm0, %v9663_v60 }
 0x9c3   : > { %v11285_v62 = vpop.f32.mrf.mxu1 }
 0x9c5   : > { %v11206_v1 = vpop.f32.mrf.mxu0  ;;  %v9762_v9 = vpop.f32.mrf.mxu1 }
 0x9c6   : > { %v9678_v31 = vadd.f32 %v11258_v38, %v11206_v1 }
 0x9c7   : > { %v9287_v24 = vpop.f32.mrf.mxu0 }
 0x9c8   : > { %9808 = vst.msk [vmem:[%s15662_s27 + $0x38] sm:$0xff] %vm346_vm0, %v9678_v31  ;;  %v9673_v23 = vadd.f32 %v9672_v32, %v9287_v24 }
 0x9c9   : > { %v11209_v34 = vpop.f32.mrf.mxu0 }
 0x9ca   : > { %9807 = vst.msk [vmem:[%s15662_s27 + $0x30] sm:$0xff] %vm346_vm0, %v9673_v23  ;;  %v9688_v12 = vadd.f32 %v11261_v55, %v11209_v34 }
 0x9cb   : > { %v9297_v3 = vpop.f32.mrf.mxu0  ;;  %v11288_v26 = vpop.f32.mrf.mxu1 }
 0x9cc   : > { %9810 = vst.msk [vmem:[%s15662_s27 + $0x48] sm:$0xff] %vm346_vm0, %v9688_v12  ;;  %v9683_v49 = vadd.f32 %v9682_v4, %v9297_v3 }
 0x9cd   : > { %v9772_v43 = vpop.f32.mrf.mxu1 }
 0x9ce   : > { %9809 = vst.msk [vmem:[%s15662_s27 + $0x40] sm:$0xff] %vm346_vm0, %v9683_v49 }
 0x9d3   : > { %v11291_v38 = vpop.f32.mrf.mxu1 }
 0x9d5   : > { %v11212_v42 = vpop.f32.mrf.mxu0  ;;  %v9782_v24 = vpop.f32.mrf.mxu1 }
 0x9d6   : > { %v9698_v54 = vadd.f32 %v11264_v15, %v11212_v42 }
 0x9d7   : > { %v9307_v50 = vpop.f32.mrf.mxu0 }
 0x9d8   : > { %9812 = vst.msk [vmem:[%s15662_s27 + $0x58] sm:$0xff] %vm346_vm0, %v9698_v54  ;;  %v9693_v46 = vadd.f32 %v9692_v29, %v9307_v50 }
 0x9d9   : > { %v11215_v14 = vpop.f32.mrf.mxu0 }
 0x9da   : > { %9811 = vst.msk [vmem:[%s15662_s27 + $0x50] sm:$0xff] %vm346_vm0, %v9693_v46  ;;  %v9708_v27 = vadd.f32 %v11267_v59, %v11215_v14 }
 0x9db   : > { %v9317_v22 = vpop.f32.mrf.mxu0  ;;  %v11294_v12 = vpop.f32.mrf.mxu1 }
 0x9dc   : > { %9814 = vst.msk [vmem:[%s15662_s27 + $0x68] sm:$0xff] %vm346_vm0, %v9708_v27  ;;  %v9703_v40 = vadd.f32 %v9702_v16, %v9317_v22 }
 0x9dd   : > { %v9792_v49 = vpop.f32.mrf.mxu1 }
 0x9de   : > { %9813 = vst.msk [vmem:[%s15662_s27 + $0x60] sm:$0xff] %vm346_vm0, %v9703_v40 }
 0x9e5   : > { %v11218_v19 = vpop.f32.mrf.mxu0 }
 0x9e6   : > { %v9718_v45 = vadd.f32 %v11270_v39, %v11218_v19 }
 0x9e7   : > { %v9327_v37 = vpop.f32.mrf.mxu0 }
 0x9e8   : > { %9816 = vst.msk [vmem:[%s15662_s27 + $0x78] sm:$0xff] %vm346_vm0, %v9718_v45  ;;  %v9713_v20 = vadd.f32 %v9712_v28, %v9327_v37 }
 0x9e9   : > { %v11221_v21 = vpop.f32.mrf.mxu0 }
 0x9ea   : > { %9815 = vst.msk [vmem:[%s15662_s27 + $0x70] sm:$0xff] %vm346_vm0, %v9713_v20  ;;  %v9728_v57 = vadd.f32 %v11273_v53, %v11221_v21 }
 0x9eb   : > { %v9337_v47 = vpop.f32.mrf.mxu0 }
 0x9ec   : > { %9818 = vst.msk [vmem:[%s15662_s27 + $0x88] sm:$0xff] %vm346_vm0, %v9728_v57  ;;  %v9723_v61 = vadd.f32 %v9722_v48, %v9337_v47 }
 0x9ee   : > { %9817 = vst.msk [vmem:[%s15662_s27 + $0x80] sm:$0xff] %vm346_vm0, %v9723_v61 }
 0x9f5   : > { %v11224_v17 = vpop.f32.mrf.mxu0 }
 0x9f6   : > { %v9738_v2 = vadd.f32 %v11276_v58, %v11224_v17 }
 0x9f7   : > { %v9347_v25 = vpop.f32.mrf.mxu0 }
 0x9f8   : > { %9820 = vst.msk [vmem:[%s15662_s27 + $0x98] sm:$0xff] %vm346_vm0, %v9738_v2  ;;  %v9733_v10 = vadd.f32 %v9732_v56, %v9347_v25 }
 0x9f9   : > { %v11227_v5 = vpop.f32.mrf.mxu0 }
 0x9fa   : > { %9819 = vst.msk [vmem:[%s15662_s27 + $0x90] sm:$0xff] %vm346_vm0, %v9733_v10  ;;  %v9748_v0 = vadd.f32 %v11279_v44, %v11227_v5 }
 0x9fb   : > { %v9357_v35 = vpop.f32.mrf.mxu0 }
 0x9fc   : > { %9822 = vst.msk [vmem:[%s15662_s27 + $0xa8] sm:$0xff] %vm346_vm0, %v9748_v0  ;;  %v9743_v18 = vadd.f32 %v9742_v8, %v9357_v35 }
 0x9fe   : > { %9821 = vst.msk [vmem:[%s15662_s27 + $0xa0] sm:$0xff] %vm346_vm0, %v9743_v18 }
 0xa01   : > { %v11230_v11 = vpop.f32.mrf.mxu0 }
 0xa02   : > { %v9758_v13 = vadd.f32 %v11282_v41, %v11230_v11 }
 0xa03   : > { %v9367_v30 = vpop.f32.mrf.mxu0 }
 0xa04   : > { %9824 = vst.msk [vmem:[%s15662_s27 + $0xb8] sm:$0xff] %vm346_vm0, %v9758_v13  ;;  %v9753_v52 = vadd.f32 %v9752_v6, %v9367_v30 }
 0xa05   : > { %v11233_v36 = vpop.f32.mrf.mxu0 }
 0xa06   : > { %9823 = vst.msk [vmem:[%s15662_s27 + $0xb0] sm:$0xff] %vm346_vm0, %v9753_v52  ;;  %v9768_v7 = vadd.f32 %v11285_v62, %v11233_v36 }
 0xa07   : > { %v9377_v33 = vpop.f32.mrf.mxu0 }
 0xa08   : > { %9826 = vst.msk [vmem:[%s15662_s27 + $0xc8] sm:$0xff] %vm346_vm0, %v9768_v7  ;;  %v9763_v63 = vadd.f32 %v9762_v9, %v9377_v33 }
 0xa09   : > { %v11236_v51 = vpop.f32.mrf.mxu0 }
 0xa0a   : > { %9825 = vst.msk [vmem:[%s15662_s27 + $0xc0] sm:$0xff] %vm346_vm0, %v9763_v63  ;;  %v9778_v60 = vadd.f32 %v11288_v26, %v11236_v51 }
 0xa0b   : > { %v9387_v32 = vpop.f32.mrf.mxu0 }
 0xa0c   : > { %9828 = vst.msk [vmem:[%s15662_s27 + $0xd8] sm:$0xff] %vm346_vm0, %v9778_v60  ;;  %v9773_v1 = vadd.f32 %v9772_v43, %v9387_v32 }
 0xa0d   : > { %v11239_v31 = vpop.f32.mrf.mxu0 }
 0xa0e   : > { %9827 = vst.msk [vmem:[%s15662_s27 + $0xd0] sm:$0xff] %vm346_vm0, %v9773_v1  ;;  %v9788_v55 = vadd.f32 %v11291_v38, %v11239_v31 }
 0xa0f   : > { %v9397_v23 = vpop.f32.mrf.mxu0 }
 0xa10   : > { %9830 = vst.msk [vmem:[%s15662_s27 + $0xe8] sm:$0xff] %vm346_vm0, %v9788_v55  ;;  %v9783_v34 = vadd.f32 %v9782_v24, %v9397_v23 }
 0xa12   : > { %9829 = vst.msk [vmem:[%s15662_s27 + $0xe0] sm:$0xff] %vm346_vm0, %v9783_v34 }
 0xa14   : > { %v11242_v4 = vpop.f32.mrf.mxu0 }
 0xa15   : > { %v9798_v3 = vadd.f32 %v11294_v12, %v11242_v4 }
 0xa16   : > { %v9407_v15 = vpop.f32.mrf.mxu0 }
 0xa17   : > { %9832 = vst.msk [vmem:[%s15662_s27 + $0xf8] sm:$0xff] %vm346_vm0, %v9798_v3  ;;  %v9793_v29 = vadd.f32 %v9792_v49, %v9407_v15 }
 0xa19   : > { %9831 = vst.msk [vmem:[%s15662_s27 + $0xf0] sm:$0xff] %vm346_vm0, %v9793_v29 }
 0xa1a   : > { %11950 = shalt.err (!%p11947_p3)
}
 0xa1b   : > { %s11951_s11 = scalar_lea.hbm %s15729_s10, 4096  ;;  %s11955_s8 = scalar_lea.hbm %s15784_s6, 8192 }
 0xa1c   : > { %p11952_p6 = scmp.ne.s32.totalorder %s15729_s10, %s11951_s11  ;;  %p11956_p0 = scmp.lt.s32.totalorder %s15729_s10, %s15784_s6 }
 0xa1d   : > { %p11957_p11 = scmp.lt.s32.totalorder %s11955_s8, %s11951_s11 }
 0xa1e   : > { %p11953_p4 = pnand %p11952_p6, %p16425_p12 }
 0xa1f   : > { %p11958_p5 = por %p11957_p11, %p11956_p0 }
 0xa20   : > { %p11954_p8 = pneg %p11953_p4 }
 0xa22   : > { %p11959_p9 = pnand %p11958_p5, %p11954_p8 }
 0xa24   : > { %11962 = shalt.err (!%p11959_p9)
}
 0xa25   : > { %s12025_s26 = smov 128   ;;  %s12026_s7 = smov 8  }
 0xa26   : > { %11309 = dma.vmem_to_hbm [thread:$0]  (%p16425_p12), %s15731_s29, 4096, %s15729_s10, %s9834_s25, %s12025_s26, %s12025_s26, %s12026_s7  }
 0xa27 PF: > { %s9862_s20 = sand.u32 1, %s11997_s21   ;;  %p16426_p7 = scmp.ne.s32.totalorder %s15966_s28, 0 }
 0xa28   : > { %p16427_p1 = scmp.ge.s32.totalorder %s12009_s24, 2  ;;  %s9863_s30 = scalar_lea.sflag [#allocation5], %s9862_s20 }
 0xa2a   : > { %p11326_p10 = pnand %p16427_p1, %p16426_p7 }
 0xa2c   : > { %p11327_p13 = pneg %p11326_p10 }
 0xa2e   : > { %11992 = dma.done.wait (%p11327_p13), %s9863_s30, 4096  }
 0xa2f   : > { %11994 = vsyncadd (%p11327_p13), %s9863_s30, 4294963200  ;;  %p21_p2 = scmp.ge.s32.totalorder %s12155_s9, 4   ;;  %s16428_s21 = smov %s12001_s22 }
 0xa30   : > { %s16429_s22 = smov %s12005_s23  ;;  %s16430_s23 = smov %s12165_s13 }
 0xa31   : > { %s16431_s24 = smov %s12155_s9  ;;  %23 = sbr.rel (!%p21_p2) target bundleno = 7 (0x7), region = 101 }
 0xa36   :  { %9868 = vsyncpa [#allocation4], 1 }
 0xa37   :  { %9870 = vsyncpa [#allocation4 + $0x1], 1 }
 0xa38   :  { %9871 = vsyncpa [#allocation7], 1 }
 0xa39   :  { %9872 = vsyncpa [#allocation10], 1 }
 0xa3a   :  { %9873 = vsyncpa [#allocation5], 1 }
 0xa3b   :  { %9875 = vsyncpa [#allocation5 + $0x1], 1 }

</bundles_post_ra>
